<compile_context>
chip_gen: v5e
topology: v5e:2x2
jax: 0.10.0
libtpu: 0.0.40
codegen_flags: <defaults>
</compile_context>

<pallas_src>
import functools

import jax
import jax.numpy as jnp
from jax.experimental import pallas as pl
from jax.experimental.pallas import tpu as pltpu


def _conv_bn_stats_kernel(lhs_ref, b_ref, conv_ref, stats_ref):
    """One batch per grid step: single folded-K MXU matmul + fused BN partial sums.

    lhs_ref  : (1, M, K_pad)  bf16  im2col-lite rows (depth-stacked, H even/odd order)
    b_ref    : (K_pad, WCp)   bf16  block-Toeplitz weights (W even/odd order, zero pad)
    conv_ref : (1, M, WCp)    bf16  conv output, channel-flattened (lane dense)
    stats_ref: (1, 2, WCp)    f32   row0 = sum over rows, row1 = sum of squares
    """
    acc = jnp.dot(lhs_ref[0], b_ref[...], preferred_element_type=jnp.float32)
    conv_ref[0] = acc.astype(conv_ref.dtype)
    s1 = jnp.sum(acc, axis=0, keepdims=True)
    s2 = jnp.sum(acc * acc, axis=0, keepdims=True)
    stats_ref[0] = jnp.concatenate([s1, s2], axis=0)      # one lane-dense store


def _bn_relu_pool_kernel(conv_ref, ss_ref, out_ref, carry_ref, *,
                         C, HE, WE, H_pool, WPC):
    """Fused BN affine + ReLU + MaxPool3d((2,3,3), stride (1,2,2), depth pad 1).

    Rows / W channel-blocks arrive in [even, odd, zero-pad] order, so the stride-2
    window starts are three contiguous slices per direction (no strided gather and no
    post-kernel selection pass).

    conv_ref : (1, H_rows, WCp) bf16  conv slice for depth min(dp, D_conv-1)
    ss_ref   : (2, WCp)         f32   row0 scale, row1 shift (channel pattern tiled)
    out_ref  : (1, 1, H_pool, WPC) f32
    carry_ref: (H_rows, WCp)    f32   previous activated depth slice
    """
    dp = pl.program_id(1)

    @pl.when(dp == 0)
    def _():
        # Depth padding: ReLU output >= 0, so a zero carry is equivalent to -inf pad.
        carry_ref[...] = jnp.zeros_like(carry_ref)

    sc = ss_ref[0, :]
    sh = ss_ref[1, :]
    # Elementwise math stays f32 on the VPU; bf16 is only the DMA / MXU format.
    a = jnp.maximum(conv_ref[0].astype(jnp.float32) * sc + sh, 0.0)
    # Depth window {dp-1, dp}: at dp == D_conv the block re-reads slice D_conv-1 whose
    # activation equals the carry, so max(carry, a) is still correct.
    dmax = jnp.maximum(carry_ref[...], a)
    carry_ref[...] = a

    # W direction, window start w = 2j: even blocks {j, j+1} and odd block {j}.
    a0 = dmax[:, 0:WPC]
    a1 = dmax[:, C:C + WPC]
    b0 = dmax[:, WE * C:WE * C + WPC]
    wmax = jnp.maximum(jnp.maximum(a0, a1), b0)           # (H_rows, WPC)

    # H direction, window start h = 2j: even rows {j, j+1} and odd row {j}.
    h0 = wmax[0:H_pool, :]
    h1 = wmax[1:H_pool + 1, :]
    h2 = wmax[HE:HE + H_pool, :]
    out_ref[0, 0] = jnp.maximum(jnp.maximum(h0, h1), h2)  # (H_pool, WPC)


def three_dim_cnn_forward(x, conv_w, gamma, beta, *, eps=1e-5):
    """x: (N, T, H, W) float32.  Returns (N, 64, D_pool, H_pool, W_pool) like PyTorch."""
    N, T, H, W = x.shape
    C, KD, KH, KW = conv_w.shape[0], conv_w.shape[2], conv_w.shape[3], conv_w.shape[4]
    SD, PD, PH, PW = 2, 2, 3, 3
    assert conv_w.shape[1] == 1 and 128 % C == 0

    T_pad, H_pad, W_pad = T + 2 * PD, H + 2 * PH, W + 2 * PW
    D_conv = (T_pad - KD) // SD + 1
    H_conv = H_pad - KH + 1
    W_conv = W_pad - KW + 1

    # MaxPool3d((2,3,3), stride (1,2,2), padding (1,0,0)), floor mode.
    D_pool = D_conv + 1
    H_pool = (H_conv - 3) // 2 + 1
    W_pool = (W_conv - 3) // 2 + 1

    # Even/odd split sizes (conv rows / W blocks are stored even-first, odd-second).
    HE = (H_conv + 1) // 2
    WE = (W_conv + 1) // 2

    # Hardware-aligned sizes: lane dims -> multiples of 128; conv rows -> multiple of 16
    # per depth slice (bf16 sublane tile), which also lands M at 128 for this shape.
    K = KD * KH * W_pad
    K_pad = ((K + 127) // 128) * 128
    WCp = ((W_conv * C + 127) // 128) * 128
    WB = WCp // C
    WPC = ((W_pool * C + 127) // 128) * 128
    WPB = WPC // C
    H_rows = ((H_conv + 15) // 16) * 16
    M = D_conv * H_rows

    # All pool-kernel slice reads stay inside the padded tiles.
    assert WPB <= WE and 1 + WPB <= WB and WE + WPB <= WB
    assert H_pool + 1 <= HE and HE + H_pool <= H_rows

    x_pad = jnp.pad(x.astype(jnp.float32),
                    ((0, 0), (PD, PD), (PH, PH), (PW, PW)))

    # ---- im2col-lite LHS: one contiguous (H_rows, K) block per (batch, depth) slice ----
    # lhs[n, d*H_rows + r, (kd*KH + kh)*W_pad + p] = x_pad[n, d*SD + kd, h_perm[r] + kh, p]
    h_perm = jnp.concatenate([jnp.arange(0, H_conv, 2), jnp.arange(1, H_conv, 2)])
    t_idx = jnp.arange(D_conv)[:, None] * SD + jnp.arange(KD)[None, :]      # (D_conv, KD)
    r_idx = h_perm[:, None] + jnp.arange(KH)[None, :]                        # (H_conv, KH)
    lhs = x_pad[:, t_idx[:, :, None, None], r_idx[None, None, :, :], :]      # (N,Dc,KD,Hc,KH,Wp)
    lhs = jnp.transpose(lhs, (0, 1, 3, 2, 4, 5)).reshape(N, D_conv, H_conv, K)
    lhs = jnp.pad(lhs, ((0, 0), (0, 0), (0, H_rows - H_conv), (0, K_pad - K)))
    lhs = lhs.reshape(N, M, K_pad).astype(jnp.bfloat16)

    # ---- block-Toeplitz RHS: the W-direction of the conv becomes the matmul contraction.
    # bmat[(kd*KH + kh)*W_pad + p, j*C + c] = w[c, kd, kh, p - w_perm[j]]  (0 <= . < KW)
    # NOTE: bmat is O(KD*KH*W_pad * W_conv*C); at realistic frame widths tile it along
    # W_conv (block-Toeplitz) to bound VMEM — unnecessary at this test scale.
    w_perm = jnp.concatenate([jnp.arange(0, W_conv, 2), jnp.arange(1, W_conv, 2)])
    w4 = conv_w.reshape(C, KD, KH, KW).astype(jnp.float32)
    p_i = jnp.arange(W_pad)[:, None, None]
    w_i = w_perm[None, :, None]
    k_i = jnp.arange(KW)[None, None, :]
    band = (p_i == w_i + k_i).astype(jnp.float32)                  # (W_pad, W_conv, KW)
    bmat = jnp.einsum('pwk,cdhk->dhpwc', band, w4)                 # (KD,KH,W_pad,W_conv,C)
    bmat = bmat.reshape(K, W_conv * C)
    bmat = jnp.pad(bmat, ((0, K_pad - K), (0, WCp - W_conv * C))).astype(jnp.bfloat16)

    conv_out, stats = pl.pallas_call(
        _conv_bn_stats_kernel,
        out_shape=(
            jax.ShapeDtypeStruct((N, M, WCp), jnp.bfloat16),
            jax.ShapeDtypeStruct((N, 2, WCp), jnp.float32),
        ),
        grid_spec=pltpu.PrefetchScalarGridSpec(
            num_scalar_prefetch=0,
            grid=(N,),
            in_specs=[
                pl.BlockSpec((1, M, K_pad), lambda n: (n, 0, 0)),
                pl.BlockSpec((K_pad, WCp), lambda n: (0, 0)),
            ],
            out_specs=(
                pl.BlockSpec((1, M, WCp), lambda n: (n, 0, 0)),
                pl.BlockSpec((1, 2, WCp), lambda n: (n, 0, 0)),
            ),
        ),
        compiler_params=pltpu.CompilerParams(
            dimension_semantics=("parallel",),
            vmem_limit_bytes=64 * 1024 * 1024),
    )(lhs, bmat)

    # BatchNorm3d training statistics (biased variance) from the fused f32 partial sums.
    # Padded rows / W blocks contribute exactly zero, so the real-element count is used.
    # (One-pass E[x^2]-E[x]^2 in f32; matches PyTorch to bf16/f32 accumulation tolerance.)
    count = N * D_conv * H_conv * W_conv
    tot = jnp.sum(stats.reshape(N, 2, WB, C), axis=(0, 2))         # (2, C)
    mean = tot[0] / count
    var = jnp.maximum(tot[1] / count - mean * mean, 0.0)
    scale = gamma * jax.lax.rsqrt(var + eps)
    shift = beta - mean * scale
    ss_flat = jnp.stack([jnp.tile(scale, WB), jnp.tile(shift, WB)], axis=0)   # (2, WCp)

    pool_kernel = functools.partial(_bn_relu_pool_kernel, C=C, HE=HE, WE=WE,
                                    H_pool=H_pool, WPC=WPC)
    pooled = pl.pallas_call(
        pool_kernel,
        out_shape=jax.ShapeDtypeStruct((N, D_pool, H_pool, WPC), jnp.float32),
        grid_spec=pltpu.PrefetchScalarGridSpec(
            num_scalar_prefetch=0,
            grid=(N, D_pool),
            in_specs=[
                pl.BlockSpec((1, H_rows, WCp),
                             lambda n, dp: (n, jnp.minimum(dp, D_conv - 1), 0)),
                pl.BlockSpec((2, WCp), lambda n, dp: (0, 0)),
            ],
            out_specs=pl.BlockSpec((1, 1, H_pool, WPC),
                                   lambda n, dp: (n, dp, 0, 0)),
            scratch_shapes=[pltpu.VMEM((H_rows, WCp), jnp.float32)],
        ),
        compiler_params=pltpu.CompilerParams(
            dimension_semantics=("parallel", "arbitrary"),
            vmem_limit_bytes=64 * 1024 * 1024),
    )(conv_out, ss_flat)

    # Pool output block j already corresponds to window start 2j (natural order); just
    # drop the W pad block and go back to PyTorch NCDHW.
    pooled = pooled.reshape(N, D_pool, H_pool, WPB, C)[:, :, :, :W_pool, :]
    return jnp.transpose(pooled, (0, 4, 1, 2, 3))      # (N, C, D_pool, H_pool, W_pool)


if __name__ == "__main__":
    key = jax.random.PRNGKey(0)
    k_x, k_w, k_g, k_b = jax.random.split(key, 4)

    N, T, H, W = 2, 8, 16, 16                     # small video: (batch, frames, H, W)
    x = jax.random.normal(k_x, (N, T, H, W), jnp.float32)

    # Deterministic synthetic parameters (shapes from __init__): Conv3d weight (64,1,5,4,4),
    # BatchNorm3d gamma/beta (64,).  Training-mode BN => running buffers are unused.
    conv_w = 0.1 * jax.random.normal(k_w, (64, 1, 5, 4, 4), jnp.float32)
    gamma = 1.0 + 0.1 * jax.random.normal(k_g, (64,), jnp.float32)
    beta = 0.1 * jax.random.normal(k_b, (64,), jnp.float32)

    out = jax.jit(three_dim_cnn_forward)(x, conv_w, gamma, beta)
    out = jax.block_until_ready(out)

    # conv: D=(8+4-5)//2+1=4, Hc=Wc=19 ; pool: D=5, Hp=Wp=9  => (2, 64, 5, 9, 9)
    assert out.shape == (2, 64, 5, 9, 9), out.shape
    assert bool(jnp.all(jnp.isfinite(out)))
    print("KERNEL_OK")
</pallas_src>

<mosaic_0001>
module attributes {stable_mosaic.version = 11 : i64} {
  func.func @_conv_bn_stats_kernel(%arg0: i32, %arg1: memref<1x128x512xbf16, #tpu.memory_space<vmem>>, %arg2: memref<512x1280xbf16, #tpu.memory_space<vmem>>, %arg3: memref<1x128x1280xbf16, #tpu.memory_space<vmem>>, %arg4: memref<1x2x1280xf32, #tpu.memory_space<vmem>>) attributes {dimension_semantics = [#tpu.dimension_semantics<parallel>], iteration_bounds = array<i64: 2>, scalar_prefetch = 0 : i64, scratch_operands = 0 : i64, tpu.core_type = #tpu.core_type<tc>, window_params = [{transform_indices = @transform_0, window_bounds = array<i64: 1, 128, 512>}, {pipeline_mode = #tpu.pipeline_mode<synchronous>, transform_indices = @transform_1, window_bounds = array<i64: 512, 1280>}, {transform_indices = @transform_2, window_bounds = array<i64: 1, 128, 1280>}, {transform_indices = @transform_3, window_bounds = array<i64: 1, 2, 1280>}]} {
    %c0 = arith.constant 0 : index
    %c0_0 = arith.constant 0 : index
    %c0_1 = arith.constant 0 : index
    %0 = vector.load %arg1[%c0, %c0_0, %c0_1] : memref<1x128x512xbf16, #tpu.memory_space<vmem>>, vector<1x128x512xbf16>
    %1 = vector.shape_cast %0 : vector<1x128x512xbf16> to vector<128x512xbf16>
    %c0_2 = arith.constant 0 : index
    %c0_3 = arith.constant 0 : index
    %2 = vector.load %arg2[%c0_2, %c0_3] : memref<512x1280xbf16, #tpu.memory_space<vmem>>, vector<512x1280xbf16>
    %cst = arith.constant dense<0.000000e+00> : vector<128x1280xf32>
    %3 = tpu.matmul %1, %2, %cst {dimension_numbers = #tpu.dot_dimension_numbers<[1], [0], [0], [1], [0, 0, 1, 1], [], []>} : vector<128x512xbf16>, vector<512x1280xbf16>, vector<128x1280xf32> -> vector<128x1280xf32>
    %4 = arith.truncf %3 : vector<128x1280xf32> to vector<128x1280xbf16>
    %c0_4 = arith.constant 0 : index
    %c0_5 = arith.constant 0 : index
    %c0_6 = arith.constant 0 : index
    %5 = vector.load %arg3[%c0_4, %c0_5, %c0_6] : memref<1x128x1280xbf16, #tpu.memory_space<vmem>>, vector<1x128x1280xbf16>
    %6 = vector.shape_cast %5 : vector<1x128x1280xbf16> to vector<128x1280xbf16>
    %7 = vector.shape_cast %4 : vector<128x1280xbf16> to vector<1x128x1280xbf16>
    tpu.vector_store %arg3[%c0_4, %c0_5, %c0_6], %7 {strides = array<i32>} : memref<1x128x1280xbf16, #tpu.memory_space<vmem>>, vector<1x128x1280xbf16>,
    %cst_7 = arith.constant dense<0.000000e+00> : vector<1280xf32>
    %8 = vector.multi_reduction <add>, %3, %cst_7 [0] : vector<128x1280xf32> to vector<1280xf32>
    %9 = vector.shape_cast %8 : vector<1280xf32> to vector<1x1280xf32>
    %10 = arith.mulf %3, %3 : vector<128x1280xf32>
    %cst_8 = arith.constant dense<0.000000e+00> : vector<1280xf32>
    %11 = vector.multi_reduction <add>, %10, %cst_8 [0] : vector<128x1280xf32> to vector<1280xf32>
    %12 = vector.shape_cast %11 : vector<1280xf32> to vector<1x1280xf32>
    %13 = tpu.concatenate %9, %12 in 0 : vector<1x1280xf32>, vector<1x1280xf32> -> vector<2x1280xf32>
    %c0_9 = arith.constant 0 : index
    %c0_10 = arith.constant 0 : index
    %c0_11 = arith.constant 0 : index
    %14 = vector.load %arg4[%c0_9, %c0_10, %c0_11] : memref<1x2x1280xf32, #tpu.memory_space<vmem>>, vector<1x2x1280xf32>
    %15 = vector.shape_cast %14 : vector<1x2x1280xf32> to vector<2x1280xf32>
    %16 = vector.shape_cast %13 : vector<2x1280xf32> to vector<1x2x1280xf32>
    tpu.vector_store %arg4[%c0_9, %c0_10, %c0_11], %16 {strides = array<i32>} : memref<1x2x1280xf32, #tpu.memory_space<vmem>>, vector<1x2x1280xf32>,
    return
  }
  func.func @transform_0(%arg0: i32) -> (i32, i32, i32) {
    %c0_i32 = arith.constant 0 : i32
    %c0_i32_0 = arith.constant 0 : i32
    %c0_i32_1 = arith.constant 0 : i32
    return %arg0, %c0_i32, %c0_i32_0 : i32, i32, i32
  }
  func.func @transform_1(%arg0: i32) -> (i32, i32) {
    %c0_i32 = arith.constant 0 : i32
    %c0_i32_0 = arith.constant 0 : i32
    %c0_i32_1 = arith.constant 0 : i32
    return %c0_i32, %c0_i32_0 : i32, i32
  }
  func.func @transform_2(%arg0: i32) -> (i32, i32, i32) {
    %c0_i32 = arith.constant 0 : i32
    %c0_i32_0 = arith.constant 0 : i32
    %c0_i32_1 = arith.constant 0 : i32
    return %arg0, %c0_i32, %c0_i32_0 : i32, i32, i32
  }
  func.func @transform_3(%arg0: i32) -> (i32, i32, i32) {
    %c0_i32 = arith.constant 0 : i32
    %c0_i32_0 = arith.constant 0 : i32
    %c0_i32_1 = arith.constant 0 : i32
    return %arg0, %c0_i32, %c0_i32_0 : i32, i32, i32
  }
}

module attributes {stable_mosaic.version = 11 : i64} {
  func.func @_bn_relu_pool_kernel(%arg0: i32, %arg1: i32, %arg2: memref<1x32x1280xbf16, #tpu.memory_space<vmem>>, %arg3: memref<2x1280xf32, #tpu.memory_space<vmem>>, %arg4: memref<1x1x9x640xf32, #tpu.memory_space<vmem>>, %arg5: memref<32x1280xf32, #tpu.memory_space<vmem>>) attributes {dimension_semantics = [#tpu.dimension_semantics<parallel>, #tpu.dimension_semantics<arbitrary>], iteration_bounds = array<i64: 2, 5>, scalar_prefetch = 0 : i64, scratch_operands = 1 : i64, tpu.core_type = #tpu.core_type<tc>, window_params = [{transform_indices = @transform_0, window_bounds = array<i64: 1, 32, 1280>}, {pipeline_mode = #tpu.pipeline_mode<synchronous>, transform_indices = @transform_1, window_bounds = array<i64: 2, 1280>}, {transform_indices = @transform_2, window_bounds = array<i64: 1, 1, 9, 640>}]} {
    %c0_i32 = arith.constant 0 : i32
    %0 = arith.cmpi eq, %arg1, %c0_i32 : i32
    %1 = arith.extui %0 : i1 to i32
    %c0_i32_0 = arith.constant 0 : i32
    %2 = arith.cmpi ne, %1, %c0_i32_0 : i32
    scf.if %2 {
      %cst_14 = arith.constant 0.000000e+00 : f32
      %34 = vector.broadcast %cst_14 : f32 to vector<32x1280xf32>
      %c0_15 = arith.constant 0 : index
      %c0_16 = arith.constant 0 : index
      %35 = vector.load %arg5[%c0_15, %c0_16] : memref<32x1280xf32, #tpu.memory_space<vmem>>, vector<32x1280xf32>
      tpu.vector_store %arg5[%c0_15, %c0_16], %34 {strides = array<i32>} : memref<32x1280xf32, #tpu.memory_space<vmem>>, vector<32x1280xf32>,
    } else {
    }
    %c0 = arith.constant 0 : index
    %c0_1 = arith.constant 0 : index
    %3 = vector.load %arg3[%c0, %c0_1] : memref<2x1280xf32, #tpu.memory_space<vmem>>, vector<1x1280xf32>
    %4 = vector.shape_cast %3 : vector<1x1280xf32> to vector<1280xf32>
    %c1 = arith.constant 1 : index
    %c0_2 = arith.constant 0 : index
    %5 = vector.load %arg3[%c1, %c0_2] : memref<2x1280xf32, #tpu.memory_space<vmem>>, vector<1x1280xf32>
    %6 = vector.shape_cast %5 : vector<1x1280xf32> to vector<1280xf32>
    %c0_3 = arith.constant 0 : index
    %c0_4 = arith.constant 0 : index
    %c0_5 = arith.constant 0 : index
    %7 = vector.load %arg2[%c0_3, %c0_4, %c0_5] : memref<1x32x1280xbf16, #tpu.memory_space<vmem>>, vector<1x32x1280xbf16>
    %8 = vector.shape_cast %7 : vector<1x32x1280xbf16> to vector<32x1280xbf16>
    %9 = arith.extf %8 : vector<32x1280xbf16> to vector<32x1280xf32>
    %10 = vector.shape_cast %4 : vector<1280xf32> to vector<1x1280xf32>
    %11 = vector.broadcast %10 : vector<1x1280xf32> to vector<32x1280xf32>
    %12 = arith.mulf %9, %11 : vector<32x1280xf32>
    %13 = vector.shape_cast %6 : vector<1280xf32> to vector<1x1280xf32>
    %14 = vector.broadcast %13 : vector<1x1280xf32> to vector<32x1280xf32>
    %15 = arith.addf %12, %14 : vector<32x1280xf32>
    %cst = arith.constant 0.000000e+00 : f32
    %16 = vector.broadcast %cst : f32 to vector<32x1280xf32>
    %17 = arith.maximumf %15, %16 : vector<32x1280xf32>
    %c0_6 = arith.constant 0 : index
    %c0_7 = arith.constant 0 : index
    %18 = vector.load %arg5[%c0_6, %c0_7] : memref<32x1280xf32, #tpu.memory_space<vmem>>, vector<32x1280xf32>
    %19 = arith.maximumf %18, %17 : vector<32x1280xf32>
    %c0_8 = arith.constant 0 : index
    %c0_9 = arith.constant 0 : index
    %20 = vector.load %arg5[%c0_8, %c0_9] : memref<32x1280xf32, #tpu.memory_space<vmem>>, vector<32x1280xf32>
    tpu.vector_store %arg5[%c0_8, %c0_9], %17 {strides = array<i32>} : memref<32x1280xf32, #tpu.memory_space<vmem>>, vector<32x1280xf32>,
    %21 = vector.extract_strided_slice %19 {offsets = [0, 0], sizes = [32, 640], strides = [1, 1]} : vector<32x1280xf32> to vector<32x640xf32>
    %22 = vector.extract_strided_slice %19 {offsets = [0, 64], sizes = [32, 640], strides = [1, 1]} : vector<32x1280xf32> to vector<32x640xf32>
    %23 = vector.extract_strided_slice %19 {offsets = [0, 640], sizes = [32, 640], strides = [1, 1]} : vector<32x1280xf32> to vector<32x640xf32>
    %24 = arith.maximumf %21, %22 : vector<32x640xf32>
    %25 = arith.maximumf %24, %23 : vector<32x640xf32>
    %26 = vector.extract_strided_slice %25 {offsets = [0, 0], sizes = [9, 640], strides = [1, 1]} : vector<32x640xf32> to vector<9x640xf32>
    %27 = vector.extract_strided_slice %25 {offsets = [1, 0], sizes = [9, 640], strides = [1, 1]} : vector<32x640xf32> to vector<9x640xf32>
    %28 = vector.extract_strided_slice %25 {offsets = [10, 0], sizes = [9, 640], strides = [1, 1]} : vector<32x640xf32> to vector<9x640xf32>
    %29 = arith.maximumf %26, %27 : vector<9x640xf32>
    %30 = arith.maximumf %29, %28 : vector<9x640xf32>
    %c0_10 = arith.constant 0 : index
    %c0_11 = arith.constant 0 : index
    %c0_12 = arith.constant 0 : index
    %c0_13 = arith.constant 0 : index
    %31 = vector.load %arg4[%c0_10, %c0_11, %c0_12, %c0_13] : memref<1x1x9x640xf32, #tpu.memory_space<vmem>>, vector<1x1x9x640xf32>
    %32 = vector.shape_cast %31 : vector<1x1x9x640xf32> to vector<9x640xf32>
    %33 = vector.shape_cast %30 : vector<9x640xf32> to vector<1x1x9x640xf32>
    tpu.vector_store %arg4[%c0_10, %c0_11, %c0_12, %c0_13], %33 {strides = array<i32>} : memref<1x1x9x640xf32, #tpu.memory_space<vmem>>, vector<1x1x9x640xf32>,
    return
  }
  func.func @transform_0(%arg0: i32, %arg1: i32) -> (i32, i32, i32) {
    %c3_i32 = arith.constant 3 : i32
    %0 = arith.minsi %arg1, %c3_i32 : i32
    %c0_i32 = arith.constant 0 : i32
    %c0_i32_0 = arith.constant 0 : i32
    return %arg0, %0, %c0_i32 : i32, i32, i32
  }
  func.func @transform_1(%arg0: i32, %arg1: i32) -> (i32, i32) {
    %c0_i32 = arith.constant 0 : i32
    %c0_i32_0 = arith.constant 0 : i32
    %c0_i32_1 = arith.constant 0 : i32
    return %c0_i32, %c0_i32_0 : i32, i32
  }
  func.func @transform_2(%arg0: i32, %arg1: i32) -> (i32, i32, i32, i32) {
    %c0_i32 = arith.constant 0 : i32
    %c0_i32_0 = arith.constant 0 : i32
    %c0_i32_1 = arith.constant 0 : i32
    return %arg0, %arg1, %c0_i32, %c0_i32_0 : i32, i32, i32, i32
  }
}

</mosaic_0001>

<bundles_post_ra>
// kernel: tile.13
= control target key start
LH: loop header
LB: loop body
LE: loop exit
PB: predicated region body
PF: predicated region fallthrough
CT: control target
= control target key end

     0   :  { %s34_s0 = inlined_call_operand.vmem [shape: f32[64], index: 0, kind: input, shape index: {}]   ;;  %s35_s1 = inlined_call_operand.vmem [shape: f32[20,64], index: 1, kind: output, shape index: {}]  }
   0x1   :  { %v4_v0 = vld [vmem:[%s34_s0] ss:$0 sm:$0xff] }
   0x2   :  { %5 = vst [vmem:[%s35_s1] sm:$0xff] %v4_v0 }
   0x3   :  { %10 = vst [vmem:[%s35_s1 + $0x8] sm:$0xff] %v4_v0 }
   0x4   :  { %11 = vst [vmem:[%s35_s1 + $0x10] sm:$0xff] %v4_v0 }

// kernel: tile.18
= control target key start
LH: loop header
LB: loop body
LE: loop exit
PB: predicated region body
PF: predicated region fallthrough
CT: control target
= control target key end

     0   :  { %s100_s8 = smov 64   ;;  %s20_s9 = smov 3  ;;  %vm3_vm0 = vcmask 523264   ;;  %vm16_vm1 = vcmask 1048064   ;;  %s156_s0 = inlined_call_operand.vmem [shape: f32[20,64], index: 0, kind: input, shape index: {}]   ;;  %s157_s1 = inlined_call_operand.vmem [shape: f32[1,1280], index: 1, kind: output, shape index: {}]  }
   0x1   :  { %v88_v0 = vld [vmem:[%s156_s0 + $0x1] ss:$2 sm:$0xff]   ;;  %v89_v1 = vld [vmem:[%s156_s0 + $0x11] ss:$2 sm:%s20_s9]   ;;  %v2_v2 = vld [vmem:[%s156_s0] ss:$2 sm:$0xff]  }
   0x2   :  { %14 = vrot.lane.b32.xlu0 %v88_v0, %s100_s8  ;;  %4 = vst.msk [vmem:[#allocation0] ss:$8 sm:$0xf] %vm3_vm0, %v2_v2   ;;  %s7_s14 = smov 3 }
   0x3   :  { %5 = vst.msk [vmem:[#allocation0] ss:$8 sm:$0xf0] %vm3_vm0, %v2_v2   ;;  %v87_v3 = vld [vmem:[%s156_s0 + $0x10] ss:$2 sm:%s7_s14]  }
   0x4   :  { %11 = vst.msk [vmem:[#allocation0 + $0x40] ss:$8 sm:$0x3] %vm3_vm0, %v87_v3  }
   0xa   :  { %22 = vrot.lane.b32.xlu0 %v89_v1, %s100_s8 }
  0x74   :  { %v15_v4 = vpop.permute.xlu0 %14  }
  0x75   :  { %17 = vst.msk [vmem:[#allocation0] ss:$8 sm:$0xf] %vm16_vm1, %v15_v4  }
  0x76   :  { %18 = vst.msk [vmem:[#allocation0] ss:$8 sm:$0xf0] %vm16_vm1, %v15_v4  }
  0x7c   :  { %v29_v5 = vld [vmem:[#allocation0] sm:$0x1]  ;;  %v34_v6 = vld [vmem:[#allocation0 + $0x8] sm:$0x1]  ;;  %v40_v7 = vld [vmem:[#allocation0 + $0x10] sm:$0x1]  ;;  %v23_v8 = vpop.permute.xlu0 %22  }
  0x7d   :  { %32 = vst [vmem:[%s157_s1] sm:$0x1] %v29_v5  ;;  %v46_v9 = vld [vmem:[#allocation0 + $0x18] sm:$0x1]  ;;  %v52_v10 = vld [vmem:[#allocation0 + $0x20] sm:$0x1] }
  0x7e   :  { %90 = vst [vmem:[%s157_s1 + $0x1] sm:$0x1] %v34_v6  ;;  %v58_v11 = vld [vmem:[#allocation0 + $0x28] sm:$0x1]  ;;  %v64_v12 = vld [vmem:[#allocation0 + $0x30] sm:$0x1] }
  0x7f   :  { %91 = vst [vmem:[%s157_s1 + $0x2] sm:$0x1] %v40_v7  ;;  %v70_v13 = vld [vmem:[#allocation0 + $0x38] sm:$0x1] }
  0x80   :  { %92 = vst [vmem:[%s157_s1 + $0x3] sm:$0x1] %v46_v9 }
  0x81   :  { %93 = vst [vmem:[%s157_s1 + $0x4] sm:$0x1] %v52_v10 }
  0x82   :  { %94 = vst [vmem:[%s157_s1 + $0x5] sm:$0x1] %v58_v11 }
  0x83   :  { %95 = vst [vmem:[%s157_s1 + $0x6] sm:$0x1] %v64_v12 }
  0x84   :  { %96 = vst [vmem:[%s157_s1 + $0x7] sm:$0x1] %v70_v13 }
  0x85   :  { %26 = vst.msk [vmem:[#allocation0 + $0x40] ss:$8 sm:$0x3] %vm16_vm1, %v23_v8  }
  0x8c   :  { %v76_v14 = vld [vmem:[#allocation0 + $0x40] sm:$0x1]  ;;  %v82_v15 = vld [vmem:[#allocation0 + $0x48] sm:$0x1] }
  0x8d   :  { %97 = vst [vmem:[%s157_s1 + $0x8] sm:$0x1] %v76_v14 }
  0x8e   :  { %98 = vst [vmem:[%s157_s1 + $0x9] sm:$0x1] %v82_v15 }

// kernel: three_dim_cnn_forward.3
= control target key start
LH: loop header
LB: loop body
LE: loop exit
PB: predicated region body
PF: predicated region fallthrough
CT: control target
= control target key end

     0   :  { %s998_s9 = smov 0   ;;  %s1000_s10 = smov 0   ;;  %s1440_s0 = inlined_call_operand.vmem [shape: bf16[2,128,1280], index: 0, kind: input, shape index: {}]   ;;  %s1441_s1 = inlined_call_operand.vmem [shape: f32[2,1280], index: 1, kind: input, shape index: {}]   ;;  %s1442_s2 = inlined_call_operand.vmem [shape: f32[2,5,9,640], index: 2, kind: output, shape index: {}]  }
   0x1   :  { %s1002_s11 = smov 0   ;;  %s1004_s12 = smov 0  }
   0x2   :  { %s1006_s13 = smov 0  }
   0x3 LB: > { %s21_s14 = sadd.s32 1, %s971_s11  ;;  %s24_s15 = sadd.s32 1, %s975_s12  ;;  %s979_s13 = sphi %s1006_s13, %s12_s13   ;;  %s975_s12 = sphi %s1004_s12, %s1456_s12   ;;  %s971_s11 = sphi %s1002_s11, %s1455_s11   ;;  %s967_s10 = sphi %s1000_s10, %s1454_s10   ;;  %s963_s9 = sphi %s998_s9, %s1453_s9  }
   0x4   : > { %p22_p0 = scmp.ge.s32.totalorder %s21_s14, 5  ;;  %p885_p1 = scmp.ge.s32.totalorder %s979_s13, 1 }
   0x5   : > { %p142_p2 = scmp.lt.s32.totalorder %s979_s13, 11 }
   0x6   : > { %s1458_s14 = smov (%p22_p0, %s21_s14), 0  ;;  %s1460_s15 = smov (!%p22_p0, %s24_s15), %s975_s12 }
   0x7   : > { %p143_p3 = pnand %p885_p1, %p142_p2  ;;  %p26_p4 = scmp.ge.s32.totalorder %s1460_s15, 2 }
   0x8   : > { %p175_p5 = scmp.lt.s32.totalorder (!%p143_p3), %s963_s9, 3  ;;  %p178_p6 = scmp.lt.s32.totalorder (!%p143_p3), %s967_s10, 1 }
   0x9   : > { %s1462_s15 = smov (%p26_p4, %s1460_s15), 0  ;;  %146 = sbr.rel (%p143_p3) target bundleno = 240 (0xf0), region = 28 }
   0xa   : > { %p192_p7 = scmp.lt.s32.totalorder (!%p143_p3), %s963_s9, 4  ;;  %p889_p9 = scmp.ne.s32.totalorder (!%p143_p3), %s963_s9, 0 }
   0xe   : > { %s176_s16 = scalar_select %p175_p5, %s963_s9, 3 }
   0xf   : > { %s1464_s10 = smov (!%p178_p6, %s967_s10), 1 }
  0x10   : > { %s886_s17 = sshll.u32 %s176_s16, 2  ;;  %s896_s18 = smul.u32 160, %s1464_s10 }
  0x11   : > { %p180_p8 = scmp.lt.s32.totalorder %s886_s17, 15  ;;  %s898_s22 = smul.u32 50, %s1464_s10 }
  0x12   : > { %s193_s19 = scalar_select %p192_p7, %s963_s9, 4 }
  0x13   : > { %s1466_s17 = smov (!%p180_p8, %s886_s17), 15 }
  0x14   : > { %s897_s20 = smul.u32 10, %s193_s19 }
  0x15   : > { %s895_s21 = smul.u32 10, %s1466_s17 }
  0x16   : > { %s196_s25 = sadd.s32 %s898_s22, %s897_s20  ;;  %202 = sbr.rel (%p889_p9) target bundleno = 58 (0x3a), region = 32 }
  0x17   : > { %s184_s23 = sadd.s32 %s896_s18, %s895_s21  ;;  %s888_s29 = sshll.u32 %s196_s25, 3 }
  0x18   : > { %s887_s24 = sshll.u32 %s184_s23, 2  ;;  %s1042_s4 = scalar_lea.vmem %s1442_s2, %s888_s29 }
  0x19   : > { %s1037_s28 = scalar_lea.vmem %s1440_s0, %s887_s24 }
  0x1b   : > { %v981_v0 = vmov 0.0  }
  0x1c   : > { %203 = vst [vmem:[#allocation2 + $0xb0] sm:$0xff] %v981_v0 }
  0x1d   : > { %204 = vst [vmem:[#allocation2 + $0xd0] sm:$0xff] %v981_v0 }
  0x1e   : > { %205 = vst [vmem:[#allocation2 + $0x10] sm:$0xff] %v981_v0 }
  0x1f   : > { %206 = vst [vmem:[#allocation2 + $0x48] sm:$0xff] %v981_v0 }
  0x20   : > { %207 = vst [vmem:[#allocation2 + $0x120] sm:$0xff] %v981_v0 }
  0x21   : > { %208 = vst [vmem:[#allocation2 + $0x38] sm:$0xff] %v981_v0 }
  0x22   : > { %209 = vst [vmem:[#allocation2 + $0xf8] sm:$0xff] %v981_v0 }
  0x23   : > { %210 = vst [vmem:[#allocation2 + $0x100] sm:$0xff] %v981_v0 }
  0x24   : > { %211 = vst [vmem:[#allocation2 + $0x80] sm:$0xff] %v981_v0 }
  0x25   : > { %212 = vst [vmem:[#allocation2 + $0x108] sm:$0xff] %v981_v0 }
  0x26   : > { %213 = vst [vmem:[#allocation2 + $0x138] sm:$0xff] %v981_v0 }
  0x27   : > { %214 = vst [vmem:[#allocation2 + $0xf0] sm:$0xff] %v981_v0 }
  0x28   : > { %215 = vst [vmem:[#allocation2 + $0x18] sm:$0xff] %v981_v0 }
  0x29   : > { %216 = vst [vmem:[#allocation2 + $0xc8] sm:$0xff] %v981_v0 }
  0x2a   : > { %217 = vst [vmem:[#allocation2 + $0x70] sm:$0xff] %v981_v0 }
  0x2b   : > { %218 = vst [vmem:[#allocation2 + $0x20] sm:$0xff] %v981_v0 }
  0x2c   : > { %219 = vst [vmem:[#allocation2 + $0x128] sm:$0xff] %v981_v0 }
  0x2d   : > { %220 = vst [vmem:[#allocation2 + $0x110] sm:$0xff] %v981_v0 }
  0x2e   : > { %221 = vst [vmem:[#allocation2 + $0x8] sm:$0xff] %v981_v0 }
  0x2f   : > { %222 = vst [vmem:[#allocation2 + $0x98] sm:$0xff] %v981_v0 }
  0x30   : > { %223 = vst [vmem:[#allocation2 + $0xa8] sm:$0xff] %v981_v0 }
  0x31   : > { %224 = vst [vmem:[#allocation2 + $0x90] sm:$0xff] %v981_v0 }
  0x32   : > { %225 = vst [vmem:[#allocation2 + $0xe0] sm:$0xff] %v981_v0 }
  0x33   : > { %226 = vst [vmem:[#allocation2 + $0x88] sm:$0xff] %v981_v0 }
  0x34   : > { %227 = vst [vmem:[#allocation2 + $0xc0] sm:$0xff] %v981_v0 }
  0x35   : > { %228 = vst [vmem:[#allocation2 + $0x118] sm:$0xff] %v981_v0 }
  0x36   : > { %229 = vst [vmem:[#allocation2 + $0xd8] sm:$0xff] %v981_v0 }
  0x37   : > { %230 = vst [vmem:[#allocation2 + $0xa0] sm:$0xff] %v981_v0 }
  0x38   : > { %231 = vst [vmem:[#allocation2 + $0x68] sm:$0xff] %v981_v0 }
  0x39   : > { %232 = vst [vmem:[#allocation2 + $0x130] sm:$0xff] %v981_v0 }
  0x3a PF: > { %v1048_v1 = vld [vmem:[%s1441_s1] ss:$2 sm:$0xff]  ;;  %v1053_v2 = vld [vmem:[%s1441_s1 + $0x1] ss:$2 sm:$0xff]  ;;  %v476_v19 = vld [vmem:[#allocation2 + $0x10] sm:$0xff]  ;;  %s982_s9 = smov 64  }
  0x3b   : > { %v251_v3 = vld [vmem:[%s1037_s28 + $0x8] sm:$0xff]  ;;  %v1057_v6 = vperm.slane %v1048_v1, 2  ;;  %v1060_v7 = vperm.slane %v1053_v2, 2  ;;  %v250_v8 = vld [vmem:[%s1037_s28] sm:$0xff]  ;;  %v1065_v12 = vperm.slane %v1048_v1, 0  ;;  %v1068_v13 = vperm.slane %v1053_v2, 0 }
  0x3c   : > { %v272_v4 = vunpack.c.l.bf16 %v251_v3  ;;  %v273_v5 = vunpack.c.h.bf16 %v251_v3  ;;  %v270_v9 = vunpack.c.l.bf16 %v250_v8  ;;  %v271_v10 = vunpack.c.h.bf16 %v250_v8  ;;  %v252_v25 = vld [vmem:[%s1037_s28 + $0x10] sm:$0xff]  ;;  %v477_v30 = vld [vmem:[#allocation2 + $0x48] sm:$0xff]  ;;  %v1101_v41 = vld [vmem:[%s1037_s28 + $0x38] sm:$0xff] }
  0x3d   : > { %v1071_v14 = vperm.slane %v1048_v1, 3  ;;  %v1074_v15 = vperm.slane %v1053_v2, 3  ;;  %v1079_v18 = vperm.slane %v1048_v1, 1  ;;  %v1083_v21 = vperm.slane %v1053_v2, 1  ;;  %v474_v26 = vld [vmem:[#allocation2 + $0xb0] sm:$0xff]  ;;  %v255_v35 = vld [vmem:[%s1037_s28 + $0x28] sm:$0xff] }
  0x3e   : > { %v334_v11 = vmul.f32 %v1057_v6, %v272_v4  ;;  %v332_v17 = vmul.f32 %v1065_v12, %v270_v9  ;;  %v475_v33 = vld [vmem:[#allocation2 + $0xd0] sm:$0xff]  ;;  %v274_v34 = vunpack.c.l.bf16 %v252_v25  ;;  %v275_v38 = vunpack.c.h.bf16 %v252_v25  ;;  %v478_v56 = vld [vmem:[#allocation2 + $0x120] sm:$0xff]  ;;  %v484_v0 = vld [vmem:[#allocation2 + $0x138] sm:$0xff] }
  0x3f   : > { %v335_v20 = vmul.f32 %v1071_v14, %v273_v5  ;;  %v333_v24 = vmul.f32 %v1079_v18, %v271_v10  ;;  %v316_v40 = vperm.slane %v1048_v1, 4  ;;  %v256_v42 = vld [vmem:[%s1037_s28 + $0x30] sm:$0xff]  ;;  %v1109_v44 = vperm.slane %v1053_v2, 4 }
  0x40   : > { %v396_v16 = vadd.f32 %v1060_v7, %v334_v11  ;;  %v394_v23 = vadd.f32 %v1068_v13, %v332_v17  ;;  %v281_v45 = vunpack.c.h.bf16 %v255_v35  ;;  %v280_v46 = vunpack.c.l.bf16 %v255_v35  ;;  %v260_v61 = vld [vmem:[%s1037_s28 + $0x50] sm:$0xff] }
  0x41   : > { %v397_v27 = vadd.f32 %v1074_v15, %v335_v20  ;;  %v395_v31 = vadd.f32 %v1083_v21, %v333_v24  ;;  %v336_v47 = vmul.f32 %v316_v40, %v274_v34  ;;  %v1112_v48 = vperm.slane %v1048_v1, 5  ;;  %v485_v63 = vld [vmem:[#allocation2 + $0xf0] sm:$0xff]  ;;  %v261_v20 = vld [vmem:[%s1037_s28 + $0x58] sm:$0xff] }
  0x42   : > { %v436_v22 = vmax.f32 %v396_v16, 0.0  ;;  %v434_v29 = vmax.f32 %v394_v23, 0.0  ;;  %v1115_v49 = vperm.slane %v1053_v2, 5  ;;  %v343_v50 = vmul.f32 %v1079_v18, %v281_v45  ;;  %v479_v16 = vld [vmem:[#allocation2 + $0x38] sm:$0xff] }
  0x43   : > { %v437_v32 = vmax.f32 %v397_v27, 0.0  ;;  %v435_v37 = vmax.f32 %v395_v31, 0.0  ;;  %v342_v51 = vmul.f32 %v1065_v12, %v280_v46  ;;  %v284_v52 = vunpack.c.l.bf16 %v1101_v41 }
  0x44   : > { %v1089_v28 = vmax.f32 %v476_v19, %v436_v22  ;;  %536 = vst [vmem:[#allocation2 + $0x10] sm:$0xff] %v436_v22  ;;  %v1095_v36 = vmax.f32 %v474_v26, %v434_v29  ;;  %v283_v53 = vunpack.c.h.bf16 %v256_v42  ;;  %v398_v54 = vadd.f32 %v1109_v44, %v336_v47  ;;  %v262_v19 = vld [vmem:[%s1037_s28 + $0x60] sm:$0xff]  ;;  %v487_v47 = vld [vmem:[#allocation2 + $0xc8] sm:$0xff] }
  0x45   : > { %534 = vst [vmem:[#allocation2 + $0xb0] sm:$0xff] %v434_v29  ;;  %v1097_v39 = vmax.f32 %v477_v30, %v437_v32  ;;  %v1106_v43 = vmax.f32 %v475_v33, %v435_v37  ;;  %v337_v55 = vmul.f32 %v1112_v48, %v275_v38  ;;  %v405_v57 = vadd.f32 %v1083_v21, %v343_v50  ;;  %v488_v38 = vld [vmem:[#allocation2 + $0x70] sm:$0xff] }
  0x46   : > { %596 = vrot.lane.b32.xlu1 %v1089_v28, %s982_s9  ;;  %592 = vrot.lane.b32.xlu0 %v1095_v36, %s982_s9  ;;  %537 = vst [vmem:[#allocation2 + $0x48] sm:$0xff] %v437_v32  ;;  %v404_v58 = vadd.f32 %v1068_v13, %v342_v51  ;;  %v346_v59 = vmul.f32 %v316_v40, %v284_v52  ;;  %v438_v62 = vmax.f32 %v398_v54, 0.0  ;;  %v291_v17 = vunpack.c.h.bf16 %v260_v61 }
  0x47   : > { %535 = vst [vmem:[#allocation2 + $0xd0] sm:$0xff] %v435_v37  ;;  %v345_v60 = vmul.f32 %v1071_v14, %v283_v53  ;;  %v399_v3 = vadd.f32 %v1115_v49, %v337_v55  ;;  %v445_v4 = vmax.f32 %v405_v57, 0.0  ;;  %v290_v26 = vunpack.c.l.bf16 %v260_v61  ;;  %v497_v61 = vld [vmem:[#allocation2 + $0x88] sm:$0xff] }
  0x48   : > { %v444_v5 = vmax.f32 %v404_v58, 0.0  ;;  %v408_v8 = vadd.f32 %v1109_v44, %v346_v59  ;;  %v1133_v10 = vmax.f32 %v478_v56, %v438_v62  ;;  %538 = vst [vmem:[#allocation2 + $0x120] sm:$0xff] %v438_v62  ;;  %v353_v25 = vmul.f32 %v1079_v18, %v291_v17  ;;  %v498_v58 = vld [vmem:[#allocation2 + $0xc0] sm:$0xff] }
  0x49   : > { %v1131_v9 = vadd.f32 %v1074_v15, %v345_v60  ;;  %v439_v11 = vmax.f32 %v399_v3, 0.0  ;;  %v1139_v22 = vmax.f32 %v485_v63, %v445_v4  ;;  %545 = vst [vmem:[#allocation2 + $0xf0] sm:$0xff] %v445_v4  ;;  %v282_v27 = vunpack.c.l.bf16 %v256_v42  ;;  %v496_v3 = vld [vmem:[#allocation2 + $0xe0] sm:$0xff] }
  0x4a   : > { %v1141_v23 = vmax.f32 %v484_v0, %v444_v5  ;;  %600 = vrot.lane.b32.xlu2 %v1133_v10, %s982_s9  ;;  %v448_v24 = vmax.f32 %v408_v8, 0.0  ;;  %544 = vst [vmem:[#allocation2 + $0x138] sm:$0xff] %v444_v5  ;;  %v294_v31 = vunpack.c.l.bf16 %v262_v19  ;;  %v293_v32 = vunpack.c.h.bf16 %v261_v20  ;;  %v499_v5 = vld [vmem:[#allocation2 + $0x118] sm:$0xff] }
  0x4b   : > { %v1146_v29 = vmax.f32 %v479_v16, %v439_v11  ;;  %v447_v30 = vmax.f32 %v1131_v9, 0.0  ;;  %539 = vst [vmem:[#allocation2 + $0x38] sm:$0xff] %v439_v11  ;;  %v415_v33 = vadd.f32 %v1083_v21, %v353_v25  ;;  %v352_v34 = vmul.f32 %v1065_v12, %v290_v26  ;;  %v495_v12 = vld [vmem:[#allocation2 + $0x90] sm:$0xff]  ;;  %v254_v25 = vld [vmem:[%s1037_s28 + $0x20] sm:$0xff] }
  0x4c   : > { %v344_v35 = vmul.f32 %v1057_v6, %v282_v27  ;;  %v285_v37 = vunpack.c.h.bf16 %v1101_v41  ;;  %v356_v18 = vmul.f32 %v316_v40, %v294_v31  ;;  %v355_v42 = vmul.f32 %v1071_v14, %v293_v32  ;;  %548 = vst [vmem:[#allocation2 + $0x70] sm:$0xff] %v448_v24 }
  0x4d   : > { %v292_v45 = vunpack.c.l.bf16 %v261_v20  ;;  %v295_v46 = vunpack.c.h.bf16 %v262_v19  ;;  %v455_v50 = vmax.f32 %v415_v33, 0.0  ;;  %v414_v51 = vadd.f32 %v1068_v13, %v352_v34  ;;  %547 = vst [vmem:[#allocation2 + $0xc8] sm:$0xff] %v447_v30  ;;  %v494_v13 = vld [vmem:[#allocation2 + $0xa8] sm:$0xff]  ;;  %v890_v20 = vld [vmem:[%s1441_s1 + $0x10] ss:$2 sm:$0x3] }
  0x4e   : > { %598 = vrot.lane.b32.xlu1 %v1097_v39, %s982_s9  ;;  %594 = vrot.lane.b32.xlu0 %v1106_v43, %s982_s9  ;;  %v406_v52 = vadd.f32 %v1060_v7, %v344_v35  ;;  %v347_v21 = vmul.f32 %v1112_v48, %v285_v37  ;;  %v418_v40 = vadd.f32 %v1109_v44, %v356_v18  ;;  %v1217_v26 = vperm.slane %v890_v20, 1  ;;  %v483_v33 = vld [vmem:[#allocation2 + $0x108] sm:$0xff]  ;;  %v253_v37 = vld [vmem:[%s1037_s28 + $0x18] sm:$0xff] }
  0x4f   : > { %v417_v14 = vadd.f32 %v1074_v15, %v355_v42  ;;  %v354_v41 = vmul.f32 %v1057_v6, %v292_v45  ;;  %555 = vst [vmem:[#allocation2 + $0x90] sm:$0xff] %v455_v50  ;;  %v454_v53 = vmax.f32 %v414_v51, 0.0  ;;  %v357_v57 = vmul.f32 %v1112_v48, %v295_v46  ;;  %v486_v15 = vld [vmem:[#allocation2 + $0x18] sm:$0xff] }
  0x50   : > { %v409_v54 = vadd.f32 %v1115_v49, %v347_v21  ;;  %v446_v55 = vmax.f32 %v406_v52, 0.0  ;;  %v458_v44 = vmax.f32 %v418_v40, 0.0  ;;  %v1169_v6 = vmax.f32 %v488_v38, %v448_v24  ;;  %v892_v24 = vld [vmem:[%s1441_s1 + $0x11] ss:$2 sm:$0x3] }
  0x51   : > { %v416_v56 = vadd.f32 %v1060_v7, %v354_v41  ;;  %554 = vst [vmem:[#allocation2 + $0xa8] sm:$0xff] %v454_v53  ;;  %v457_v59 = vmax.f32 %v417_v14, 0.0  ;;  %v419_v60 = vadd.f32 %v1115_v49, %v357_v57  ;;  %v1172_v63 = vmax.f32 %v487_v47, %v447_v30  ;;  %v489_v7 = vld [vmem:[#allocation2 + $0x20] sm:$0xff] }
  0x52   : > { %602 = vrot.lane.b32.xlu2 %v1146_v29, %s982_s9  ;;  %546 = vst [vmem:[#allocation2 + $0x18] sm:$0xff] %v446_v55  ;;  %v449_v62 = vmax.f32 %v409_v54, 0.0  ;;  %v1174_v0 = vmax.f32 %v486_v15, %v446_v55  ;;  %v1182_v49 = vmax.f32 %v495_v12, %v455_v50  ;;  %v1184_v8 = vmax.f32 %v494_v13, %v454_v53  ;;  %v482_v53 = vld [vmem:[#allocation2 + $0x80] sm:$0xff] }
  0x53   : > { %558 = vst [vmem:[#allocation2 + $0xc0] sm:$0xff] %v458_v44  ;;  %v456_v48 = vmax.f32 %v416_v56, 0.0  ;;  %v459_v4 = vmax.f32 %v419_v60, 0.0  ;;  %v1194_v11 = vmax.f32 %v498_v58, %v458_v44  ;;  %v1196_v16 = vmax.f32 %v497_v61, %v457_v59  ;;  %v1247_v56 = vld [vmem:[#allocation2 + $0x100] sm:$0xff]  ;;  %v1255_v44 = vld [vmem:[#allocation2 + $0xf8] sm:$0xff]  ;;  %v1262_v61 = vld [vmem:[#allocation2 + $0x128] sm:$0xff] }
  0x54   : > { %557 = vst [vmem:[#allocation2 + $0x88] sm:$0xff] %v457_v59  ;;  %v1186_v9 = vmax.f32 %v489_v7, %v449_v62  ;;  %v279_v27 = vunpack.c.h.bf16 %v254_v25  ;;  %v1219_v30 = vperm.slane %v892_v24, 1  ;;  %v278_v38 = vunpack.c.l.bf16 %v254_v25  ;;  %v258_v57 = vld [vmem:[%s1037_s28 + $0x40] sm:$0xff] }
  0x55   : > { %549 = vst [vmem:[#allocation2 + $0x20] sm:$0xff] %v449_v62  ;;  %v1198_v17 = vmax.f32 %v496_v3, %v456_v48  ;;  %v1206_v19 = vmax.f32 %v499_v5, %v459_v4  ;;  %v1227_v18 = vperm.slane %v1048_v1, 7  ;;  %v1229_v42 = vperm.slane %v890_v20, 0  ;;  %v259_v62 = vld [vmem:[%s1037_s28 + $0x48] sm:$0xff] }
  0x56   : > { %606 = vrot.lane.b32.xlu1 %v1139_v22, %s982_s9  ;;  %604 = vrot.lane.b32.xlu0 %v1141_v23, %s982_s9  ;;  %556 = vst [vmem:[#allocation2 + $0xe0] sm:$0xff] %v456_v48  ;;  %v341_v31 = vmul.f32 %v1217_v26, %v279_v27  ;;  %v277_v45 = vunpack.c.h.bf16 %v253_v37  ;;  %v1232_v46 = vperm.slane %v1053_v2, 7  ;;  %v1234_v47 = vperm.slane %v892_v24, 0 }
  0x57   : > { %559 = vst [vmem:[#allocation2 + $0x118] sm:$0xff] %v459_v4  ;;  %v340_v50 = vmul.f32 %v1229_v42, %v278_v38  ;;  %v276_v51 = vunpack.c.l.bf16 %v253_v37  ;;  %v318_v52 = vperm.slane %v1048_v1, 6  ;;  %v380_v14 = vperm.slane %v1053_v2, 6  ;;  %v263_v37 = vld [vmem:[%s1037_s28 + $0x68] sm:$0xff] }
  0x58   : > { %v403_v32 = vadd.f32 %v1219_v30, %v341_v31  ;;  %v339_v21 = vmul.f32 %v1227_v18, %v277_v45  ;;  %v286_v15 = vunpack.c.l.bf16 %v258_v57  ;;  %v289_v7 = vunpack.c.h.bf16 %v259_v62  ;;  %v1289_v45 = vld [vmem:[#allocation2 + $0x110] sm:$0xff] }
  0x59   : > { %v402_v12 = vadd.f32 %v1234_v47, %v340_v50  ;;  %v338_v40 = vmul.f32 %v318_v52, %v276_v51  ;;  %v287_v48 = vunpack.c.h.bf16 %v258_v57  ;;  %v288_v3 = vunpack.c.l.bf16 %v259_v62  ;;  %v1291_v51 = vld [vmem:[#allocation2 + $0x8] sm:$0xff] }
  0x5a   : > { %608 = vrot.lane.b32.xlu2 %v1174_v0, %s982_s9  ;;  %v443_v34 = vmax.f32 %v403_v32, 0.0  ;;  %v1242_v41 = vadd.f32 %v1232_v46, %v339_v21  ;;  %v348_v58 = vmul.f32 %v318_v52, %v286_v15  ;;  %v351_v5 = vmul.f32 %v1217_v26, %v289_v7  ;;  %v1300_v15 = vld [vmem:[#allocation2 + $0xd8] sm:$0xff] }
  0x5b   : > { %v442_v54 = vmax.f32 %v402_v12, 0.0  ;;  %v1244_v13 = vadd.f32 %v380_v14, %v338_v40  ;;  %v349_v20 = vmul.f32 %v1227_v18, %v287_v48  ;;  %v350_v24 = vmul.f32 %v1229_v42, %v288_v3 }
  0x5c   : > { %v1223_v35 = vmax.f32 %v483_v33, %v443_v34  ;;  %543 = vst [vmem:[#allocation2 + $0x108] sm:$0xff] %v443_v34  ;;  %v441_v55 = vmax.f32 %v1242_v41, 0.0  ;;  %v1259_v59 = vadd.f32 %v380_v14, %v348_v58  ;;  %v1273_v25 = vadd.f32 %v1219_v30, %v351_v5  ;;  %v1282_v33 = vld [vmem:[#allocation2 + $0x98] sm:$0xff]  ;;  %v264_v58 = vld [vmem:[%s1037_s28 + $0x70] sm:$0xff] }
  0x5d   : > { %v1249_v1 = vmax.f32 %v482_v53, %v442_v54  ;;  %542 = vst [vmem:[#allocation2 + $0x80] sm:$0xff] %v442_v54  ;;  %v440_v2 = vmax.f32 %v1244_v13, 0.0  ;;  %v1276_v27 = vadd.f32 %v1232_v46, %v349_v20  ;;  %v1279_v31 = vadd.f32 %v1234_v47, %v350_v24 }
  0x5e   : > { %612 = vrot.lane.b32.xlu1 %v1169_v6, %s982_s9  ;;  %610 = vrot.lane.b32.xlu0 %v1172_v63, %s982_s9  ;;  %541 = vst [vmem:[#allocation2 + $0x100] sm:$0xff] %v441_v55  ;;  %v450_v60 = vmax.f32 %v1259_v59, 0.0  ;;  %v453_v32 = vmax.f32 %v1273_v25, 0.0  ;;  %v296_v50 = vunpack.c.l.bf16 %v263_v37  ;;  %v299_v62 = vunpack.c.h.bf16 %v264_v58 }
  0x5f   : > { %540 = vst [vmem:[#allocation2 + $0xf8] sm:$0xff] %v440_v2  ;;  %v1447_v34 = vmax.f32 %v1276_v27, 0.0  ;;  %v1446_v38 = vmax.f32 %v1279_v31, 0.0  ;;  %v297_v7 = vunpack.c.h.bf16 %v263_v37  ;;  %v298_v48 = vunpack.c.l.bf16 %v264_v58  ;;  %v503_v58 = vld [vmem:[#allocation2 + $0x130] sm:$0xff] }
  0x60   : > { %550 = vst [vmem:[#allocation2 + $0x128] sm:$0xff] %v450_v60  ;;  %v358_v21 = vmul.f32 %v318_v52, %v296_v50  ;;  %v361_v3 = vmul.f32 %v1217_v26, %v299_v62  ;;  %vm628_vm0 = vcmask 523264   ;;  %vm699_vm1 = vcmask 1046528  }
  0x61   : > { %553 = vst [vmem:[#allocation2 + $0x98] sm:$0xff] %v453_v32  ;;  %v359_v52 = vmul.f32 %v1227_v18, %v297_v7  ;;  %v360_v5 = vmul.f32 %v1229_v42, %v298_v48  ;;  %v501_v42 = vld [vmem:[#allocation2 + $0xa0] sm:$0xff]  ;;  %v1448_v41 = vmax.f32 %v1276_v27, 0.0  ;;  %vm740_vm2 = vcmask 1045504  }
  0x62   : > { %614 = vrot.lane.b32.xlu2 %v1186_v9, %s982_s9  ;;  %551 = vst [vmem:[#allocation2 + $0x110] sm:$0xff] %v1447_v34  ;;  %v1297_v53 = vadd.f32 %v380_v14, %v358_v21  ;;  %v1309_v24 = vadd.f32 %v1219_v30, %v361_v3  ;;  %v1322_v30 = vld [vmem:[#allocation2 + $0x68] sm:$0xff] }
  0x63   : > { %552 = vst [vmem:[#allocation2 + $0x8] sm:$0xff] %v1446_v38  ;;  %v1312_v50 = vadd.f32 %v1232_v46, %v359_v52  ;;  %v1315_v21 = vadd.f32 %v1234_v47, %v360_v5 }
  0x64   : > { %v1443_v57 = vmax.f32 %v1297_v53, 0.0  ;;  %v1445_v37 = vmax.f32 %v1309_v24, 0.0  ;;  %v1450_v27 = vmax.f32 %v1297_v53, 0.0 }
  0x65   : > { %v461_v26 = vmax.f32 %v1312_v50, 0.0  ;;  %v1444_v18 = vmax.f32 %v1315_v21, 0.0 }
  0x66   : > { %618 = vrot.lane.b32.xlu1 %v1182_v49, %s982_s9  ;;  %616 = vrot.lane.b32.xlu0 %v1184_v8, %s982_s9  ;;  %560 = vst [vmem:[#allocation2 + $0xd8] sm:$0xff] %v1443_v57 }
  0x67   : > { %563 = vst [vmem:[#allocation2 + $0x130] sm:$0xff] %v1445_v37 }
  0x68   : > { %561 = vst [vmem:[#allocation2 + $0xa0] sm:$0xff] %v461_v26 }
  0x69   : > { %562 = vst [vmem:[#allocation2 + $0x68] sm:$0xff] %v1444_v18  ;;  %v520_v18 = vmax.f32 %v1262_v61, %v450_v60 }
  0x6a   : > { %620 = vrot.lane.b32.xlu2 %v1198_v17, %s982_s9 }
  0x6e   : > { %624 = vrot.lane.b32.xlu1 %v1194_v11, %s982_s9  ;;  %622 = vrot.lane.b32.xlu0 %v1196_v16, %s982_s9 }
  0x72   : > { %626 = vrot.lane.b32.xlu2 %v1206_v19, %s982_s9 }
  0xa4   : > { %v1267_v4 = vpop.permute.xlu2 %600 }
  0xac   : > { %v603_v12 = vpop.permute.xlu2 %602 }
  0xad   : > { %v633_v7 = vsel %vm628_vm0, %v1267_v4, %v603_v12  ;;  %v510_v12 = vmax.f32 %v1255_v44, %v440_v2 }
  0xae   : > { %v663_v5 = vmax.f32 %v1133_v10, %v633_v7 }
  0xb0   : > { %v1347_v60 = vmax.f32 %v663_v5, %v1223_v35 }
  0xb4   : > { %v609_v20 = vpop.permute.xlu2 %608 }
  0xb8   : > { %v597_v40 = vpop.permute.xlu1 %596  ;;  %v593_v54 = vpop.permute.xlu0 %592 }
  0xbc   : > { %v615_v62 = vpop.permute.xlu2 %614 }
  0xc0   : > { %v599_v14 = vpop.permute.xlu1 %598  ;;  %v595_v57 = vpop.permute.xlu0 %594 }
  0xc1   : > { %v630_v3 = vsel %vm628_vm0, %v595_v57, %v597_v40  ;;  %v629_v50 = vsel %vm628_vm0, %v593_v54, %v595_v57  ;;  %v631_v34 = vsel %vm628_vm0, %v597_v40, %v599_v14 }
  0xc2   : > { %v660_v10 = vmax.f32 %v1106_v43, %v630_v3  ;;  %v659_v59 = vmax.f32 %v1095_v36, %v629_v50  ;;  %v661_v44 = vmax.f32 %v1089_v28, %v631_v34  ;;  %v1449_v28 = vmax.f32 %v1279_v31, 0.0 }
  0xc3   : > { %v530_v34 = vmax.f32 %v1300_v15, %v1450_v27 }
  0xc4   : > { %v1352_v2 = vpop.permute.xlu2 %620  ;;  %v675_v35 = vmax.f32 %v660_v10, %v510_v12 }
  0xc8   : > { %v607_v46 = vpop.permute.xlu1 %606  ;;  %v605_v47 = vpop.permute.xlu0 %604 }
  0xc9   : > { %v635_v48 = vsel %vm628_vm0, %v607_v46, %v609_v20  ;;  %v634_v52 = vsel %vm628_vm0, %v605_v47, %v607_v46  ;;  %v632_v46 = vsel %vm628_vm0, %v599_v14, %v1267_v4  ;;  %v674_v4 = vmax.f32 %v659_v59, %v1146_v29 }
  0xca   : > { %v665_v37 = vmax.f32 %v1139_v22, %v635_v48  ;;  %v664_v54 = vmax.f32 %v1141_v23, %v634_v52  ;;  %v511_v22 = vmax.f32 %v1247_v56, %v441_v55  ;;  %v662_v43 = vmax.f32 %v1097_v39, %v632_v46 }
  0xcb   : > { %v523_v23 = vmax.f32 %v1282_v33, %v453_v32  ;;  %v521_v55 = vmax.f32 %v1289_v45, %v1448_v41  ;;  %v522_v39 = vmax.f32 %v1291_v51, %v1449_v28  ;;  %v712_v32 = vrot.slane %v1347_v60, 1 }
  0xcc   : > { %v680_v13 = vmax.f32 %v665_v37, %v520_v18  ;;  %v679_v61 = vmax.f32 %v664_v54, %v1186_v9  ;;  %v1375_v40 = vmax.f32 %v661_v44, %v511_v22  ;;  %v1378_v29 = vmax.f32 %v662_v43, %v1249_v1 }
  0xcd   : > { %v703_v51 = vrot.slane %v675_v35, 1  ;;  %v700_v37 = vrot.slane %v674_v4, 1  ;;  %v1451_v18 = vmax.f32 %v1309_v24, 0.0  ;;  %v531_v1 = vmax.f32 %v501_v42, %v461_v26 }
  0xce   : > { %v704_v33 = vrot.slane %v680_v13, 1  ;;  %v701_v14 = vrot.slane %v679_v61, 1  ;;  %v744_v3 = vrot.slane %v680_v13, 2  ;;  %v706_v26 = vrot.slane %v1375_v40, 1 }
  0xcf   : > { %v533_v47 = vmax.f32 %v503_v58, %v1451_v18  ;;  %v627_v58 = vpop.permute.xlu2 %626  ;;  %v741_v42 = vrot.slane %v679_v61, 2  ;;  %v709_v41 = vrot.slane %v1378_v29, 1 }
  0xd0   : > { %v613_v38 = vpop.permute.xlu1 %612  ;;  %v611_v57 = vpop.permute.xlu0 %610  ;;  %v731_v5 = vmax.f32 %v680_v13, %v704_v33  ;;  %v702_v46 = vsel %vm699_vm1, %v700_v37, %v701_v14 }
  0xd1   : > { %v638_v36 = vsel %vm628_vm0, %v613_v38, %v615_v62  ;;  %v636_v56 = vsel %vm628_vm0, %v609_v20, %v611_v57  ;;  %v637_v25 = vsel %vm628_vm0, %v611_v57, %v613_v38  ;;  %v725_v44 = vmax.f32 %v674_v4, %v702_v46 }
  0xd2   : > { %v668_v9 = vmax.f32 %v1169_v6, %v638_v36  ;;  %v666_v31 = vmax.f32 %v1174_v0, %v636_v56  ;;  %v667_v20 = vmax.f32 %v1172_v63, %v637_v25  ;;  %v705_v0 = vsel %vm699_vm1, %v703_v51, %v704_v33 }
  0xd3   : > { %v1452_v63 = vmax.f32 %v1315_v21, 0.0  ;;  %v726_v10 = vmax.f32 %v675_v35, %v705_v0 }
  0xd4   : > { %v683_v62 = vmax.f32 %v668_v9, %v523_v23  ;;  %v681_v52 = vmax.f32 %v666_v31, %v521_v55  ;;  %v682_v50 = vmax.f32 %v667_v20, %v522_v39 }
  0xd6   : > { %v713_v54 = vrot.slane %v683_v62, 1  ;;  %v707_v22 = vrot.slane %v681_v52, 1  ;;  %v710_v43 = vrot.slane %v682_v50, 1  ;;  %v753_v9 = vrot.slane %v683_v62, 2 }
  0xd7   : > { %v750_v51 = vrot.slane %v682_v50, 2 }
  0xd8   : > { %v619_v45 = vpop.permute.xlu1 %618  ;;  %v617_v53 = vpop.permute.xlu0 %616  ;;  %v714_v28 = vsel %vm699_vm1, %v712_v32, %v713_v54  ;;  %v708_v27 = vsel %vm699_vm1, %v706_v26, %v707_v22  ;;  %v733_v18 = vmax.f32 %v682_v50, %v710_v43 }
  0xd9   : > { %v640_v38 = vsel %vm628_vm0, %v619_v45, %v1352_v2  ;;  %v639_v15 = vsel %vm628_vm0, %v617_v53, %v619_v45  ;;  %v711_v45 = vsel %vm699_vm1, %v709_v41, %v710_v43  ;;  %v729_v32 = vmax.f32 %v1347_v60, %v714_v28 }
  0xda   : > { %v670_v6 = vmax.f32 %v1182_v49, %v640_v38  ;;  %v669_v48 = vmax.f32 %v1184_v8, %v639_v15  ;;  %v532_v49 = vmax.f32 %v1322_v30, %v1452_v63  ;;  %v730_v8 = vmax.f32 %v679_v61, %v701_v14 }
  0xdb   : > { %v747_v38 = vrot.slane %v681_v52, 2  ;;  %v732_v14 = vmax.f32 %v681_v52, %v707_v22  ;;  %v727_v37 = vmax.f32 %v1375_v40, %v708_v27  ;;  %v728_v15 = vmax.f32 %v1378_v29, %v711_v45 }
  0xdc   : > { %v685_v7 = vmax.f32 %v670_v6, %v530_v34  ;;  %v684_v24 = vmax.f32 %v669_v48, %v1206_v19 }
  0xde   : > { %v745_v12 = vrot.slane %v685_v7, 2  ;;  %v742_v59 = vrot.slane %v684_v24, 2 }
  0xe0   : > { %v746_v57 = vsel %vm740_vm2, %v744_v3, %v745_v12  ;;  %v772_v21 = vmax.f32 %v731_v5, %v745_v12  ;;  %v625_v30 = vpop.permute.xlu1 %624  ;;  %v743_v23 = vsel %vm740_vm2, %v741_v42, %v742_v59  ;;  %v771_v36 = vmax.f32 %v730_v8, %v742_v59  ;;  %v623_v61 = vpop.permute.xlu0 %622 }
  0xe1   : > { %v767_v13 = vmax.f32 %v726_v10, %v746_v57  ;;  %v643_v19 = vsel %vm628_vm0, %v625_v30, %v627_v58  ;;  %v766_v55 = vmax.f32 %v725_v44, %v743_v23  ;;  %v641_v56 = vsel %vm628_vm0, %v1352_v2, %v623_v61 }
  0xe2   : > { %782 = vst [vmem:[%s1042_s4 + $0x30] sm:$0x1] %v772_v21  ;;  %v673_v35 = vmax.f32 %v1194_v11, %v643_v19  ;;  %v642_v4 = vsel %vm628_vm0, %v623_v61, %v625_v30  ;;  %v671_v25 = vmax.f32 %v1198_v17, %v641_v56  ;;  %v734_v11 = vmax.f32 %v683_v62, %v713_v54 }
  0xe3   : > { %777 = vst [vmem:[%s1042_s4 + $0x8] sm:$0xff] %v767_v13  ;;  %v672_v33 = vmax.f32 %v1196_v16, %v642_v4 }
  0xe4   : > { %781 = vst [vmem:[%s1042_s4 + $0x28] sm:$0x1] %v771_v36  ;;  %v688_v39 = vmax.f32 %v673_v35, %v533_v47  ;;  %v686_v2 = vmax.f32 %v671_v25, %v531_v1 }
  0xe5   : > { %776 = vst [vmem:[%s1042_s4] sm:$0xff] %v766_v55  ;;  %v687_v31 = vmax.f32 %v672_v33, %v532_v49 }
  0xe6   : > { %v754_v34 = vrot.slane %v688_v39, 2  ;;  %v748_v20 = vrot.slane %v686_v2, 2 }
  0xe7   : > { %v751_v6 = vrot.slane %v687_v31, 2 }
  0xe8   : > { %v755_v17 = vsel %vm740_vm2, %v753_v9, %v754_v34  ;;  %v775_v16 = vmax.f32 %v734_v11, %v754_v34  ;;  %v749_v47 = vsel %vm740_vm2, %v747_v38, %v748_v20  ;;  %v773_v1 = vmax.f32 %v732_v14, %v748_v20 }
  0xe9   : > { %v770_v53 = vmax.f32 %v729_v32, %v755_v17  ;;  %v752_v60 = vsel %vm740_vm2, %v750_v51, %v751_v6  ;;  %v768_v62 = vmax.f32 %v727_v37, %v749_v47  ;;  %v774_v0 = vmax.f32 %v733_v18, %v751_v6 }
  0xea   : > { %785 = vst [vmem:[%s1042_s4 + $0x48] sm:$0x1] %v775_v16  ;;  %v769_v7 = vmax.f32 %v728_v15, %v752_v60 }
  0xeb   : > { %780 = vst [vmem:[%s1042_s4 + $0x20] sm:$0xff] %v770_v53 }
  0xec   : > { %783 = vst [vmem:[%s1042_s4 + $0x38] sm:$0x1] %v773_v1 }
  0xed   : > { %778 = vst [vmem:[%s1042_s4 + $0x10] sm:$0xff] %v768_v62 }
  0xee   : > { %779 = vst [vmem:[%s1042_s4 + $0x18] sm:$0xff] %v769_v7 }
  0xef   : > { %784 = vst [vmem:[%s1042_s4 + $0x40] sm:$0x1] %v774_v0 }
  0xf0 PF: > { %s12_s13 = sadd.s32 1, %s979_s13   ;;  %s1453_s9 = smov %s971_s11 }
  0xf1   : > { %p9_p10 = scmp.ge.s32.totalorder %s12_s13, 12   ;;  %s1454_s10 = smov %s975_s12 }
  0xf2   : > { %s1455_s11 = smov %s1458_s14  ;;  %s1456_s12 = smov %s1462_s15 }
  0xf3   :  { %11 = sbr.rel (!%p9_p10) target bundleno = 3 (0x3), region = 65 }

// kernel: three_dim_cnn_forward.2
= control target key start
LH: loop header
LB: loop body
LE: loop exit
PB: predicated region body
PF: predicated region fallthrough
CT: control target
= control target key end

     0   :  { %s6938_s12 = smov 0   ;;  %s10068_s0 = inlined_call_operand.vmem [shape: bf16[2,128,512], index: 0, kind: input, shape index: {}]   ;;  %s10069_s1 = inlined_call_operand.vmem [shape: bf16[512,1280], index: 1, kind: input, shape index: {}]   ;;  %s10070_s2 = inlined_call_operand.vmem [shape: bf16[2,128,1280], index: 2, kind: output, shape index: {0}]   ;;  %s10071_s3 = inlined_call_operand.vmem [shape: f32[2,2,1280], index: 3, kind: output, shape index: {1}]  }
   0x1 LB: > { %s5128_s13 = sadd.s32 4294967295, %s6916_s12   ;;  %p5132_p0 = scmp.ge.s32.totalorder %s6916_s12, 1  ;;  %s6916_s12 = sphi %s6938_s12, %s14_s12  }
   0x2   : > { %p140_p1 = scmp.lt.s32.totalorder %s6916_s12, 3 }
   0x4   : > { %p141_p2 = pnand %p5132_p0, %p140_p1 }
   0x6   : > { %144 = sbr.rel (%p141_p2) target bundleno = 1476 (0x5c4), region = 28 }
   0xb   : > { %v5547_v0 = vld [vmem:[%s10069_s1 + $0x230] sm:$0xf]  ;;  %v6655_v1 = vld [vmem:[%s10069_s1 + $0x254] sm:$0xf0]  ;;  %v5507_v11 = vld [vmem:[%s10069_s1 + $0x1e0] sm:$0xf] }
   0xc   : > { %v5867_v2 = vld [vmem:[%s10069_s1 + $0x4b0] sm:$0xf]  ;;  %v5548_v3 = vor.u32 %v6655_v1, %v5547_v0  ;;  %v6735_v4 = vld [vmem:[%s10069_s1 + $0x4d4] sm:$0xf0]  ;;  %v6645_v13 = vld [vmem:[%s10069_s1 + $0x204] sm:$0xf0] }
   0xd   : > { %v6187_v5 = vld [vmem:[%s10069_s1 + $0x730] sm:$0xf]  ;;  %v6815_v6 = vld [vmem:[%s10069_s1 + $0x754] sm:$0xf0]  ;;  %v5868_v7 = vor.u32 %v6735_v4, %v5867_v2  ;;  %v5827_v14 = vld [vmem:[%s10069_s1 + $0x460] sm:$0xf]  ;;  %v5508_v16 = vor.u32 %v6645_v13, %v5507_v11 }
   0xe   : > { %v6188_v8 = vor.u32 %v6815_v6, %v6187_v5  ;;  %v6507_v9 = vld [vmem:[%s10069_s1 + $0x9b0] sm:$0xf]  ;;  %v6895_v10 = vld [vmem:[%s10069_s1 + $0x9d4] sm:$0xf0]  ;;  %2296 = vmatpush.bf16.msra.mxu0 %v5548_v3  ;;  %v6725_v15 = vld [vmem:[%s10069_s1 + $0x484] sm:$0xf0] }
   0xf   : > { %v6508_v12 = vor.u32 %v6895_v10, %v6507_v9  ;;  %2345 = vmatpush.bf16.msra.mxu1 %v5868_v7  ;;  %v5828_v17 = vor.u32 %v6725_v15, %v5827_v14  ;;  %v6147_v18 = vld [vmem:[%s10069_s1 + $0x6e0] sm:$0xf]  ;;  %v6805_v19 = vld [vmem:[%s10069_s1 + $0x704] sm:$0xf0]  ;;  %v5467_v23 = vld [vmem:[%s10069_s1 + $0x190] sm:$0xf] }
  0x10   : > { %2394 = vmatpush.bf16.msra.mxu2 %v6188_v8  ;;  %v6467_v20 = vld [vmem:[%s10069_s1 + $0x960] sm:$0xf]  ;;  %v6148_v21 = vor.u32 %v6805_v19, %v6147_v18  ;;  %v6885_v22 = vld [vmem:[%s10069_s1 + $0x984] sm:$0xf0]  ;;  %v6635_v24 = vld [vmem:[%s10069_s1 + $0x1b4] sm:$0xf0] }
  0x11   : > { %2443 = vmatpush.bf16.msra.mxu3 %v6508_v12  ;;  %v6468_v25 = vor.u32 %v6885_v22, %v6467_v20  ;;  %v5787_v26 = vld [vmem:[%s10069_s1 + $0x410] sm:$0xf]  ;;  %v6715_v27 = vld [vmem:[%s10069_s1 + $0x434] sm:$0xf0]  ;;  %v5468_v29 = vor.u32 %v6635_v24, %v5467_v23  ;;  %v5427_v35 = vld [vmem:[%s10069_s1 + $0x140] sm:$0xf] }
  0x12   : > { %v6107_v28 = vld [vmem:[%s10069_s1 + $0x690] sm:$0xf]  ;;  %2297 = vmatpush.bf16.msra.mxu0 %v5508_v16  ;;  %v6795_v30 = vld [vmem:[%s10069_s1 + $0x6b4] sm:$0xf0]  ;;  %v5788_v33 = vor.u32 %v6715_v27, %v5787_v26  ;;  %v6625_v36 = vld [vmem:[%s10069_s1 + $0x164] sm:$0xf0] }
  0x13   : > { %v6427_v31 = vld [vmem:[%s10069_s1 + $0x910] sm:$0xf]  ;;  %v6875_v32 = vld [vmem:[%s10069_s1 + $0x934] sm:$0xf0]  ;;  %2346 = vmatpush.bf16.msra.mxu1 %v5828_v17  ;;  %v6108_v34 = vor.u32 %v6795_v30, %v6107_v28  ;;  %v5747_v37 = vld [vmem:[%s10069_s1 + $0x3c0] sm:$0xf]  ;;  %v5428_v44 = vor.u32 %v6625_v36, %v5427_v35 }
  0x14   : > { %2395 = vmatpush.bf16.msra.mxu2 %v6148_v21  ;;  %v6428_v38 = vor.u32 %v6875_v32, %v6427_v31  ;;  %v6705_v39 = vld [vmem:[%s10069_s1 + $0x3e4] sm:$0xf0]  ;;  %v6067_v40 = vld [vmem:[%s10069_s1 + $0x640] sm:$0xf]  ;;  %v5387_v47 = vld [vmem:[%s10069_s1 + $0xf0] sm:$0xf] }
  0x15   : > { %2444 = vmatpush.bf16.msra.mxu3 %v6468_v25  ;;  %v6785_v41 = vld [vmem:[%s10069_s1 + $0x664] sm:$0xf0]  ;;  %v6387_v42 = vld [vmem:[%s10069_s1 + $0x8c0] sm:$0xf]  ;;  %v5748_v45 = vor.u32 %v6705_v39, %v5747_v37  ;;  %v6615_v48 = vld [vmem:[%s10069_s1 + $0x114] sm:$0xf0] }
  0x16   : > { %v6865_v43 = vld [vmem:[%s10069_s1 + $0x8e4] sm:$0xf0]  ;;  %2298 = vmatpush.bf16.msra.mxu0 %v5468_v29  ;;  %v6068_v46 = vor.u32 %v6785_v41, %v6067_v40  ;;  %v5707_v49 = vld [vmem:[%s10069_s1 + $0x370] sm:$0xf]  ;;  %v6695_v51 = vld [vmem:[%s10069_s1 + $0x394] sm:$0xf0]  ;;  %v5388_v56 = vor.u32 %v6615_v48, %v5387_v47 }
  0x17   : > { %2347 = vmatpush.bf16.msra.mxu1 %v5788_v33  ;;  %v6388_v50 = vor.u32 %v6865_v43, %v6387_v42  ;;  %v6027_v52 = vld [vmem:[%s10069_s1 + $0x5f0] sm:$0xf]  ;;  %v6775_v53 = vld [vmem:[%s10069_s1 + $0x614] sm:$0xf0]  ;;  %v5708_v57 = vor.u32 %v6695_v51, %v5707_v49  ;;  %v5347_v59 = vld [vmem:[%s10069_s1 + $0xa0] sm:$0xf] }
  0x18   : > { %2396 = vmatpush.bf16.msra.mxu2 %v6108_v34  ;;  %v6347_v54 = vld [vmem:[%s10069_s1 + $0x870] sm:$0xf]  ;;  %v6855_v55 = vld [vmem:[%s10069_s1 + $0x894] sm:$0xf0]  ;;  %v6028_v58 = vor.u32 %v6775_v53, %v6027_v52  ;;  %v6605_v60 = vld [vmem:[%s10069_s1 + $0xc4] sm:$0xf0] }
  0x19   : > { %2445 = vmatpush.bf16.msra.mxu3 %v6428_v38  ;;  %v5667_v61 = vld [vmem:[%s10069_s1 + $0x320] sm:$0xf]  ;;  %v6348_v62 = vor.u32 %v6855_v55, %v6347_v54  ;;  %v6685_v63 = vld [vmem:[%s10069_s1 + $0x344] sm:$0xf0]  ;;  %v5348_v4 = vor.u32 %v6605_v60, %v5347_v59  ;;  %v5307_v5 = vld [vmem:[%s10069_s1 + $0x50] sm:$0xf] }
  0x1a   : > { %2299 = vmatpush.bf16.msra.mxu0 %v5428_v44  ;;  %v5987_v0 = vld [vmem:[%s10069_s1 + $0x5a0] sm:$0xf]  ;;  %v6765_v1 = vld [vmem:[%s10069_s1 + $0x5c4] sm:$0xf0]  ;;  %v6595_v6 = vld [vmem:[%s10069_s1 + $0x74] sm:$0xf0]  ;;  %v5668_v7 = vor.u32 %v6685_v63, %v5667_v61 }
  0x1b   : > { %2348 = vmatpush.bf16.msra.mxu1 %v5748_v45  ;;  %v6307_v2 = vld [vmem:[%s10069_s1 + $0x820] sm:$0xf]  ;;  %v6845_v3 = vld [vmem:[%s10069_s1 + $0x844] sm:$0xf0]  ;;  %v5988_v8 = vor.u32 %v6765_v1, %v5987_v0  ;;  %v5627_v9 = vld [vmem:[%s10069_s1 + $0x2d0] sm:$0xf]  ;;  %v5308_v18 = vor.u32 %v6595_v6, %v5307_v5 }
  0x1c   : > { %2397 = vmatpush.bf16.msra.mxu2 %v6068_v46  ;;  %v6675_v10 = vld [vmem:[%s10069_s1 + $0x2f4] sm:$0xf0]  ;;  %v5947_v11 = vld [vmem:[%s10069_s1 + $0x550] sm:$0xf]  ;;  %v6308_v12 = vor.u32 %v6845_v3, %v6307_v2  ;;  %p169_p3 = scmp.lt.s32.totalorder %s5128_s13, 1  ;;  %vm4996_vm0 = vcmask 1040384  }
  0x1d   : > { %2446 = vmatpush.bf16.msra.mxu3 %v6388_v50  ;;  %v6755_v13 = vld [vmem:[%s10069_s1 + $0x574] sm:$0xf0]  ;;  %v6267_v14 = vld [vmem:[%s10069_s1 + $0x7d0] sm:$0xf]  ;;  %v5267_v16 = vld [vmem:[%s10069_s1] sm:$0xf]  ;;  %v5628_v21 = vor.u32 %v6675_v10, %v5627_v9 }
  0x1e   : > { %2300 = vmatpush.bf16.msra.mxu0 %v5388_v56  ;;  %v6835_v15 = vld [vmem:[%s10069_s1 + $0x7f4] sm:$0xf0]  ;;  %v6585_v17 = vld [vmem:[%s10069_s1 + $0x24] sm:$0xf0]  ;;  %v5587_v19 = vld [vmem:[%s10069_s1 + $0x280] sm:$0xf]  ;;  %v5948_v22 = vor.u32 %v6755_v13, %v5947_v11 }
  0x1f   : > { %2349 = vmatpush.bf16.msra.mxu1 %v5708_v57  ;;  %v6665_v20 = vld [vmem:[%s10069_s1 + $0x2a4] sm:$0xf0]  ;;  %s10251_s13 = smov (!%p169_p3, %s5128_s13), 1  ;;  %v5907_v23 = vld [vmem:[%s10069_s1 + $0x500] sm:$0xf]  ;;  %v6268_v26 = vor.u32 %v6835_v15, %v6267_v14  ;;  %v5268_v32 = vor.u32 %v6585_v17, %v5267_v16  ;;  %vm5024_vm1 = vcmask 1041408  }
  0x20   : > { %2398 = vmatpush.bf16.msra.mxu2 %v6028_v58  ;;  %v6745_v24 = vld [vmem:[%s10069_s1 + $0x524] sm:$0xf0]  ;;  %v6227_v25 = vld [vmem:[%s10069_s1 + $0x780] sm:$0xf]  ;;  %s6547_s17 = sshll.u32 %s10251_s13, 8  ;;  %v5588_v38 = vor.u32 %v6665_v20, %v5587_v19  ;;  %s6900_s18 = smul.u32 640, %s10251_s13 }
  0x21   : > { %2447 = vmatpush.bf16.msra.mxu3 %v6348_v62  ;;  %v6825_v27 = vld [vmem:[%s10069_s1 + $0x7a4] sm:$0xf0]  ;;  %v6810_v28 = vld [vmem:[%s10069_s1 + $0x734] sm:$0xf]  ;;  %s7151_s22 = scalar_lea.vmem %s10068_s0, %s6547_s17  ;;  %v6189_v29 = vld [vmem:[%s10069_s1 + $0x758] sm:$0xf0]  ;;  %v5908_v39 = vor.u32 %v6745_v24, %v5907_v23 }
  0x22   : > { %2301 = vmatpush.bf16.msra.mxu0 %v5348_v4  ;;  %v6890_v30 = vld [vmem:[%s10069_s1 + $0x9b4] sm:$0xf]  ;;  %v6509_v31 = vld [vmem:[%s10069_s1 + $0x9d8] sm:$0xf0]  ;;  %v5139_v33 = vld [vmem:[%s7151_s22] sm:$0xf]  ;;  %v6228_v43 = vor.u32 %v6825_v27, %v6227_v25  ;;  %v6192_v46 = vor.u32 %v6810_v28, %v6189_v29  ;;  %s7826_s25 = scalar_lea.vmem %s10070_s2, %s6900_s18 }
  0x23   : > { %2350 = vmatpush.bf16.msra.mxu1 %v5668_v7  ;;  %v6550_v34 = vld [vmem:[%s7151_s22 + $0xc] sm:$0xf0]  ;;  %v6548_v35 = vld [vmem:[%s7151_s22 + $0x4] sm:$0xf]  ;;  %v6650_v36 = vld [vmem:[%s10069_s1 + $0x234] sm:$0xf]  ;;  %v6512_v49 = vor.u32 %v6890_v30, %v6509_v31 }
  0x24   : > { %2399 = vmatpush.bf16.msra.mxu2 %v5988_v8  ;;  %v5549_v37 = vld [vmem:[%s10069_s1 + $0x258] sm:$0xf0]  ;;  %v5141_v40 = vld [vmem:[%s7151_s22 + $0x10] sm:$0xf0]  ;;  %v5147_v41 = vld [vmem:[%s7151_s22 + $0x8] sm:$0xf]  ;;  %v7179_v48 = vor.u32 %v6550_v34, %v5139_v33 }
  0x25   : > { %2448 = vmatpush.bf16.msra.mxu3 %v6308_v12  ;;  %v6551_v42 = vld [vmem:[%s7151_s22 + $0x14] sm:$0xf0]  ;;  %v6549_v44 = vld [vmem:[%s7151_s22 + $0xc] sm:$0xf]  ;;  %v5149_v45 = vld [vmem:[%s7151_s22 + $0x18] sm:$0xf0]  ;;  %v7190_v53 = vor.u32 %v6548_v35, %v5141_v40  ;;  %v5552_v58 = vor.u32 %v6650_v36, %v5549_v37 }
  0x26   : > { %2302 = vmatpush.bf16.msra.mxu0 %v5308_v18  ;;  %v6730_v47 = vld [vmem:[%s10069_s1 + $0x4b4] sm:$0xf]  ;;  %10156 = vst [vmem:[#allocation2_spill] sm:$0xff] %v7179_v48  ;;  %v5869_v50 = vld [vmem:[%s10069_s1 + $0x4d8] sm:$0xf0]  ;;  %v7192_v54 = vor.u32 %v6551_v42, %v5147_v41  ;;  %v7200_v57 = vor.u32 %v6549_v44, %v5149_v45  ;;  %s6901_s7 = smul.u32 20, %s10251_s13 }
  0x27   : > { %2351 = vmatpush.bf16.msra.mxu1 %v5628_v21  ;;  %v6800_v51 = vld [vmem:[%s10069_s1 + $0x6e4] sm:$0xf]  ;;  %v6149_v52 = vld [vmem:[%s10069_s1 + $0x708] sm:$0xf0]  ;;  %10157 = vst [vmem:[#allocation3_spill] sm:$0xff] %v7190_v53  ;;  %v5872_v59 = vor.u32 %v6730_v47, %v5869_v50  ;;  %vm5026_vm2 = vcmask 1045508  }
  0x28   : > { %2400 = vmatpush.bf16.msra.mxu2 %v5948_v22  ;;  %10158 = vst [vmem:[#allocation4_spill] sm:$0xff] %v7192_v54  ;;  %v6880_v55 = vld [vmem:[%s10069_s1 + $0x964] sm:$0xf]  ;;  %v6469_v56 = vld [vmem:[%s10069_s1 + $0x988] sm:$0xf0]  ;;  %v6152_v60 = vor.u32 %v6800_v51, %v6149_v52  ;;  %vm5028_vm3 = vcmask 1043456   ;;  %s8795_s17 = scalar_lea.vmem %s10071_s3, %s6901_s7 }
  0x29   : > { %2449 = vmatpush.bf16.msra.mxu3 %v6268_v26  ;;  %10159 = vst [vmem:[#allocation5_spill] sm:$0xff] %v7200_v57  ;;  %v6640_v61 = vld [vmem:[%s10069_s1 + $0x1e4] sm:$0xf]  ;;  %v5509_v62 = vld [vmem:[%s10069_s1 + $0x208] sm:$0xf0]  ;;  %v6472_v63 = vor.u32 %v6880_v55, %v6469_v56 }
  0x2a   : > { %2303 = vmatpush.bf16.msra.mxu0 %v5268_v32  ;;  %v6720_v0 = vld [vmem:[%s10069_s1 + $0x464] sm:$0xf]  ;;  %v5829_v1 = vld [vmem:[%s10069_s1 + $0x488] sm:$0xf0]  ;;  %v5512_v2 = vor.u32 %v6640_v61, %v5509_v62  ;;  %v6790_v3 = vld [vmem:[%s10069_s1 + $0x694] sm:$0xf] }
  0x2b   : > { %2352 = vmatpush.bf16.msra.mxu1 %v5588_v38  ;;  %v6109_v4 = vld [vmem:[%s10069_s1 + $0x6b8] sm:$0xf0]  ;;  %v6870_v5 = vld [vmem:[%s10069_s1 + $0x914] sm:$0xf]  ;;  %v5832_v6 = vor.u32 %v6720_v0, %v5829_v1  ;;  %v5155_v16 = vld [vmem:[%s7151_s22 + $0x20] sm:$0xf] }
  0x2c   : > { %2401 = vmatpush.bf16.msra.mxu2 %v5908_v39  ;;  %v6112_v7 = vor.u32 %v6790_v3, %v6109_v4  ;;  %v6429_v8 = vld [vmem:[%s10069_s1 + $0x938] sm:$0xf0]  ;;  %v6630_v9 = vld [vmem:[%s10069_s1 + $0x194] sm:$0xf]  ;;  %v6554_v17 = vld [vmem:[%s7151_s22 + $0x2c] sm:$0xf0] }
  0x2d   : > { %2450 = vmatpush.bf16.msra.mxu3 %v6228_v43  ;;  %2304 = vmatmul.bf16.vlgmr.msra.gmra.mxu0 %v7179_v48  ;;  %v5469_v10 = vld [vmem:[%s10069_s1 + $0x1b8] sm:$0xf0]  ;;  %v6432_v11 = vor.u32 %v6870_v5, %v6429_v8  ;;  %v6710_v12 = vld [vmem:[%s10069_s1 + $0x414] sm:$0xf]  ;;  %v6552_v18 = vld [vmem:[%s7151_s22 + $0x24] sm:$0xf]  ;;  %v7250_v24 = vor.u32 %v6554_v17, %v5155_v16 }
  0x2e   : > { %2353 = vmatmul.bf16.vlgmr.msra.gmra.mxu1 %v7190_v53  ;;  %2492 = vmatpush.bf16.msrb.mxu0 %v5552_v58  ;;  %v5789_v13 = vld [vmem:[%s10069_s1 + $0x438] sm:$0xf0]  ;;  %v5472_v14 = vor.u32 %v6630_v9, %v5469_v10  ;;  %v5157_v19 = vld [vmem:[%s7151_s22 + $0x30] sm:$0xf0]  ;;  %v5163_v20 = vld [vmem:[%s7151_s22 + $0x28] sm:$0xf] }
  0x2f   : > { %2402 = vmatmul.bf16.vlgmr.msra.gmra.mxu2 %v7192_v54  ;;  %2541 = vmatpush.bf16.msrb.mxu1 %v5872_v59  ;;  %v5792_v15 = vor.u32 %v6710_v12, %v5789_v13  ;;  %v6555_v21 = vld [vmem:[%s7151_s22 + $0x34] sm:$0xf0]  ;;  %v6553_v22 = vld [vmem:[%s7151_s22 + $0x2c] sm:$0xf]  ;;  %v5165_v23 = vld [vmem:[%s7151_s22 + $0x38] sm:$0xf0]  ;;  %v7252_v25 = vor.u32 %v6552_v18, %v5157_v19 }
  0x30   : > { %2590 = vmatpush.bf16.msrb.mxu2 %v6192_v46  ;;  %2451 = vmatmul.bf16.vlgmr.msra.gmra.mxu3 %v7200_v57  ;;  %v7254_v26 = vor.u32 %v6555_v21, %v5163_v20  ;;  %v7256_v27 = vor.u32 %v6553_v22, %v5165_v23  ;;  %v6780_v28 = vld [vmem:[%s10069_s1 + $0x644] sm:$0xf]  ;;  %v6069_v29 = vld [vmem:[%s10069_s1 + $0x668] sm:$0xf0]  ;;  %v5171_v40 = vld [vmem:[%s7151_s22 + $0x40] sm:$0xf] }
  0x31   : > { %2639 = vmatpush.bf16.msrb.mxu3 %v6512_v49  ;;  %v6860_v30 = vld [vmem:[%s10069_s1 + $0x8c4] sm:$0xf]  ;;  %v6072_v31 = vor.u32 %v6780_v28, %v6069_v29  ;;  %v6389_v32 = vld [vmem:[%s10069_s1 + $0x8e8] sm:$0xf0]  ;;  %v6558_v41 = vld [vmem:[%s7151_s22 + $0x4c] sm:$0xf0] }
  0x32   : > { %2493 = vmatpush.bf16.msrb.mxu0 %v5512_v2  ;;  %10160 = vst [vmem:[#allocation6_spill] sm:$0xff] %v7256_v27  ;;  %v6620_v33 = vld [vmem:[%s10069_s1 + $0x144] sm:$0xf]  ;;  %v5429_v34 = vld [vmem:[%s10069_s1 + $0x168] sm:$0xf0]  ;;  %v6392_v35 = vor.u32 %v6860_v30, %v6389_v32  ;;  %v7294_v49 = vor.u32 %v6558_v41, %v5171_v40 }
  0x33   : > { %2542 = vmatpush.bf16.msrb.mxu1 %v5832_v6  ;;  %v5432_v36 = vor.u32 %v6620_v33, %v5429_v34  ;;  %v6700_v37 = vld [vmem:[%s10069_s1 + $0x3c4] sm:$0xf]  ;;  %v5749_v38 = vld [vmem:[%s10069_s1 + $0x3e8] sm:$0xf0]  ;;  %v5173_v43 = vld [vmem:[%s7151_s22 + $0x50] sm:$0xf0] }
  0x34   : > { %2591 = vmatpush.bf16.msrb.mxu2 %v6152_v60  ;;  %v5752_v39 = vor.u32 %v6700_v37, %v5749_v38  ;;  %v6556_v42 = vld [vmem:[%s7151_s22 + $0x44] sm:$0xf]  ;;  %v5179_v44 = vld [vmem:[%s7151_s22 + $0x48] sm:$0xf]  ;;  %v6559_v45 = vld [vmem:[%s7151_s22 + $0x54] sm:$0xf0] }
  0x35   : > { %2640 = vmatpush.bf16.msrb.mxu3 %v6472_v63  ;;  %v6557_v46 = vld [vmem:[%s7151_s22 + $0x4c] sm:$0xf]  ;;  %v5181_v47 = vld [vmem:[%s7151_s22 + $0x58] sm:$0xf0]  ;;  %v7296_v50 = vor.u32 %v6556_v42, %v5173_v43  ;;  %v7298_v51 = vor.u32 %v6559_v45, %v5179_v44  ;;  %v6770_v55 = vld [vmem:[%s10069_s1 + $0x5f4] sm:$0xf] }
  0x36   : > { %2494 = vmatpush.bf16.msrb.mxu0 %v5472_v14  ;;  %v7300_v52 = vor.u32 %v6557_v46, %v5181_v47  ;;  %v6029_v56 = vld [vmem:[%s10069_s1 + $0x618] sm:$0xf0]  ;;  %v6850_v58 = vld [vmem:[%s10069_s1 + $0x874] sm:$0xf]  ;;  %v5187_v4 = vld [vmem:[%s7151_s22 + $0x60] sm:$0xf] }
  0x37   : > { %2543 = vmatpush.bf16.msrb.mxu1 %v5792_v15  ;;  %v6032_v59 = vor.u32 %v6770_v55, %v6029_v56  ;;  %v6349_v60 = vld [vmem:[%s10069_s1 + $0x898] sm:$0xf0]  ;;  %v6610_v61 = vld [vmem:[%s10069_s1 + $0xf4] sm:$0xf]  ;;  %v6562_v5 = vld [vmem:[%s7151_s22 + $0x6c] sm:$0xf0] }
  0x38   : > { %2592 = vmatpush.bf16.msrb.mxu2 %v6112_v7  ;;  %v5389_v62 = vld [vmem:[%s10069_s1 + $0x118] sm:$0xf0]  ;;  %v6352_v63 = vor.u32 %v6850_v58, %v6349_v60  ;;  %v6690_v1 = vld [vmem:[%s10069_s1 + $0x374] sm:$0xf]  ;;  %v6560_v6 = vld [vmem:[%s7151_s22 + $0x64] sm:$0xf]  ;;  %v7338_v12 = vor.u32 %v6562_v5, %v5187_v4 }
  0x39   : > { %2641 = vmatpush.bf16.msrb.mxu3 %v6432_v11  ;;  %v5392_v0 = vor.u32 %v6610_v61, %v5389_v62  ;;  %v5709_v2 = vld [vmem:[%s10069_s1 + $0x398] sm:$0xf0]  ;;  %v5189_v7 = vld [vmem:[%s7151_s22 + $0x70] sm:$0xf0]  ;;  %v5195_v8 = vld [vmem:[%s7151_s22 + $0x68] sm:$0xf] }
  0x3a   : > { %2495 = vmatpush.bf16.msrb.mxu0 %v5432_v36  ;;  %v5712_v3 = vor.u32 %v6690_v1, %v5709_v2  ;;  %v6563_v9 = vld [vmem:[%s7151_s22 + $0x74] sm:$0xf0]  ;;  %v6561_v10 = vld [vmem:[%s7151_s22 + $0x6c] sm:$0xf]  ;;  %v5197_v11 = vld [vmem:[%s7151_s22 + $0x78] sm:$0xf0]  ;;  %v7340_v13 = vor.u32 %v6560_v6, %v5189_v7 }
  0x3b   : > { %2544 = vmatpush.bf16.msrb.mxu1 %v5752_v39  ;;  %v7342_v14 = vor.u32 %v6563_v9, %v5195_v8  ;;  %v7344_v15 = vor.u32 %v6561_v10, %v5197_v11  ;;  %v6760_v16 = vld [vmem:[%s10069_s1 + $0x5a4] sm:$0xf]  ;;  %v5989_v17 = vld [vmem:[%s10069_s1 + $0x5c8] sm:$0xf0]  ;;  %v5203_v32 = vld [vmem:[%s7151_s22 + $0x80] sm:$0xf] }
  0x3c   : > { %2593 = vmatpush.bf16.msrb.mxu2 %v6072_v31  ;;  %v6840_v18 = vld [vmem:[%s10069_s1 + $0x824] sm:$0xf]  ;;  %v5992_v19 = vor.u32 %v6760_v16, %v5989_v17  ;;  %v6309_v20 = vld [vmem:[%s10069_s1 + $0x848] sm:$0xf0]  ;;  %v6566_v33 = vld [vmem:[%s7151_s22 + $0x8c] sm:$0xf0] }
  0x3d   : > { %2309 = vmatmul.bf16.gmra.mxu0 %v7250_v24  ;;  %2642 = vmatpush.bf16.msrb.mxu3 %v6392_v35  ;;  %v6600_v21 = vld [vmem:[%s10069_s1 + $0xa4] sm:$0xf]  ;;  %v5349_v22 = vld [vmem:[%s10069_s1 + $0xc8] sm:$0xf0]  ;;  %v6312_v23 = vor.u32 %v6840_v18, %v6309_v20  ;;  %v5205_v35 = vld [vmem:[%s7151_s22 + $0x90] sm:$0xf0]  ;;  %v7382_v40 = vor.u32 %v6566_v33, %v5203_v32 }
  0x3e   : > { %2358 = vmatmul.bf16.gmra.mxu1 %v7252_v25  ;;  %2496 = vmatpush.bf16.msrb.mxu0 %v5392_v0  ;;  %v5352_v28 = vor.u32 %v6600_v21, %v5349_v22  ;;  %v6680_v29 = vld [vmem:[%s10069_s1 + $0x324] sm:$0xf]  ;;  %v5669_v30 = vld [vmem:[%s10069_s1 + $0x348] sm:$0xf0]  ;;  %v5211_v36 = vld [vmem:[%s7151_s22 + $0x88] sm:$0xf] }
  0x3f   : > { %2407 = vmatmul.bf16.gmra.mxu2 %v7254_v26  ;;  %2545 = vmatpush.bf16.msrb.mxu1 %v5712_v3  ;;  %v5672_v31 = vor.u32 %v6680_v29, %v5669_v30  ;;  %v6564_v34 = vld [vmem:[%s7151_s22 + $0x84] sm:$0xf]  ;;  %v6567_v37 = vld [vmem:[%s7151_s22 + $0x94] sm:$0xf0]  ;;  %v6565_v38 = vld [vmem:[%s7151_s22 + $0x8c] sm:$0xf] }
  0x40   : > { %2456 = vmatmul.bf16.gmra.mxu3 %v7256_v27  ;;  %2594 = vmatpush.bf16.msrb.mxu2 %v6032_v59  ;;  %v5213_v39 = vld [vmem:[%s7151_s22 + $0x98] sm:$0xf0]  ;;  %v7384_v41 = vor.u32 %v6564_v34, %v5205_v35  ;;  %v7386_v42 = vor.u32 %v6567_v37, %v5211_v36  ;;  %v6750_v44 = vld [vmem:[%s10069_s1 + $0x554] sm:$0xf]  ;;  %v5219_v0 = vld [vmem:[%s7151_s22 + $0xa0] sm:$0xf] }
  0x41   : > { %2643 = vmatpush.bf16.msrb.mxu3 %v6352_v63  ;;  %v7388_v43 = vor.u32 %v6565_v38, %v5213_v39  ;;  %v5949_v45 = vld [vmem:[%s10069_s1 + $0x578] sm:$0xf0]  ;;  %v6830_v46 = vld [vmem:[%s10069_s1 + $0x7d4] sm:$0xf]  ;;  %v6570_v1 = vld [vmem:[%s7151_s22 + $0xac] sm:$0xf0] }
  0x42   : > { %2497 = vmatpush.bf16.msrb.mxu0 %v5352_v28  ;;  %v5952_v47 = vor.u32 %v6750_v44, %v5949_v45  ;;  %v6269_v55 = vld [vmem:[%s10069_s1 + $0x7f8] sm:$0xf0]  ;;  %v6590_v56 = vld [vmem:[%s10069_s1 + $0x54] sm:$0xf]  ;;  %v6568_v2 = vld [vmem:[%s7151_s22 + $0xa4] sm:$0xf]  ;;  %v7426_v8 = vor.u32 %v6570_v1, %v5219_v0 }
  0x43   : > { %2546 = vmatpush.bf16.msrb.mxu1 %v5672_v31  ;;  %v5309_v58 = vld [vmem:[%s10069_s1 + $0x78] sm:$0xf0]  ;;  %v6272_v59 = vor.u32 %v6830_v46, %v6269_v55  ;;  %v6670_v61 = vld [vmem:[%s10069_s1 + $0x2d4] sm:$0xf]  ;;  %v5227_v4 = vld [vmem:[%s7151_s22 + $0xa8] sm:$0xf] }
  0x44   : > { %2595 = vmatpush.bf16.msrb.mxu2 %v5992_v19  ;;  %v5312_v60 = vor.u32 %v6590_v56, %v5309_v58  ;;  %v5629_v62 = vld [vmem:[%s10069_s1 + $0x2f8] sm:$0xf0]  ;;  %v5221_v3 = vld [vmem:[%s7151_s22 + $0xb0] sm:$0xf0]  ;;  %v6571_v5 = vld [vmem:[%s7151_s22 + $0xb4] sm:$0xf0] }
  0x45   : > { %2644 = vmatpush.bf16.msrb.mxu3 %v6312_v23  ;;  %v5632_v63 = vor.u32 %v6670_v61, %v5629_v62  ;;  %v6569_v6 = vld [vmem:[%s7151_s22 + $0xac] sm:$0xf]  ;;  %v5229_v7 = vld [vmem:[%s7151_s22 + $0xb8] sm:$0xf0]  ;;  %v7428_v9 = vor.u32 %v6568_v2, %v5221_v3  ;;  %v7430_v10 = vor.u32 %v6571_v5, %v5227_v4  ;;  %v6740_v16 = vld [vmem:[%s10069_s1 + $0x504] sm:$0xf] }
  0x46   : > { %2498 = vmatpush.bf16.msrb.mxu0 %v5312_v60  ;;  %v7432_v11 = vor.u32 %v6569_v6, %v5229_v7  ;;  %v5909_v17 = vld [vmem:[%s10069_s1 + $0x528] sm:$0xf0]  ;;  %v6820_v18 = vld [vmem:[%s10069_s1 + $0x784] sm:$0xf]  ;;  %v5235_v32 = vld [vmem:[%s7151_s22 + $0xc0] sm:$0xf] }
  0x47   : > { %2547 = vmatpush.bf16.msrb.mxu1 %v5632_v63  ;;  %v5912_v19 = vor.u32 %v6740_v16, %v5909_v17  ;;  %v6229_v20 = vld [vmem:[%s10069_s1 + $0x7a8] sm:$0xf0]  ;;  %v6580_v21 = vld [vmem:[%s10069_s1 + $0x4] sm:$0xf]  ;;  %v6574_v33 = vld [vmem:[%s7151_s22 + $0xcc] sm:$0xf0] }
  0x48   : > { %2596 = vmatpush.bf16.msrb.mxu2 %v5952_v47  ;;  %v5269_v22 = vld [vmem:[%s10069_s1 + $0x28] sm:$0xf0]  ;;  %v6232_v23 = vor.u32 %v6820_v18, %v6229_v20  ;;  %v6660_v29 = vld [vmem:[%s10069_s1 + $0x284] sm:$0xf]  ;;  %v5237_v35 = vld [vmem:[%s7151_s22 + $0xd0] sm:$0xf0]  ;;  %v7470_v44 = vor.u32 %v6574_v33, %v5235_v32 }
  0x49   : > { %2645 = vmatpush.bf16.msrb.mxu3 %v6272_v59  ;;  %v5272_v28 = vor.u32 %v6580_v21, %v5269_v22  ;;  %v5589_v30 = vld [vmem:[%s10069_s1 + $0x2a8] sm:$0xf0]  ;;  %v6572_v34 = vld [vmem:[%s7151_s22 + $0xc4] sm:$0xf]  ;;  %v5243_v36 = vld [vmem:[%s7151_s22 + $0xc8] sm:$0xf] }
  0x4a   : > { %v5592_v31 = vor.u32 %v6660_v29, %v5589_v30  ;;  %v6575_v37 = vld [vmem:[%s7151_s22 + $0xd4] sm:$0xf0]  ;;  %v6573_v38 = vld [vmem:[%s7151_s22 + $0xcc] sm:$0xf]  ;;  %v5245_v39 = vld [vmem:[%s7151_s22 + $0xd8] sm:$0xf0]  ;;  %v7472_v45 = vor.u32 %v6572_v34, %v5237_v35 }
  0x4b   : > { %2499 = vmatpush.bf16.msrb.mxu0 %v5272_v28  ;;  %v7474_v46 = vor.u32 %v6575_v37, %v5243_v36  ;;  %v7476_v47 = vor.u32 %v6573_v38, %v5245_v39  ;;  %v6195_v55 = vld [vmem:[%s10069_s1 + $0x738] sm:$0xf]  ;;  %v6816_v56 = vld [vmem:[%s10069_s1 + $0x75c] sm:$0xf0]  ;;  %v6578_v63 = vld [vmem:[%s7151_s22 + $0xec] sm:$0xf0] }
  0x4c   : > { %2597 = vmatpush.bf16.msrb.mxu2 %v5912_v19  ;;  %2548 = vmatpush.bf16.msrb.mxu1 %v5592_v31  ;;  %10161 = vst [vmem:[#allocation7_spill] sm:$0xff] %v7472_v45  ;;  %v6515_v58 = vld [vmem:[%s10069_s1 + $0x9b8] sm:$0xf]  ;;  %v6196_v59 = vor.u32 %v6816_v56, %v6195_v55  ;;  %v6896_v60 = vld [vmem:[%s10069_s1 + $0x9dc] sm:$0xf0] }
  0x4d   : > { %2314 = vmatmul.bf16.gmra.mxu0 %v7294_v49  ;;  %2646 = vmatpush.bf16.msrb.mxu3 %v6232_v23  ;;  %10162 = vst [vmem:[#allocation8_spill] sm:$0xff] %v7474_v46  ;;  %v6516_v61 = vor.u32 %v6896_v60, %v6515_v58  ;;  %v5251_v62 = vld [vmem:[%s7151_s22 + $0xe0] sm:$0xf]  ;;  %v6576_v0 = vld [vmem:[%s7151_s22 + $0xe4] sm:$0xf] }
  0x4e   : > { %2363 = vmatmul.bf16.gmra.mxu1 %v7296_v50  ;;  %10163 = vst [vmem:[#allocation9_spill] sm:$0xff] %v7476_v47  ;;  %v5253_v1 = vld [vmem:[%s7151_s22 + $0xf0] sm:$0xf0]  ;;  %v5555_v2 = vld [vmem:[%s10069_s1 + $0x238] sm:$0xf]  ;;  %v7514_v20 = vor.u32 %v6578_v63, %v5251_v62 }
  0x4f   : > { %2412 = vmatmul.bf16.gmra.mxu2 %v7298_v51  ;;  %v6656_v3 = vld [vmem:[%s10069_s1 + $0x25c] sm:$0xf0]  ;;  %v5875_v4 = vld [vmem:[%s10069_s1 + $0x4b8] sm:$0xf]  ;;  %v5259_v5 = vld [vmem:[%s7151_s22 + $0xe8] sm:$0xf]  ;;  %v7516_v21 = vor.u32 %v6576_v0, %v5253_v1 }
  0x50   : > { %2461 = vmatmul.bf16.gmra.mxu3 %v7300_v52  ;;  %2786 = vmatpush.bf16.msra.mxu2 %v6196_v59  ;;  %v6579_v6 = vld [vmem:[%s7151_s22 + $0xf4] sm:$0xf0]  ;;  %v5556_v7 = vor.u32 %v6656_v3, %v5555_v2  ;;  %v6736_v16 = vld [vmem:[%s10069_s1 + $0x4dc] sm:$0xf0]  ;;  %v6577_v17 = vld [vmem:[%s7151_s22 + $0xec] sm:$0xf] }
  0x51   : > { %2835 = vmatpush.bf16.msra.mxu3 %v6516_v61  ;;  %v5261_v18 = vld [vmem:[%s7151_s22 + $0xf8] sm:$0xf0]  ;;  %v5876_v19 = vor.u32 %v6736_v16, %v5875_v4  ;;  %v7518_v22 = vor.u32 %v6579_v6, %v5259_v5  ;;  %v6155_v28 = vld [vmem:[%s10069_s1 + $0x6e8] sm:$0xf]  ;;  %v6806_v29 = vld [vmem:[%s10069_s1 + $0x70c] sm:$0xf0] }
  0x52   : > { %2688 = vmatpush.bf16.msra.mxu0 %v5556_v7  ;;  %v7520_v23 = vor.u32 %v6577_v17, %v5261_v18  ;;  %v6475_v30 = vld [vmem:[%s10069_s1 + $0x968] sm:$0xf]  ;;  %v6156_v31 = vor.u32 %v6806_v29, %v6155_v28  ;;  %v6886_v32 = vld [vmem:[%s10069_s1 + $0x98c] sm:$0xf0]  ;;  %v6115_v59 = vld [vmem:[%s10069_s1 + $0x698] sm:$0xf] }
  0x53   : > { %10164 = vst [vmem:[#allocation10_spill] sm:$0xff] %v7518_v22  ;;  %2737 = vmatpush.bf16.msra.mxu1 %v5876_v19  ;;  %v6476_v33 = vor.u32 %v6886_v32, %v6475_v30  ;;  %v5515_v34 = vld [vmem:[%s10069_s1 + $0x1e8] sm:$0xf]  ;;  %v6646_v35 = vld [vmem:[%s10069_s1 + $0x20c] sm:$0xf0] }
  0x54   : > { %10165 = vst [vmem:[#allocation11_spill] sm:$0xff] %v7520_v23  ;;  %2787 = vmatpush.bf16.msra.mxu2 %v6156_v31  ;;  %v5835_v36 = vld [vmem:[%s10069_s1 + $0x468] sm:$0xf]  ;;  %v5516_v37 = vor.u32 %v6646_v35, %v5515_v34  ;;  %v6726_v38 = vld [vmem:[%s10069_s1 + $0x48c] sm:$0xf0] }
  0x55   : > { %2836 = vmatpush.bf16.msra.mxu3 %v6476_v33  ;;  %v5836_v55 = vor.u32 %v6726_v38, %v5835_v36  ;;  %v6796_v60 = vld [vmem:[%s10069_s1 + $0x6bc] sm:$0xf0]  ;;  %v6435_v61 = vld [vmem:[%s10069_s1 + $0x918] sm:$0xf]  ;;  %v6786_v38 = vld [vmem:[%s10069_s1 + $0x66c] sm:$0xf0] }
  0x56   : > { %2689 = vmatpush.bf16.msra.mxu0 %v5516_v37  ;;  %v6116_v63 = vor.u32 %v6796_v60, %v6115_v59  ;;  %v6876_v0 = vld [vmem:[%s10069_s1 + $0x93c] sm:$0xf0]  ;;  %v5475_v16 = vld [vmem:[%s10069_s1 + $0x198] sm:$0xf]  ;;  %v6075_v37 = vld [vmem:[%s10069_s1 + $0x648] sm:$0xf] }
  0x57   : > { %2738 = vmatpush.bf16.msra.mxu1 %v5836_v55  ;;  %v6436_v4 = vor.u32 %v6876_v0, %v6435_v61  ;;  %v6636_v17 = vld [vmem:[%s10069_s1 + $0x1bc] sm:$0xf0]  ;;  %v5795_v18 = vld [vmem:[%s10069_s1 + $0x418] sm:$0xf] }
  0x58   : > { %2788 = vmatpush.bf16.msra.mxu2 %v6116_v63  ;;  %v5476_v28 = vor.u32 %v6636_v17, %v5475_v16  ;;  %v6716_v29 = vld [vmem:[%s10069_s1 + $0x43c] sm:$0xf0]  ;;  %v6706_v16 = vld [vmem:[%s10069_s1 + $0x3ec] sm:$0xf0] }
  0x59   : > { %2837 = vmatpush.bf16.msra.mxu3 %v6436_v4  ;;  %v5796_v33 = vor.u32 %v6716_v29, %v5795_v18  ;;  %v5755_v4 = vld [vmem:[%s10069_s1 + $0x3c8] sm:$0xf] }
  0x5a   : > { %2690 = vmatpush.bf16.msra.mxu0 %v5476_v28  ;;  %v5756_v28 = vor.u32 %v6706_v16, %v5755_v4  ;;  %v6696_v4 = vld [vmem:[%s10069_s1 + $0x39c] sm:$0xf0] }
  0x5b   : > { %2739 = vmatpush.bf16.msra.mxu1 %v5796_v33  ;;  %v6776_v33 = vld [vmem:[%s10069_s1 + $0x61c] sm:$0xf0] }
  0x5d   : > { %2319 = vmatmul.bf16.gmra.mxu0 %v7338_v12 }
  0x5e   : > { %2368 = vmatmul.bf16.gmra.mxu1 %v7340_v13 }
  0x5f   : > { %2417 = vmatmul.bf16.gmra.mxu2 %v7342_v14  ;;  %2740 = vmatpush.bf16.msra.mxu1 %v5756_v28 }
  0x60   : > { %2466 = vmatmul.bf16.gmra.mxu3 %v7344_v15 }
  0x6d   : > { %2324 = vmatmul.bf16.gmra.mxu0 %v7382_v40 }
  0x6e   : > { %2373 = vmatmul.bf16.gmra.mxu1 %v7384_v41 }
  0x6f   : > { %2422 = vmatmul.bf16.gmra.mxu2 %v7386_v42 }
  0x70   : > { %2471 = vmatmul.bf16.gmra.mxu3 %v7388_v43 }
  0x7d   : > { %2329 = vmatmul.bf16.gmra.mxu0 %v7426_v8 }
  0x7e   : > { %2378 = vmatmul.bf16.gmra.mxu1 %v7428_v9 }
  0x7f   : > { %2427 = vmatmul.bf16.gmra.mxu2 %v7430_v10 }
  0x80   : > { %2476 = vmatmul.bf16.gmra.mxu3 %v7432_v11 }
  0x8d   : > { %2334 = vmatmul.bf16.gmra.mxu0 %v7470_v44 }
  0x8e   : > { %2383 = vmatmul.bf16.gmra.mxu1 %v7472_v45 }
  0x8f   : > { %2432 = vmatmul.bf16.gmra.mxu2 %v7474_v46 }
  0x90   : > { %2481 = vmatmul.bf16.gmra.mxu3 %v7476_v47 }
  0x9d   : > { %2339 = vmatmul.bf16.gmra.mxu0 %v7514_v20 }
  0x9e   : > { %2388 = vmatmul.bf16.gmra.mxu1 %v7516_v21 }
  0x9f   : > { %2437 = vmatmul.bf16.gmra.mxu2 %v7518_v22 }
  0xa0   : > { %2486 = vmatmul.bf16.gmra.mxu3 %v7520_v23 }
  0xaa   : > { %v2305_v39 = vpop.f32.mrf.mxu0 }
  0xab   : > { %v2354_v56 = vpop.f32.mrf.mxu1 }
  0xac   : > { %v2355_v58 = vadd.f32 %v2354_v56, %v2305_v39  ;;  %v6395_v39 = vld [vmem:[%s10069_s1 + $0x8c8] sm:$0xf]  ;;  %v6076_v56 = vor.u32 %v6786_v38, %v6075_v37  ;;  %v6856_v38 = vld [vmem:[%s10069_s1 + $0x89c] sm:$0xf0] }
  0xad   : > { %2500 = vmatmul.bf16.vlgmr.msrb.gmra.mxu0 %v7179_v48 }
  0xae   : > { %2549 = vmatmul.bf16.vlgmr.msrb.gmra.mxu1 %v7190_v53  ;;  %2789 = vmatpush.bf16.msra.mxu2 %v6076_v56 }
  0xaf   : > { %2598 = vmatmul.bf16.vlgmr.msrb.gmra.mxu2 %v7192_v54 }
  0xb0   : > { %2647 = vmatmul.bf16.vlgmr.msrb.gmra.mxu3 %v7200_v57 }
  0xb2   : > { %v2403_v62 = vpop.f32.mrf.mxu2  ;;  %v2307_v3 = vpop.f32.mrf.mxu0 }
  0xb3   : > { %v2404_v1 = vadd.f32 %v2403_v62, %v2355_v58  ;;  %v2452_v2 = vpop.f32.mrf.mxu3  ;;  %v2356_v5 = vpop.f32.mrf.mxu1  ;;  %v6866_v58 = vld [vmem:[%s10069_s1 + $0x8ec] sm:$0xf0] }
  0xb4   : > { %v2357_v7 = vadd.f32 %v2356_v5, %v2307_v3  ;;  %v6396_v62 = vor.u32 %v6866_v58, %v6395_v39  ;;  %v6626_v3 = vld [vmem:[%s10069_s1 + $0x16c] sm:$0xf0] }
  0xb5   : > { %v7566_v6 = vadd.f32 %v2452_v2, %v2404_v1  ;;  %v5435_v2 = vld [vmem:[%s10069_s1 + $0x148] sm:$0xf] }
  0xb6   : > { %2838 = vmatpush.bf16.msra.mxu3 %v6396_v62  ;;  %v5395_v62 = vld [vmem:[%s10069_s1 + $0xf8] sm:$0xf] }
  0xb7   : > { %10166 = vst [vmem:[#allocation12_spill] sm:$0xff] %v7566_v6 }
  0xba   : > { %v2405_v19 = vpop.f32.mrf.mxu2  ;;  %v2310_v32 = vpop.f32.mrf.mxu0 }
  0xbb   : > { %v2406_v30 = vadd.f32 %v2405_v19, %v2357_v7  ;;  %v2454_v31 = vpop.f32.mrf.mxu3  ;;  %v2359_v34 = vpop.f32.mrf.mxu1  ;;  %v5436_v7 = vor.u32 %v6626_v3, %v5435_v2 }
  0xbc   : > { %v2360_v36 = vadd.f32 %v2359_v34, %v2310_v32  ;;  %v6035_v32 = vld [vmem:[%s10069_s1 + $0x5f8] sm:$0xf] }
  0xbd   : > { %v7580_v35 = vadd.f32 %v2454_v31, %v2406_v30  ;;  %2505 = vmatmul.bf16.gmra.mxu0 %v7250_v24  ;;  %v6355_v34 = vld [vmem:[%s10069_s1 + $0x878] sm:$0xf]  ;;  %v6036_v37 = vor.u32 %v6776_v33, %v6035_v32  ;;  %v6315_v32 = vld [vmem:[%s10069_s1 + $0x828] sm:$0xf] }
  0xbe   : > { %2554 = vmatmul.bf16.gmra.mxu1 %v7252_v25  ;;  %2691 = vmatpush.bf16.msra.mxu0 %v5436_v7  ;;  %v6356_v58 = vor.u32 %v6856_v38, %v6355_v34 }
  0xbf   : > { %10167 = vst [vmem:[#allocation13_spill] sm:$0xff] %v7580_v35  ;;  %2603 = vmatmul.bf16.gmra.mxu2 %v7254_v26 }
  0xc0   : > { %2652 = vmatmul.bf16.gmra.mxu3 %v7256_v27  ;;  %2790 = vmatpush.bf16.msra.mxu2 %v6036_v37 }
  0xc1   : > { %2839 = vmatpush.bf16.msra.mxu3 %v6356_v58 }
  0xc2   : > { %v2408_v55 = vpop.f32.mrf.mxu2  ;;  %v2312_v61 = vpop.f32.mrf.mxu0 }
  0xc3   : > { %v2409_v59 = vadd.f32 %v2408_v55, %v2360_v36  ;;  %v2457_v60 = vpop.f32.mrf.mxu3  ;;  %v2361_v63 = vpop.f32.mrf.mxu1 }
  0xc4   : > { %v2362_v1 = vadd.f32 %v2361_v63, %v2312_v61  ;;  %v6616_v63 = vld [vmem:[%s10069_s1 + $0x11c] sm:$0xf0] }
  0xc5   : > { %v7598_v0 = vadd.f32 %v2457_v60, %v2409_v59  ;;  %v5396_v3 = vor.u32 %v6616_v63, %v5395_v62  ;;  %v6606_v62 = vld [vmem:[%s10069_s1 + $0xcc] sm:$0xf0]  ;;  %v5675_v63 = vld [vmem:[%s10069_s1 + $0x328] sm:$0xf] }
  0xc7   : > { %2692 = vmatpush.bf16.msra.mxu0 %v5396_v3  ;;  %v6686_v3 = vld [vmem:[%s10069_s1 + $0x34c] sm:$0xf0] }
  0xca   : > { %v2410_v5 = vpop.f32.mrf.mxu2  ;;  %v2315_v19 = vpop.f32.mrf.mxu0 }
  0xcb   : > { %v2411_v17 = vadd.f32 %v2410_v5, %v2362_v1  ;;  %v2459_v18 = vpop.f32.mrf.mxu3  ;;  %v2364_v29 = vpop.f32.mrf.mxu1  ;;  %v5715_v1 = vld [vmem:[%s10069_s1 + $0x378] sm:$0xf] }
  0xcc   : > { %v2365_v31 = vadd.f32 %v2364_v29, %v2315_v19  ;;  %v5995_v29 = vld [vmem:[%s10069_s1 + $0x5a8] sm:$0xf] }
  0xcd   : > { %v7612_v30 = vadd.f32 %v2459_v18, %v2411_v17  ;;  %2510 = vmatmul.bf16.gmra.mxu0 %v7294_v49  ;;  %v5716_v17 = vor.u32 %v6696_v4, %v5715_v1 }
  0xce   : > { %2559 = vmatmul.bf16.gmra.mxu1 %v7296_v50 }
  0xcf   : > { %2608 = vmatmul.bf16.gmra.mxu2 %v7298_v51  ;;  %2741 = vmatpush.bf16.msra.mxu1 %v5716_v17 }
  0xd0   : > { %2657 = vmatmul.bf16.gmra.mxu3 %v7300_v52 }
  0xd2   : > { %v2413_v36 = vpop.f32.mrf.mxu2  ;;  %v2317_v56 = vpop.f32.mrf.mxu0 }
  0xd3   : > { %v2414_v39 = vadd.f32 %v2413_v36, %v2365_v31  ;;  %v2462_v55 = vpop.f32.mrf.mxu3  ;;  %v2366_v59 = vpop.f32.mrf.mxu1  ;;  %v6766_v31 = vld [vmem:[%s10069_s1 + $0x5cc] sm:$0xf0] }
  0xd4   : > { %v2367_v61 = vadd.f32 %v2366_v59, %v2317_v56  ;;  %v5996_v34 = vor.u32 %v6766_v31, %v5995_v29  ;;  %v6846_v36 = vld [vmem:[%s10069_s1 + $0x84c] sm:$0xf0]  ;;  %v5955_v29 = vld [vmem:[%s10069_s1 + $0x558] sm:$0xf]  ;;  %v6756_v31 = vld [vmem:[%s10069_s1 + $0x57c] sm:$0xf0] }
  0xd5   : > { %v7630_v60 = vadd.f32 %v2462_v55, %v2414_v39  ;;  %v6316_v55 = vor.u32 %v6846_v36, %v6315_v32  ;;  %v6275_v32 = vld [vmem:[%s10069_s1 + $0x7d8] sm:$0xf]  ;;  %v6836_v36 = vld [vmem:[%s10069_s1 + $0x7fc] sm:$0xf0] }
  0xd6   : > { %2791 = vmatpush.bf16.msra.mxu2 %v5996_v34  ;;  %v5956_v34 = vor.u32 %v6756_v31, %v5955_v29 }
  0xd7   : > { %2840 = vmatpush.bf16.msra.mxu3 %v6316_v55  ;;  %v6276_v55 = vor.u32 %v6836_v36, %v6275_v32  ;;  %v5915_v32 = vld [vmem:[%s10069_s1 + $0x508] sm:$0xf] }
  0xda   : > { %v2415_v2 = vpop.f32.mrf.mxu2  ;;  %v2320_v16 = vpop.f32.mrf.mxu0  ;;  %2792 = vmatpush.bf16.msra.mxu2 %v5956_v34  ;;  %v6235_v34 = vld [vmem:[%s10069_s1 + $0x788] sm:$0xf] }
  0xdb   : > { %v2416_v5 = vadd.f32 %v2415_v2, %v2367_v61  ;;  %v2464_v7 = vpop.f32.mrf.mxu3  ;;  %v2369_v18 = vpop.f32.mrf.mxu1  ;;  %v5355_v61 = vld [vmem:[%s10069_s1 + $0xa8] sm:$0xf]  ;;  %2841 = vmatpush.bf16.msra.mxu3 %v6276_v55 }
  0xdc   : > { %v2370_v28 = vadd.f32 %v2369_v18, %v2320_v16  ;;  %v5356_v2 = vor.u32 %v6606_v62, %v5355_v61  ;;  %v5676_v16 = vor.u32 %v6686_v3, %v5675_v63  ;;  %v5315_v62 = vld [vmem:[%s10069_s1 + $0x58] sm:$0xf]  ;;  %v6596_v63 = vld [vmem:[%s10069_s1 + $0x7c] sm:$0xf0] }
  0xdd   : > { %v7644_v19 = vadd.f32 %v2464_v7, %v2416_v5  ;;  %2515 = vmatmul.bf16.gmra.mxu0 %v7338_v12  ;;  %v5316_v3 = vor.u32 %v6596_v63, %v5315_v62 }
  0xde   : > { %2564 = vmatmul.bf16.gmra.mxu1 %v7340_v13  ;;  %2693 = vmatpush.bf16.msra.mxu0 %v5356_v2 }
  0xdf   : > { %10168 = vst [vmem:[#allocation14_spill] sm:$0xff] %v7644_v19  ;;  %2613 = vmatmul.bf16.gmra.mxu2 %v7342_v14  ;;  %2742 = vmatpush.bf16.msra.mxu1 %v5676_v16 }
  0xe0   : > { %2662 = vmatmul.bf16.gmra.mxu3 %v7344_v15 }
  0xe2   : > { %v2418_v33 = vpop.f32.mrf.mxu2  ;;  %v2322_v39 = vpop.f32.mrf.mxu0  ;;  %2694 = vmatpush.bf16.msra.mxu0 %v5316_v3  ;;  %v6586_v3 = vld [vmem:[%s10069_s1 + $0x2c] sm:$0xf0] }
  0xe3   : > { %v2419_v37 = vadd.f32 %v2418_v33, %v2370_v28  ;;  %v2467_v38 = vpop.f32.mrf.mxu3  ;;  %v2371_v56 = vpop.f32.mrf.mxu1 }
  0xe4   : > { %v2372_v59 = vadd.f32 %v2371_v56, %v2322_v39 }
  0xe5   : > { %v7662_v58 = vadd.f32 %v2467_v38, %v2419_v37 }
  0xe7   : > { %10169 = vst [vmem:[#allocation15_spill] sm:$0xff] %v7662_v58 }
  0xea   : > { %v2420_v1 = vpop.f32.mrf.mxu2  ;;  %v2325_v7 = vpop.f32.mrf.mxu0 }
  0xeb   : > { %v2421_v4 = vadd.f32 %v2420_v1, %v2372_v59  ;;  %v2469_v5 = vpop.f32.mrf.mxu3  ;;  %v2374_v17 = vpop.f32.mrf.mxu1  ;;  %v5635_v1 = vld [vmem:[%s10069_s1 + $0x2d8] sm:$0xf] }
  0xec   : > { %v2375_v28 = vadd.f32 %v2374_v17, %v2325_v7 }
  0xed   : > { %v7676_v18 = vadd.f32 %v2469_v5, %v2421_v4  ;;  %2520 = vmatmul.bf16.gmra.mxu0 %v7382_v40  ;;  %v6676_v4 = vld [vmem:[%s10069_s1 + $0x2fc] sm:$0xf0] }
  0xee   : > { %2569 = vmatmul.bf16.gmra.mxu1 %v7384_v41  ;;  %v5636_v17 = vor.u32 %v6676_v4, %v5635_v1  ;;  %v5595_v4 = vld [vmem:[%s10069_s1 + $0x288] sm:$0xf] }
  0xef   : > { %10170 = vst [vmem:[#allocation16_spill] sm:$0xff] %v7676_v18  ;;  %2618 = vmatmul.bf16.gmra.mxu2 %v7386_v42 }
  0xf0   : > { %2667 = vmatmul.bf16.gmra.mxu3 %v7388_v43  ;;  %2743 = vmatpush.bf16.msra.mxu1 %v5636_v17 }
  0xf2   : > { %v2423_v33 = vpop.f32.mrf.mxu2  ;;  %v2327_v39 = vpop.f32.mrf.mxu0 }
  0xf3   : > { %v2424_v37 = vadd.f32 %v2423_v33, %v2375_v28  ;;  %v2472_v38 = vpop.f32.mrf.mxu3  ;;  %v2376_v56 = vpop.f32.mrf.mxu1  ;;  %v6746_v33 = vld [vmem:[%s10069_s1 + $0x52c] sm:$0xf0] }
  0xf4   : > { %v2377_v61 = vadd.f32 %v2376_v56, %v2327_v39 }
  0xf5   : > { %v7694_v59 = vadd.f32 %v2472_v38, %v2424_v37  ;;  %v5916_v37 = vor.u32 %v6746_v33, %v5915_v32  ;;  %v6826_v38 = vld [vmem:[%s10069_s1 + $0x7ac] sm:$0xf0] }
  0xf7   : > { %10171 = vst [vmem:[#allocation17_spill] sm:$0xff] %v7694_v59  ;;  %2793 = vmatpush.bf16.msra.mxu2 %v5916_v37 }
  0xfa   : > { %v2425_v2 = vpop.f32.mrf.mxu2  ;;  %v2330_v16 = vpop.f32.mrf.mxu0 }
  0xfb   : > { %v2426_v5 = vadd.f32 %v2425_v2, %v2377_v61  ;;  %v2474_v7 = vpop.f32.mrf.mxu3  ;;  %v2379_v28 = vpop.f32.mrf.mxu1  ;;  %v6236_v61 = vor.u32 %v6826_v38, %v6235_v34  ;;  %v5275_v2 = vld [vmem:[%s10069_s1 + $0x8] sm:$0xf] }
  0xfc   : > { %v2380_v31 = vadd.f32 %v2379_v28, %v2330_v16  ;;  %v6666_v16 = vld [vmem:[%s10069_s1 + $0x2ac] sm:$0xf0] }
  0xfd   : > { %v7708_v29 = vadd.f32 %v2474_v7, %v2426_v5  ;;  %2525 = vmatmul.bf16.gmra.mxu0 %v7426_v8  ;;  %2842 = vmatpush.bf16.msra.mxu3 %v6236_v61  ;;  %v5276_v7 = vor.u32 %v6586_v3, %v5275_v2  ;;  %v5596_v32 = vor.u32 %v6666_v16, %v5595_v4 }
  0xfe   : > { %2574 = vmatmul.bf16.gmra.mxu1 %v7428_v9 }
  0xff   : > { %10172 = vst [vmem:[#allocation18_spill] sm:$0xff] %v7708_v29  ;;  %2623 = vmatmul.bf16.gmra.mxu2 %v7430_v10  ;;  %2695 = vmatpush.bf16.msra.mxu0 %v5276_v7 }
 0x100   : > { %2672 = vmatmul.bf16.gmra.mxu3 %v7432_v11  ;;  %2744 = vmatpush.bf16.msra.mxu1 %v5596_v32 }
 0x102   : > { %v2428_v36 = vpop.f32.mrf.mxu2  ;;  %v2332_v56 = vpop.f32.mrf.mxu0 }
 0x103   : > { %v2429_v39 = vadd.f32 %v2428_v36, %v2380_v31  ;;  %v2477_v55 = vpop.f32.mrf.mxu3  ;;  %v2381_v62 = vpop.f32.mrf.mxu1 }
 0x104   : > { %v2382_v1 = vadd.f32 %v2381_v62, %v2332_v56 }
 0x105   : > { %v7726_v63 = vadd.f32 %v2477_v55, %v2429_v39 }
 0x107   : > { %10173 = vst [vmem:[#allocation19_spill] sm:$0xff] %v7726_v63 }
 0x10a   : > { %v2430_v5 = vpop.f32.mrf.mxu2  ;;  %v2335_v31 = vpop.f32.mrf.mxu0 }
 0x10b   : > { %v2431_v17 = vadd.f32 %v2430_v5, %v2382_v1  ;;  %v2479_v28 = vpop.f32.mrf.mxu3  ;;  %v2384_v33 = vpop.f32.mrf.mxu1 }
 0x10c   : > { %v2385_v36 = vadd.f32 %v2384_v33, %v2335_v31  ;;  %v6891_v31 = vld [vmem:[%s10069_s1 + $0x9bc] sm:$0xf]  ;;  %v6517_v33 = vld [vmem:[%s10069_s1 + $0x9e0] sm:$0xf0] }
 0x10d   : > { %v7740_v34 = vadd.f32 %v2479_v28, %v2431_v17  ;;  %2530 = vmatmul.bf16.gmra.mxu0 %v7470_v44  ;;  %v6811_v17 = vld [vmem:[%s10069_s1 + $0x73c] sm:$0xf]  ;;  %v6197_v28 = vld [vmem:[%s10069_s1 + $0x760] sm:$0xf0] }
 0x10e   : > { %2579 = vmatmul.bf16.gmra.mxu1 %v7472_v45  ;;  %v6200_v32 = vor.u32 %v6811_v17, %v6197_v28 }
 0x10f   : > { %10174 = vst [vmem:[#allocation20_spill] sm:$0xff] %v7740_v34  ;;  %2628 = vmatmul.bf16.gmra.mxu2 %v7474_v46 }
 0x110   : > { %2677 = vmatmul.bf16.gmra.mxu3 %v7476_v47  ;;  %2982 = vmatpush.bf16.msrb.mxu2 %v6200_v32 }
 0x112   : > { %v2433_v37 = vpop.f32.mrf.mxu2  ;;  %v2337_v55 = vpop.f32.mrf.mxu0 }
 0x113   : > { %v2434_v38 = vadd.f32 %v2433_v37, %v2385_v36  ;;  %v2482_v39 = vpop.f32.mrf.mxu3  ;;  %v2386_v56 = vpop.f32.mrf.mxu1  ;;  %v6651_v36 = vld [vmem:[%s10069_s1 + $0x23c] sm:$0xf]  ;;  %v5557_v37 = vld [vmem:[%s10069_s1 + $0x260] sm:$0xf0] }
 0x114   : > { %v2387_v62 = vadd.f32 %v2386_v56, %v2337_v55  ;;  %v6731_v55 = vld [vmem:[%s10069_s1 + $0x4bc] sm:$0xf]  ;;  %v5877_v56 = vld [vmem:[%s10069_s1 + $0x4e0] sm:$0xf0] }
 0x115   : > { %v7746_v61 = vadd.f32 %v2482_v39, %v2434_v38  ;;  %v6520_v38 = vor.u32 %v6891_v31, %v6517_v33  ;;  %v5560_v39 = vor.u32 %v6651_v36, %v5557_v37 }
 0x117   : > { %10175 = vst [vmem:[#allocation21_spill] sm:$0xff] %v7746_v61  ;;  %3031 = vmatpush.bf16.msrb.mxu3 %v6520_v38  ;;  %2884 = vmatpush.bf16.msrb.mxu0 %v5560_v39  ;;  %v6721_v38 = vld [vmem:[%s10069_s1 + $0x46c] sm:$0xf] }
 0x11a   : > { %v2435_v1 = vpop.f32.mrf.mxu2  ;;  %v2340_v4 = vpop.f32.mrf.mxu0 }
 0x11b   : > { %v2436_v2 = vadd.f32 %v2435_v1, %v2387_v62  ;;  %v2484_v3 = vpop.f32.mrf.mxu3  ;;  %v2389_v5 = vpop.f32.mrf.mxu1  ;;  %v6801_v62 = vld [vmem:[%s10069_s1 + $0x6ec] sm:$0xf] }
 0x11c   : > { %v2390_v16 = vadd.f32 %v2389_v5, %v2340_v4  ;;  %v6881_v4 = vld [vmem:[%s10069_s1 + $0x96c] sm:$0xf]  ;;  %v6477_v5 = vld [vmem:[%s10069_s1 + $0x990] sm:$0xf0] }
 0x11d   : > { %v7748_v7 = vadd.f32 %v2484_v3, %v2436_v2  ;;  %2535 = vmatmul.bf16.gmra.mxu0 %v7514_v20  ;;  %v5880_v2 = vor.u32 %v6731_v55, %v5877_v56  ;;  %v6157_v3 = vld [vmem:[%s10069_s1 + $0x710] sm:$0xf0]  ;;  %v6480_v32 = vor.u32 %v6881_v4, %v6477_v5  ;;  %v6641_v56 = vld [vmem:[%s10069_s1 + $0x1ec] sm:$0xf] }
 0x11e   : > { %2584 = vmatmul.bf16.gmra.mxu1 %v7516_v21  ;;  %v6160_v33 = vor.u32 %v6801_v62, %v6157_v3 }
 0x11f   : > { %10176 = vst [vmem:[#allocation22_spill] sm:$0xff] %v7748_v7  ;;  %2633 = vmatmul.bf16.gmra.mxu2 %v7518_v22  ;;  %2933 = vmatpush.bf16.msrb.mxu1 %v5880_v2 }
 0x120   : > { %2682 = vmatmul.bf16.gmra.mxu3 %v7520_v23  ;;  %2983 = vmatpush.bf16.msrb.mxu2 %v6160_v33  ;;  %v6791_v33 = vld [vmem:[%s10069_s1 + $0x69c] sm:$0xf] }
 0x121   : > { %3032 = vmatpush.bf16.msrb.mxu3 %v6480_v32  ;;  %v6117_v32 = vld [vmem:[%s10069_s1 + $0x6c0] sm:$0xf0] }
 0x122   : > { %v2438_v1 = vpop.f32.mrf.mxu2  ;;  %v2342_v31 = vpop.f32.mrf.mxu0 }
 0x123   : > { %v2439_v17 = vadd.f32 %v2438_v1, %v2390_v16  ;;  %v2487_v28 = vpop.f32.mrf.mxu3  ;;  %v2391_v36 = vpop.f32.mrf.mxu1  ;;  %v5517_v16 = vld [vmem:[%s10069_s1 + $0x210] sm:$0xf0] }
 0x124   : > { %v2392_v55 = vadd.f32 %v2391_v36, %v2342_v31  ;;  %v5520_v62 = vor.u32 %v6641_v56, %v5517_v16  ;;  %v5837_v1 = vld [vmem:[%s10069_s1 + $0x490] sm:$0xf0]  ;;  %v6871_v56 = vld [vmem:[%s10069_s1 + $0x91c] sm:$0xf]  ;;  %v6437_v16 = vld [vmem:[%s10069_s1 + $0x940] sm:$0xf0] }
 0x125   : > { %v7790_v37 = vadd.f32 %v2487_v28, %v2439_v17  ;;  %v5840_v5 = vor.u32 %v6721_v38, %v5837_v1  ;;  %v6440_v1 = vor.u32 %v6871_v56, %v6437_v16 }
 0x126   : > { %2885 = vmatpush.bf16.msrb.mxu0 %v5520_v62 }
 0x127   : > { %10177 = vst [vmem:[#allocation23_spill] sm:$0xff] %v7790_v37  ;;  %2934 = vmatpush.bf16.msrb.mxu1 %v5840_v5  ;;  %3033 = vmatpush.bf16.msrb.mxu3 %v6440_v1 }
 0x12a   : > { %v2440_v39 = vpop.f32.mrf.mxu2  ;;  %v2501_v4 = vpop.f32.mrf.mxu0 }
 0x12b   : > { %v2441_v2 = vadd.f32 %v2440_v39, %v2392_v55  ;;  %v2489_v3 = vpop.f32.mrf.mxu3  ;;  %v2550_v17 = vpop.f32.mrf.mxu1  ;;  %v6120_v55 = vor.u32 %v6791_v33, %v6117_v32 }
 0x12c   : > { %v2551_v31 = vadd.f32 %v2550_v17, %v2501_v4  ;;  %v6631_v17 = vld [vmem:[%s10069_s1 + $0x19c] sm:$0xf] }
 0x12d   : > { %v7804_v28 = vadd.f32 %v2489_v3, %v2441_v2  ;;  %2696 = vmatmul.bf16.vlgmr.msra.gmra.mxu0 %v7179_v48  ;;  %2984 = vmatpush.bf16.msrb.mxu2 %v6120_v55  ;;  %v5797_v55 = vld [vmem:[%s10069_s1 + $0x440] sm:$0xf0] }
 0x12e   : > { %2745 = vmatmul.bf16.vlgmr.msra.gmra.mxu1 %v7190_v53 }
 0x12f   : > { %10178 = vst [vmem:[#allocation24_spill] sm:$0xff] %v7804_v28  ;;  %2794 = vmatmul.bf16.vlgmr.msra.gmra.mxu2 %v7192_v54 }
 0x130   : > { %2843 = vmatmul.bf16.vlgmr.msra.gmra.mxu3 %v7200_v57 }
 0x132   : > { %v2599_v36 = vpop.f32.mrf.mxu2  ;;  %v2503_v62 = vpop.f32.mrf.mxu0 }
 0x133   : > { %v2600_v38 = vadd.f32 %v2599_v36, %v2551_v31  ;;  %v2648_v39 = vpop.f32.mrf.mxu3  ;;  %v2552_v2 = vpop.f32.mrf.mxu1  ;;  %v5477_v31 = vld [vmem:[%s10069_s1 + $0x1c0] sm:$0xf0]  ;;  %v6711_v36 = vld [vmem:[%s10069_s1 + $0x41c] sm:$0xf] }
 0x134   : > { %v2553_v5 = vadd.f32 %v2552_v2, %v2503_v62  ;;  %v5480_v32 = vor.u32 %v6631_v17, %v5477_v31 }
 0x135   : > { %v2649_v3 = vadd.f32 %v2648_v39, %v2600_v38  ;;  %v5800_v39 = vor.u32 %v6711_v36, %v5797_v55  ;;  %v6861_v55 = vld [vmem:[%s10069_s1 + $0x8cc] sm:$0xf] }
 0x136   : > { %2886 = vmatpush.bf16.msrb.mxu0 %v5480_v32  ;;  %v6077_v32 = vld [vmem:[%s10069_s1 + $0x670] sm:$0xf0] }
 0x137   : > { %v4256_v4 = vpack.c.bf16 %v2649_v3, %v7566_v6  ;;  %2935 = vmatpush.bf16.msrb.mxu1 %v5800_v39  ;;  %v4627_v2 = vmul.f32 %v2649_v3, %v2649_v3 }
 0x139   : > { %4336 = vst [vmem:[%s7826_s25] sm:$0xff] %v4256_v4 }
 0x13a   : > { %v2601_v33 = vpop.f32.mrf.mxu2  ;;  %v2506_v38 = vpop.f32.mrf.mxu0 }
 0x13b   : > { %v2602_v56 = vadd.f32 %v2601_v33, %v2553_v5  ;;  %v2650_v16 = vpop.f32.mrf.mxu3  ;;  %v2555_v62 = vpop.f32.mrf.mxu1  ;;  %v6781_v33 = vld [vmem:[%s10069_s1 + $0x64c] sm:$0xf] }
 0x13c   : > { %v2556_v6 = vadd.f32 %v2555_v62, %v2506_v38  ;;  %v6080_v36 = vor.u32 %v6781_v33, %v6077_v32 }
 0x13d   : > { %v2651_v1 = vadd.f32 %v2650_v16, %v2602_v56  ;;  %2701 = vmatmul.bf16.gmra.mxu0 %v7250_v24  ;;  %v6397_v56 = vld [vmem:[%s10069_s1 + $0x8f0] sm:$0xf0] }
 0x13e   : > { %2750 = vmatmul.bf16.gmra.mxu1 %v7252_v25  ;;  %v6400_v62 = vor.u32 %v6861_v55, %v6397_v56  ;;  %2985 = vmatpush.bf16.msrb.mxu2 %v6080_v36  ;;  %v6701_v36 = vld [vmem:[%s10069_s1 + $0x3cc] sm:$0xf] }
 0x13f   : > { %v4261_v4 = vpack.c.bf16 %v2651_v1, %v7580_v35  ;;  %v4437_v17 = vadd.f32 %v2651_v1, %v2649_v3  ;;  %v4637_v31 = vmul.f32 %v2651_v1, %v2651_v1  ;;  %2799 = vmatmul.bf16.gmra.mxu2 %v7254_v26 }
 0x140   : > { %2848 = vmatmul.bf16.gmra.mxu3 %v7256_v27  ;;  %v6621_v27 = vld [vmem:[%s10069_s1 + $0x14c] sm:$0xf] }
 0x141   : > { %4341 = vst [vmem:[%s7826_s25 + $0x28] sm:$0xff] %v4261_v4  ;;  %v4807_v5 = vadd.f32 %v4637_v31, %v4627_v2  ;;  %3034 = vmatpush.bf16.msrb.mxu3 %v6400_v62 }
 0x142   : > { %v2604_v3 = vpop.f32.mrf.mxu2  ;;  %v2508_v39 = vpop.f32.mrf.mxu0 }
 0x143   : > { %v2605_v16 = vadd.f32 %v2604_v3, %v2556_v6  ;;  %v2653_v38 = vpop.f32.mrf.mxu3  ;;  %v2557_v1 = vpop.f32.mrf.mxu1  ;;  %v5437_v6 = vld [vmem:[%s10069_s1 + $0x170] sm:$0xf0] }
 0x144   : > { %v2558_v35 = vadd.f32 %v2557_v1, %v2508_v39  ;;  %v5440_v55 = vor.u32 %v6621_v27, %v5437_v6  ;;  %v6037_v6 = vld [vmem:[%s10069_s1 + $0x620] sm:$0xf0] }
 0x145   : > { %v2654_v2 = vadd.f32 %v2653_v38, %v2605_v16 }
 0x146   : > { %2887 = vmatpush.bf16.msrb.mxu0 %v5440_v55  ;;  %v6851_v55 = vld [vmem:[%s10069_s1 + $0x87c] sm:$0xf] }
 0x147   : > { %v4266_v4 = vpack.c.bf16 %v2654_v2, %v7598_v0  ;;  %v4438_v31 = vadd.f32 %v4437_v17, %v2654_v2  ;;  %v4647_v33 = vmul.f32 %v2654_v2, %v2654_v2  ;;  %v5757_v17 = vld [vmem:[%s10069_s1 + $0x3f0] sm:$0xf0] }
 0x148   : > { %v5760_v38 = vor.u32 %v6701_v36, %v5757_v17  ;;  %v6357_v36 = vld [vmem:[%s10069_s1 + $0x8a0] sm:$0xf0] }
 0x149   : > { %4346 = vst [vmem:[%s7826_s25 + $0x50] sm:$0xff] %v4266_v4  ;;  %v4808_v32 = vadd.f32 %v4807_v5, %v4647_v33  ;;  %v6771_v33 = vld [vmem:[%s10069_s1 + $0x5fc] sm:$0xf] }
 0x14a   : > { %v2606_v3 = vpop.f32.mrf.mxu2  ;;  %v2511_v16 = vpop.f32.mrf.mxu0  ;;  %2936 = vmatpush.bf16.msrb.mxu1 %v5760_v38 }
 0x14b   : > { %v2607_v5 = vadd.f32 %v2606_v3, %v2558_v35  ;;  %v2655_v56 = vpop.f32.mrf.mxu3  ;;  %v2560_v39 = vpop.f32.mrf.mxu1  ;;  %v6040_v3 = vor.u32 %v6771_v33, %v6037_v6  ;;  %v6611_v6 = vld [vmem:[%s10069_s1 + $0xfc] sm:$0xf] }
 0x14c   : > { %v2561_v4 = vadd.f32 %v2560_v39, %v2511_v16 }
 0x14d   : > { %v2656_v62 = vadd.f32 %v2655_v56, %v2607_v5  ;;  %2706 = vmatmul.bf16.gmra.mxu0 %v7294_v49  ;;  %v6360_v56 = vor.u32 %v6851_v55, %v6357_v36  ;;  %2986 = vmatpush.bf16.msrb.mxu2 %v6040_v3  ;;  %v6691_v3 = vld [vmem:[%s10069_s1 + $0x37c] sm:$0xf] }
 0x14e   : > { %2755 = vmatmul.bf16.gmra.mxu1 %v7296_v50 }
 0x14f   : > { %v4271_v27 = vpack.c.bf16 %v2656_v62, %v7612_v30  ;;  %v4439_v1 = vadd.f32 %v4438_v31, %v2656_v62  ;;  %v4657_v2 = vmul.f32 %v2656_v62, %v2656_v62  ;;  %2804 = vmatmul.bf16.gmra.mxu2 %v7298_v51  ;;  %3035 = vmatpush.bf16.msrb.mxu3 %v6360_v56 }
 0x150   : > { %2853 = vmatmul.bf16.gmra.mxu3 %v7300_v52 }
 0x151   : > { %4351 = vst [vmem:[%s7826_s25 + $0x78] sm:$0xff] %v4271_v27  ;;  %v4809_v35 = vadd.f32 %v4808_v32, %v4657_v2 }
 0x152   : > { %v2609_v31 = vpop.f32.mrf.mxu2  ;;  %v2513_v5 = vpop.f32.mrf.mxu0 }
 0x153   : > { %v2610_v32 = vadd.f32 %v2609_v31, %v2561_v4  ;;  %v2658_v17 = vpop.f32.mrf.mxu3  ;;  %v2562_v16 = vpop.f32.mrf.mxu1  ;;  %v5397_v4 = vld [vmem:[%s10069_s1 + $0x120] sm:$0xf0] }
 0x154   : > { %v2563_v33 = vadd.f32 %v2562_v16, %v2513_v5  ;;  %v5400_v55 = vor.u32 %v6611_v6, %v5397_v4  ;;  %v6761_v6 = vld [vmem:[%s10069_s1 + $0x5ac] sm:$0xf]  ;;  %v5997_v4 = vld [vmem:[%s10069_s1 + $0x5d0] sm:$0xf0] }
 0x155   : > { %v2659_v38 = vadd.f32 %v2658_v17, %v2610_v32 }
 0x156   : > { %2888 = vmatpush.bf16.msrb.mxu0 %v5400_v55  ;;  %v6841_v55 = vld [vmem:[%s10069_s1 + $0x82c] sm:$0xf] }
 0x157   : > { %v4276_v39 = vpack.c.bf16 %v2659_v38, %v7630_v60  ;;  %v4440_v62 = vadd.f32 %v4439_v1, %v2659_v38  ;;  %v4667_v27 = vmul.f32 %v2659_v38, %v2659_v38  ;;  %v5717_v1 = vld [vmem:[%s10069_s1 + $0x3a0] sm:$0xf0] }
 0x158   : > { %v5720_v17 = vor.u32 %v6691_v3, %v5717_v1  ;;  %v6317_v3 = vld [vmem:[%s10069_s1 + $0x850] sm:$0xf0] }
 0x159   : > { %4356 = vst [vmem:[%s7826_s25 + $0xa0] sm:$0xff] %v4276_v39  ;;  %v4810_v2 = vadd.f32 %v4809_v35, %v4667_v27 }
 0x15a   : > { %v2611_v31 = vpop.f32.mrf.mxu2  ;;  %v2516_v32 = vpop.f32.mrf.mxu0  ;;  %2937 = vmatpush.bf16.msrb.mxu1 %v5720_v17 }
 0x15b   : > { %v2612_v35 = vadd.f32 %v2611_v31, %v2563_v33  ;;  %v2660_v36 = vpop.f32.mrf.mxu3  ;;  %v2565_v5 = vpop.f32.mrf.mxu1  ;;  %v6000_v31 = vor.u32 %v6761_v6, %v5997_v4  ;;  %v6601_v4 = vld [vmem:[%s10069_s1 + $0xac] sm:$0xf] }
 0x15c   : > { %v2566_v27 = vadd.f32 %v2565_v5, %v2516_v32 }
 0x15d   : > { %v2661_v56 = vadd.f32 %v2660_v36, %v2612_v35  ;;  %2711 = vmatmul.bf16.gmra.mxu0 %v7338_v12  ;;  %v6320_v36 = vor.u32 %v6841_v55, %v6317_v3  ;;  %2987 = vmatpush.bf16.msrb.mxu2 %v6000_v31  ;;  %v6681_v31 = vld [vmem:[%s10069_s1 + $0x32c] sm:$0xf] }
 0x15e   : > { %2760 = vmatmul.bf16.gmra.mxu1 %v7340_v13 }
 0x15f   : > { %v4281_v16 = vpack.c.bf16 %v2661_v56, %v7644_v19  ;;  %v4441_v38 = vadd.f32 %v4440_v62, %v2661_v56  ;;  %v4677_v39 = vmul.f32 %v2661_v56, %v2661_v56  ;;  %2809 = vmatmul.bf16.gmra.mxu2 %v7342_v14  ;;  %3036 = vmatpush.bf16.msrb.mxu3 %v6320_v36 }
 0x160   : > { %2858 = vmatmul.bf16.gmra.mxu3 %v7344_v15 }
 0x161   : > { %4361 = vst [vmem:[%s7826_s25 + $0xc8] sm:$0xff] %v4281_v16  ;;  %v4811_v33 = vadd.f32 %v4810_v2, %v4677_v39 }
 0x162   : > { %v2614_v62 = vpop.f32.mrf.mxu2  ;;  %v2518_v35 = vpop.f32.mrf.mxu0 }
 0x163   : > { %v2615_v2 = vadd.f32 %v2614_v62, %v2566_v27  ;;  %v2663_v1 = vpop.f32.mrf.mxu3  ;;  %v2567_v32 = vpop.f32.mrf.mxu1  ;;  %v5357_v27 = vld [vmem:[%s10069_s1 + $0xd0] sm:$0xf0] }
 0x164   : > { %v2568_v6 = vadd.f32 %v2567_v32, %v2518_v35  ;;  %v5360_v55 = vor.u32 %v6601_v4, %v5357_v27  ;;  %v6751_v4 = vld [vmem:[%s10069_s1 + $0x55c] sm:$0xf]  ;;  %v5957_v27 = vld [vmem:[%s10069_s1 + $0x580] sm:$0xf0] }
 0x165   : > { %v2664_v17 = vadd.f32 %v2663_v1, %v2615_v2 }
 0x166   : > { %2889 = vmatpush.bf16.msrb.mxu0 %v5360_v55  ;;  %v6831_v55 = vld [vmem:[%s10069_s1 + $0x7dc] sm:$0xf] }
 0x167   : > { %v4286_v5 = vpack.c.bf16 %v2664_v17, %v7662_v58  ;;  %v4442_v56 = vadd.f32 %v4441_v38, %v2664_v17  ;;  %v4687_v16 = vmul.f32 %v2664_v17, %v2664_v17  ;;  %v5677_v38 = vld [vmem:[%s10069_s1 + $0x350] sm:$0xf0] }
 0x168   : > { %v5680_v1 = vor.u32 %v6681_v31, %v5677_v38  ;;  %v6277_v31 = vld [vmem:[%s10069_s1 + $0x800] sm:$0xf0] }
 0x169   : > { %4366 = vst [vmem:[%s7826_s25 + $0xf0] sm:$0xff] %v4286_v5  ;;  %v4812_v39 = vadd.f32 %v4811_v33, %v4687_v16 }
 0x16a   : > { %v2616_v62 = vpop.f32.mrf.mxu2  ;;  %v2521_v2 = vpop.f32.mrf.mxu0  ;;  %2938 = vmatpush.bf16.msrb.mxu1 %v5680_v1 }
 0x16b   : > { %v2617_v33 = vadd.f32 %v2616_v62, %v2568_v6  ;;  %v2665_v3 = vpop.f32.mrf.mxu3  ;;  %v2570_v35 = vpop.f32.mrf.mxu1  ;;  %v5960_v62 = vor.u32 %v6751_v4, %v5957_v27  ;;  %v6591_v27 = vld [vmem:[%s10069_s1 + $0x5c] sm:$0xf] }
 0x16c   : > { %v2571_v16 = vadd.f32 %v2570_v35, %v2521_v2 }
 0x16d   : > { %v2666_v36 = vadd.f32 %v2665_v3, %v2617_v33  ;;  %2716 = vmatmul.bf16.gmra.mxu0 %v7382_v40  ;;  %v6280_v3 = vor.u32 %v6831_v55, %v6277_v31  ;;  %2988 = vmatpush.bf16.msrb.mxu2 %v5960_v62  ;;  %v6671_v62 = vld [vmem:[%s10069_s1 + $0x2dc] sm:$0xf] }
 0x16e   : > { %2765 = vmatmul.bf16.gmra.mxu1 %v7384_v41 }
 0x16f   : > { %v4291_v32 = vpack.c.bf16 %v2666_v36, %v7676_v18  ;;  %v4443_v17 = vadd.f32 %v4442_v56, %v2666_v36  ;;  %v4697_v5 = vmul.f32 %v2666_v36, %v2666_v36  ;;  %2814 = vmatmul.bf16.gmra.mxu2 %v7386_v42  ;;  %3037 = vmatpush.bf16.msrb.mxu3 %v6280_v3 }
 0x170   : > { %2863 = vmatmul.bf16.gmra.mxu3 %v7388_v43 }
 0x171   : > { %4371 = vst [vmem:[%s7826_s25 + $0x118] sm:$0xff] %v4291_v32  ;;  %v4813_v6 = vadd.f32 %v4812_v39, %v4697_v5 }
 0x172   : > { %v2619_v56 = vpop.f32.mrf.mxu2  ;;  %v2523_v33 = vpop.f32.mrf.mxu0 }
 0x173   : > { %v2620_v39 = vadd.f32 %v2619_v56, %v2571_v16  ;;  %v2668_v38 = vpop.f32.mrf.mxu3  ;;  %v2572_v2 = vpop.f32.mrf.mxu1  ;;  %v5317_v16 = vld [vmem:[%s10069_s1 + $0x80] sm:$0xf0] }
 0x174   : > { %v2573_v4 = vadd.f32 %v2572_v2, %v2523_v33  ;;  %v5320_v55 = vor.u32 %v6591_v27, %v5317_v16  ;;  %v6741_v27 = vld [vmem:[%s10069_s1 + $0x50c] sm:$0xf]  ;;  %v5917_v16 = vld [vmem:[%s10069_s1 + $0x530] sm:$0xf0] }
 0x175   : > { %v2669_v1 = vadd.f32 %v2668_v38, %v2620_v39 }
 0x176   : > { %2890 = vmatpush.bf16.msrb.mxu0 %v5320_v55  ;;  %v6821_v55 = vld [vmem:[%s10069_s1 + $0x78c] sm:$0xf] }
 0x177   : > { %v4296_v35 = vpack.c.bf16 %v2669_v1, %v7694_v59  ;;  %v4444_v36 = vadd.f32 %v4443_v17, %v2669_v1  ;;  %v4707_v32 = vmul.f32 %v2669_v1, %v2669_v1  ;;  %v5637_v17 = vld [vmem:[%s10069_s1 + $0x300] sm:$0xf0] }
 0x178   : > { %v5640_v38 = vor.u32 %v6671_v62, %v5637_v17  ;;  %v6237_v62 = vld [vmem:[%s10069_s1 + $0x7b0] sm:$0xf0] }
 0x179   : > { %4376 = vst [vmem:[%s7826_s25 + $0x140] sm:$0xff] %v4296_v35  ;;  %v4814_v5 = vadd.f32 %v4813_v6, %v4707_v32 }
 0x17a   : > { %v2621_v56 = vpop.f32.mrf.mxu2  ;;  %v2526_v39 = vpop.f32.mrf.mxu0  ;;  %2939 = vmatpush.bf16.msrb.mxu1 %v5640_v38 }
 0x17b   : > { %v2622_v6 = vadd.f32 %v2621_v56, %v2573_v4  ;;  %v2670_v31 = vpop.f32.mrf.mxu3  ;;  %v2575_v33 = vpop.f32.mrf.mxu1  ;;  %v5920_v56 = vor.u32 %v6741_v27, %v5917_v16  ;;  %v6581_v16 = vld [vmem:[%s10069_s1 + $0xc] sm:$0xf] }
 0x17c   : > { %v2576_v32 = vadd.f32 %v2575_v33, %v2526_v39 }
 0x17d   : > { %v2671_v3 = vadd.f32 %v2670_v31, %v2622_v6  ;;  %2721 = vmatmul.bf16.gmra.mxu0 %v7426_v8  ;;  %v6240_v31 = vor.u32 %v6821_v55, %v6237_v62  ;;  %2989 = vmatpush.bf16.msrb.mxu2 %v5920_v56  ;;  %v6661_v56 = vld [vmem:[%s10069_s1 + $0x28c] sm:$0xf] }
 0x17e   : > { %2770 = vmatmul.bf16.gmra.mxu1 %v7428_v9 }
 0x17f   : > { %v4301_v2 = vpack.c.bf16 %v2671_v3, %v7708_v29  ;;  %v4445_v1 = vadd.f32 %v4444_v36, %v2671_v3  ;;  %v4717_v35 = vmul.f32 %v2671_v3, %v2671_v3  ;;  %2819 = vmatmul.bf16.gmra.mxu2 %v7430_v10  ;;  %3038 = vmatpush.bf16.msrb.mxu3 %v6240_v31 }
 0x180   : > { %2868 = vmatmul.bf16.gmra.mxu3 %v7432_v11 }
 0x181   : > { %4381 = vst [vmem:[%s7826_s25 + $0x168] sm:$0xff] %v4301_v2  ;;  %v4815_v4 = vadd.f32 %v4814_v5, %v4717_v35 }
 0x182   : > { %v2624_v36 = vpop.f32.mrf.mxu2  ;;  %v2528_v6 = vpop.f32.mrf.mxu0 }
 0x183   : > { %v2625_v5 = vadd.f32 %v2624_v36, %v2576_v32  ;;  %v2673_v17 = vpop.f32.mrf.mxu3  ;;  %v2577_v39 = vpop.f32.mrf.mxu1  ;;  %v5277_v32 = vld [vmem:[%s10069_s1 + $0x30] sm:$0xf0] }
 0x184   : > { %v2578_v27 = vadd.f32 %v2577_v39, %v2528_v6  ;;  %v5280_v55 = vor.u32 %v6581_v16, %v5277_v32 }
 0x185   : > { %v2674_v38 = vadd.f32 %v2673_v17, %v2625_v5 }
 0x186   : > { %2891 = vmatpush.bf16.msrb.mxu0 %v5280_v55 }
 0x187   : > { %v4306_v33 = vpack.c.bf16 %v2674_v38, %v7726_v63  ;;  %v4446_v3 = vadd.f32 %v4445_v1, %v2674_v38  ;;  %v4727_v2 = vmul.f32 %v2674_v38, %v2674_v38  ;;  %v5597_v1 = vld [vmem:[%s10069_s1 + $0x2b0] sm:$0xf0] }
 0x188   : > { %v5600_v17 = vor.u32 %v6661_v56, %v5597_v1 }
 0x189   : > { %4386 = vst [vmem:[%s7826_s25 + $0x190] sm:$0xff] %v4306_v33  ;;  %v4816_v35 = vadd.f32 %v4815_v4, %v4727_v2 }
 0x18a   : > { %v2626_v36 = vpop.f32.mrf.mxu2  ;;  %v2531_v5 = vpop.f32.mrf.mxu0  ;;  %2940 = vmatpush.bf16.msrb.mxu1 %v5600_v17 }
 0x18b   : > { %v2627_v4 = vadd.f32 %v2626_v36, %v2578_v27  ;;  %v2675_v62 = vpop.f32.mrf.mxu3  ;;  %v2580_v6 = vpop.f32.mrf.mxu1 }
 0x18c   : > { %v2581_v2 = vadd.f32 %v2580_v6, %v2531_v5 }
 0x18d   : > { %v2676_v31 = vadd.f32 %v2675_v62, %v2627_v4  ;;  %2726 = vmatmul.bf16.gmra.mxu0 %v7470_v44 }
 0x18e   : > { %2775 = vmatmul.bf16.gmra.mxu1 %v7472_v45 }
 0x18f   : > { %v4311_v39 = vpack.c.bf16 %v2676_v31, %v7740_v34  ;;  %v4447_v38 = vadd.f32 %v4446_v3, %v2676_v31  ;;  %v4737_v33 = vmul.f32 %v2676_v31, %v2676_v31  ;;  %2824 = vmatmul.bf16.gmra.mxu2 %v7474_v46 }
 0x190   : > { %2873 = vmatmul.bf16.gmra.mxu3 %v7476_v47 }
 0x191   : > { %4391 = vst [vmem:[%s7826_s25 + $0x1b8] sm:$0xff] %v4311_v39  ;;  %v4817_v27 = vadd.f32 %v4816_v35, %v4737_v33 }
 0x192   : > { %v2629_v16 = vpop.f32.mrf.mxu2  ;;  %v2533_v55 = vpop.f32.mrf.mxu0 }
 0x193   : > { %v2630_v32 = vadd.f32 %v2629_v16, %v2581_v2  ;;  %v2678_v36 = vpop.f32.mrf.mxu3  ;;  %v2582_v56 = vpop.f32.mrf.mxu1 }
 0x194   : > { %v2583_v17 = vadd.f32 %v2582_v56, %v2533_v55 }
 0x195   : > { %v2679_v1 = vadd.f32 %v2678_v36, %v2630_v32  ;;  %v6817_v36 = vld [vmem:[%s10069_s1 + $0x764] sm:$0xf0] }
 0x197   : > { %v4316_v4 = vpack.c.bf16 %v2679_v1, %v7746_v61  ;;  %v4448_v3 = vadd.f32 %v4447_v38, %v2679_v1  ;;  %v4747_v62 = vmul.f32 %v2679_v1, %v2679_v1 }
 0x199   : > { %4396 = vst [vmem:[%s7826_s25 + $0x1e0] sm:$0xff] %v4316_v4  ;;  %v4818_v5 = vadd.f32 %v4817_v27, %v4747_v62  ;;  %v5563_v62 = vld [vmem:[%s10069_s1 + $0x240] sm:$0xf] }
 0x19a   : > { %v2631_v6 = vpop.f32.mrf.mxu2  ;;  %v2536_v63 = vpop.f32.mrf.mxu0 }
 0x19b   : > { %v2632_v31 = vadd.f32 %v2631_v6, %v2583_v17  ;;  %v2680_v34 = vpop.f32.mrf.mxu3  ;;  %v2585_v39 = vpop.f32.mrf.mxu1 }
 0x19c   : > { %v2586_v32 = vadd.f32 %v2585_v39, %v2536_v63  ;;  %v6523_v63 = vld [vmem:[%s10069_s1 + $0x9c0] sm:$0xf] }
 0x19d   : > { %v2681_v35 = vadd.f32 %v2680_v34, %v2632_v31  ;;  %2731 = vmatmul.bf16.gmra.mxu0 %v7514_v20  ;;  %v6203_v34 = vld [vmem:[%s10069_s1 + $0x740] sm:$0xf] }
 0x19e   : > { %2780 = vmatmul.bf16.gmra.mxu1 %v7516_v21  ;;  %v6204_v4 = vor.u32 %v6817_v36, %v6203_v34  ;;  %v5883_v39 = vld [vmem:[%s10069_s1 + $0x4c0] sm:$0xf]  ;;  %v6483_v34 = vld [vmem:[%s10069_s1 + $0x970] sm:$0xf]  ;;  %v6887_v36 = vld [vmem:[%s10069_s1 + $0x994] sm:$0xf0] }
 0x19f   : > { %v4321_v33 = vpack.c.bf16 %v2681_v35, %v7748_v7  ;;  %v4449_v2 = vadd.f32 %v4448_v3, %v2681_v35  ;;  %v4757_v16 = vmul.f32 %v2681_v35, %v2681_v35  ;;  %2829 = vmatmul.bf16.gmra.mxu2 %v7518_v22  ;;  %v6897_v3 = vld [vmem:[%s10069_s1 + $0x9e4] sm:$0xf0] }
 0x1a0   : > { %2878 = vmatmul.bf16.gmra.mxu3 %v7520_v23  ;;  %v6524_v6 = vor.u32 %v6897_v3, %v6523_v63  ;;  %v6737_v35 = vld [vmem:[%s10069_s1 + $0x4e4] sm:$0xf0]  ;;  %3178 = vmatpush.bf16.msra.mxu2 %v6204_v4  ;;  %v6484_v3 = vor.u32 %v6887_v36, %v6483_v34 }
 0x1a1   : > { %4401 = vst [vmem:[%s7826_s25 + $0x208] sm:$0xff] %v4321_v33  ;;  %v4819_v38 = vadd.f32 %v4818_v5, %v4757_v16  ;;  %v6657_v5 = vld [vmem:[%s10069_s1 + $0x264] sm:$0xf0]  ;;  %v6163_v33 = vld [vmem:[%s10069_s1 + $0x6f0] sm:$0xf] }
 0x1a2   : > { %v2634_v27 = vpop.f32.mrf.mxu2  ;;  %v2538_v1 = vpop.f32.mrf.mxu0  ;;  %v5564_v31 = vor.u32 %v6657_v5, %v5563_v62  ;;  %3227 = vmatpush.bf16.msra.mxu3 %v6524_v6  ;;  %v6647_v6 = vld [vmem:[%s10069_s1 + $0x214] sm:$0xf0] }
 0x1a3   : > { %v2635_v55 = vadd.f32 %v2634_v27, %v2586_v32  ;;  %v2683_v56 = vpop.f32.mrf.mxu3  ;;  %v2587_v17 = vpop.f32.mrf.mxu1  ;;  %v5884_v32 = vor.u32 %v6737_v35, %v5883_v39  ;;  %v6807_v27 = vld [vmem:[%s10069_s1 + $0x714] sm:$0xf0]  ;;  %v5523_v35 = vld [vmem:[%s10069_s1 + $0x1f0] sm:$0xf] }
 0x1a4   : > { %3080 = vmatpush.bf16.msra.mxu0 %v5564_v31  ;;  %v6164_v63 = vor.u32 %v6807_v27, %v6163_v33  ;;  %v2588_v5 = vadd.f32 %v2587_v17, %v2538_v1  ;;  %v6727_v1 = vld [vmem:[%s10069_s1 + $0x494] sm:$0xf0] }
 0x1a5   : > { %v2684_v16 = vadd.f32 %v2683_v56, %v2635_v55  ;;  %3129 = vmatpush.bf16.msra.mxu1 %v5884_v32 }
 0x1a6   : > { %3179 = vmatpush.bf16.msra.mxu2 %v6164_v63  ;;  %3228 = vmatpush.bf16.msra.mxu3 %v6484_v3 }
 0x1a7   : > { %v4326_v55 = vpack.c.bf16 %v2684_v16, %v7790_v37  ;;  %v4450_v56 = vadd.f32 %v4449_v2, %v2684_v16  ;;  %v4767_v4 = vmul.f32 %v2684_v16, %v2684_v16  ;;  %v5843_v2 = vld [vmem:[%s10069_s1 + $0x470] sm:$0xf] }
 0x1a8   : > { %v5844_v32 = vor.u32 %v6727_v1, %v5843_v2 }
 0x1a9   : > { %4406 = vst [vmem:[%s7826_s25 + $0x230] sm:$0xff] %v4326_v55  ;;  %v4820_v62 = vadd.f32 %v4819_v38, %v4767_v4  ;;  %v5524_v38 = vor.u32 %v6647_v6, %v5523_v35  ;;  %v6797_v35 = vld [vmem:[%s10069_s1 + $0x6c4] sm:$0xf0] }
 0x1aa   : > { %v2636_v39 = vpop.f32.mrf.mxu2  ;;  %v2697_v16 = vpop.f32.mrf.mxu0  ;;  %3130 = vmatpush.bf16.msra.mxu1 %v5844_v32 }
 0x1ab   : > { %v2637_v31 = vadd.f32 %v2636_v39, %v2588_v5  ;;  %v2685_v33 = vpop.f32.mrf.mxu3  ;;  %v2746_v17 = vpop.f32.mrf.mxu1  ;;  %3081 = vmatpush.bf16.msra.mxu0 %v5524_v38  ;;  %v6123_v39 = vld [vmem:[%s10069_s1 + $0x6a0] sm:$0xf] }
 0x1ac   : > { %v2747_v34 = vadd.f32 %v2746_v17, %v2697_v16  ;;  %v6124_v38 = vor.u32 %v6797_v35, %v6123_v39  ;;  %v5483_v39 = vld [vmem:[%s10069_s1 + $0x1a0] sm:$0xf]  ;;  %v6637_v35 = vld [vmem:[%s10069_s1 + $0x1c4] sm:$0xf0] }
 0x1ad   : > { %v2686_v27 = vadd.f32 %v2685_v33, %v2637_v31  ;;  %2892 = vmatmul.bf16.vlgmr.msrb.gmra.mxu0 %v7179_v48 }
 0x1ae   : > { %2941 = vmatmul.bf16.vlgmr.msrb.gmra.mxu1 %v7190_v53  ;;  %3180 = vmatpush.bf16.msra.mxu2 %v6124_v38 }
 0x1af   : > { %v4331_v36 = vpack.c.bf16 %v2686_v27, %v7804_v28  ;;  %v4451_v63 = vadd.f32 %v4450_v56, %v2686_v27  ;;  %v4777_v3 = vmul.f32 %v2686_v27, %v2686_v27  ;;  %2990 = vmatmul.bf16.vlgmr.msrb.gmra.mxu2 %v7192_v54  ;;  %v6443_v56 = vld [vmem:[%s10069_s1 + $0x920] sm:$0xf] }
 0x1b0   : > { %3039 = vmatmul.bf16.vlgmr.msrb.gmra.mxu3 %v7200_v57 }
 0x1b1   : > { %4411 = vst [vmem:[%s7826_s25 + $0x258] sm:$0xff] %v4331_v36  ;;  %v4452_v55 = vrot.slane %v4451_v63, 4  ;;  %v4821_v4 = vadd.f32 %v4820_v62, %v4777_v3  ;;  %v6877_v62 = vld [vmem:[%s10069_s1 + $0x944] sm:$0xf0] }
 0x1b2   : > { %v2795_v5 = vpop.f32.mrf.mxu2  ;;  %v2699_v16 = vpop.f32.mrf.mxu0  ;;  %v6444_v17 = vor.u32 %v6877_v62, %v6443_v56 }
 0x1b3   : > { %v4453_v6 = vadd.f32 %v4452_v55, %v4451_v63  ;;  %v4822_v2 = vrot.slane %v4821_v4, 4  ;;  %v2796_v31 = vadd.f32 %v2795_v5, %v2747_v34  ;;  %v2844_v33 = vpop.f32.mrf.mxu3  ;;  %v2748_v1 = vpop.f32.mrf.mxu1 }
 0x1b4   : > { %v2749_v3 = vadd.f32 %v2748_v1, %v2699_v16  ;;  %3229 = vmatpush.bf16.msra.mxu3 %v6444_v17  ;;  %v6717_v16 = vld [vmem:[%s10069_s1 + $0x444] sm:$0xf0] }
 0x1b5   : > { %v4454_v32 = vrot.slane %v4453_v6, 2  ;;  %v4823_v27 = vadd.f32 %v4822_v2, %v4821_v4  ;;  %v8084_v36 = vadd.f32 %v2844_v33, %v2796_v31  ;;  %v5803_v4 = vld [vmem:[%s10069_s1 + $0x420] sm:$0xf]  ;;  %v5484_v33 = vor.u32 %v6637_v35, %v5483_v39 }
 0x1b6   : > { %v5804_v62 = vor.u32 %v6717_v16, %v5803_v4  ;;  %v6867_v4 = vld [vmem:[%s10069_s1 + $0x8f4] sm:$0xf0] }
 0x1b7   : > { %v4455_v28 = vadd.f32 %v4454_v32, %v4453_v6  ;;  %v4824_v63 = vrot.slane %v4823_v27, 2  ;;  %3082 = vmatpush.bf16.msra.mxu0 %v5484_v33 }
 0x1b8   : > { %3131 = vmatpush.bf16.msra.mxu1 %v5804_v62  ;;  %v6627_v62 = vld [vmem:[%s10069_s1 + $0x174] sm:$0xf0] }
 0x1b9   : > { %v4456_v55 = vrot.slane %v4455_v28, 1  ;;  %v4825_v34 = vadd.f32 %v4824_v63, %v4823_v27  ;;  %v10180_v63 = vld [vmem:[#allocation6_spill] sm:$0xff] }
 0x1ba   : > { %v2797_v5 = vpop.f32.mrf.mxu2  ;;  %v2702_v6 = vpop.f32.mrf.mxu0 }
 0x1bb   : > { %v4826_v56 = vrot.slane %v4825_v34, 1  ;;  %v2798_v2 = vadd.f32 %v2797_v5, %v2749_v3  ;;  %v2846_v31 = vpop.f32.mrf.mxu3  ;;  %v2751_v38 = vpop.f32.mrf.mxu1  ;;  %v4457_v1 = vadd.f32 %v4456_v55, %v4455_v28  ;;  %v6083_v28 = vld [vmem:[%s10069_s1 + $0x650] sm:$0xf]  ;;  %v6787_v55 = vld [vmem:[%s10069_s1 + $0x674] sm:$0xf0] }
 0x1bc   : > { %v2752_v27 = vadd.f32 %v2751_v38, %v2702_v6  ;;  %v6084_v35 = vor.u32 %v6787_v55, %v6083_v28  ;;  %v5443_v38 = vld [vmem:[%s10069_s1 + $0x150] sm:$0xf]  ;;  %v6707_v55 = vld [vmem:[%s10069_s1 + $0x3f4] sm:$0xf0] }
 0x1bd   : > { %v4827_v17 = vadd.f32 %v4826_v56, %v4825_v34  ;;  %v8098_v32 = vadd.f32 %v2846_v31, %v2798_v2  ;;  %2897 = vmatmul.bf16.gmra.mxu0 %v7250_v24  ;;  %v6403_v34 = vld [vmem:[%s10069_s1 + $0x8d0] sm:$0xf]  ;;  %v5444_v28 = vor.u32 %v6627_v62, %v5443_v38 }
 0x1be   : > { %2946 = vmatmul.bf16.gmra.mxu1 %v7252_v25  ;;  %v6404_v6 = vor.u32 %v6867_v4, %v6403_v34  ;;  %3181 = vmatpush.bf16.msra.mxu2 %v6084_v35 }
 0x1bf   : > { %v8102_v3 = vsel %vm4996_vm0, %v4457_v1, %v4827_v17  ;;  %2995 = vmatmul.bf16.gmra.mxu2 %v7254_v26  ;;  %v5763_v1 = vld [vmem:[%s10069_s1 + $0x3d0] sm:$0xf]  ;;  %3083 = vmatpush.bf16.msra.mxu0 %v5444_v28  ;;  %v4458_v37 = vadd.f32 %v8098_v32, %v8084_v36 }
 0x1c0   : > { %10179 = vst [vmem:[#allocation25_spill] sm:$0xff] %v8102_v3  ;;  %3044 = vmatmul.bf16.gmra.mxu3 %v10180_v63  ;;  %v5764_v35 = vor.u32 %v6707_v55, %v5763_v1  ;;  %v6857_v1 = vld [vmem:[%s10069_s1 + $0x8a4] sm:$0xf0] }
 0x1c1   : > { %3230 = vmatpush.bf16.msra.mxu3 %v6404_v6  ;;  %v6363_v6 = vld [vmem:[%s10069_s1 + $0x880] sm:$0xf] }
 0x1c2   : > { %v2800_v5 = vpop.f32.mrf.mxu2  ;;  %v2704_v2 = vpop.f32.mrf.mxu0  ;;  %3132 = vmatpush.bf16.msra.mxu1 %v5764_v35  ;;  %v6364_v55 = vor.u32 %v6857_v1, %v6363_v6  ;;  %v6617_v35 = vld [vmem:[%s10069_s1 + $0x124] sm:$0xf0] }
 0x1c3   : > { %v2849_v39 = vpop.f32.mrf.mxu3  ;;  %v2801_v56 = vadd.f32 %v2800_v5, %v2752_v27  ;;  %v2753_v31 = vpop.f32.mrf.mxu1 }
 0x1c4   : > { %v2754_v33 = vadd.f32 %v2753_v31, %v2704_v2  ;;  %v6043_v2 = vld [vmem:[%s10069_s1 + $0x600] sm:$0xf]  ;;  %v6777_v31 = vld [vmem:[%s10069_s1 + $0x624] sm:$0xf0] }
 0x1c5   : > { %v8119_v16 = vadd.f32 %v2849_v39, %v2801_v56  ;;  %v6044_v62 = vor.u32 %v6777_v31, %v6043_v2  ;;  %3231 = vmatpush.bf16.msra.mxu3 %v6364_v55  ;;  %v4638_v2 = vmul.f32 %v8098_v32, %v8098_v32 }
 0x1c7   : > { %3182 = vmatpush.bf16.msra.mxu2 %v6044_v62  ;;  %v4648_v55 = vmul.f32 %v8119_v16, %v8119_v16 }
 0x1ca   : > { %v2802_v17 = vpop.f32.mrf.mxu2  ;;  %v2707_v5 = vpop.f32.mrf.mxu0 }
 0x1cb   : > { %v2851_v27 = vpop.f32.mrf.mxu3  ;;  %v2803_v34 = vadd.f32 %v2802_v17, %v2754_v33  ;;  %v2756_v39 = vpop.f32.mrf.mxu1 }
 0x1cc   : > { %v2757_v4 = vadd.f32 %v2756_v39, %v2707_v5  ;;  %v5403_v39 = vld [vmem:[%s10069_s1 + $0x100] sm:$0xf] }
 0x1cd   : > { %v8133_v56 = vadd.f32 %v2851_v27, %v2803_v34  ;;  %2902 = vmatmul.bf16.gmra.mxu0 %v7294_v49 }
 0x1ce   : > { %2951 = vmatmul.bf16.gmra.mxu1 %v7296_v50 }
 0x1cf   : > { %3000 = vmatmul.bf16.gmra.mxu2 %v7298_v51 }
 0x1d0   : > { %3049 = vmatmul.bf16.gmra.mxu3 %v7300_v52 }
 0x1d2   : > { %v2805_v33 = vpop.f32.mrf.mxu2  ;;  %v2709_v27 = vpop.f32.mrf.mxu0 }
 0x1d3   : > { %v2854_v38 = vpop.f32.mrf.mxu3  ;;  %v2806_v17 = vadd.f32 %v2805_v33, %v2757_v4  ;;  %v2758_v28 = vpop.f32.mrf.mxu1  ;;  %v5723_v4 = vld [vmem:[%s10069_s1 + $0x380] sm:$0xf]  ;;  %v5404_v33 = vor.u32 %v6617_v35, %v5403_v39  ;;  %v4658_v35 = vmul.f32 %v8133_v56, %v8133_v56 }
 0x1d4   : > { %v2759_v34 = vadd.f32 %v2758_v28, %v2709_v27  ;;  %v4628_v28 = vmul.f32 %v8084_v36, %v8084_v36 }
 0x1d5   : > { %v8151_v5 = vadd.f32 %v2854_v38, %v2806_v17  ;;  %v6697_v38 = vld [vmem:[%s10069_s1 + $0x3a4] sm:$0xf0]  ;;  %3084 = vmatpush.bf16.msra.mxu0 %v5404_v33 }
 0x1d6   : > { %v5724_v27 = vor.u32 %v6697_v38, %v5723_v4  ;;  %v4459_v4 = vadd.f32 %v4458_v37, %v8119_v16  ;;  %v6767_v38 = vld [vmem:[%s10069_s1 + $0x5d4] sm:$0xf0]  ;;  %v6323_v37 = vld [vmem:[%s10069_s1 + $0x830] sm:$0xf] }
 0x1d8   : > { %3133 = vmatpush.bf16.msra.mxu1 %v5724_v27  ;;  %v4460_v33 = vadd.f32 %v4459_v4, %v8133_v56 }
 0x1da   : > { %v2807_v31 = vpop.f32.mrf.mxu2  ;;  %v2712_v1 = vpop.f32.mrf.mxu0 }
 0x1db   : > { %v2856_v6 = vpop.f32.mrf.mxu3  ;;  %v2808_v62 = vadd.f32 %v2807_v31, %v2759_v34  ;;  %v2761_v17 = vpop.f32.mrf.mxu1  ;;  %v4828_v34 = vadd.f32 %v4638_v2, %v4628_v28  ;;  %v6003_v2 = vld [vmem:[%s10069_s1 + $0x5b0] sm:$0xf]  ;;  %v6847_v28 = vld [vmem:[%s10069_s1 + $0x854] sm:$0xf0] }
 0x1dc   : > { %v2762_v3 = vadd.f32 %v2761_v17, %v2712_v1  ;;  %v6004_v27 = vor.u32 %v6767_v38, %v6003_v2  ;;  %v6324_v29 = vor.u32 %v6847_v28, %v6323_v37  ;;  %v6687_v37 = vld [vmem:[%s10069_s1 + $0x354] sm:$0xf0] }
 0x1dd   : > { %v8173_v39 = vadd.f32 %v2856_v6, %v2808_v62  ;;  %2907 = vmatmul.bf16.gmra.mxu0 %v7338_v12  ;;  %v4829_v31 = vadd.f32 %v4828_v34, %v4648_v55  ;;  %v4668_v6 = vmul.f32 %v8151_v5, %v8151_v5  ;;  %v4461_v55 = vadd.f32 %v4460_v33, %v8151_v5 }
 0x1de   : > { %2956 = vmatmul.bf16.gmra.mxu1 %v7340_v13  ;;  %3183 = vmatpush.bf16.msra.mxu2 %v6004_v27 }
 0x1df   : > { %3005 = vmatmul.bf16.gmra.mxu2 %v7342_v14  ;;  %v4830_v62 = vadd.f32 %v4829_v31, %v4658_v35  ;;  %v4678_v34 = vmul.f32 %v8173_v39, %v8173_v39  ;;  %v4462_v35 = vadd.f32 %v4461_v55, %v8173_v39  ;;  %3232 = vmatpush.bf16.msra.mxu3 %v6324_v29 }
 0x1e0   : > { %3054 = vmatmul.bf16.gmra.mxu3 %v7344_v15 }
 0x1e1   : > { %v4831_v18 = vadd.f32 %v4830_v62, %v4668_v6 }
 0x1e2   : > { %v2810_v1 = vpop.f32.mrf.mxu2  ;;  %v2714_v7 = vpop.f32.mrf.mxu0 }
 0x1e3   : > { %v2859_v17 = vpop.f32.mrf.mxu3  ;;  %v2811_v4 = vadd.f32 %v2810_v1, %v2762_v3  ;;  %v2763_v61 = vpop.f32.mrf.mxu1  ;;  %v4832_v2 = vadd.f32 %v4831_v18, %v4678_v34  ;;  %v5363_v3 = vld [vmem:[%s10069_s1 + $0xb0] sm:$0xf] }
 0x1e4   : > { %v2764_v59 = vadd.f32 %v2763_v61, %v2714_v7  ;;  %v6607_v61 = vld [vmem:[%s10069_s1 + $0xd4] sm:$0xf0]  ;;  %v5683_v7 = vld [vmem:[%s10069_s1 + $0x330] sm:$0xf] }
 0x1e5   : > { %v8201_v31 = vadd.f32 %v2859_v17, %v2811_v4  ;;  %v5364_v6 = vor.u32 %v6607_v61, %v5363_v3  ;;  %v5684_v27 = vor.u32 %v6687_v37, %v5683_v7  ;;  %v6837_v7 = vld [vmem:[%s10069_s1 + $0x804] sm:$0xf0] }
 0x1e7   : > { %v4463_v38 = vadd.f32 %v4462_v35, %v8201_v31  ;;  %v4688_v33 = vmul.f32 %v8201_v31, %v8201_v31  ;;  %3085 = vmatpush.bf16.msra.mxu0 %v5364_v6  ;;  %3134 = vmatpush.bf16.msra.mxu1 %v5684_v27  ;;  %v5963_v35 = vld [vmem:[%s10069_s1 + $0x560] sm:$0xf] }
 0x1e9   : > { %v4833_v58 = vadd.f32 %v4832_v2, %v4688_v33  ;;  %v6757_v2 = vld [vmem:[%s10069_s1 + $0x584] sm:$0xf0] }
 0x1ea   : > { %v2812_v29 = vpop.f32.mrf.mxu2  ;;  %v2717_v1 = vpop.f32.mrf.mxu0  ;;  %v5964_v61 = vor.u32 %v6757_v2, %v5963_v35  ;;  %v5643_v35 = vld [vmem:[%s10069_s1 + $0x2e0] sm:$0xf] }
 0x1eb   : > { %v2861_v18 = vpop.f32.mrf.mxu3  ;;  %v2813_v62 = vadd.f32 %v2812_v29, %v2764_v59  ;;  %v2766_v17 = vpop.f32.mrf.mxu1 }
 0x1ec   : > { %v2767_v28 = vadd.f32 %v2766_v17, %v2717_v1  ;;  %3184 = vmatpush.bf16.msra.mxu2 %v5964_v61 }
 0x1ed   : > { %v8218_v55 = vadd.f32 %v2861_v18, %v2813_v62  ;;  %2912 = vmatmul.bf16.gmra.mxu0 %v7382_v40 }
 0x1ee   : > { %2961 = vmatmul.bf16.gmra.mxu1 %v7384_v41 }
 0x1ef   : > { %v4464_v34 = vadd.f32 %v4463_v38, %v8218_v55  ;;  %v4698_v4 = vmul.f32 %v8218_v55, %v8218_v55  ;;  %3010 = vmatmul.bf16.gmra.mxu2 %v7386_v42  ;;  %v6283_v38 = vld [vmem:[%s10069_s1 + $0x7e0] sm:$0xf] }
 0x1f0   : > { %3059 = vmatmul.bf16.gmra.mxu3 %v7388_v43  ;;  %v6284_v6 = vor.u32 %v6837_v7, %v6283_v38 }
 0x1f1   : > { %v4834_v59 = vadd.f32 %v4833_v58, %v4698_v4  ;;  %v5323_v4 = vld [vmem:[%s10069_s1 + $0x60] sm:$0xf] }
 0x1f2   : > { %v2815_v33 = vpop.f32.mrf.mxu2  ;;  %v2719_v29 = vpop.f32.mrf.mxu0  ;;  %3233 = vmatpush.bf16.msra.mxu3 %v6284_v6 }
 0x1f3   : > { %v2864_v3 = vpop.f32.mrf.mxu3  ;;  %v2816_v58 = vadd.f32 %v2815_v33, %v2767_v28  ;;  %v2768_v18 = vpop.f32.mrf.mxu1  ;;  %v6597_v28 = vld [vmem:[%s10069_s1 + $0x84] sm:$0xf0] }
 0x1f4   : > { %v2769_v37 = vadd.f32 %v2768_v18, %v2719_v29  ;;  %v5324_v33 = vor.u32 %v6597_v28, %v5323_v4  ;;  %v6747_v4 = vld [vmem:[%s10069_s1 + $0x534] sm:$0xf0] }
 0x1f5   : > { %v8239_v62 = vadd.f32 %v2864_v3, %v2816_v58 }
 0x1f6   : > { %3086 = vmatpush.bf16.msra.mxu0 %v5324_v33 }
 0x1f7   : > { %v4465_v1 = vadd.f32 %v4464_v34, %v8239_v62  ;;  %v4708_v17 = vmul.f32 %v8239_v62, %v8239_v62  ;;  %v6677_v34 = vld [vmem:[%s10069_s1 + $0x304] sm:$0xf0] }
 0x1f8   : > { %v5644_v7 = vor.u32 %v6677_v34, %v5643_v35 }
 0x1f9   : > { %v4835_v27 = vadd.f32 %v4834_v59, %v4708_v17  ;;  %v5923_v17 = vld [vmem:[%s10069_s1 + $0x510] sm:$0xf] }
 0x1fa   : > { %v2817_v2 = vpop.f32.mrf.mxu2  ;;  %v2722_v3 = vpop.f32.mrf.mxu0  ;;  %3135 = vmatpush.bf16.msra.mxu1 %v5644_v7 }
 0x1fb   : > { %v2866_v38 = vpop.f32.mrf.mxu3  ;;  %v2818_v59 = vadd.f32 %v2817_v2, %v2769_v37  ;;  %v2771_v61 = vpop.f32.mrf.mxu1  ;;  %v5924_v2 = vor.u32 %v6747_v4, %v5923_v17  ;;  %v5283_v17 = vld [vmem:[%s10069_s1 + $0x10] sm:$0xf] }
 0x1fc   : > { %v2772_v58 = vadd.f32 %v2771_v61, %v2722_v3  ;;  %v5603_v4 = vld [vmem:[%s10069_s1 + $0x290] sm:$0xf] }
 0x1fd   : > { %v8256_v29 = vadd.f32 %v2866_v38, %v2818_v59  ;;  %2917 = vmatmul.bf16.gmra.mxu0 %v7426_v8  ;;  %v6827_v38 = vld [vmem:[%s10069_s1 + $0x7b4] sm:$0xf0]  ;;  %3185 = vmatpush.bf16.msra.mxu2 %v5924_v2 }
 0x1fe   : > { %2966 = vmatmul.bf16.gmra.mxu1 %v7428_v9 }
 0x1ff   : > { %v4466_v18 = vadd.f32 %v4465_v1, %v8256_v29  ;;  %v4718_v6 = vmul.f32 %v8256_v29, %v8256_v29  ;;  %3015 = vmatmul.bf16.gmra.mxu2 %v7430_v10  ;;  %v6243_v1 = vld [vmem:[%s10069_s1 + $0x790] sm:$0xf] }
 0x200   : > { %3064 = vmatmul.bf16.gmra.mxu3 %v7432_v11  ;;  %v6244_v59 = vor.u32 %v6827_v38, %v6243_v1 }
 0x201   : > { %v4836_v37 = vadd.f32 %v4835_v27, %v4718_v6 }
 0x202   : > { %v2820_v28 = vpop.f32.mrf.mxu2  ;;  %v2724_v33 = vpop.f32.mrf.mxu0  ;;  %3234 = vmatpush.bf16.msra.mxu3 %v6244_v59 }
 0x203   : > { %v2869_v35 = vpop.f32.mrf.mxu3  ;;  %v2821_v27 = vadd.f32 %v2820_v28, %v2772_v58  ;;  %v2773_v34 = vpop.f32.mrf.mxu1  ;;  %v6587_v58 = vld [vmem:[%s10069_s1 + $0x34] sm:$0xf0] }
 0x204   : > { %v2774_v3 = vadd.f32 %v2773_v34, %v2724_v33 }
 0x205   : > { %v8277_v61 = vadd.f32 %v2869_v35, %v2821_v27  ;;  %v5284_v35 = vor.u32 %v6587_v58, %v5283_v17 }
 0x207   : > { %v4467_v7 = vadd.f32 %v4466_v18, %v8277_v61  ;;  %v4728_v6 = vmul.f32 %v8277_v61, %v8277_v61  ;;  %v6667_v18 = vld [vmem:[%s10069_s1 + $0x2b4] sm:$0xf0]  ;;  %3087 = vmatpush.bf16.msra.mxu0 %v5284_v35 }
 0x208   : > { %v5604_v27 = vor.u32 %v6667_v18, %v5603_v4 }
 0x209   : > { %v4837_v19 = vadd.f32 %v4836_v37, %v4728_v6 }
 0x20a   : > { %v2822_v1 = vpop.f32.mrf.mxu2  ;;  %v2727_v2 = vpop.f32.mrf.mxu0  ;;  %3136 = vmatpush.bf16.msra.mxu1 %v5604_v27 }
 0x20b   : > { %v2871_v28 = vpop.f32.mrf.mxu3  ;;  %v2823_v37 = vadd.f32 %v2822_v1, %v2774_v3  ;;  %v2776_v38 = vpop.f32.mrf.mxu1 }
 0x20c   : > { %v2777_v33 = vadd.f32 %v2776_v38, %v2727_v2 }
 0x20d   : > { %v8294_v34 = vadd.f32 %v2871_v28, %v2823_v37  ;;  %2922 = vmatmul.bf16.gmra.mxu0 %v7470_v44 }
 0x20e   : > { %2971 = vmatmul.bf16.gmra.mxu1 %v7472_v45 }
 0x20f   : > { %10181 = vst [vmem:[#allocation26_spill] sm:$0xff] %v8294_v34  ;;  %v4468_v59 = vadd.f32 %v4467_v7, %v8294_v34  ;;  %v4738_v6 = vmul.f32 %v8294_v34, %v8294_v34  ;;  %3020 = vmatmul.bf16.gmra.mxu2 %v7474_v46 }
 0x210   : > { %3069 = vmatmul.bf16.gmra.mxu3 %v7476_v47 }
 0x211   : > { %v4838_v3 = vadd.f32 %v4837_v19, %v4738_v6 }
 0x212   : > { %v2825_v17 = vpop.f32.mrf.mxu2  ;;  %v2729_v1 = vpop.f32.mrf.mxu0 }
 0x213   : > { %v2874_v58 = vpop.f32.mrf.mxu3  ;;  %v2826_v4 = vadd.f32 %v2825_v17, %v2777_v33  ;;  %v2778_v28 = vpop.f32.mrf.mxu1 }
 0x214   : > { %v2779_v35 = vadd.f32 %v2778_v28, %v2729_v1  ;;  %v5565_v1 = vld [vmem:[%s10069_s1 + $0x268] sm:$0xf0] }
 0x215   : > { %v8303_v18 = vadd.f32 %v2874_v58, %v2826_v4  ;;  %v6525_v58 = vld [vmem:[%s10069_s1 + $0x9e8] sm:$0xf0]  ;;  %v6652_v4 = vld [vmem:[%s10069_s1 + $0x244] sm:$0xf] }
 0x217   : > { %v4469_v37 = vadd.f32 %v4468_v59, %v8303_v18  ;;  %v4748_v7 = vmul.f32 %v8303_v18, %v8303_v18 }
 0x219   : > { %v4839_v2 = vadd.f32 %v4838_v3, %v4748_v7  ;;  %v6812_v3 = vld [vmem:[%s10069_s1 + $0x744] sm:$0xf]  ;;  %v5568_v7 = vor.u32 %v6652_v4, %v5565_v1  ;;  %v6485_v4 = vld [vmem:[%s10069_s1 + $0x998] sm:$0xf0] }
 0x21a   : > { %v2827_v38 = vpop.f32.mrf.mxu2  ;;  %v2732_v34 = vpop.f32.mrf.mxu0 }
 0x21b   : > { %v2876_v27 = vpop.f32.mrf.mxu3  ;;  %v2828_v46 = vadd.f32 %v2827_v38, %v2779_v35  ;;  %v2781_v47 = vpop.f32.mrf.mxu1  ;;  %v5885_v38 = vld [vmem:[%s10069_s1 + $0x4e8] sm:$0xf0]  ;;  %3276 = vmatpush.bf16.msrb.mxu0 %v5568_v7 }
 0x21c   : > { %v2782_v19 = vadd.f32 %v2781_v47, %v2732_v34  ;;  %v6892_v47 = vld [vmem:[%s10069_s1 + $0x9c4] sm:$0xf] }
 0x21d   : > { %v8308_v6 = vadd.f32 %v2876_v27, %v2828_v46  ;;  %2927 = vmatmul.bf16.gmra.mxu0 %v7514_v20  ;;  %v6205_v46 = vld [vmem:[%s10069_s1 + $0x768] sm:$0xf0]  ;;  %v6802_v27 = vld [vmem:[%s10069_s1 + $0x6f4] sm:$0xf] }
 0x21e   : > { %2976 = vmatmul.bf16.gmra.mxu1 %v7516_v21  ;;  %v6208_v17 = vor.u32 %v6812_v3, %v6205_v46 }
 0x21f   : > { %10182 = vst [vmem:[#allocation27_spill] sm:$0xff] %v8308_v6  ;;  %v4470_v33 = vadd.f32 %v4469_v37, %v8308_v6  ;;  %v4758_v59 = vmul.f32 %v8308_v6, %v8308_v6  ;;  %3025 = vmatmul.bf16.gmra.mxu2 %v7518_v22  ;;  %v6528_v37 = vor.u32 %v6892_v47, %v6525_v58  ;;  %v6165_v47 = vld [vmem:[%s10069_s1 + $0x718] sm:$0xf0]  ;;  %v6882_v58 = vld [vmem:[%s10069_s1 + $0x974] sm:$0xf] }
 0x220   : > { %3074 = vmatmul.bf16.gmra.mxu3 %v7520_v23  ;;  %3374 = vmatpush.bf16.msrb.mxu2 %v6208_v17  ;;  %v6642_v6 = vld [vmem:[%s10069_s1 + $0x1f4] sm:$0xf] }
 0x221   : > { %v4840_v34 = vadd.f32 %v4839_v2, %v4758_v59  ;;  %v6732_v2 = vld [vmem:[%s10069_s1 + $0x4c4] sm:$0xf]  ;;  %3423 = vmatpush.bf16.msrb.mxu3 %v6528_v37  ;;  %v5525_v37 = vld [vmem:[%s10069_s1 + $0x218] sm:$0xf0] }
 0x222   : > { %v2830_v28 = vpop.f32.mrf.mxu2  ;;  %v2734_v3 = vpop.f32.mrf.mxu0  ;;  %v5888_v23 = vor.u32 %v6732_v2, %v5885_v38  ;;  %v5528_v7 = vor.u32 %v6642_v6, %v5525_v37 }
 0x223   : > { %v2879_v35 = vpop.f32.mrf.mxu3  ;;  %v2831_v59 = vadd.f32 %v2830_v28, %v2782_v19  ;;  %v2783_v46 = vpop.f32.mrf.mxu1  ;;  %v6168_v19 = vor.u32 %v6802_v27, %v6165_v47  ;;  %v6488_v28 = vor.u32 %v6882_v58, %v6485_v4  ;;  %v5845_v27 = vld [vmem:[%s10069_s1 + $0x498] sm:$0xf0] }
 0x224   : > { %v2784_v1 = vadd.f32 %v2783_v46, %v2734_v3  ;;  %3325 = vmatpush.bf16.msrb.mxu1 %v5888_v23  ;;  %v6722_v23 = vld [vmem:[%s10069_s1 + $0x474] sm:$0xf]  ;;  %3277 = vmatpush.bf16.msrb.mxu0 %v5528_v7 }
 0x225   : > { %v8353_v22 = vadd.f32 %v2879_v35, %v2831_v59  ;;  %3375 = vmatpush.bf16.msrb.mxu2 %v6168_v19  ;;  %3424 = vmatpush.bf16.msrb.mxu3 %v6488_v28  ;;  %v5848_v46 = vor.u32 %v6722_v23, %v5845_v27  ;;  %v6792_v28 = vld [vmem:[%s10069_s1 + $0x6a4] sm:$0xf] }
 0x227   : > { %v4471_v17 = vadd.f32 %v4470_v33, %v8353_v22  ;;  %v4768_v2 = vmul.f32 %v8353_v22, %v8353_v22 }
 0x228   : > { %3326 = vmatpush.bf16.msrb.mxu1 %v5848_v46 }
 0x229   : > { %v4841_v38 = vadd.f32 %v4840_v34, %v4768_v2  ;;  %v6125_v2 = vld [vmem:[%s10069_s1 + $0x6c8] sm:$0xf0] }
 0x22a   : > { %v2832_v35 = vpop.f32.mrf.mxu2  ;;  %v2893_v59 = vpop.f32.mrf.mxu0  ;;  %v6128_v23 = vor.u32 %v6792_v28, %v6125_v2 }
 0x22b   : > { %v2881_v33 = vpop.f32.mrf.mxu3  ;;  %v2833_v34 = vadd.f32 %v2832_v35, %v2784_v1  ;;  %v2942_v3 = vpop.f32.mrf.mxu1  ;;  %v6872_v35 = vld [vmem:[%s10069_s1 + $0x924] sm:$0xf] }
 0x22c   : > { %v2943_v4 = vadd.f32 %v2942_v3, %v2893_v59  ;;  %3376 = vmatpush.bf16.msrb.mxu2 %v6128_v23 }
 0x22d   : > { %v8370_v47 = vadd.f32 %v2881_v33, %v2833_v34  ;;  %3088 = vmatmul.bf16.vlgmr.msra.gmra.mxu0 %v7179_v48  ;;  %v6445_v33 = vld [vmem:[%s10069_s1 + $0x948] sm:$0xf0] }
 0x22e   : > { %3137 = vmatmul.bf16.vlgmr.msra.gmra.mxu1 %v7190_v53  ;;  %v6448_v3 = vor.u32 %v6872_v35, %v6445_v33 }
 0x22f   : > { %10183 = vst [vmem:[#allocation28_spill] sm:$0xff] %v8370_v47  ;;  %v4472_v58 = vadd.f32 %v4471_v17, %v8370_v47  ;;  %v4778_v6 = vmul.f32 %v8370_v47, %v8370_v47  ;;  %3186 = vmatmul.bf16.vlgmr.msra.gmra.mxu2 %v7192_v54 }
 0x230   : > { %3235 = vmatmul.bf16.vlgmr.msra.gmra.mxu3 %v7200_v57 }
 0x231   : > { %v4473_v1 = vrot.slane %v4472_v58, 4  ;;  %v4842_v19 = vadd.f32 %v4841_v38, %v4778_v6  ;;  %3425 = vmatpush.bf16.msrb.mxu3 %v6448_v3 }
 0x232   : > { %v2991_v37 = vpop.f32.mrf.mxu2  ;;  %v2895_v34 = vpop.f32.mrf.mxu0 }
 0x233   : > { %v3040_v17 = vpop.f32.mrf.mxu3  ;;  %v4474_v38 = vadd.f32 %v4473_v1, %v4472_v58  ;;  %v4843_v7 = vrot.slane %v4842_v19, 4  ;;  %v2992_v27 = vadd.f32 %v2991_v37, %v2943_v4  ;;  %v2944_v59 = vpop.f32.mrf.mxu1  ;;  %v6632_v58 = vld [vmem:[%s10069_s1 + $0x1a4] sm:$0xf]  ;;  %v5485_v4 = vld [vmem:[%s10069_s1 + $0x1c8] sm:$0xf0] }
 0x234   : > { %v2945_v48 = vadd.f32 %v2944_v59, %v2895_v34  ;;  %v5488_v37 = vor.u32 %v6632_v58, %v5485_v4 }
 0x235   : > { %v4475_v46 = vrot.slane %v4474_v38, 2  ;;  %v4844_v6 = vadd.f32 %v4843_v7, %v4842_v19  ;;  %v3041_v57 = vadd.f32 %v3040_v17, %v2992_v27  ;;  %v6712_v17 = vld [vmem:[%s10069_s1 + $0x424] sm:$0xf] }
 0x236   : > { %3278 = vmatpush.bf16.msrb.mxu0 %v5488_v37 }
 0x237   : > { %v4476_v28 = vadd.f32 %v4475_v46, %v4474_v38  ;;  %v4845_v2 = vrot.slane %v4844_v6, 2  ;;  %v4257_v54 = vpack.c.bf16 %v3041_v57, %v8084_v36  ;;  %v4629_v59 = vmul.f32 %v3041_v57, %v3041_v57 }
 0x239   : > { %v4477_v47 = vrot.slane %v4476_v28, 1  ;;  %v4846_v53 = vadd.f32 %v4845_v2, %v4844_v6  ;;  %4337 = vst [vmem:[%s7826_s25 + $0x8] sm:$0xff] %v4257_v54  ;;  %v5805_v54 = vld [vmem:[%s10069_s1 + $0x448] sm:$0xf0] }
 0x23a   : > { %v2993_v1 = vpop.f32.mrf.mxu2  ;;  %v2898_v35 = vpop.f32.mrf.mxu0  ;;  %v5808_v38 = vor.u32 %v6712_v17, %v5805_v54 }
 0x23b   : > { %v3042_v19 = vpop.f32.mrf.mxu3  ;;  %v4847_v36 = vrot.slane %v4846_v53, 1  ;;  %v2994_v23 = vadd.f32 %v2993_v1, %v2945_v48  ;;  %v2947_v33 = vpop.f32.mrf.mxu1  ;;  %v4478_v7 = vadd.f32 %v4477_v47, %v4476_v28  ;;  %v6782_v47 = vld [vmem:[%s10069_s1 + $0x654] sm:$0xf]  ;;  %v6085_v28 = vld [vmem:[%s10069_s1 + $0x678] sm:$0xf0] }
 0x23c   : > { %3327 = vmatpush.bf16.msrb.mxu1 %v5808_v38  ;;  %v2948_v3 = vadd.f32 %v2947_v33, %v2898_v35  ;;  %v6405_v1 = vld [vmem:[%s10069_s1 + $0x8f8] sm:$0xf0] }
 0x23d   : > { %v4848_v27 = vadd.f32 %v4847_v36, %v4846_v53  ;;  %v3043_v34 = vadd.f32 %v3042_v19, %v2994_v23  ;;  %3093 = vmatmul.bf16.gmra.mxu0 %v7250_v24 }
 0x23e   : > { %3142 = vmatmul.bf16.gmra.mxu1 %v7252_v25 }
 0x23f   : > { %v8408_v46 = vsel %vm4996_vm0, %v4478_v7, %v4848_v27  ;;  %v4262_v48 = vpack.c.bf16 %v3043_v34, %v8098_v32  ;;  %v4479_v6 = vadd.f32 %v3043_v34, %v3041_v57  ;;  %v4639_v2 = vmul.f32 %v3043_v34, %v3043_v34  ;;  %3191 = vmatmul.bf16.gmra.mxu2 %v7254_v26  ;;  %v6862_v57 = vld [vmem:[%s10069_s1 + $0x8d4] sm:$0xf]  ;;  %v5445_v34 = vld [vmem:[%s10069_s1 + $0x178] sm:$0xf0] }
 0x240   : > { %3240 = vmatmul.bf16.gmra.mxu3 %v10180_v63  ;;  %v6088_v32 = vor.u32 %v6782_v47, %v6085_v28  ;;  %v6408_v54 = vor.u32 %v6862_v57, %v6405_v1  ;;  %v6622_v27 = vld [vmem:[%s10069_s1 + $0x154] sm:$0xf] }
 0x241   : > { %4342 = vst [vmem:[%s7826_s25 + $0x30] sm:$0xff] %v4262_v48  ;;  %v4849_v53 = vadd.f32 %v4639_v2, %v4629_v59  ;;  %v5448_v48 = vor.u32 %v6622_v27, %v5445_v34 }
 0x242   : > { %v2996_v58 = vpop.f32.mrf.mxu2  ;;  %v2900_v37 = vpop.f32.mrf.mxu0  ;;  %3377 = vmatpush.bf16.msrb.mxu2 %v6088_v32  ;;  %3426 = vmatpush.bf16.msrb.mxu3 %v6408_v54 }
 0x243   : > { %v3045_v4 = vpop.f32.mrf.mxu3  ;;  %v2997_v19 = vadd.f32 %v2996_v58, %v2948_v3  ;;  %v2949_v17 = vpop.f32.mrf.mxu1  ;;  %3279 = vmatpush.bf16.msrb.mxu0 %v5448_v48 }
 0x244   : > { %v2950_v7 = vadd.f32 %v2949_v17, %v2900_v37  ;;  %v6772_v37 = vld [vmem:[%s10069_s1 + $0x604] sm:$0xf]  ;;  %v6045_v17 = vld [vmem:[%s10069_s1 + $0x628] sm:$0xf0] }
 0x245   : > { %v3046_v36 = vadd.f32 %v3045_v4, %v2997_v19 }
 0x247   : > { %v4267_v23 = vpack.c.bf16 %v3046_v36, %v8119_v16  ;;  %v4480_v35 = vadd.f32 %v4479_v6, %v3046_v36  ;;  %v4649_v33 = vmul.f32 %v3046_v36, %v3046_v36  ;;  %v6702_v16 = vld [vmem:[%s10069_s1 + $0x3d4] sm:$0xf]  ;;  %v5765_v6 = vld [vmem:[%s10069_s1 + $0x3f8] sm:$0xf0]  ;;  %v6048_v36 = vor.u32 %v6772_v37, %v6045_v17 }
 0x248   : > { %v5768_v28 = vor.u32 %v6702_v16, %v5765_v6 }
 0x249   : > { %4347 = vst [vmem:[%s7826_s25 + $0x58] sm:$0xff] %v4267_v23  ;;  %v4850_v38 = vadd.f32 %v4849_v53, %v4649_v33  ;;  %v6852_v23 = vld [vmem:[%s10069_s1 + $0x884] sm:$0xf]  ;;  %3378 = vmatpush.bf16.msrb.mxu2 %v6048_v36  ;;  %v6005_v36 = vld [vmem:[%s10069_s1 + $0x5d8] sm:$0xf0] }
 0x24a   : > { %v2998_v59 = vpop.f32.mrf.mxu2  ;;  %v2903_v53 = vpop.f32.mrf.mxu0  ;;  %3328 = vmatpush.bf16.msrb.mxu1 %v5768_v28 }
 0x24b   : > { %v3047_v3 = vpop.f32.mrf.mxu3  ;;  %v2999_v2 = vadd.f32 %v2998_v59, %v2950_v7  ;;  %v2952_v47 = vpop.f32.mrf.mxu1 }
 0x24c   : > { %v2953_v1 = vadd.f32 %v2952_v47, %v2903_v53  ;;  %v5405_v53 = vld [vmem:[%s10069_s1 + $0x128] sm:$0xf0] }
 0x24d   : > { %v3048_v58 = vadd.f32 %v3047_v3, %v2999_v2  ;;  %3098 = vmatmul.bf16.gmra.mxu0 %v7294_v49  ;;  %v6612_v2 = vld [vmem:[%s10069_s1 + $0x104] sm:$0xf] }
 0x24e   : > { %3147 = vmatmul.bf16.gmra.mxu1 %v7296_v50 }
 0x24f   : > { %v4272_v4 = vpack.c.bf16 %v3048_v58, %v8133_v56  ;;  %v4481_v32 = vadd.f32 %v4480_v35, %v3048_v58  ;;  %v4659_v57 = vmul.f32 %v3048_v58, %v3048_v58  ;;  %3196 = vmatmul.bf16.gmra.mxu2 %v7298_v51  ;;  %v6365_v35 = vld [vmem:[%s10069_s1 + $0x8a8] sm:$0xf0]  ;;  %v5408_v58 = vor.u32 %v6612_v2, %v5405_v53  ;;  %v6602_v53 = vld [vmem:[%s10069_s1 + $0xb4] sm:$0xf] }
 0x250   : > { %3245 = vmatmul.bf16.gmra.mxu3 %v7300_v52  ;;  %v6368_v27 = vor.u32 %v6852_v23, %v6365_v35 }
 0x251   : > { %4352 = vst [vmem:[%s7826_s25 + $0x80] sm:$0xff] %v4272_v4  ;;  %v4851_v19 = vadd.f32 %v4850_v38, %v4659_v57  ;;  %v5725_v4 = vld [vmem:[%s10069_s1 + $0x3a8] sm:$0xf0]  ;;  %3280 = vmatpush.bf16.msrb.mxu0 %v5408_v58 }
 0x252   : > { %v3001_v54 = vpop.f32.mrf.mxu2  ;;  %v2905_v38 = vpop.f32.mrf.mxu0  ;;  %3427 = vmatpush.bf16.msrb.mxu3 %v6368_v27 }
 0x253   : > { %v3050_v56 = vpop.f32.mrf.mxu3  ;;  %v3002_v33 = vadd.f32 %v3001_v54, %v2953_v1  ;;  %v2954_v7 = vpop.f32.mrf.mxu1 }
 0x254   : > { %v2955_v6 = vadd.f32 %v2954_v7, %v2905_v38  ;;  %v6325_v38 = vld [vmem:[%s10069_s1 + $0x858] sm:$0xf0] }
 0x255   : > { %v3051_v34 = vadd.f32 %v3050_v56, %v3002_v33  ;;  %v6762_v56 = vld [vmem:[%s10069_s1 + $0x5b4] sm:$0xf] }
 0x256   : > { %v6008_v33 = vor.u32 %v6762_v56, %v6005_v36  ;;  %v6752_v36 = vld [vmem:[%s10069_s1 + $0x564] sm:$0xf] }
 0x257   : > { %v4277_v59 = vpack.c.bf16 %v3051_v34, %v8151_v5  ;;  %v8459_v3 = vadd.f32 %v4481_v32, %v3051_v34  ;;  %v4669_v48 = vmul.f32 %v3051_v34, %v3051_v34  ;;  %v6692_v5 = vld [vmem:[%s10069_s1 + $0x384] sm:$0xf] }
 0x258   : > { %3379 = vmatpush.bf16.msrb.mxu2 %v6008_v33 }
 0x259   : > { %4357 = vst [vmem:[%s7826_s25 + $0xa8] sm:$0xff] %v4277_v59  ;;  %v8462_v16 = vadd.f32 %v4851_v19, %v4669_v48  ;;  %v5728_v19 = vor.u32 %v6692_v5, %v5725_v4  ;;  %v6682_v4 = vld [vmem:[%s10069_s1 + $0x334] sm:$0xf] }
 0x25a   : > { %v3003_v47 = vpop.f32.mrf.mxu2  ;;  %v2908_v57 = vpop.f32.mrf.mxu0 }
 0x25b   : > { %v3052_v28 = vpop.f32.mrf.mxu3  ;;  %v3004_v32 = vadd.f32 %v3003_v47, %v2955_v6  ;;  %v2957_v1 = vpop.f32.mrf.mxu1  ;;  %3329 = vmatpush.bf16.msrb.mxu1 %v5728_v19  ;;  %v5365_v47 = vld [vmem:[%s10069_s1 + $0xd8] sm:$0xf0] }
 0x25c   : > { %v2958_v54 = vadd.f32 %v2957_v1, %v2908_v57  ;;  %v5368_v5 = vor.u32 %v6602_v53, %v5365_v47  ;;  %v6592_v47 = vld [vmem:[%s10069_s1 + $0x64] sm:$0xf] }
 0x25d   : > { %v8476_v37 = vadd.f32 %v3052_v28, %v3004_v32  ;;  %3103 = vmatmul.bf16.gmra.mxu0 %v7338_v12 }
 0x25e   : > { %3152 = vmatmul.bf16.gmra.mxu1 %v7340_v13  ;;  %3281 = vmatpush.bf16.msrb.mxu0 %v5368_v5 }
 0x25f   : > { %v4282_v17 = vpack.c.bf16 %v8476_v37, %v8173_v39  ;;  %3201 = vmatmul.bf16.gmra.mxu2 %v7342_v14  ;;  %v6842_v39 = vld [vmem:[%s10069_s1 + $0x834] sm:$0xf] }
 0x260   : > { %3250 = vmatmul.bf16.gmra.mxu3 %v7344_v15  ;;  %v6328_v59 = vor.u32 %v6842_v39, %v6325_v38  ;;  %v6285_v38 = vld [vmem:[%s10069_s1 + $0x808] sm:$0xf0] }
 0x261   : > { %4362 = vst [vmem:[%s7826_s25 + $0xd0] sm:$0xff] %v4282_v17 }
 0x262   : > { %v3006_v23 = vpop.f32.mrf.mxu2  ;;  %v2910_v27 = vpop.f32.mrf.mxu0  ;;  %3428 = vmatpush.bf16.msrb.mxu3 %v6328_v59 }
 0x263   : > { %v3055_v35 = vpop.f32.mrf.mxu3  ;;  %v3007_v7 = vadd.f32 %v3006_v23, %v2958_v54  ;;  %v2959_v34 = vpop.f32.mrf.mxu1  ;;  %v5965_v23 = vld [vmem:[%s10069_s1 + $0x588] sm:$0xf0] }
 0x264   : > { %v2960_v2 = vadd.f32 %v2959_v34, %v2910_v27  ;;  %v5968_v39 = vor.u32 %v6752_v36, %v5965_v23  ;;  %v6742_v23 = vld [vmem:[%s10069_s1 + $0x514] sm:$0xf] }
 0x265   : > { %v8497_v48 = vadd.f32 %v3055_v35, %v3007_v7 }
 0x266   : > { %3380 = vmatpush.bf16.msrb.mxu2 %v5968_v39 }
 0x267   : > { %v4287_v6 = vpack.c.bf16 %v8497_v48, %v8201_v31  ;;  %v5685_v31 = vld [vmem:[%s10069_s1 + $0x358] sm:$0xf0] }
 0x268   : > { %v5688_v19 = vor.u32 %v6682_v4, %v5685_v31  ;;  %v6672_v31 = vld [vmem:[%s10069_s1 + $0x2e4] sm:$0xf] }
 0x269   : > { %4367 = vst [vmem:[%s7826_s25 + $0xf8] sm:$0xff] %v4287_v6 }
 0x26a   : > { %v3008_v28 = vpop.f32.mrf.mxu2  ;;  %v2913_v57 = vpop.f32.mrf.mxu0  ;;  %3330 = vmatpush.bf16.msrb.mxu1 %v5688_v19 }
 0x26b   : > { %v3057_v58 = vpop.f32.mrf.mxu3  ;;  %v3009_v32 = vadd.f32 %v3008_v28, %v2960_v2  ;;  %v2962_v1 = vpop.f32.mrf.mxu1  ;;  %v5325_v28 = vld [vmem:[%s10069_s1 + $0x88] sm:$0xf0] }
 0x26c   : > { %v2963_v56 = vadd.f32 %v2962_v1, %v2913_v57  ;;  %v5328_v4 = vor.u32 %v6592_v47, %v5325_v28  ;;  %v10185_v28 = vld [vmem:[#allocation12_spill] sm:$0xff] }
 0x26d   : > { %v8514_v17 = vadd.f32 %v3057_v58, %v3009_v32  ;;  %3108 = vmatmul.bf16.gmra.mxu0 %v7382_v40 }
 0x26e   : > { %3157 = vmatmul.bf16.gmra.mxu1 %v7384_v41  ;;  %3282 = vmatpush.bf16.msrb.mxu0 %v5328_v4 }
 0x26f   : > { %v4292_v54 = vpack.c.bf16 %v8514_v17, %v8218_v55  ;;  %3206 = vmatmul.bf16.gmra.mxu2 %v7386_v42  ;;  %v6832_v55 = vld [vmem:[%s10069_s1 + $0x7e4] sm:$0xf] }
 0x270   : > { %3255 = vmatmul.bf16.gmra.mxu3 %v7388_v43  ;;  %v6288_v59 = vor.u32 %v6832_v55, %v6285_v38  ;;  %v6245_v38 = vld [vmem:[%s10069_s1 + $0x7b8] sm:$0xf0] }
 0x271   : > { %4372 = vst [vmem:[%s7826_s25 + $0x120] sm:$0xff] %v4292_v54 }
 0x272   : > { %v3011_v35 = vpop.f32.mrf.mxu2  ;;  %v2915_v27 = vpop.f32.mrf.mxu0  ;;  %3429 = vmatpush.bf16.msrb.mxu3 %v6288_v59 }
 0x273   : > { %v3060_v33 = vpop.f32.mrf.mxu3  ;;  %v3012_v7 = vadd.f32 %v3011_v35, %v2963_v56  ;;  %v2964_v34 = vpop.f32.mrf.mxu1  ;;  %v5925_v35 = vld [vmem:[%s10069_s1 + $0x538] sm:$0xf0] }
 0x274   : > { %v2965_v53 = vadd.f32 %v2964_v34, %v2915_v27  ;;  %v5928_v55 = vor.u32 %v6742_v23, %v5925_v35 }
 0x275   : > { %v8535_v6 = vadd.f32 %v3060_v33, %v3012_v7 }
 0x276   : > { %3381 = vmatpush.bf16.msrb.mxu2 %v5928_v55 }
 0x277   : > { %v4297_v2 = vpack.c.bf16 %v8535_v6, %v8239_v62  ;;  %v5645_v62 = vld [vmem:[%s10069_s1 + $0x308] sm:$0xf0] }
 0x278   : > { %v5648_v19 = vor.u32 %v6672_v31, %v5645_v62  ;;  %v4656_v62 = vmul.f32 %v7612_v30, %v7612_v30 }
 0x279   : > { %4377 = vst [vmem:[%s7826_s25 + $0x148] sm:$0xff] %v4297_v2  ;;  %v10184_v2 = vld [vmem:[#allocation13_spill] sm:$0xff] }
 0x27a   : > { %v3013_v58 = vpop.f32.mrf.mxu2  ;;  %v2918_v57 = vpop.f32.mrf.mxu0  ;;  %3331 = vmatpush.bf16.msrb.mxu1 %v5648_v19  ;;  %v5285_v19 = vld [vmem:[%s10069_s1 + $0x38] sm:$0xf0] }
 0x27b   : > { %v3062_v5 = vpop.f32.mrf.mxu3  ;;  %v3014_v32 = vadd.f32 %v3013_v58, %v2965_v53  ;;  %v2967_v1 = vpop.f32.mrf.mxu1  ;;  %v4636_v53 = vmul.f32 %v10184_v2, %v10184_v2  ;;  %v4626_v58 = vmul.f32 %v10185_v28, %v10185_v28 }
 0x27c   : > { %v2968_v36 = vadd.f32 %v2967_v1, %v2918_v57  ;;  %v6582_v1 = vld [vmem:[%s10069_s1 + $0x14] sm:$0xf] }
 0x27d   : > { %v8552_v54 = vadd.f32 %v3062_v5, %v3014_v32  ;;  %3113 = vmatmul.bf16.gmra.mxu0 %v7426_v8  ;;  %v4646_v5 = vmul.f32 %v7598_v0, %v7598_v0  ;;  %v4786_v31 = vadd.f32 %v4636_v53, %v4626_v58  ;;  %v4416_v32 = vadd.f32 %v10184_v2, %v10185_v28 }
 0x27e   : > { %3162 = vmatmul.bf16.gmra.mxu1 %v7428_v9  ;;  %v5288_v35 = vor.u32 %v6582_v1, %v5285_v19  ;;  %v10190_v1 = vld [vmem:[#allocation16_spill] sm:$0xff] }
 0x27f   : > { %v4302_v56 = vpack.c.bf16 %v8552_v54, %v8256_v29  ;;  %3211 = vmatmul.bf16.gmra.mxu2 %v7430_v10  ;;  %v6822_v29 = vld [vmem:[%s10069_s1 + $0x794] sm:$0xf]  ;;  %v4417_v55 = vadd.f32 %v4416_v32, %v7598_v0  ;;  %v4696_v19 = vmul.f32 %v10190_v1, %v10190_v1 }
 0x280   : > { %3260 = vmatmul.bf16.gmra.mxu3 %v7432_v11  ;;  %v6248_v59 = vor.u32 %v6822_v29, %v6245_v38  ;;  %3283 = vmatpush.bf16.msrb.mxu0 %v5288_v35 }
 0x281   : > { %4382 = vst [vmem:[%s7826_s25 + $0x170] sm:$0xff] %v4302_v56  ;;  %v4787_v56 = vadd.f32 %v4786_v31, %v4646_v5  ;;  %v4418_v53 = vadd.f32 %v4417_v55, %v7612_v30  ;;  %v10187_v5 = vld [vmem:[#allocation15_spill] sm:$0xff]  ;;  %v10188_v31 = vld [vmem:[#allocation26_spill] sm:$0xff] }
 0x282   : > { %v3016_v33 = vpop.f32.mrf.mxu2  ;;  %v2920_v27 = vpop.f32.mrf.mxu0  ;;  %3430 = vmatpush.bf16.msrb.mxu3 %v6248_v59  ;;  %v10186_v59 = vld [vmem:[#allocation14_spill] sm:$0xff]  ;;  %v4686_v0 = vmul.f32 %v10187_v5, %v10187_v5 }
 0x283   : > { %v3065_v39 = vpop.f32.mrf.mxu3  ;;  %v3017_v7 = vadd.f32 %v3016_v33, %v2968_v36  ;;  %v2969_v34 = vpop.f32.mrf.mxu1  ;;  %v6662_v33 = vld [vmem:[%s10069_s1 + $0x294] sm:$0xf]  ;;  %v4676_v2 = vmul.f32 %v10186_v59, %v10186_v59 }
 0x284   : > { %v2970_v57 = vadd.f32 %v2969_v34, %v2920_v27  ;;  %v4788_v34 = vadd.f32 %v4787_v56, %v4656_v62  ;;  %v10191_v56 = vld [vmem:[#allocation9_spill] sm:$0xff] }
 0x285   : > { %v8575_v47 = vadd.f32 %v3065_v39, %v3017_v7  ;;  %v5605_v39 = vld [vmem:[%s10069_s1 + $0x2b8] sm:$0xf0] }
 0x286   : > { %v5608_v27 = vor.u32 %v6662_v33, %v5605_v39 }
 0x287   : > { %v4307_v4 = vpack.c.bf16 %v8575_v47, %v8277_v61  ;;  %v4666_v61 = vmul.f32 %v7630_v60, %v7630_v60 }
 0x288   : > { %3332 = vmatpush.bf16.msrb.mxu1 %v5608_v27  ;;  %v10193_v27 = vld [vmem:[#allocation18_spill] sm:$0xff] }
 0x289   : > { %4387 = vst [vmem:[%s7826_s25 + $0x198] sm:$0xff] %v4307_v4  ;;  %v4789_v58 = vadd.f32 %v4788_v34, %v4666_v61  ;;  %v4419_v4 = vadd.f32 %v4418_v53, %v7630_v60  ;;  %v4716_v34 = vmul.f32 %v10193_v27, %v10193_v27 }
 0x28a   : > { %v3018_v36 = vpop.f32.mrf.mxu2  ;;  %v2923_v38 = vpop.f32.mrf.mxu0 }
 0x28b   : > { %v3067_v23 = vpop.f32.mrf.mxu3  ;;  %v3019_v29 = vadd.f32 %v3018_v36, %v2970_v57  ;;  %v2972_v7 = vpop.f32.mrf.mxu1  ;;  %v10189_v57 = vld [vmem:[#allocation8_spill] sm:$0xff]  ;;  %v4790_v30 = vadd.f32 %v4789_v58, %v4676_v2  ;;  %v4420_v61 = vadd.f32 %v4419_v4, %v10186_v59  ;;  %v10194_v58 = vld [vmem:[#allocation19_spill] sm:$0xff] }
 0x28c   : > { %v2973_v32 = vadd.f32 %v2972_v7, %v2923_v38 }
 0x28d   : > { %v8606_v28 = vadd.f32 %v3067_v23, %v3019_v29  ;;  %3118 = vmatmul.bf16.gmra.mxu0 %v7470_v44  ;;  %v4791_v36 = vadd.f32 %v4790_v30, %v4686_v0  ;;  %v10192_v23 = vld [vmem:[#allocation17_spill] sm:$0xff]  ;;  %v4421_v39 = vadd.f32 %v4420_v61, %v10187_v5  ;;  %v4726_v0 = vmul.f32 %v10194_v58, %v10194_v58 }
 0x28e   : > { %3167 = vmatmul.bf16.gmra.mxu1 %v7472_v45  ;;  %v4706_v35 = vmul.f32 %v10192_v23, %v10192_v23  ;;  %v4679_v30 = vmul.f32 %v8476_v37, %v8476_v37 }
 0x28f   : > { %v4312_v62 = vpack.c.bf16 %v8606_v28, %v10188_v31  ;;  %3216 = vmatmul.bf16.gmra.mxu2 %v10189_v57  ;;  %v4792_v7 = vadd.f32 %v4791_v36, %v4696_v19  ;;  %v4422_v2 = vadd.f32 %v4421_v39, %v10190_v1  ;;  %v10196_v36 = vld [vmem:[#allocation21_spill] sm:$0xff]  ;;  %v4483_v39 = vadd.f32 %v8459_v3, %v8476_v37  ;;  %v10198_v37 = vld [vmem:[#allocation23_spill] sm:$0xff] }
 0x290   : > { %3265 = vmatmul.bf16.gmra.mxu3 %v10191_v56 }
 0x291   : > { %4392 = vst [vmem:[%s7826_s25 + $0x1c0] sm:$0xff] %v4312_v62  ;;  %v4793_v53 = vadd.f32 %v4792_v7, %v4706_v35  ;;  %v4423_v4 = vadd.f32 %v4422_v2, %v10192_v23  ;;  %v10195_v62 = vld [vmem:[#allocation20_spill] sm:$0xff]  ;;  %v4746_v35 = vmul.f32 %v10196_v36, %v10196_v36  ;;  %v4689_v23 = vmul.f32 %v8497_v48, %v8497_v48  ;;  %v10197_v2 = vld [vmem:[#allocation22_spill] sm:$0xff] }
 0x292   : > { %v3021_v60 = vpop.f32.mrf.mxu2  ;;  %v2925_v29 = vpop.f32.mrf.mxu0 }
 0x293   : > { %v3070_v33 = vpop.f32.mrf.mxu3  ;;  %v3022_v55 = vadd.f32 %v3021_v60, %v2973_v32  ;;  %v2974_v38 = vpop.f32.mrf.mxu1  ;;  %v4794_v31 = vadd.f32 %v4793_v53, %v4716_v34  ;;  %v4736_v32 = vmul.f32 %v10195_v62, %v10195_v62  ;;  %v4424_v1 = vadd.f32 %v4423_v4, %v10193_v27 }
 0x294   : > { %v2975_v19 = vadd.f32 %v2974_v38, %v2925_v29  ;;  %v4756_v29 = vmul.f32 %v10197_v2, %v10197_v2  ;;  %v4853_v38 = vadd.f32 %v8462_v16, %v4679_v30  ;;  %v4699_v53 = vmul.f32 %v8514_v17, %v8514_v17 }
 0x295   : > { %v8627_v59 = vadd.f32 %v3070_v33, %v3022_v55  ;;  %v4795_v61 = vadd.f32 %v4794_v31, %v4726_v0  ;;  %v4425_v33 = vadd.f32 %v4424_v1, %v10194_v58  ;;  %v4484_v4 = vadd.f32 %v4483_v39, %v8497_v48  ;;  %v10199_v48 = vld [vmem:[#allocation27_spill] sm:$0xff] }
 0x296   : > { %v4854_v31 = vadd.f32 %v4853_v38, %v4689_v23  ;;  %v4709_v16 = vmul.f32 %v8535_v6, %v8535_v6 }
 0x297   : > { %v4317_v5 = vpack.c.bf16 %v8627_v59, %v8303_v18  ;;  %v4796_v27 = vadd.f32 %v4795_v61, %v4736_v32  ;;  %v4426_v0 = vadd.f32 %v4425_v33, %v10195_v62  ;;  %v4485_v62 = vadd.f32 %v4484_v4, %v8514_v17  ;;  %v10202_v33 = vld [vmem:[#allocation11_spill] sm:$0xff] }
 0x298   : > { %v4855_v23 = vadd.f32 %v4854_v31, %v4699_v53 }
 0x299   : > { %4397 = vst [vmem:[%s7826_s25 + $0x1e8] sm:$0xff] %v4317_v5  ;;  %v4797_v3 = vadd.f32 %v4796_v27, %v4746_v35  ;;  %v4766_v5 = vmul.f32 %v10198_v37, %v10198_v37  ;;  %v4427_v32 = vadd.f32 %v4426_v0, %v10196_v36  ;;  %v10201_v35 = vld [vmem:[#allocation24_spill] sm:$0xff]  ;;  %v4486_v17 = vadd.f32 %v4485_v62, %v8535_v6 }
 0x29a   : > { %v3023_v60 = vpop.f32.mrf.mxu2  ;;  %v2928_v7 = vpop.f32.mrf.mxu0  ;;  %v6818_v6 = vld [vmem:[%s10069_s1 + $0x76c] sm:$0xf0] }
 0x29b   : > { %v3072_v18 = vpop.f32.mrf.mxu3  ;;  %v3024_v55 = vadd.f32 %v3023_v60, %v2975_v19  ;;  %v2977_v34 = vpop.f32.mrf.mxu1  ;;  %v10200_v19 = vld [vmem:[#allocation10_spill] sm:$0xff]  ;;  %v4798_v61 = vadd.f32 %v4797_v3, %v4756_v29  ;;  %v4776_v60 = vmul.f32 %v10201_v35, %v10201_v35  ;;  %v4428_v36 = vadd.f32 %v4427_v32, %v10197_v2  ;;  %v6211_v2 = vld [vmem:[%s10069_s1 + $0x748] sm:$0xf]  ;;  %v6658_v62 = vld [vmem:[%s10069_s1 + $0x26c] sm:$0xf0] }
 0x29c   : > { %v2978_v1 = vadd.f32 %v2977_v34, %v2928_v7  ;;  %v4729_v7 = vmul.f32 %v8575_v47, %v8575_v47  ;;  %v4487_v38 = vadd.f32 %v4486_v17, %v8552_v54  ;;  %v6531_v3 = vld [vmem:[%s10069_s1 + $0x9c8] sm:$0xf] }
 0x29d   : > { %v8654_v58 = vadd.f32 %v3072_v18, %v3024_v55  ;;  %3123 = vmatmul.bf16.gmra.mxu0 %v7514_v20  ;;  %v4719_v18 = vmul.f32 %v8552_v54, %v8552_v54  ;;  %v4799_v39 = vadd.f32 %v4798_v61, %v4766_v5  ;;  %v4856_v55 = vadd.f32 %v4855_v23, %v4709_v16  ;;  %v6898_v16 = vld [vmem:[%s10069_s1 + $0x9ec] sm:$0xf0]  ;;  %v5571_v32 = vld [vmem:[%s10069_s1 + $0x248] sm:$0xf] }
 0x29e   : > { %3172 = vmatmul.bf16.gmra.mxu1 %v7516_v21  ;;  %v4429_v29 = vadd.f32 %v4428_v36, %v10198_v37  ;;  %v4739_v54 = vmul.f32 %v8606_v28, %v8606_v28  ;;  %v6212_v37 = vor.u32 %v6818_v6, %v6211_v2  ;;  %v5572_v61 = vor.u32 %v6658_v62, %v5571_v32  ;;  %v6738_v23 = vld [vmem:[%s10069_s1 + $0x4ec] sm:$0xf0] }
 0x29f   : > { %v4322_v30 = vpack.c.bf16 %v8654_v58, %v10199_v48  ;;  %3221 = vmatmul.bf16.gmra.mxu2 %v10200_v19  ;;  %v4800_v5 = vadd.f32 %v4799_v39, %v4776_v60  ;;  %v4857_v31 = vadd.f32 %v4856_v55, %v4719_v18  ;;  %v4488_v48 = vadd.f32 %v4487_v38, %v8575_v47  ;;  %v5891_v60 = vld [vmem:[%s10069_s1 + $0x4c8] sm:$0xf]  ;;  %v6171_v18 = vld [vmem:[%s10069_s1 + $0x6f8] sm:$0xf]  ;;  %v6808_v55 = vld [vmem:[%s10069_s1 + $0x71c] sm:$0xf0] }
 0x2a0   : > { %3270 = vmatmul.bf16.gmra.mxu3 %v10202_v33  ;;  %v4430_v36 = vadd.f32 %v4429_v29, %v10201_v35  ;;  %v4749_v47 = vmul.f32 %v8627_v59, %v8627_v59  ;;  %3570 = vmatpush.bf16.msra.mxu2 %v6212_v37  ;;  %v5892_v39 = vor.u32 %v6738_v23, %v5891_v60 }
 0x2a1   : > { %4402 = vst [vmem:[%s7826_s25 + $0x210] sm:$0xff] %v4322_v30  ;;  %v4858_v17 = vadd.f32 %v4857_v31, %v4729_v7  ;;  %v4489_v35 = vadd.f32 %v4488_v48, %v8606_v28  ;;  %3472 = vmatpush.bf16.msra.mxu0 %v5572_v61  ;;  %v4801_v29 = vrot.slane %v4800_v5, 4  ;;  %v5531_v28 = vld [vmem:[%s10069_s1 + $0x1f8] sm:$0xf] }
 0x2a2   : > { %v3026_v34 = vpop.f32.mrf.mxu2  ;;  %v2930_v0 = vpop.f32.mrf.mxu0  ;;  %3521 = vmatpush.bf16.msra.mxu1 %v5892_v39  ;;  %v4431_v37 = vrot.slane %v4430_v36, 4 }
 0x2a3   : > { %v3075_v27 = vpop.f32.mrf.mxu3  ;;  %v3027_v53 = vadd.f32 %v3026_v34, %v2978_v1  ;;  %v2979_v4 = vpop.f32.mrf.mxu1  ;;  %v6532_v1 = vor.u32 %v6898_v16, %v6531_v3  ;;  %v6491_v34 = vld [vmem:[%s10069_s1 + $0x978] sm:$0xf]  ;;  %v4859_v38 = vadd.f32 %v4858_v17, %v4739_v54  ;;  %v4490_v6 = vadd.f32 %v4489_v35, %v8627_v59  ;;  %v10204_v35 = vld [vmem:[#allocation3_spill] sm:$0xff] }
 0x2a4   : > { %v4759_v3 = vmul.f32 %v8654_v58, %v8654_v58  ;;  %v2980_v31 = vadd.f32 %v2979_v4, %v2930_v0  ;;  %v5851_v59 = vld [vmem:[%s10069_s1 + $0x478] sm:$0xf]  ;;  %v6728_v0 = vld [vmem:[%s10069_s1 + $0x49c] sm:$0xf0] }
 0x2a5   : > { %v3076_v30 = vadd.f32 %v3075_v27, %v3027_v53  ;;  %v6888_v27 = vld [vmem:[%s10069_s1 + $0x99c] sm:$0xf0]  ;;  %3619 = vmatpush.bf16.msra.mxu3 %v6532_v1  ;;  %v6172_v53 = vor.u32 %v6808_v55, %v6171_v18  ;;  %v4860_v54 = vadd.f32 %v4859_v38, %v4749_v47  ;;  %v4491_v4 = vadd.f32 %v4490_v6, %v8654_v58 }
 0x2a6   : > { %v6492_v2 = vor.u32 %v6888_v27, %v6491_v34  ;;  %v5852_v23 = vor.u32 %v6728_v0, %v5851_v59  ;;  %v4802_v18 = vadd.f32 %v4801_v29, %v4800_v5  ;;  %v10203_v34 = vld [vmem:[#allocation2_spill] sm:$0xff]  ;;  %v4432_v27 = vadd.f32 %v4431_v37, %v4430_v36  ;;  %v10207_v29 = vld [vmem:[#allocation5_spill] sm:$0xff]  ;;  %v6798_v36 = vld [vmem:[%s10069_s1 + $0x6cc] sm:$0xf0] }
 0x2a7   : > { %v4327_v7 = vpack.c.bf16 %v3076_v30, %v8353_v22  ;;  %v6648_v22 = vld [vmem:[%s10069_s1 + $0x21c] sm:$0xf0]  ;;  %3571 = vmatpush.bf16.msra.mxu2 %v6172_v53  ;;  %v4769_v48 = vmul.f32 %v3076_v30, %v3076_v30  ;;  %v4861_v47 = vadd.f32 %v4860_v54, %v4759_v3  ;;  %v4492_v39 = vadd.f32 %v4491_v4, %v3076_v30 }
 0x2a8   : > { %v5532_v62 = vor.u32 %v6648_v22, %v5531_v28  ;;  %3522 = vmatpush.bf16.msra.mxu1 %v5852_v23  ;;  %v4803_v5 = vrot.slane %v4802_v18, 2  ;;  %v4433_v28 = vrot.slane %v4432_v27, 2 }
 0x2a9   : > { %4407 = vst [vmem:[%s7826_s25 + $0x238] sm:$0xff] %v4327_v7  ;;  %3620 = vmatpush.bf16.msra.mxu3 %v6492_v2  ;;  %v4862_v58 = vadd.f32 %v4861_v47, %v4769_v48  ;;  %v10205_v7 = vld [vmem:[#allocation28_spill] sm:$0xff] }
 0x2aa   : > { %v3028_v16 = vpop.f32.mrf.mxu2  ;;  %v3089_v61 = vpop.f32.mrf.mxu0  ;;  %3473 = vmatpush.bf16.msra.mxu0 %v5532_v62  ;;  %v10206_v2 = vld [vmem:[#allocation4_spill] sm:$0xff] }
 0x2ab   : > { %v3077_v32 = vpop.f32.mrf.mxu3  ;;  %v3029_v1 = vadd.f32 %v3028_v16, %v2980_v31  ;;  %v3138_v60 = vpop.f32.mrf.mxu1  ;;  %v6131_v31 = vld [vmem:[%s10069_s1 + $0x6a8] sm:$0xf] }
 0x2ac   : > { %v3139_v17 = vadd.f32 %v3138_v60, %v3089_v61  ;;  %v6132_v54 = vor.u32 %v6798_v36, %v6131_v31  ;;  %v6451_v16 = vld [vmem:[%s10069_s1 + $0x928] sm:$0xf]  ;;  %v4804_v61 = vadd.f32 %v4803_v5, %v4802_v18  ;;  %v6638_v18 = vld [vmem:[%s10069_s1 + $0x1cc] sm:$0xf0] }
 0x2ad   : > { %v3078_v55 = vadd.f32 %v3077_v32, %v3029_v1  ;;  %3284 = vmatmul.bf16.vlgmr.msrb.gmra.mxu0 %v10203_v34  ;;  %v6878_v32 = vld [vmem:[%s10069_s1 + $0x94c] sm:$0xf0] }
 0x2ae   : > { %3333 = vmatmul.bf16.vlgmr.msrb.gmra.mxu1 %v10204_v35  ;;  %v6452_v1 = vor.u32 %v6878_v32, %v6451_v16  ;;  %3572 = vmatpush.bf16.msra.mxu2 %v6132_v54 }
 0x2af   : > { %v4332_v38 = vpack.c.bf16 %v3078_v55, %v10205_v7  ;;  %v4493_v53 = vadd.f32 %v4492_v39, %v3078_v55  ;;  %v4779_v6 = vmul.f32 %v3078_v55, %v3078_v55  ;;  %3382 = vmatmul.bf16.vlgmr.msrb.gmra.mxu2 %v10206_v2  ;;  %v4434_v55 = vadd.f32 %v4433_v28, %v4432_v27  ;;  %v5811_v27 = vld [vmem:[%s10069_s1 + $0x428] sm:$0xf] }
 0x2b0   : > { %3431 = vmatmul.bf16.vlgmr.msrb.gmra.mxu3 %v10207_v29 }
 0x2b1   : > { %4412 = vst [vmem:[%s7826_s25 + $0x260] sm:$0xff] %v4332_v38  ;;  %v4494_v3 = vrot.slane %v4493_v53, 4  ;;  %v4863_v30 = vadd.f32 %v4862_v58, %v4779_v6  ;;  %3621 = vmatpush.bf16.msra.mxu3 %v6452_v1  ;;  %v4805_v38 = vrot.slane %v4804_v61, 1  ;;  %v4435_v36 = vrot.slane %v4434_v55, 1 }
 0x2b2   : > { %v3187_v22 = vpop.f32.mrf.mxu2  ;;  %v3091_v4 = vpop.f32.mrf.mxu0 }
 0x2b3   : > { %v3236_v37 = vpop.f32.mrf.mxu3  ;;  %v4495_v62 = vadd.f32 %v4494_v3, %v4493_v53  ;;  %v4864_v59 = vrot.slane %v4863_v30, 4  ;;  %v3188_v0 = vadd.f32 %v3187_v22, %v3139_v17  ;;  %v3140_v48 = vpop.f32.mrf.mxu1  ;;  %v5491_v17 = vld [vmem:[%s10069_s1 + $0x1a8] sm:$0xf]  ;;  %v4806_v32 = vadd.f32 %v4805_v38, %v4804_v61  ;;  %v6411_v38 = vld [vmem:[%s10069_s1 + $0x8d8] sm:$0xf] }
 0x2b4   : > { %v3141_v60 = vadd.f32 %v3140_v48, %v3091_v4  ;;  %v5492_v3 = vor.u32 %v6638_v18, %v5491_v17  ;;  %v10210_v48 = vld [vmem:[#allocation25_spill] sm:$0xff]  ;;  %v5018_v61 = vrot.slane %v8408_v46, 4  ;;  %v6868_v18 = vld [vmem:[%s10069_s1 + $0x8fc] sm:$0xf0] }
 0x2b5   : > { %v4496_v23 = vrot.slane %v4495_v62, 2  ;;  %v4865_v47 = vadd.f32 %v4864_v59, %v4863_v30  ;;  %v8758_v39 = vadd.f32 %v3236_v37, %v3188_v0  ;;  %v6718_v30 = vld [vmem:[%s10069_s1 + $0x44c] sm:$0xf0]  ;;  %v5017_v1 = vrot.slane %v10210_v48, 6 }
 0x2b6   : > { %v5812_v16 = vor.u32 %v6718_v30, %v5811_v27  ;;  %3474 = vmatpush.bf16.msra.mxu0 %v5492_v3  ;;  %v6412_v30 = vor.u32 %v6868_v18, %v6411_v38 }
 0x2b7   : > { %10208 = vst [vmem:[#allocation13_spill] sm:$0xff] %v8758_v39  ;;  %v4497_v58 = vadd.f32 %v4496_v23, %v4495_v62  ;;  %v4866_v7 = vrot.slane %v4865_v47, 2  ;;  %v4436_v23 = vadd.f32 %v4435_v36, %v4434_v55  ;;  %v6788_v55 = vld [vmem:[%s10069_s1 + $0x67c] sm:$0xf0] }
 0x2b8   : > { %3523 = vmatpush.bf16.msra.mxu1 %v5812_v16  ;;  %3622 = vmatpush.bf16.msra.mxu3 %v6412_v30  ;;  %v5771_v16 = vld [vmem:[%s10069_s1 + $0x3d8] sm:$0xf]  ;;  %v5411_v30 = vld [vmem:[%s10069_s1 + $0x108] sm:$0xf] }
 0x2b9   : > { %v4498_v6 = vrot.slane %v4497_v58, 1  ;;  %v4867_v31 = vadd.f32 %v4866_v7, %v4865_v47  ;;  %v6091_v7 = vld [vmem:[%s10069_s1 + $0x658] sm:$0xf] }
 0x2ba   : > { %v3189_v53 = vpop.f32.mrf.mxu2  ;;  %v3094_v37 = vpop.f32.mrf.mxu0  ;;  %v6092_v17 = vor.u32 %v6788_v55, %v6091_v7  ;;  %v6778_v7 = vld [vmem:[%s10069_s1 + $0x62c] sm:$0xf0]  ;;  %v6371_v55 = vld [vmem:[%s10069_s1 + $0x888] sm:$0xf] }
 0x2bb   : > { %v3238_v5 = vpop.f32.mrf.mxu3  ;;  %v4868_v28 = vrot.slane %v4867_v31, 1  ;;  %v3190_v22 = vadd.f32 %v3189_v53, %v3141_v60  ;;  %v3143_v54 = vpop.f32.mrf.mxu1  ;;  %v4499_v59 = vadd.f32 %v4498_v6, %v4497_v58  ;;  %v4997_v58 = vsel %vm4996_vm0, %v4436_v23, %v4806_v32 }
 0x2bc   : > { %v3144_v62 = vadd.f32 %v3143_v54, %v3094_v37  ;;  %v5025_v46 = vsel %vm5024_vm1, %v4997_v58, %v5017_v1  ;;  %3573 = vmatpush.bf16.msra.mxu2 %v6092_v17  ;;  %v5451_v37 = vld [vmem:[%s10069_s1 + $0x158] sm:$0xf]  ;;  %v6628_v54 = vld [vmem:[%s10069_s1 + $0x17c] sm:$0xf0]  ;;  %v6051_v58 = vld [vmem:[%s10069_s1 + $0x608] sm:$0xf] }
 0x2bd   : > { %v4869_v0 = vadd.f32 %v4868_v28, %v4867_v31  ;;  %v8772_v4 = vadd.f32 %v3238_v5, %v3190_v22  ;;  %3289 = vmatmul.bf16.gmra.mxu0 %v7250_v24 }
 0x2be   : > { %3338 = vmatmul.bf16.gmra.mxu1 %v7252_v25 }
 0x2bf   : > { %10209 = vst [vmem:[#allocation12_spill] sm:$0xff] %v8772_v4  ;;  %v5000_v60 = vsel %vm4996_vm0, %v4499_v59, %v4869_v0  ;;  %3387 = vmatmul.bf16.gmra.mxu2 %v7254_v26  ;;  %v6708_v59 = vld [vmem:[%s10069_s1 + $0x3fc] sm:$0xf0] }
 0x2c0   : > { %v5019_v47 = vrot.slane %v5000_v60, 2  ;;  %3436 = vmatmul.bf16.gmra.mxu3 %v10180_v63  ;;  %v5772_v23 = vor.u32 %v6708_v59, %v5771_v16  ;;  %v6698_v16 = vld [vmem:[%s10069_s1 + $0x3ac] sm:$0xf0] }
 0x2c2   : > { %v5027_v6 = vsel %vm5026_vm2, %v5018_v61, %v5019_v47  ;;  %v3192_v31 = vpop.f32.mrf.mxu2  ;;  %v3096_v27 = vpop.f32.mrf.mxu0  ;;  %3524 = vmatpush.bf16.msra.mxu1 %v5772_v23 }
 0x2c3   : > { %v5029_v53 = vsel %vm5028_vm3, %v5025_v46, %v5027_v6  ;;  %v3193_v5 = vadd.f32 %v3192_v31, %v3144_v62  ;;  %v3241_v3 = vpop.f32.mrf.mxu3  ;;  %v3145_v36 = vpop.f32.mrf.mxu1  ;;  %v5452_v62 = vor.u32 %v6628_v54, %v5451_v37  ;;  %v6052_v46 = vor.u32 %v6778_v7, %v6051_v58  ;;  %v6858_v6 = vld [vmem:[%s10069_s1 + $0x8ac] sm:$0xf0]  ;;  %v6331_v58 = vld [vmem:[%s10069_s1 + $0x838] sm:$0xf] }
 0x2c4   : > { %5037 = vst [vmem:[%s8795_s17] sm:$0xff] %v5029_v53  ;;  %v3146_v22 = vadd.f32 %v3145_v36, %v3096_v27  ;;  %v6372_v53 = vor.u32 %v6858_v6, %v6371_v55  ;;  %v6618_v36 = vld [vmem:[%s10069_s1 + $0x12c] sm:$0xf0] }
 0x2c5   : > { %v8804_v28 = vadd.f32 %v3241_v3, %v3193_v5  ;;  %3475 = vmatpush.bf16.msra.mxu0 %v5452_v62  ;;  %3574 = vmatpush.bf16.msra.mxu2 %v6052_v46  ;;  %v5412_v54 = vor.u32 %v6618_v36, %v5411_v30  ;;  %v6608_v30 = vld [vmem:[%s10069_s1 + $0xdc] sm:$0xf0]  ;;  %v5691_v36 = vld [vmem:[%s10069_s1 + $0x338] sm:$0xf] }
 0x2c6   : > { %3623 = vmatpush.bf16.msra.mxu3 %v6372_v53 }
 0x2c9   : > { %3476 = vmatpush.bf16.msra.mxu0 %v5412_v54  ;;  %v6688_v54 = vld [vmem:[%s10069_s1 + $0x35c] sm:$0xf0] }
 0x2ca   : > { %v3194_v32 = vpop.f32.mrf.mxu2  ;;  %v3099_v1 = vpop.f32.mrf.mxu0 }
 0x2cb   : > { %v3195_v0 = vadd.f32 %v3194_v32, %v3146_v22  ;;  %v3243_v48 = vpop.f32.mrf.mxu3  ;;  %v3148_v60 = vpop.f32.mrf.mxu1  ;;  %v5731_v22 = vld [vmem:[%s10069_s1 + $0x388] sm:$0xf] }
 0x2cc   : > { %v3149_v47 = vadd.f32 %v3148_v60, %v3099_v1  ;;  %v6011_v60 = vld [vmem:[%s10069_s1 + $0x5b8] sm:$0xf] }
 0x2cd   : > { %v8818_v61 = vadd.f32 %v3243_v48, %v3195_v0  ;;  %3294 = vmatmul.bf16.gmra.mxu0 %v7294_v49  ;;  %v5732_v0 = vor.u32 %v6698_v16, %v5731_v22 }
 0x2ce   : > { %3343 = vmatmul.bf16.gmra.mxu1 %v7296_v50 }
 0x2cf   : > { %3392 = vmatmul.bf16.gmra.mxu2 %v7298_v51  ;;  %3525 = vmatpush.bf16.msra.mxu1 %v5732_v0 }
 0x2d0   : > { %3441 = vmatmul.bf16.gmra.mxu3 %v7300_v52 }
 0x2d2   : > { %v3197_v38 = vpop.f32.mrf.mxu2  ;;  %v3101_v18 = vpop.f32.mrf.mxu0 }
 0x2d3   : > { %v3198_v31 = vadd.f32 %v3197_v38, %v3149_v47  ;;  %v3246_v17 = vpop.f32.mrf.mxu3  ;;  %v3150_v5 = vpop.f32.mrf.mxu1  ;;  %v6768_v47 = vld [vmem:[%s10069_s1 + $0x5dc] sm:$0xf0] }
 0x2d4   : > { %v3151_v27 = vadd.f32 %v3150_v5, %v3101_v18  ;;  %v6012_v55 = vor.u32 %v6768_v47, %v6011_v60  ;;  %v6848_v38 = vld [vmem:[%s10069_s1 + $0x85c] sm:$0xf0]  ;;  %v5971_v60 = vld [vmem:[%s10069_s1 + $0x568] sm:$0xf]  ;;  %v6758_v47 = vld [vmem:[%s10069_s1 + $0x58c] sm:$0xf0] }
 0x2d5   : > { %v8836_v3 = vadd.f32 %v3246_v17, %v3198_v31  ;;  %v6332_v17 = vor.u32 %v6848_v38, %v6331_v58  ;;  %v6291_v58 = vld [vmem:[%s10069_s1 + $0x7e8] sm:$0xf]  ;;  %v6838_v38 = vld [vmem:[%s10069_s1 + $0x80c] sm:$0xf0] }
 0x2d6   : > { %3575 = vmatpush.bf16.msra.mxu2 %v6012_v55  ;;  %v5972_v55 = vor.u32 %v6758_v47, %v5971_v60 }
 0x2d7   : > { %3624 = vmatpush.bf16.msra.mxu3 %v6332_v17  ;;  %v6292_v17 = vor.u32 %v6838_v38, %v6291_v58  ;;  %v5931_v58 = vld [vmem:[%s10069_s1 + $0x518] sm:$0xf] }
 0x2da   : > { %v3199_v37 = vpop.f32.mrf.mxu2  ;;  %v3104_v59 = vpop.f32.mrf.mxu0  ;;  %3576 = vmatpush.bf16.msra.mxu2 %v5972_v55  ;;  %v6251_v55 = vld [vmem:[%s10069_s1 + $0x798] sm:$0xf] }
 0x2db   : > { %v3200_v32 = vadd.f32 %v3199_v37, %v3151_v27  ;;  %v3248_v62 = vpop.f32.mrf.mxu3  ;;  %v3153_v48 = vpop.f32.mrf.mxu1  ;;  %v5371_v27 = vld [vmem:[%s10069_s1 + $0xb8] sm:$0xf]  ;;  %3625 = vmatpush.bf16.msra.mxu3 %v6292_v17 }
 0x2dc   : > { %v3154_v23 = vadd.f32 %v3153_v48, %v3104_v59  ;;  %v5372_v37 = vor.u32 %v6608_v30, %v5371_v27  ;;  %v5692_v59 = vor.u32 %v6688_v54, %v5691_v36  ;;  %v5331_v30 = vld [vmem:[%s10069_s1 + $0x68] sm:$0xf]  ;;  %v6598_v36 = vld [vmem:[%s10069_s1 + $0x8c] sm:$0xf0] }
 0x2dd   : > { %v8850_v1 = vadd.f32 %v3248_v62, %v3200_v32  ;;  %3299 = vmatmul.bf16.gmra.mxu0 %v7338_v12  ;;  %v5332_v54 = vor.u32 %v6598_v36, %v5331_v30 }
 0x2de   : > { %3348 = vmatmul.bf16.gmra.mxu1 %v7340_v13  ;;  %3477 = vmatpush.bf16.msra.mxu0 %v5372_v37 }
 0x2df   : > { %3397 = vmatmul.bf16.gmra.mxu2 %v7342_v14  ;;  %3526 = vmatpush.bf16.msra.mxu1 %v5692_v59 }
 0x2e0   : > { %3446 = vmatmul.bf16.gmra.mxu3 %v7344_v15 }
 0x2e2   : > { %v3202_v7 = vpop.f32.mrf.mxu2  ;;  %v3106_v31 = vpop.f32.mrf.mxu0  ;;  %3478 = vmatpush.bf16.msra.mxu0 %v5332_v54  ;;  %v6588_v54 = vld [vmem:[%s10069_s1 + $0x3c] sm:$0xf0] }
 0x2e3   : > { %v3203_v46 = vadd.f32 %v3202_v7, %v3154_v23  ;;  %v3251_v6 = vpop.f32.mrf.mxu3  ;;  %v3155_v18 = vpop.f32.mrf.mxu1 }
 0x2e4   : > { %v3156_v5 = vadd.f32 %v3155_v18, %v3106_v31 }
 0x2e5   : > { %v8868_v53 = vadd.f32 %v3251_v6, %v3203_v46 }
 0x2e7   : > { %10211 = vst [vmem:[#allocation14_spill] sm:$0xff] %v8868_v53 }
 0x2ea   : > { %v3204_v22 = vpop.f32.mrf.mxu2  ;;  %v3109_v62 = vpop.f32.mrf.mxu0 }
 0x2eb   : > { %v3205_v16 = vadd.f32 %v3204_v22, %v3156_v5  ;;  %v3253_v32 = vpop.f32.mrf.mxu3  ;;  %v3158_v0 = vpop.f32.mrf.mxu1  ;;  %v5651_v22 = vld [vmem:[%s10069_s1 + $0x2e8] sm:$0xf] }
 0x2ec   : > { %v3159_v23 = vadd.f32 %v3158_v0, %v3109_v62 }
 0x2ed   : > { %v8882_v48 = vadd.f32 %v3253_v32, %v3205_v16  ;;  %3304 = vmatmul.bf16.gmra.mxu0 %v7382_v40  ;;  %v6678_v16 = vld [vmem:[%s10069_s1 + $0x30c] sm:$0xf0] }
 0x2ee   : > { %3353 = vmatmul.bf16.gmra.mxu1 %v7384_v41  ;;  %v5652_v0 = vor.u32 %v6678_v16, %v5651_v22  ;;  %v5611_v16 = vld [vmem:[%s10069_s1 + $0x298] sm:$0xf] }
 0x2ef   : > { %10212 = vst [vmem:[#allocation15_spill] sm:$0xff] %v8882_v48  ;;  %3402 = vmatmul.bf16.gmra.mxu2 %v7386_v42 }
 0x2f0   : > { %3451 = vmatmul.bf16.gmra.mxu3 %v7388_v43  ;;  %3527 = vmatpush.bf16.msra.mxu1 %v5652_v0 }
 0x2f2   : > { %v3207_v7 = vpop.f32.mrf.mxu2  ;;  %v3111_v31 = vpop.f32.mrf.mxu0 }
 0x2f3   : > { %v3208_v46 = vadd.f32 %v3207_v7, %v3159_v23  ;;  %v3256_v6 = vpop.f32.mrf.mxu3  ;;  %v3160_v18 = vpop.f32.mrf.mxu1  ;;  %v6748_v7 = vld [vmem:[%s10069_s1 + $0x53c] sm:$0xf0] }
 0x2f4   : > { %v3161_v27 = vadd.f32 %v3160_v18, %v3111_v31 }
 0x2f5   : > { %v8900_v5 = vadd.f32 %v3256_v6, %v3208_v46  ;;  %v5932_v46 = vor.u32 %v6748_v7, %v5931_v58  ;;  %v6828_v6 = vld [vmem:[%s10069_s1 + $0x7bc] sm:$0xf0] }
 0x2f7   : > { %10213 = vst [vmem:[#allocation26_spill] sm:$0xff] %v8900_v5  ;;  %3577 = vmatpush.bf16.msra.mxu2 %v5932_v46 }
 0x2fa   : > { %v3209_v37 = vpop.f32.mrf.mxu2  ;;  %v3114_v59 = vpop.f32.mrf.mxu0 }
 0x2fb   : > { %v3210_v32 = vadd.f32 %v3209_v37, %v3161_v27  ;;  %v3258_v62 = vpop.f32.mrf.mxu3  ;;  %v3163_v23 = vpop.f32.mrf.mxu1  ;;  %v6252_v27 = vor.u32 %v6828_v6, %v6251_v55  ;;  %v5291_v37 = vld [vmem:[%s10069_s1 + $0x18] sm:$0xf] }
 0x2fc   : > { %v3164_v47 = vadd.f32 %v3163_v23, %v3114_v59  ;;  %v6668_v59 = vld [vmem:[%s10069_s1 + $0x2bc] sm:$0xf0] }
 0x2fd   : > { %v8914_v60 = vadd.f32 %v3258_v62, %v3210_v32  ;;  %3309 = vmatmul.bf16.gmra.mxu0 %v7426_v8  ;;  %3626 = vmatpush.bf16.msra.mxu3 %v6252_v27  ;;  %v5292_v62 = vor.u32 %v6588_v54, %v5291_v37  ;;  %v5612_v58 = vor.u32 %v6668_v59, %v5611_v16 }
 0x2fe   : > { %3358 = vmatmul.bf16.gmra.mxu1 %v7428_v9 }
 0x2ff   : > { %10214 = vst [vmem:[#allocation16_spill] sm:$0xff] %v8914_v60  ;;  %3407 = vmatmul.bf16.gmra.mxu2 %v7430_v10  ;;  %3479 = vmatpush.bf16.msra.mxu0 %v5292_v62 }
 0x300   : > { %3456 = vmatmul.bf16.gmra.mxu3 %v7432_v11  ;;  %3528 = vmatpush.bf16.msra.mxu1 %v5612_v58 }
 0x302   : > { %v3212_v38 = vpop.f32.mrf.mxu2  ;;  %v3116_v18 = vpop.f32.mrf.mxu0 }
 0x303   : > { %v3213_v31 = vadd.f32 %v3212_v38, %v3164_v47  ;;  %v3261_v17 = vpop.f32.mrf.mxu3  ;;  %v3165_v30 = vpop.f32.mrf.mxu1 }
 0x304   : > { %v3166_v22 = vadd.f32 %v3165_v30, %v3116_v18 }
 0x305   : > { %v8932_v36 = vadd.f32 %v3261_v17, %v3213_v31 }
 0x307   : > { %10215 = vst [vmem:[#allocation17_spill] sm:$0xff] %v8932_v36 }
 0x30a   : > { %v3214_v32 = vpop.f32.mrf.mxu2  ;;  %v3119_v47 = vpop.f32.mrf.mxu0 }
 0x30b   : > { %v3215_v0 = vadd.f32 %v3214_v32, %v3166_v22  ;;  %v3263_v23 = vpop.f32.mrf.mxu3  ;;  %v3168_v7 = vpop.f32.mrf.mxu1 }
 0x30c   : > { %v3169_v38 = vadd.f32 %v3168_v7, %v3119_v47  ;;  %v6893_v47 = vld [vmem:[%s10069_s1 + $0x9cc] sm:$0xf]  ;;  %v6533_v7 = vld [vmem:[%s10069_s1 + $0x9f0] sm:$0xf0] }
 0x30d   : > { %v8946_v55 = vadd.f32 %v3263_v23, %v3215_v0  ;;  %3314 = vmatmul.bf16.gmra.mxu0 %v7470_v44  ;;  %v6813_v0 = vld [vmem:[%s10069_s1 + $0x74c] sm:$0xf]  ;;  %v6213_v23 = vld [vmem:[%s10069_s1 + $0x770] sm:$0xf0] }
 0x30e   : > { %3363 = vmatmul.bf16.gmra.mxu1 %v7472_v45  ;;  %v6216_v58 = vor.u32 %v6813_v0, %v6213_v23 }
 0x30f   : > { %10216 = vst [vmem:[#allocation18_spill] sm:$0xff] %v8946_v55  ;;  %3412 = vmatmul.bf16.gmra.mxu2 %v10189_v57 }
 0x310   : > { %3461 = vmatmul.bf16.gmra.mxu3 %v10191_v56  ;;  %3766 = vmatpush.bf16.msrb.mxu2 %v6216_v58 }
 0x312   : > { %v3217_v46 = vpop.f32.mrf.mxu2  ;;  %v3121_v17 = vpop.f32.mrf.mxu0 }
 0x313   : > { %v3218_v6 = vadd.f32 %v3217_v46, %v3169_v38  ;;  %v3266_v31 = vpop.f32.mrf.mxu3  ;;  %v3170_v18 = vpop.f32.mrf.mxu1  ;;  %v6653_v38 = vld [vmem:[%s10069_s1 + $0x24c] sm:$0xf]  ;;  %v5573_v46 = vld [vmem:[%s10069_s1 + $0x270] sm:$0xf0] }
 0x314   : > { %v3171_v30 = vadd.f32 %v3170_v18, %v3121_v17  ;;  %v6733_v17 = vld [vmem:[%s10069_s1 + $0x4cc] sm:$0xf]  ;;  %v5893_v18 = vld [vmem:[%s10069_s1 + $0x4f0] sm:$0xf0] }
 0x315   : > { %v8952_v27 = vadd.f32 %v3266_v31, %v3218_v6  ;;  %v6536_v6 = vor.u32 %v6893_v47, %v6533_v7  ;;  %v5576_v31 = vor.u32 %v6653_v38, %v5573_v46 }
 0x317   : > { %10217 = vst [vmem:[#allocation19_spill] sm:$0xff] %v8952_v27  ;;  %3815 = vmatpush.bf16.msrb.mxu3 %v6536_v6  ;;  %3668 = vmatpush.bf16.msrb.mxu0 %v5576_v31  ;;  %v6723_v6 = vld [vmem:[%s10069_s1 + $0x47c] sm:$0xf] }
 0x31a   : > { %v3219_v22 = vpop.f32.mrf.mxu2  ;;  %v3124_v16 = vpop.f32.mrf.mxu0 }
 0x31b   : > { %v3220_v37 = vadd.f32 %v3219_v22, %v3171_v30  ;;  %v3268_v54 = vpop.f32.mrf.mxu3  ;;  %v3173_v32 = vpop.f32.mrf.mxu1  ;;  %v6803_v30 = vld [vmem:[%s10069_s1 + $0x6fc] sm:$0xf] }
 0x31c   : > { %v3174_v59 = vadd.f32 %v3173_v32, %v3124_v16  ;;  %v6883_v16 = vld [vmem:[%s10069_s1 + $0x97c] sm:$0xf]  ;;  %v6493_v32 = vld [vmem:[%s10069_s1 + $0x9a0] sm:$0xf0] }
 0x31d   : > { %v8954_v62 = vadd.f32 %v3268_v54, %v3220_v37  ;;  %3319 = vmatmul.bf16.gmra.mxu0 %v7514_v20  ;;  %v5896_v37 = vor.u32 %v6733_v17, %v5893_v18  ;;  %v6173_v54 = vld [vmem:[%s10069_s1 + $0x720] sm:$0xf0]  ;;  %v6496_v58 = vor.u32 %v6883_v16, %v6493_v32  ;;  %v6643_v18 = vld [vmem:[%s10069_s1 + $0x1fc] sm:$0xf] }
 0x31e   : > { %3368 = vmatmul.bf16.gmra.mxu1 %v7516_v21  ;;  %v6176_v7 = vor.u32 %v6803_v30, %v6173_v54 }
 0x31f   : > { %10218 = vst [vmem:[#allocation20_spill] sm:$0xff] %v8954_v62  ;;  %3417 = vmatmul.bf16.gmra.mxu2 %v10200_v19  ;;  %3717 = vmatpush.bf16.msrb.mxu1 %v5896_v37 }
 0x320   : > { %3466 = vmatmul.bf16.gmra.mxu3 %v10202_v33  ;;  %3767 = vmatpush.bf16.msrb.mxu2 %v6176_v7  ;;  %v6793_v7 = vld [vmem:[%s10069_s1 + $0x6ac] sm:$0xf] }
 0x321   : > { %3816 = vmatpush.bf16.msrb.mxu3 %v6496_v58  ;;  %v6133_v58 = vld [vmem:[%s10069_s1 + $0x6d0] sm:$0xf0] }
 0x322   : > { %v3222_v22 = vpop.f32.mrf.mxu2  ;;  %v3126_v47 = vpop.f32.mrf.mxu0 }
 0x323   : > { %v3223_v0 = vadd.f32 %v3222_v22, %v3174_v59  ;;  %v3271_v23 = vpop.f32.mrf.mxu3  ;;  %v3175_v38 = vpop.f32.mrf.mxu1  ;;  %v5533_v59 = vld [vmem:[%s10069_s1 + $0x220] sm:$0xf0] }
 0x324   : > { %v3176_v17 = vadd.f32 %v3175_v38, %v3126_v47  ;;  %v5536_v30 = vor.u32 %v6643_v18, %v5533_v59  ;;  %v5853_v22 = vld [vmem:[%s10069_s1 + $0x4a0] sm:$0xf0]  ;;  %v6873_v18 = vld [vmem:[%s10069_s1 + $0x92c] sm:$0xf]  ;;  %v6453_v59 = vld [vmem:[%s10069_s1 + $0x950] sm:$0xf0] }
 0x325   : > { %v8996_v46 = vadd.f32 %v3271_v23, %v3223_v0  ;;  %v5856_v32 = vor.u32 %v6723_v6, %v5853_v22  ;;  %v6456_v22 = vor.u32 %v6873_v18, %v6453_v59 }
 0x326   : > { %3669 = vmatpush.bf16.msrb.mxu0 %v5536_v30 }
 0x327   : > { %10219 = vst [vmem:[#allocation21_spill] sm:$0xff] %v8996_v46  ;;  %3718 = vmatpush.bf16.msrb.mxu1 %v5856_v32  ;;  %3817 = vmatpush.bf16.msrb.mxu3 %v6456_v22 }
 0x32a   : > { %v3224_v31 = vpop.f32.mrf.mxu2  ;;  %v3285_v16 = vpop.f32.mrf.mxu0 }
 0x32b   : > { %v3225_v37 = vadd.f32 %v3224_v31, %v3176_v17  ;;  %v3273_v54 = vpop.f32.mrf.mxu3  ;;  %v3334_v0 = vpop.f32.mrf.mxu1  ;;  %v6136_v17 = vor.u32 %v6793_v7, %v6133_v58  ;;  %v5493_v7 = vld [vmem:[%s10069_s1 + $0x1d0] sm:$0xf0] }
 0x32c   : > { %v3335_v47 = vadd.f32 %v3334_v0, %v3285_v16  ;;  %v6633_v0 = vld [vmem:[%s10069_s1 + $0x1ac] sm:$0xf] }
 0x32d   : > { %v9010_v23 = vadd.f32 %v3273_v54, %v3225_v37  ;;  %3480 = vmatmul.bf16.vlgmr.msra.gmra.mxu0 %v10203_v34  ;;  %3768 = vmatpush.bf16.msrb.mxu2 %v6136_v17  ;;  %v5496_v58 = vor.u32 %v6633_v0, %v5493_v7  ;;  %v5813_v17 = vld [vmem:[%s10069_s1 + $0x450] sm:$0xf0] }
 0x32e   : > { %3529 = vmatmul.bf16.vlgmr.msra.gmra.mxu1 %v10204_v35 }
 0x32f   : > { %10220 = vst [vmem:[#allocation22_spill] sm:$0xff] %v9010_v23  ;;  %3578 = vmatmul.bf16.vlgmr.msra.gmra.mxu2 %v10206_v2  ;;  %3670 = vmatpush.bf16.msrb.mxu0 %v5496_v58  ;;  %v6093_v58 = vld [vmem:[%s10069_s1 + $0x680] sm:$0xf0] }
 0x330   : > { %3627 = vmatmul.bf16.vlgmr.msra.gmra.mxu3 %v10207_v29 }
 0x332   : > { %v3383_v38 = vpop.f32.mrf.mxu2  ;;  %v3287_v30 = vpop.f32.mrf.mxu0 }
 0x333   : > { %v3384_v6 = vadd.f32 %v3383_v38, %v3335_v47  ;;  %v3432_v31 = vpop.f32.mrf.mxu3  ;;  %v3336_v37 = vpop.f32.mrf.mxu1  ;;  %v6713_v38 = vld [vmem:[%s10069_s1 + $0x42c] sm:$0xf] }
 0x334   : > { %v3337_v32 = vadd.f32 %v3336_v37, %v3287_v30 }
 0x335   : > { %v3433_v54 = vadd.f32 %v3432_v31, %v3384_v6  ;;  %v5816_v31 = vor.u32 %v6713_v38, %v5813_v17 }
 0x337   : > { %v4258_v16 = vpack.c.bf16 %v3433_v54, %v8758_v39  ;;  %3719 = vmatpush.bf16.msrb.mxu1 %v5816_v31  ;;  %v4631_v37 = vmul.f32 %v3433_v54, %v3433_v54 }
 0x339   : > { %4338 = vst [vmem:[%s7826_s25 + $0x10] sm:$0xff] %v4258_v16 }
 0x33a   : > { %v3385_v47 = vpop.f32.mrf.mxu2  ;;  %v3290_v6 = vpop.f32.mrf.mxu0 }
 0x33b   : > { %v3386_v18 = vadd.f32 %v3385_v47, %v3337_v32  ;;  %v3434_v59 = vpop.f32.mrf.mxu3  ;;  %v3339_v30 = vpop.f32.mrf.mxu1  ;;  %v6783_v47 = vld [vmem:[%s10069_s1 + $0x65c] sm:$0xf] }
 0x33c   : > { %v3340_v39 = vadd.f32 %v3339_v30, %v3290_v6  ;;  %v6096_v17 = vor.u32 %v6783_v47, %v6093_v58 }
 0x33d   : > { %v3435_v22 = vadd.f32 %v3434_v59, %v3386_v18  ;;  %3485 = vmatmul.bf16.gmra.mxu0 %v7250_v24  ;;  %v6413_v18 = vld [vmem:[%s10069_s1 + $0x900] sm:$0xf0] }
 0x33e   : > { %3534 = vmatmul.bf16.gmra.mxu1 %v7252_v25  ;;  %3769 = vmatpush.bf16.msrb.mxu2 %v6096_v17  ;;  %v6703_v17 = vld [vmem:[%s10069_s1 + $0x3dc] sm:$0xf] }
 0x33f   : > { %v4263_v16 = vpack.c.bf16 %v3435_v22, %v8772_v4  ;;  %v4521_v0 = vadd.f32 %v3435_v22, %v3433_v54  ;;  %v4641_v7 = vmul.f32 %v3435_v22, %v3435_v22  ;;  %3583 = vmatmul.bf16.gmra.mxu2 %v7254_v26  ;;  %v6863_v54 = vld [vmem:[%s10069_s1 + $0x8dc] sm:$0xf] }
 0x340   : > { %3632 = vmatmul.bf16.gmra.mxu3 %v10180_v63  ;;  %v6416_v30 = vor.u32 %v6863_v54, %v6413_v18  ;;  %v6623_v63 = vld [vmem:[%s10069_s1 + $0x15c] sm:$0xf] }
 0x341   : > { %4343 = vst [vmem:[%s7826_s25 + $0x38] sm:$0xff] %v4263_v16  ;;  %v4891_v32 = vadd.f32 %v4641_v7, %v4631_v37 }
 0x342   : > { %v3388_v38 = vpop.f32.mrf.mxu2  ;;  %v3292_v31 = vpop.f32.mrf.mxu0  ;;  %3818 = vmatpush.bf16.msrb.mxu3 %v6416_v30 }
 0x343   : > { %v3389_v59 = vadd.f32 %v3388_v38, %v3340_v39  ;;  %v3437_v6 = vpop.f32.mrf.mxu3  ;;  %v3341_v22 = vpop.f32.mrf.mxu1  ;;  %v5453_v39 = vld [vmem:[%s10069_s1 + $0x180] sm:$0xf0] }
 0x344   : > { %v3342_v4 = vadd.f32 %v3341_v22, %v3292_v31  ;;  %v5456_v54 = vor.u32 %v6623_v63, %v5453_v39  ;;  %v6053_v39 = vld [vmem:[%s10069_s1 + $0x630] sm:$0xf0] }
 0x345   : > { %v3438_v37 = vadd.f32 %v3437_v6, %v3389_v59 }
 0x346   : > { %3671 = vmatpush.bf16.msrb.mxu0 %v5456_v54 }
 0x347   : > { %v4268_v16 = vpack.c.bf16 %v3438_v37, %v8804_v28  ;;  %v4522_v7 = vadd.f32 %v4521_v0, %v3438_v37  ;;  %v4651_v47 = vmul.f32 %v3438_v37, %v3438_v37  ;;  %v5773_v0 = vld [vmem:[%s10069_s1 + $0x400] sm:$0xf0] }
 0x348   : > { %v5776_v6 = vor.u32 %v6703_v17, %v5773_v0  ;;  %v6373_v17 = vld [vmem:[%s10069_s1 + $0x8b0] sm:$0xf0] }
 0x349   : > { %4348 = vst [vmem:[%s7826_s25 + $0x60] sm:$0xff] %v4268_v16  ;;  %v4892_v58 = vadd.f32 %v4891_v32, %v4651_v47  ;;  %v6773_v47 = vld [vmem:[%s10069_s1 + $0x60c] sm:$0xf] }
 0x34a   : > { %v3390_v38 = vpop.f32.mrf.mxu2  ;;  %v3295_v59 = vpop.f32.mrf.mxu0  ;;  %3720 = vmatpush.bf16.msrb.mxu1 %v5776_v6  ;;  %v6056_v54 = vor.u32 %v6773_v47, %v6053_v39  ;;  %v6613_v39 = vld [vmem:[%s10069_s1 + $0x10c] sm:$0xf] }
 0x34b   : > { %v3391_v32 = vadd.f32 %v3390_v38, %v3342_v4  ;;  %v3439_v18 = vpop.f32.mrf.mxu3  ;;  %v3344_v31 = vpop.f32.mrf.mxu1 }
 0x34c   : > { %v3345_v16 = vadd.f32 %v3344_v31, %v3295_v59  ;;  %3770 = vmatpush.bf16.msrb.mxu2 %v6056_v54  ;;  %v6693_v54 = vld [vmem:[%s10069_s1 + $0x38c] sm:$0xf] }
 0x34d   : > { %v3440_v30 = vadd.f32 %v3439_v18, %v3391_v32  ;;  %3490 = vmatmul.bf16.gmra.mxu0 %v7294_v49 }
 0x34e   : > { %3539 = vmatmul.bf16.gmra.mxu1 %v7296_v50 }
 0x34f   : > { %v4273_v63 = vpack.c.bf16 %v3440_v30, %v8818_v61  ;;  %v4523_v22 = vadd.f32 %v4522_v7, %v3440_v30  ;;  %v4661_v37 = vmul.f32 %v3440_v30, %v3440_v30  ;;  %3588 = vmatmul.bf16.gmra.mxu2 %v7298_v51  ;;  %v6853_v7 = vld [vmem:[%s10069_s1 + $0x88c] sm:$0xf] }
 0x350   : > { %3637 = vmatmul.bf16.gmra.mxu3 %v7300_v52  ;;  %v6376_v18 = vor.u32 %v6853_v7, %v6373_v17 }
 0x351   : > { %4353 = vst [vmem:[%s7826_s25 + $0x88] sm:$0xff] %v4273_v63  ;;  %v4893_v4 = vadd.f32 %v4892_v58, %v4661_v37 }
 0x352   : > { %v3393_v38 = vpop.f32.mrf.mxu2  ;;  %v3297_v32 = vpop.f32.mrf.mxu0  ;;  %3819 = vmatpush.bf16.msrb.mxu3 %v6376_v18 }
 0x353   : > { %v3394_v58 = vadd.f32 %v3393_v38, %v3345_v16  ;;  %v3442_v0 = vpop.f32.mrf.mxu3  ;;  %v3346_v59 = vpop.f32.mrf.mxu1  ;;  %v5413_v16 = vld [vmem:[%s10069_s1 + $0x130] sm:$0xf0] }
 0x354   : > { %v3347_v47 = vadd.f32 %v3346_v59, %v3297_v32  ;;  %v5416_v7 = vor.u32 %v6613_v39, %v5413_v16  ;;  %v6763_v39 = vld [vmem:[%s10069_s1 + $0x5bc] sm:$0xf]  ;;  %v6013_v16 = vld [vmem:[%s10069_s1 + $0x5e0] sm:$0xf0] }
 0x355   : > { %v3443_v6 = vadd.f32 %v3442_v0, %v3394_v58 }
 0x356   : > { %3672 = vmatpush.bf16.msrb.mxu0 %v5416_v7  ;;  %v6016_v7 = vor.u32 %v6763_v39, %v6013_v16  ;;  %v6603_v16 = vld [vmem:[%s10069_s1 + $0xbc] sm:$0xf] }
 0x357   : > { %v4278_v31 = vpack.c.bf16 %v3443_v6, %v8836_v3  ;;  %v4524_v30 = vadd.f32 %v4523_v22, %v3443_v6  ;;  %v4671_v63 = vmul.f32 %v3443_v6, %v3443_v6  ;;  %v5733_v22 = vld [vmem:[%s10069_s1 + $0x3b0] sm:$0xf0] }
 0x358   : > { %v5736_v0 = vor.u32 %v6693_v54, %v5733_v22  ;;  %v6333_v54 = vld [vmem:[%s10069_s1 + $0x860] sm:$0xf0]  ;;  %3771 = vmatpush.bf16.msrb.mxu2 %v6016_v7  ;;  %v6683_v7 = vld [vmem:[%s10069_s1 + $0x33c] sm:$0xf] }
 0x359   : > { %4358 = vst [vmem:[%s7826_s25 + $0xb0] sm:$0xff] %v4278_v31  ;;  %v4894_v37 = vadd.f32 %v4893_v4, %v4671_v63 }
 0x35a   : > { %v3395_v38 = vpop.f32.mrf.mxu2  ;;  %v3300_v58 = vpop.f32.mrf.mxu0  ;;  %3721 = vmatpush.bf16.msrb.mxu1 %v5736_v0 }
 0x35b   : > { %v3396_v4 = vadd.f32 %v3395_v38, %v3347_v47  ;;  %v3444_v17 = vpop.f32.mrf.mxu3  ;;  %v3349_v32 = vpop.f32.mrf.mxu1 }
 0x35c   : > { %v3350_v63 = vadd.f32 %v3349_v32, %v3300_v58 }
 0x35d   : > { %v3445_v18 = vadd.f32 %v3444_v17, %v3396_v4  ;;  %3495 = vmatmul.bf16.gmra.mxu0 %v7338_v12 }
 0x35e   : > { %3544 = vmatmul.bf16.gmra.mxu1 %v7340_v13 }
 0x35f   : > { %v4283_v59 = vpack.c.bf16 %v3445_v18, %v8850_v1  ;;  %v4525_v6 = vadd.f32 %v4524_v30, %v3445_v18  ;;  %v4681_v31 = vmul.f32 %v3445_v18, %v3445_v18  ;;  %3593 = vmatmul.bf16.gmra.mxu2 %v7342_v14  ;;  %v6843_v30 = vld [vmem:[%s10069_s1 + $0x83c] sm:$0xf] }
 0x360   : > { %3642 = vmatmul.bf16.gmra.mxu3 %v7344_v15  ;;  %v6336_v17 = vor.u32 %v6843_v30, %v6333_v54 }
 0x361   : > { %4363 = vst [vmem:[%s7826_s25 + $0xd8] sm:$0xff] %v4283_v59  ;;  %v4895_v47 = vadd.f32 %v4894_v37, %v4681_v31 }
 0x362   : > { %v3398_v38 = vpop.f32.mrf.mxu2  ;;  %v3302_v4 = vpop.f32.mrf.mxu0  ;;  %3820 = vmatpush.bf16.msrb.mxu3 %v6336_v17 }
 0x363   : > { %v3399_v37 = vadd.f32 %v3398_v38, %v3350_v63  ;;  %v3447_v22 = vpop.f32.mrf.mxu3  ;;  %v3351_v58 = vpop.f32.mrf.mxu1  ;;  %v5373_v63 = vld [vmem:[%s10069_s1 + $0xe0] sm:$0xf0] }
 0x364   : > { %v3352_v39 = vadd.f32 %v3351_v58, %v3302_v4  ;;  %v5376_v30 = vor.u32 %v6603_v16, %v5373_v63  ;;  %v6753_v16 = vld [vmem:[%s10069_s1 + $0x56c] sm:$0xf]  ;;  %v5973_v63 = vld [vmem:[%s10069_s1 + $0x590] sm:$0xf0] }
 0x365   : > { %v3448_v0 = vadd.f32 %v3447_v22, %v3399_v37 }
 0x366   : > { %3673 = vmatpush.bf16.msrb.mxu0 %v5376_v30  ;;  %v5976_v30 = vor.u32 %v6753_v16, %v5973_v63  ;;  %v6593_v63 = vld [vmem:[%s10069_s1 + $0x6c] sm:$0xf] }
 0x367   : > { %v4288_v32 = vpack.c.bf16 %v3448_v0, %v8868_v53  ;;  %v4526_v18 = vadd.f32 %v4525_v6, %v3448_v0  ;;  %v4691_v59 = vmul.f32 %v3448_v0, %v3448_v0  ;;  %v5693_v6 = vld [vmem:[%s10069_s1 + $0x360] sm:$0xf0] }
 0x368   : > { %v5696_v22 = vor.u32 %v6683_v7, %v5693_v6  ;;  %v6293_v7 = vld [vmem:[%s10069_s1 + $0x810] sm:$0xf0]  ;;  %3772 = vmatpush.bf16.msrb.mxu2 %v5976_v30  ;;  %v6673_v30 = vld [vmem:[%s10069_s1 + $0x2ec] sm:$0xf] }
 0x369   : > { %4368 = vst [vmem:[%s7826_s25 + $0x100] sm:$0xff] %v4288_v32  ;;  %v4896_v31 = vadd.f32 %v4895_v47, %v4691_v59 }
 0x36a   : > { %v3400_v38 = vpop.f32.mrf.mxu2  ;;  %v3305_v37 = vpop.f32.mrf.mxu0  ;;  %3722 = vmatpush.bf16.msrb.mxu1 %v5696_v22 }
 0x36b   : > { %v3401_v47 = vadd.f32 %v3400_v38, %v3352_v39  ;;  %v3449_v54 = vpop.f32.mrf.mxu3  ;;  %v3354_v4 = vpop.f32.mrf.mxu1 }
 0x36c   : > { %v3355_v59 = vadd.f32 %v3354_v4, %v3305_v37 }
 0x36d   : > { %v3450_v17 = vadd.f32 %v3449_v54, %v3401_v47  ;;  %3500 = vmatmul.bf16.gmra.mxu0 %v7382_v40 }
 0x36e   : > { %3549 = vmatmul.bf16.gmra.mxu1 %v7384_v41 }
 0x36f   : > { %v4293_v58 = vpack.c.bf16 %v3450_v17, %v8882_v48  ;;  %v4527_v0 = vadd.f32 %v4526_v18, %v3450_v17  ;;  %v4701_v32 = vmul.f32 %v3450_v17, %v3450_v17  ;;  %3598 = vmatmul.bf16.gmra.mxu2 %v7386_v42  ;;  %v6833_v18 = vld [vmem:[%s10069_s1 + $0x7ec] sm:$0xf] }
 0x370   : > { %3647 = vmatmul.bf16.gmra.mxu3 %v7388_v43  ;;  %v6296_v54 = vor.u32 %v6833_v18, %v6293_v7 }
 0x371   : > { %4373 = vst [vmem:[%s7826_s25 + $0x128] sm:$0xff] %v4293_v58  ;;  %v4897_v39 = vadd.f32 %v4896_v31, %v4701_v32 }
 0x372   : > { %v3403_v38 = vpop.f32.mrf.mxu2  ;;  %v3307_v47 = vpop.f32.mrf.mxu0  ;;  %3821 = vmatpush.bf16.msrb.mxu3 %v6296_v54 }
 0x373   : > { %v3404_v31 = vadd.f32 %v3403_v38, %v3355_v59  ;;  %v3452_v6 = vpop.f32.mrf.mxu3  ;;  %v3356_v37 = vpop.f32.mrf.mxu1  ;;  %v5333_v59 = vld [vmem:[%s10069_s1 + $0x90] sm:$0xf0] }
 0x374   : > { %v3357_v16 = vadd.f32 %v3356_v37, %v3307_v47  ;;  %v5336_v18 = vor.u32 %v6593_v63, %v5333_v59  ;;  %v6743_v63 = vld [vmem:[%s10069_s1 + $0x51c] sm:$0xf]  ;;  %v5933_v59 = vld [vmem:[%s10069_s1 + $0x540] sm:$0xf0] }
 0x375   : > { %v3453_v22 = vadd.f32 %v3452_v6, %v3404_v31 }
 0x376   : > { %3674 = vmatpush.bf16.msrb.mxu0 %v5336_v18  ;;  %v5936_v18 = vor.u32 %v6743_v63, %v5933_v59  ;;  %v6583_v59 = vld [vmem:[%s10069_s1 + $0x1c] sm:$0xf] }
 0x377   : > { %v4298_v4 = vpack.c.bf16 %v3453_v22, %v8900_v5  ;;  %v4528_v17 = vadd.f32 %v4527_v0, %v3453_v22  ;;  %v4711_v58 = vmul.f32 %v3453_v22, %v3453_v22  ;;  %v5653_v0 = vld [vmem:[%s10069_s1 + $0x310] sm:$0xf0] }
 0x378   : > { %v5656_v6 = vor.u32 %v6673_v30, %v5653_v0  ;;  %v6253_v30 = vld [vmem:[%s10069_s1 + $0x7c0] sm:$0xf0]  ;;  %3773 = vmatpush.bf16.msrb.mxu2 %v5936_v18  ;;  %v6663_v18 = vld [vmem:[%s10069_s1 + $0x29c] sm:$0xf] }
 0x379   : > { %4378 = vst [vmem:[%s7826_s25 + $0x150] sm:$0xff] %v4298_v4  ;;  %v4898_v32 = vadd.f32 %v4897_v39, %v4711_v58 }
 0x37a   : > { %v3405_v38 = vpop.f32.mrf.mxu2  ;;  %v3310_v31 = vpop.f32.mrf.mxu0  ;;  %3723 = vmatpush.bf16.msrb.mxu1 %v5656_v6 }
 0x37b   : > { %v3406_v39 = vadd.f32 %v3405_v38, %v3357_v16  ;;  %v3454_v7 = vpop.f32.mrf.mxu3  ;;  %v3359_v47 = vpop.f32.mrf.mxu1 }
 0x37c   : > { %v3360_v58 = vadd.f32 %v3359_v47, %v3310_v31 }
 0x37d   : > { %v3455_v54 = vadd.f32 %v3454_v7, %v3406_v39  ;;  %3505 = vmatmul.bf16.gmra.mxu0 %v7426_v8 }
 0x37e   : > { %3554 = vmatmul.bf16.gmra.mxu1 %v7428_v9 }
 0x37f   : > { %v4303_v37 = vpack.c.bf16 %v3455_v54, %v8914_v60  ;;  %v4529_v22 = vadd.f32 %v4528_v17, %v3455_v54  ;;  %v4721_v4 = vmul.f32 %v3455_v54, %v3455_v54  ;;  %3603 = vmatmul.bf16.gmra.mxu2 %v7430_v10  ;;  %v6823_v17 = vld [vmem:[%s10069_s1 + $0x79c] sm:$0xf] }
 0x380   : > { %3652 = vmatmul.bf16.gmra.mxu3 %v7432_v11  ;;  %v6256_v7 = vor.u32 %v6823_v17, %v6253_v30 }
 0x381   : > { %4383 = vst [vmem:[%s7826_s25 + $0x178] sm:$0xff] %v4303_v37  ;;  %v4899_v16 = vadd.f32 %v4898_v32, %v4721_v4 }
 0x382   : > { %v3408_v38 = vpop.f32.mrf.mxu2  ;;  %v3312_v39 = vpop.f32.mrf.mxu0  ;;  %3822 = vmatpush.bf16.msrb.mxu3 %v6256_v7 }
 0x383   : > { %v3409_v32 = vadd.f32 %v3408_v38, %v3360_v58  ;;  %v3457_v0 = vpop.f32.mrf.mxu3  ;;  %v3361_v31 = vpop.f32.mrf.mxu1  ;;  %v5293_v58 = vld [vmem:[%s10069_s1 + $0x40] sm:$0xf0] }
 0x384   : > { %v3362_v63 = vadd.f32 %v3361_v31, %v3312_v39  ;;  %v5296_v17 = vor.u32 %v6583_v59, %v5293_v58 }
 0x385   : > { %v3458_v6 = vadd.f32 %v3457_v0, %v3409_v32 }
 0x386   : > { %3675 = vmatpush.bf16.msrb.mxu0 %v5296_v17 }
 0x387   : > { %v4308_v47 = vpack.c.bf16 %v3458_v6, %v8932_v36  ;;  %v4530_v54 = vadd.f32 %v4529_v22, %v3458_v6  ;;  %v4731_v37 = vmul.f32 %v3458_v6, %v3458_v6  ;;  %v5613_v22 = vld [vmem:[%s10069_s1 + $0x2c0] sm:$0xf0] }
 0x388   : > { %v5616_v0 = vor.u32 %v6663_v18, %v5613_v22 }
 0x389   : > { %4388 = vst [vmem:[%s7826_s25 + $0x1a0] sm:$0xff] %v4308_v47  ;;  %v4900_v4 = vadd.f32 %v4899_v16, %v4731_v37 }
 0x38a   : > { %v3410_v38 = vpop.f32.mrf.mxu2  ;;  %v3315_v32 = vpop.f32.mrf.mxu0  ;;  %3724 = vmatpush.bf16.msrb.mxu1 %v5616_v0 }
 0x38b   : > { %v3411_v16 = vadd.f32 %v3410_v38, %v3362_v63  ;;  %v3459_v30 = vpop.f32.mrf.mxu3  ;;  %v3364_v39 = vpop.f32.mrf.mxu1 }
 0x38c   : > { %v3365_v37 = vadd.f32 %v3364_v39, %v3315_v32 }
 0x38d   : > { %v3460_v7 = vadd.f32 %v3459_v30, %v3411_v16  ;;  %3510 = vmatmul.bf16.gmra.mxu0 %v7470_v44 }
 0x38e   : > { %3559 = vmatmul.bf16.gmra.mxu1 %v7472_v45 }
 0x38f   : > { %v4313_v31 = vpack.c.bf16 %v3460_v7, %v8946_v55  ;;  %v4531_v6 = vadd.f32 %v4530_v54, %v3460_v7  ;;  %v4741_v47 = vmul.f32 %v3460_v7, %v3460_v7  ;;  %3608 = vmatmul.bf16.gmra.mxu2 %v10189_v57 }
 0x390   : > { %3657 = vmatmul.bf16.gmra.mxu3 %v10191_v56 }
 0x391   : > { %4393 = vst [vmem:[%s7826_s25 + $0x1c8] sm:$0xff] %v4313_v31  ;;  %v4901_v63 = vadd.f32 %v4900_v4, %v4741_v47 }
 0x392   : > { %v3413_v59 = vpop.f32.mrf.mxu2  ;;  %v3317_v17 = vpop.f32.mrf.mxu0 }
 0x393   : > { %v3414_v58 = vadd.f32 %v3413_v59, %v3365_v37  ;;  %v3462_v38 = vpop.f32.mrf.mxu3  ;;  %v3366_v18 = vpop.f32.mrf.mxu1 }
 0x394   : > { %v3367_v32 = vadd.f32 %v3366_v18, %v3317_v17  ;;  %v6539_v17 = vld [vmem:[%s10069_s1 + $0x9d0] sm:$0xf] }
 0x395   : > { %v3463_v22 = vadd.f32 %v3462_v38, %v3414_v58  ;;  %v6819_v38 = vld [vmem:[%s10069_s1 + $0x774] sm:$0xf0] }
 0x397   : > { %v4318_v16 = vpack.c.bf16 %v3463_v22, %v8952_v27  ;;  %v4532_v30 = vadd.f32 %v4531_v6, %v3463_v22  ;;  %v4751_v0 = vmul.f32 %v3463_v22, %v3463_v22 }
 0x399   : > { %4398 = vst [vmem:[%s7826_s25 + $0x1f0] sm:$0xff] %v4318_v16  ;;  %v4902_v54 = vadd.f32 %v4901_v63, %v4751_v0  ;;  %v5579_v0 = vld [vmem:[%s10069_s1 + $0x250] sm:$0xf] }
 0x39a   : > { %v3415_v39 = vpop.f32.mrf.mxu2  ;;  %v3320_v36 = vpop.f32.mrf.mxu0 }
 0x39b   : > { %v3416_v7 = vadd.f32 %v3415_v39, %v3367_v32  ;;  %v3464_v55 = vpop.f32.mrf.mxu3  ;;  %v3369_v31 = vpop.f32.mrf.mxu1 }
 0x39c   : > { %v3370_v6 = vadd.f32 %v3369_v31, %v3320_v36  ;;  %v5899_v31 = vld [vmem:[%s10069_s1 + $0x4d0] sm:$0xf] }
 0x39d   : > { %v3465_v4 = vadd.f32 %v3464_v55, %v3416_v7  ;;  %3515 = vmatmul.bf16.gmra.mxu0 %v7514_v20  ;;  %v6219_v55 = vld [vmem:[%s10069_s1 + $0x750] sm:$0xf] }
 0x39e   : > { %3564 = vmatmul.bf16.gmra.mxu1 %v7516_v21  ;;  %v6220_v16 = vor.u32 %v6819_v38, %v6219_v55  ;;  %v6499_v55 = vld [vmem:[%s10069_s1 + $0x980] sm:$0xf]  ;;  %v6889_v38 = vld [vmem:[%s10069_s1 + $0x9a4] sm:$0xf0] }
 0x39f   : > { %v4323_v47 = vpack.c.bf16 %v3465_v4, %v8954_v62  ;;  %v4533_v37 = vadd.f32 %v4532_v30, %v3465_v4  ;;  %v4761_v59 = vmul.f32 %v3465_v4, %v3465_v4  ;;  %3613 = vmatmul.bf16.gmra.mxu2 %v10200_v19  ;;  %v6899_v30 = vld [vmem:[%s10069_s1 + $0x9f4] sm:$0xf0] }
 0x3a0   : > { %3662 = vmatmul.bf16.gmra.mxu3 %v10202_v33  ;;  %v6540_v39 = vor.u32 %v6899_v30, %v6539_v17  ;;  %v6739_v4 = vld [vmem:[%s10069_s1 + $0x4f4] sm:$0xf0]  ;;  %3962 = vmatpush.bf16.msra.mxu2 %v6220_v16  ;;  %v6500_v30 = vor.u32 %v6889_v38, %v6499_v55 }
 0x3a1   : > { %4403 = vst [vmem:[%s7826_s25 + $0x218] sm:$0xff] %v4323_v47  ;;  %v4903_v63 = vadd.f32 %v4902_v54, %v4761_v59  ;;  %v6659_v54 = vld [vmem:[%s10069_s1 + $0x274] sm:$0xf0]  ;;  %v6179_v47 = vld [vmem:[%s10069_s1 + $0x700] sm:$0xf] }
 0x3a2   : > { %v3418_v58 = vpop.f32.mrf.mxu2  ;;  %v3322_v22 = vpop.f32.mrf.mxu0  ;;  %v5580_v7 = vor.u32 %v6659_v54, %v5579_v0  ;;  %4011 = vmatpush.bf16.msra.mxu3 %v6540_v39  ;;  %v6649_v39 = vld [vmem:[%s10069_s1 + $0x224] sm:$0xf0] }
 0x3a3   : > { %v3419_v36 = vadd.f32 %v3418_v58, %v3370_v6  ;;  %v3467_v18 = vpop.f32.mrf.mxu3  ;;  %v3371_v32 = vpop.f32.mrf.mxu1  ;;  %v5900_v6 = vor.u32 %v6739_v4, %v5899_v31  ;;  %v6809_v58 = vld [vmem:[%s10069_s1 + $0x724] sm:$0xf0]  ;;  %v5539_v31 = vld [vmem:[%s10069_s1 + $0x200] sm:$0xf] }
 0x3a4   : > { %3864 = vmatpush.bf16.msra.mxu0 %v5580_v7  ;;  %v6180_v17 = vor.u32 %v6809_v58, %v6179_v47  ;;  %v3372_v54 = vadd.f32 %v3371_v32, %v3322_v22  ;;  %v5540_v4 = vor.u32 %v6649_v39, %v5539_v31  ;;  %v6799_v31 = vld [vmem:[%s10069_s1 + $0x6d4] sm:$0xf0] }
 0x3a5   : > { %v3468_v59 = vadd.f32 %v3467_v18, %v3419_v36  ;;  %3913 = vmatpush.bf16.msra.mxu1 %v5900_v6 }
 0x3a6   : > { %3963 = vmatpush.bf16.msra.mxu2 %v6180_v17  ;;  %4012 = vmatpush.bf16.msra.mxu3 %v6500_v30 }
 0x3a7   : > { %v4328_v36 = vpack.c.bf16 %v3468_v59, %v8996_v46  ;;  %v4534_v18 = vadd.f32 %v4533_v37, %v3468_v59  ;;  %v4771_v16 = vmul.f32 %v3468_v59, %v3468_v59  ;;  %v5859_v37 = vld [vmem:[%s10069_s1 + $0x480] sm:$0xf] }
 0x3a8   : > { %3865 = vmatpush.bf16.msra.mxu0 %v5540_v4  ;;  %v6879_v4 = vld [vmem:[%s10069_s1 + $0x954] sm:$0xf0] }
 0x3a9   : > { %4408 = vst [vmem:[%s7826_s25 + $0x240] sm:$0xff] %v4328_v36  ;;  %v4904_v0 = vadd.f32 %v4903_v63, %v4771_v16  ;;  %v6729_v63 = vld [vmem:[%s10069_s1 + $0x4a4] sm:$0xf0] }
 0x3aa   : > { %v3420_v7 = vpop.f32.mrf.mxu2  ;;  %v3481_v47 = vpop.f32.mrf.mxu0  ;;  %v5860_v59 = vor.u32 %v6729_v63, %v5859_v37 }
 0x3ab   : > { %v3421_v22 = vadd.f32 %v3420_v7, %v3372_v54  ;;  %v3469_v32 = vpop.f32.mrf.mxu3  ;;  %v3530_v6 = vpop.f32.mrf.mxu1  ;;  %v6139_v54 = vld [vmem:[%s10069_s1 + $0x6b0] sm:$0xf] }
 0x3ac   : > { %v3531_v55 = vadd.f32 %v3530_v6, %v3481_v47  ;;  %3914 = vmatpush.bf16.msra.mxu1 %v5860_v59  ;;  %v6140_v7 = vor.u32 %v6799_v31, %v6139_v54 }
 0x3ad   : > { %v3470_v58 = vadd.f32 %v3469_v32, %v3421_v22  ;;  %3676 = vmatmul.bf16.vlgmr.msrb.gmra.mxu0 %v10203_v34 }
 0x3ae   : > { %3725 = vmatmul.bf16.vlgmr.msrb.gmra.mxu1 %v10204_v35  ;;  %3964 = vmatpush.bf16.msra.mxu2 %v6140_v7  ;;  %v6719_v7 = vld [vmem:[%s10069_s1 + $0x454] sm:$0xf0] }
 0x3af   : > { %v4333_v38 = vpack.c.bf16 %v3470_v58, %v9010_v23  ;;  %v4535_v17 = vadd.f32 %v4534_v18, %v3470_v58  ;;  %v4781_v30 = vmul.f32 %v3470_v58, %v3470_v58  ;;  %3774 = vmatmul.bf16.vlgmr.msrb.gmra.mxu2 %v10206_v2  ;;  %v6459_v18 = vld [vmem:[%s10069_s1 + $0x930] sm:$0xf] }
 0x3b0   : > { %3823 = vmatmul.bf16.vlgmr.msrb.gmra.mxu3 %v10207_v29  ;;  %v6460_v47 = vor.u32 %v6879_v4, %v6459_v18 }
 0x3b1   : > { %4413 = vst [vmem:[%s7826_s25 + $0x268] sm:$0xff] %v4333_v38  ;;  %v4536_v36 = vrot.slane %v4535_v17, 4  ;;  %v4905_v16 = vadd.f32 %v4904_v0, %v4781_v30 }
 0x3b2   : > { %v3579_v39 = vpop.f32.mrf.mxu2  ;;  %v3483_v32 = vpop.f32.mrf.mxu0  ;;  %4013 = vmatpush.bf16.msra.mxu3 %v6460_v47 }
 0x3b3   : > { %v4537_v37 = vadd.f32 %v4536_v36, %v4535_v17  ;;  %v4906_v0 = vrot.slane %v4905_v16, 4  ;;  %v3580_v63 = vadd.f32 %v3579_v39, %v3531_v55  ;;  %v3628_v22 = vpop.f32.mrf.mxu3  ;;  %v3532_v59 = vpop.f32.mrf.mxu1  ;;  %v5499_v17 = vld [vmem:[%s10069_s1 + $0x1b0] sm:$0xf]  ;;  %v6639_v55 = vld [vmem:[%s10069_s1 + $0x1d4] sm:$0xf0] }
 0x3b4   : > { %v3533_v30 = vadd.f32 %v3532_v59, %v3483_v32  ;;  %v5500_v39 = vor.u32 %v6639_v55, %v5499_v17  ;;  %v6869_v55 = vld [vmem:[%s10069_s1 + $0x904] sm:$0xf0] }
 0x3b5   : > { %v4538_v6 = vrot.slane %v4537_v37, 2  ;;  %v4907_v58 = vadd.f32 %v4906_v0, %v4905_v16  ;;  %v9284_v38 = vadd.f32 %v3628_v22, %v3580_v63  ;;  %v5819_v16 = vld [vmem:[%s10069_s1 + $0x430] sm:$0xf] }
 0x3b6   : > { %v5820_v63 = vor.u32 %v6719_v7, %v5819_v16  ;;  %3866 = vmatpush.bf16.msra.mxu0 %v5500_v39 }
 0x3b7   : > { %v4539_v54 = vadd.f32 %v4538_v6, %v4537_v37  ;;  %v4908_v31 = vrot.slane %v4907_v58, 2 }
 0x3b8   : > { %3915 = vmatpush.bf16.msra.mxu1 %v5820_v63  ;;  %v6629_v63 = vld [vmem:[%s10069_s1 + $0x184] sm:$0xf0] }
 0x3b9   : > { %v4540_v23 = vrot.slane %v4539_v54, 1  ;;  %v4909_v46 = vadd.f32 %v4908_v31, %v4907_v58 }
 0x3ba   : > { %v3581_v36 = vpop.f32.mrf.mxu2  ;;  %v3486_v0 = vpop.f32.mrf.mxu0 }
 0x3bb   : > { %v4910_v18 = vrot.slane %v4909_v46, 1  ;;  %v3582_v4 = vadd.f32 %v3581_v36, %v3533_v30  ;;  %v3630_v37 = vpop.f32.mrf.mxu3  ;;  %v4541_v22 = vadd.f32 %v4540_v23, %v4539_v54  ;;  %v3535_v32 = vpop.f32.mrf.mxu1  ;;  %v10222_v30 = vld [vmem:[#allocation6_spill] sm:$0xff] }
 0x3bc   : > { %v3536_v6 = vadd.f32 %v3535_v32, %v3486_v0  ;;  %v6099_v23 = vld [vmem:[%s10069_s1 + $0x660] sm:$0xf] }
 0x3bd   : > { %v4911_v47 = vadd.f32 %v4910_v18, %v4909_v46  ;;  %v9298_v59 = vadd.f32 %v3630_v37, %v3582_v4  ;;  %3681 = vmatmul.bf16.gmra.mxu0 %v7250_v24  ;;  %v6789_v46 = vld [vmem:[%s10069_s1 + $0x684] sm:$0xf0]  ;;  %v6419_v54 = vld [vmem:[%s10069_s1 + $0x8e0] sm:$0xf] }
 0x3be   : > { %3730 = vmatmul.bf16.gmra.mxu1 %v7252_v25  ;;  %v6100_v17 = vor.u32 %v6789_v46, %v6099_v23  ;;  %v6420_v7 = vor.u32 %v6869_v55, %v6419_v54  ;;  %v5459_v0 = vld [vmem:[%s10069_s1 + $0x160] sm:$0xf] }
 0x3bf   : > { %v9303_v58 = vsel %vm4996_vm0, %v4541_v22, %v4911_v47  ;;  %3779 = vmatmul.bf16.gmra.mxu2 %v7254_v26  ;;  %v5779_v22 = vld [vmem:[%s10069_s1 + $0x3e0] sm:$0xf]  ;;  %v5460_v47 = vor.u32 %v6629_v63, %v5459_v0  ;;  %v6859_v0 = vld [vmem:[%s10069_s1 + $0x8b4] sm:$0xf0] }
 0x3c0   : > { %10221 = vst [vmem:[#allocation23_spill] sm:$0xff] %v9303_v58  ;;  %3828 = vmatmul.bf16.gmra.mxu3 %v10222_v30  ;;  %3965 = vmatpush.bf16.msra.mxu2 %v6100_v17 }
 0x3c1   : > { %4014 = vmatpush.bf16.msra.mxu3 %v6420_v7  ;;  %3867 = vmatpush.bf16.msra.mxu0 %v5460_v47  ;;  %v6379_v7 = vld [vmem:[%s10069_s1 + $0x890] sm:$0xf] }
 0x3c2   : > { %v3584_v31 = vpop.f32.mrf.mxu2  ;;  %v3488_v16 = vpop.f32.mrf.mxu0  ;;  %v6380_v47 = vor.u32 %v6859_v0, %v6379_v7  ;;  %v6699_v7 = vld [vmem:[%s10069_s1 + $0x3b4] sm:$0xf0] }
 0x3c3   : > { %v3585_v36 = vadd.f32 %v3584_v31, %v3536_v6  ;;  %v3633_v39 = vpop.f32.mrf.mxu3  ;;  %v3537_v18 = vpop.f32.mrf.mxu1  ;;  %v6709_v6 = vld [vmem:[%s10069_s1 + $0x404] sm:$0xf0] }
 0x3c4   : > { %v3538_v37 = vadd.f32 %v3537_v18, %v3488_v16  ;;  %v5780_v31 = vor.u32 %v6709_v6, %v5779_v22  ;;  %v6779_v16 = vld [vmem:[%s10069_s1 + $0x634] sm:$0xf0] }
 0x3c5   : > { %v9319_v4 = vadd.f32 %v3633_v39, %v3585_v36  ;;  %v6059_v39 = vld [vmem:[%s10069_s1 + $0x610] sm:$0xf]  ;;  %4015 = vmatpush.bf16.msra.mxu3 %v6380_v47 }
 0x3c6   : > { %3916 = vmatpush.bf16.msra.mxu1 %v5780_v31  ;;  %v6619_v31 = vld [vmem:[%s10069_s1 + $0x134] sm:$0xf0] }
 0x3ca   : > { %v3586_v32 = vpop.f32.mrf.mxu2  ;;  %v3491_v54 = vpop.f32.mrf.mxu0 }
 0x3cb   : > { %v3587_v23 = vadd.f32 %v3586_v32, %v3538_v37  ;;  %v3635_v46 = vpop.f32.mrf.mxu3  ;;  %v3540_v17 = vpop.f32.mrf.mxu1  ;;  %v6060_v37 = vor.u32 %v6779_v16, %v6059_v39 }
 0x3cc   : > { %v3541_v36 = vadd.f32 %v3540_v17, %v3491_v54  ;;  %v5419_v54 = vld [vmem:[%s10069_s1 + $0x110] sm:$0xf] }
 0x3cd   : > { %v9333_v55 = vadd.f32 %v3635_v46, %v3587_v23  ;;  %3686 = vmatmul.bf16.gmra.mxu0 %v7294_v49  ;;  %3966 = vmatpush.bf16.msra.mxu2 %v6060_v37  ;;  %v5739_v17 = vld [vmem:[%s10069_s1 + $0x390] sm:$0xf]  ;;  %v5420_v16 = vor.u32 %v6619_v31, %v5419_v54 }
 0x3ce   : > { %3735 = vmatmul.bf16.gmra.mxu1 %v7296_v50 }
 0x3cf   : > { %3784 = vmatmul.bf16.gmra.mxu2 %v7298_v51  ;;  %3868 = vmatpush.bf16.msra.mxu0 %v5420_v16 }
 0x3d0   : > { %3833 = vmatmul.bf16.gmra.mxu3 %v7300_v52 }
 0x3d2   : > { %v3589_v18 = vpop.f32.mrf.mxu2  ;;  %v3493_v32 = vpop.f32.mrf.mxu0 }
 0x3d3   : > { %v3590_v63 = vadd.f32 %v3589_v18, %v3541_v36  ;;  %v3638_v22 = vpop.f32.mrf.mxu3  ;;  %v3542_v6 = vpop.f32.mrf.mxu1  ;;  %v4642_v36 = vmul.f32 %v9298_v59, %v9298_v59 }
 0x3d4   : > { %v3543_v46 = vadd.f32 %v3542_v6, %v3493_v32  ;;  %v4652_v32 = vmul.f32 %v9319_v4, %v9319_v4  ;;  %v4542_v6 = vadd.f32 %v9298_v59, %v9284_v38 }
 0x3d5   : > { %v9351_v23 = vadd.f32 %v3638_v22, %v3590_v63  ;;  %v5740_v63 = vor.u32 %v6699_v7, %v5739_v17  ;;  %v4632_v22 = vmul.f32 %v9284_v38, %v9284_v38  ;;  %v4662_v17 = vmul.f32 %v9333_v55, %v9333_v55 }
 0x3d7   : > { %3917 = vmatpush.bf16.msra.mxu1 %v5740_v63 }
 0x3da   : > { %v3591_v39 = vpop.f32.mrf.mxu2  ;;  %v3496_v0 = vpop.f32.mrf.mxu0 }
 0x3db   : > { %v3592_v18 = vadd.f32 %v3591_v39, %v3543_v46  ;;  %v3640_v37 = vpop.f32.mrf.mxu3  ;;  %v3545_v47 = vpop.f32.mrf.mxu1  ;;  %v4912_v46 = vadd.f32 %v4642_v36, %v4632_v22  ;;  %v4543_v39 = vadd.f32 %v4542_v6, %v9319_v4  ;;  %v6019_v36 = vld [vmem:[%s10069_s1 + $0x5c0] sm:$0xf] }
 0x3dc   : > { %v3546_v31 = vadd.f32 %v3545_v47, %v3496_v0  ;;  %v6339_v0 = vld [vmem:[%s10069_s1 + $0x840] sm:$0xf]  ;;  %v6849_v47 = vld [vmem:[%s10069_s1 + $0x864] sm:$0xf0] }
 0x3dd   : > { %v9373_v54 = vadd.f32 %v3640_v37, %v3592_v18  ;;  %3691 = vmatmul.bf16.gmra.mxu0 %v7338_v12  ;;  %v4913_v16 = vadd.f32 %v4912_v46, %v4652_v32  ;;  %v4544_v7 = vadd.f32 %v4543_v39, %v9333_v55  ;;  %v4672_v18 = vmul.f32 %v9351_v23, %v9351_v23  ;;  %v6769_v37 = vld [vmem:[%s10069_s1 + $0x5e4] sm:$0xf0] }
 0x3de   : > { %3740 = vmatmul.bf16.gmra.mxu1 %v7340_v13  ;;  %v6020_v32 = vor.u32 %v6769_v37, %v6019_v36  ;;  %v6340_v27 = vor.u32 %v6849_v47, %v6339_v0 }
 0x3df   : > { %3789 = vmatmul.bf16.gmra.mxu2 %v7342_v14  ;;  %v4914_v63 = vadd.f32 %v4913_v16, %v4662_v17  ;;  %v4545_v6 = vadd.f32 %v4544_v7, %v9351_v23  ;;  %v4682_v46 = vmul.f32 %v9373_v54, %v9373_v54 }
 0x3e0   : > { %3838 = vmatmul.bf16.gmra.mxu3 %v7344_v15  ;;  %3967 = vmatpush.bf16.msra.mxu2 %v6020_v32 }
 0x3e1   : > { %v4915_v5 = vadd.f32 %v4914_v63, %v4672_v18  ;;  %v4546_v17 = vadd.f32 %v4545_v6, %v9373_v54  ;;  %4016 = vmatpush.bf16.msra.mxu3 %v6340_v27  ;;  %v6609_v18 = vld [vmem:[%s10069_s1 + $0xe4] sm:$0xf0] }
 0x3e2   : > { %v3594_v22 = vpop.f32.mrf.mxu2  ;;  %v3498_v62 = vpop.f32.mrf.mxu0 }
 0x3e3   : > { %v3595_v39 = vadd.f32 %v3594_v22, %v3546_v31  ;;  %v3643_v58 = vpop.f32.mrf.mxu3  ;;  %v3547_v60 = vpop.f32.mrf.mxu1  ;;  %v4916_v37 = vadd.f32 %v4915_v5, %v4682_v46  ;;  %v5379_v31 = vld [vmem:[%s10069_s1 + $0xc0] sm:$0xf] }
 0x3e4   : > { %v3548_v36 = vadd.f32 %v3547_v60, %v3498_v62  ;;  %v5699_v60 = vld [vmem:[%s10069_s1 + $0x340] sm:$0xf]  ;;  %v5380_v5 = vor.u32 %v6609_v18, %v5379_v31  ;;  %v6689_v62 = vld [vmem:[%s10069_s1 + $0x364] sm:$0xf0]  ;;  %v6839_v18 = vld [vmem:[%s10069_s1 + $0x814] sm:$0xf0] }
 0x3e5   : > { %v9401_v16 = vadd.f32 %v3643_v58, %v3595_v39  ;;  %v5700_v22 = vor.u32 %v6689_v62, %v5699_v60 }
 0x3e6   : > { %3869 = vmatpush.bf16.msra.mxu0 %v5380_v5 }
 0x3e7   : > { %v4547_v48 = vadd.f32 %v4546_v17, %v9401_v16  ;;  %v4692_v7 = vmul.f32 %v9401_v16, %v9401_v16  ;;  %3918 = vmatpush.bf16.msra.mxu1 %v5700_v22 }
 0x3e9   : > { %v4917_v53 = vadd.f32 %v4916_v37, %v4692_v7  ;;  %v6759_v37 = vld [vmem:[%s10069_s1 + $0x594] sm:$0xf0] }
 0x3ea   : > { %v3596_v27 = vpop.f32.mrf.mxu2  ;;  %v3501_v63 = vpop.f32.mrf.mxu0 }
 0x3eb   : > { %v3597_v58 = vadd.f32 %v3596_v27, %v3548_v36  ;;  %v3645_v0 = vpop.f32.mrf.mxu3  ;;  %v3550_v32 = vpop.f32.mrf.mxu1  ;;  %v5979_v36 = vld [vmem:[%s10069_s1 + $0x570] sm:$0xf] }
 0x3ec   : > { %v3551_v6 = vadd.f32 %v3550_v32, %v3501_v63  ;;  %v5980_v31 = vor.u32 %v6759_v37, %v5979_v36  ;;  %v5659_v36 = vld [vmem:[%s10069_s1 + $0x2f0] sm:$0xf] }
 0x3ed   : > { %v9418_v47 = vadd.f32 %v3645_v0, %v3597_v58  ;;  %3696 = vmatmul.bf16.gmra.mxu0 %v7382_v40 }
 0x3ee   : > { %3745 = vmatmul.bf16.gmra.mxu1 %v7384_v41  ;;  %3968 = vmatpush.bf16.msra.mxu2 %v5980_v31 }
 0x3ef   : > { %v4548_v46 = vadd.f32 %v4547_v48, %v9418_v47  ;;  %v4702_v39 = vmul.f32 %v9418_v47, %v9418_v47  ;;  %3794 = vmatmul.bf16.gmra.mxu2 %v7386_v42  ;;  %v6299_v48 = vld [vmem:[%s10069_s1 + $0x7f0] sm:$0xf] }
 0x3f0   : > { %3843 = vmatmul.bf16.gmra.mxu3 %v7388_v43  ;;  %v6300_v5 = vor.u32 %v6839_v18, %v6299_v48 }
 0x3f1   : > { %v4918_v17 = vadd.f32 %v4917_v53, %v4702_v39  ;;  %v5339_v39 = vld [vmem:[%s10069_s1 + $0x70] sm:$0xf] }
 0x3f2   : > { %v3599_v7 = vpop.f32.mrf.mxu2  ;;  %v3503_v27 = vpop.f32.mrf.mxu0  ;;  %4017 = vmatpush.bf16.msra.mxu3 %v6300_v5 }
 0x3f3   : > { %v3600_v60 = vadd.f32 %v3599_v7, %v3551_v6  ;;  %v3648_v53 = vpop.f32.mrf.mxu3  ;;  %v3552_v62 = vpop.f32.mrf.mxu1  ;;  %v6599_v6 = vld [vmem:[%s10069_s1 + $0x94] sm:$0xf0] }
 0x3f4   : > { %v3553_v0 = vadd.f32 %v3552_v62, %v3503_v27  ;;  %v5340_v48 = vor.u32 %v6599_v6, %v5339_v39  ;;  %v6749_v39 = vld [vmem:[%s10069_s1 + $0x544] sm:$0xf0] }
 0x3f5   : > { %v9439_v58 = vadd.f32 %v3648_v53, %v3600_v60 }
 0x3f6   : > { %3870 = vmatpush.bf16.msra.mxu0 %v5340_v48 }
 0x3f7   : > { %v4549_v63 = vadd.f32 %v4548_v46, %v9439_v58  ;;  %v4712_v22 = vmul.f32 %v9439_v58, %v9439_v58  ;;  %v6679_v46 = vld [vmem:[%s10069_s1 + $0x314] sm:$0xf0] }
 0x3f8   : > { %v5660_v18 = vor.u32 %v6679_v46, %v5659_v36 }
 0x3f9   : > { %v4919_v32 = vadd.f32 %v4918_v17, %v4712_v22  ;;  %v5939_v22 = vld [vmem:[%s10069_s1 + $0x520] sm:$0xf] }
 0x3fa   : > { %v3601_v37 = vpop.f32.mrf.mxu2  ;;  %v3506_v31 = vpop.f32.mrf.mxu0  ;;  %3919 = vmatpush.bf16.msra.mxu1 %v5660_v18  ;;  %v5940_v36 = vor.u32 %v6749_v39, %v5939_v22  ;;  %v5299_v39 = vld [vmem:[%s10069_s1 + $0x20] sm:$0xf] }
 0x3fb   : > { %v3602_v7 = vadd.f32 %v3601_v37, %v3553_v0  ;;  %v3650_v17 = vpop.f32.mrf.mxu3  ;;  %v3555_v60 = vpop.f32.mrf.mxu1  ;;  %v6829_v37 = vld [vmem:[%s10069_s1 + $0x7c4] sm:$0xf0] }
 0x3fc   : > { %v3556_v27 = vadd.f32 %v3555_v60, %v3506_v31  ;;  %3969 = vmatpush.bf16.msra.mxu2 %v5940_v36 }
 0x3fd   : > { %v9456_v53 = vadd.f32 %v3650_v17, %v3602_v7  ;;  %3701 = vmatmul.bf16.gmra.mxu0 %v7426_v8 }
 0x3fe   : > { %3750 = vmatmul.bf16.gmra.mxu1 %v7428_v9 }
 0x3ff   : > { %v4550_v5 = vadd.f32 %v4549_v63, %v9456_v53  ;;  %v4722_v62 = vmul.f32 %v9456_v53, %v9456_v53  ;;  %3799 = vmatmul.bf16.gmra.mxu2 %v7430_v10  ;;  %v6259_v63 = vld [vmem:[%s10069_s1 + $0x7a0] sm:$0xf] }
 0x400   : > { %3848 = vmatmul.bf16.gmra.mxu3 %v7432_v11  ;;  %v6260_v7 = vor.u32 %v6829_v37, %v6259_v63  ;;  %v5619_v63 = vld [vmem:[%s10069_s1 + $0x2a0] sm:$0xf] }
 0x401   : > { %v4920_v0 = vadd.f32 %v4919_v32, %v4722_v62 }
 0x402   : > { %v3604_v6 = vpop.f32.mrf.mxu2  ;;  %v3508_v46 = vpop.f32.mrf.mxu0  ;;  %4018 = vmatpush.bf16.msra.mxu3 %v6260_v7 }
 0x403   : > { %v3605_v48 = vadd.f32 %v3604_v6, %v3556_v27  ;;  %v3653_v32 = vpop.f32.mrf.mxu3  ;;  %v3557_v17 = vpop.f32.mrf.mxu1  ;;  %v6589_v27 = vld [vmem:[%s10069_s1 + $0x44] sm:$0xf0] }
 0x404   : > { %v3558_v18 = vadd.f32 %v3557_v17, %v3508_v46  ;;  %v5300_v36 = vor.u32 %v6589_v27, %v5299_v39 }
 0x405   : > { %v9477_v31 = vadd.f32 %v3653_v32, %v3605_v48 }
 0x406   : > { %3871 = vmatpush.bf16.msra.mxu0 %v5300_v36 }
 0x407   : > { %v4551_v60 = vadd.f32 %v4550_v5, %v9477_v31  ;;  %v4732_v62 = vmul.f32 %v9477_v31, %v9477_v31  ;;  %v6669_v5 = vld [vmem:[%s10069_s1 + $0x2c4] sm:$0xf0] }
 0x408   : > { %v5620_v32 = vor.u32 %v6669_v5, %v5619_v63 }
 0x409   : > { %v4921_v22 = vadd.f32 %v4920_v0, %v4732_v62 }
 0x40a   : > { %v3606_v6 = vpop.f32.mrf.mxu2  ;;  %v3511_v48 = vpop.f32.mrf.mxu0  ;;  %3920 = vmatpush.bf16.msra.mxu1 %v5620_v32 }
 0x40b   : > { %v3607_v37 = vadd.f32 %v3606_v6, %v3558_v18  ;;  %v3655_v0 = vpop.f32.mrf.mxu3  ;;  %v3560_v46 = vpop.f32.mrf.mxu1 }
 0x40c   : > { %v3561_v17 = vadd.f32 %v3560_v46, %v3511_v48 }
 0x40d   : > { %v9494_v7 = vadd.f32 %v3655_v0, %v3607_v37  ;;  %3706 = vmatmul.bf16.gmra.mxu0 %v7470_v44 }
 0x40e   : > { %3755 = vmatmul.bf16.gmra.mxu1 %v7472_v45 }
 0x40f   : > { %10223 = vst [vmem:[#allocation27_spill] sm:$0xff] %v9494_v7  ;;  %v4552_v62 = vadd.f32 %v4551_v60, %v9494_v7  ;;  %v4742_v39 = vmul.f32 %v9494_v7, %v9494_v7  ;;  %3804 = vmatmul.bf16.gmra.mxu2 %v10189_v57 }
 0x410   : > { %3853 = vmatmul.bf16.gmra.mxu3 %v10191_v56 }
 0x411   : > { %v4922_v18 = vadd.f32 %v4921_v22, %v4742_v39 }
 0x412   : > { %v3609_v27 = vpop.f32.mrf.mxu2  ;;  %v3513_v36 = vpop.f32.mrf.mxu0 }
 0x413   : > { %v3610_v63 = vadd.f32 %v3609_v27, %v3561_v17  ;;  %v3658_v6 = vpop.f32.mrf.mxu3  ;;  %v3562_v5 = vpop.f32.mrf.mxu1  ;;  %v6541_v27 = vld [vmem:[%s10069_s1 + $0x9f8] sm:$0xf0] }
 0x414   : > { %v3563_v0 = vadd.f32 %v3562_v5, %v3513_v36 }
 0x415   : > { %v9503_v37 = vadd.f32 %v3658_v6, %v3610_v63  ;;  %v6654_v63 = vld [vmem:[%s10069_s1 + $0x254] sm:$0xf]  ;;  %v5581_v6 = vld [vmem:[%s10069_s1 + $0x278] sm:$0xf0] }
 0x417   : > { %v4553_v48 = vadd.f32 %v4552_v62, %v9503_v37  ;;  %v4752_v60 = vmul.f32 %v9503_v37, %v9503_v37 }
 0x419   : > { %v4923_v32 = vadd.f32 %v4922_v18, %v4752_v60  ;;  %v6814_v18 = vld [vmem:[%s10069_s1 + $0x754] sm:$0xf]  ;;  %v5901_v60 = vld [vmem:[%s10069_s1 + $0x4f8] sm:$0xf0] }
 0x41a   : > { %v3611_v46 = vpop.f32.mrf.mxu2  ;;  %v3516_v45 = vpop.f32.mrf.mxu0 }
 0x41b   : > { %v3612_v7 = vadd.f32 %v3611_v46, %v3563_v0  ;;  %v3660_v57 = vpop.f32.mrf.mxu3  ;;  %v3565_v56 = vpop.f32.mrf.mxu1  ;;  %v5584_v0 = vor.u32 %v6654_v63, %v5581_v6  ;;  %v6501_v63 = vld [vmem:[%s10069_s1 + $0x9a8] sm:$0xf0] }
 0x41c   : > { %v3566_v17 = vadd.f32 %v3565_v56, %v3516_v45  ;;  %v6221_v45 = vld [vmem:[%s10069_s1 + $0x778] sm:$0xf0] }
 0x41d   : > { %v9508_v22 = vadd.f32 %v3660_v57, %v3612_v7  ;;  %3711 = vmatmul.bf16.gmra.mxu0 %v7514_v20  ;;  %v6894_v57 = vld [vmem:[%s10069_s1 + $0x9d4] sm:$0xf]  ;;  %v6224_v7 = vor.u32 %v6814_v18, %v6221_v45 }
 0x41e   : > { %3760 = vmatmul.bf16.gmra.mxu1 %v7516_v21  ;;  %v6544_v5 = vor.u32 %v6894_v57, %v6541_v27  ;;  %v6181_v57 = vld [vmem:[%s10069_s1 + $0x728] sm:$0xf0]  ;;  %v6884_v27 = vld [vmem:[%s10069_s1 + $0x984] sm:$0xf]  ;;  %4060 = vmatpush.bf16.msrb.mxu0 %v5584_v0 }
 0x41f   : > { %10224 = vst [vmem:[#allocation24_spill] sm:$0xff] %v9508_v22  ;;  %v4554_v39 = vadd.f32 %v4553_v48, %v9508_v22  ;;  %v4762_v62 = vmul.f32 %v9508_v22, %v9508_v22  ;;  %3809 = vmatmul.bf16.gmra.mxu2 %v10200_v19  ;;  %v6734_v48 = vld [vmem:[%s10069_s1 + $0x4d4] sm:$0xf]  ;;  %v6644_v22 = vld [vmem:[%s10069_s1 + $0x204] sm:$0xf] }
 0x420   : > { %3858 = vmatmul.bf16.gmra.mxu3 %v10202_v33  ;;  %4158 = vmatpush.bf16.msrb.mxu2 %v6224_v7  ;;  %v5904_v45 = vor.u32 %v6734_v48, %v5901_v60  ;;  %v6724_v0 = vld [vmem:[%s10069_s1 + $0x484] sm:$0xf] }
 0x421   : > { %v4924_v56 = vadd.f32 %v4923_v32, %v4762_v62  ;;  %v6804_v32 = vld [vmem:[%s10069_s1 + $0x704] sm:$0xf]  ;;  %4207 = vmatpush.bf16.msrb.mxu3 %v6544_v5  ;;  %v5541_v5 = vld [vmem:[%s10069_s1 + $0x228] sm:$0xf0] }
 0x422   : > { %v3614_v36 = vpop.f32.mrf.mxu2  ;;  %v3518_v18 = vpop.f32.mrf.mxu0  ;;  %4109 = vmatpush.bf16.msrb.mxu1 %v5904_v45 }
 0x423   : > { %v3615_v46 = vadd.f32 %v3614_v36, %v3566_v17  ;;  %v3663_v62 = vpop.f32.mrf.mxu3  ;;  %v3567_v6 = vpop.f32.mrf.mxu1  ;;  %v6184_v17 = vor.u32 %v6804_v32, %v6181_v57  ;;  %v6504_v36 = vor.u32 %v6884_v27, %v6501_v63 }
 0x424   : > { %v3568_v7 = vadd.f32 %v3567_v6, %v3518_v18 }
 0x425   : > { %v9553_v33 = vadd.f32 %v3663_v62, %v3615_v46  ;;  %4159 = vmatpush.bf16.msrb.mxu2 %v6184_v17  ;;  %4208 = vmatpush.bf16.msrb.mxu3 %v6504_v36  ;;  %v5861_v46 = vld [vmem:[%s10069_s1 + $0x4a8] sm:$0xf0] }
 0x426   : > { %v5864_v45 = vor.u32 %v6724_v0, %v5861_v46  ;;  %v6874_v0 = vld [vmem:[%s10069_s1 + $0x934] sm:$0xf] }
 0x427   : > { %v4555_v48 = vadd.f32 %v4554_v39, %v9553_v33  ;;  %v4772_v60 = vmul.f32 %v9553_v33, %v9553_v33  ;;  %v5544_v39 = vor.u32 %v6644_v22, %v5541_v5 }
 0x428   : > { %4110 = vmatpush.bf16.msrb.mxu1 %v5864_v45 }
 0x429   : > { %v4925_v19 = vadd.f32 %v4924_v56, %v4772_v60  ;;  %4061 = vmatpush.bf16.msrb.mxu0 %v5544_v39  ;;  %v6141_v60 = vld [vmem:[%s10069_s1 + $0x6d8] sm:$0xf0] }
 0x42a   : > { %v3616_v32 = vpop.f32.mrf.mxu2  ;;  %v3677_v18 = vpop.f32.mrf.mxu0 }
 0x42b   : > { %v3617_v62 = vadd.f32 %v3616_v32, %v3568_v7  ;;  %v3665_v56 = vpop.f32.mrf.mxu3  ;;  %v3726_v57 = vpop.f32.mrf.mxu1  ;;  %v6794_v7 = vld [vmem:[%s10069_s1 + $0x6b4] sm:$0xf]  ;;  %v6461_v32 = vld [vmem:[%s10069_s1 + $0x958] sm:$0xf0] }
 0x42c   : > { %v3727_v6 = vadd.f32 %v3726_v57, %v3677_v18  ;;  %v6464_v18 = vor.u32 %v6874_v0, %v6461_v32 }
 0x42d   : > { %v9570_v27 = vadd.f32 %v3665_v56, %v3617_v62  ;;  %3872 = vmatmul.bf16.vlgmr.msra.gmra.mxu0 %v10203_v34 }
 0x42e   : > { %3921 = vmatmul.bf16.vlgmr.msra.gmra.mxu1 %v10204_v35  ;;  %4209 = vmatpush.bf16.msrb.mxu3 %v6464_v18 }
 0x42f   : > { %10225 = vst [vmem:[#allocation2_spill] sm:$0xff] %v9570_v27  ;;  %v4556_v63 = vadd.f32 %v4555_v48, %v9570_v27  ;;  %v4782_v22 = vmul.f32 %v9570_v27, %v9570_v27  ;;  %3970 = vmatmul.bf16.vlgmr.msra.gmra.mxu2 %v10206_v2  ;;  %v6144_v48 = vor.u32 %v6794_v7, %v6141_v60 }
 0x430   : > { %4019 = vmatmul.bf16.vlgmr.msra.gmra.mxu3 %v10207_v29 }
 0x431   : > { %v4557_v17 = vrot.slane %v4556_v63, 4  ;;  %v4926_v36 = vadd.f32 %v4925_v19, %v4782_v22  ;;  %4160 = vmatpush.bf16.msrb.mxu2 %v6144_v48  ;;  %v6714_v48 = vld [vmem:[%s10069_s1 + $0x434] sm:$0xf] }
 0x432   : > { %v3775_v5 = vpop.f32.mrf.mxu2  ;;  %v3679_v56 = vpop.f32.mrf.mxu0 }
 0x433   : > { %v4558_v39 = vadd.f32 %v4557_v17, %v4556_v63  ;;  %v4927_v19 = vrot.slane %v4926_v36, 4  ;;  %v3776_v46 = vadd.f32 %v3775_v5, %v3727_v6  ;;  %v3824_v62 = vpop.f32.mrf.mxu3  ;;  %v3728_v45 = vpop.f32.mrf.mxu1  ;;  %v6634_v6 = vld [vmem:[%s10069_s1 + $0x1b4] sm:$0xf]  ;;  %v5501_v17 = vld [vmem:[%s10069_s1 + $0x1d8] sm:$0xf0] }
 0x434   : > { %v3729_v63 = vadd.f32 %v3728_v45, %v3679_v56 }
 0x435   : > { %v4559_v57 = vrot.slane %v4558_v39, 2  ;;  %v4928_v22 = vadd.f32 %v4927_v19, %v4926_v36  ;;  %v3825_v7 = vadd.f32 %v3824_v62, %v3776_v46  ;;  %v5504_v36 = vor.u32 %v6634_v6, %v5501_v17 }
 0x437   : > { %v4560_v60 = vadd.f32 %v4559_v57, %v4558_v39  ;;  %v4929_v29 = vrot.slane %v4928_v22, 2  ;;  %v4259_v2 = vpack.c.bf16 %v3825_v7, %v9284_v38  ;;  %4062 = vmatpush.bf16.msrb.mxu0 %v5504_v36  ;;  %v4633_v18 = vmul.f32 %v3825_v7, %v3825_v7 }
 0x439   : > { %v4561_v27 = vrot.slane %v4560_v60, 1  ;;  %v4930_v35 = vadd.f32 %v4929_v29, %v4928_v22  ;;  %4339 = vst [vmem:[%s7826_s25 + $0x18] sm:$0xff] %v4259_v2  ;;  %v5821_v29 = vld [vmem:[%s10069_s1 + $0x458] sm:$0xf0] }
 0x43a   : > { %v3777_v5 = vpop.f32.mrf.mxu2  ;;  %v3682_v32 = vpop.f32.mrf.mxu0  ;;  %v5824_v39 = vor.u32 %v6714_v48, %v5821_v29 }
 0x43b   : > { %v4931_v2 = vrot.slane %v4930_v35, 1  ;;  %v3778_v38 = vadd.f32 %v3777_v5, %v3729_v63  ;;  %v3826_v0 = vpop.f32.mrf.mxu3  ;;  %v3731_v19 = vpop.f32.mrf.mxu1  ;;  %v4562_v46 = vadd.f32 %v4561_v27, %v4560_v60  ;;  %v6784_v27 = vld [vmem:[%s10069_s1 + $0x664] sm:$0xf]  ;;  %v6101_v60 = vld [vmem:[%s10069_s1 + $0x688] sm:$0xf0] }
 0x43c   : > { %4111 = vmatpush.bf16.msrb.mxu1 %v5824_v39  ;;  %v3732_v45 = vadd.f32 %v3731_v19, %v3682_v32  ;;  %v6104_v5 = vor.u32 %v6784_v27, %v6101_v60 }
 0x43d   : > { %v4932_v62 = vadd.f32 %v4931_v2, %v4930_v35  ;;  %v3827_v56 = vadd.f32 %v3826_v0, %v3778_v38  ;;  %3877 = vmatmul.bf16.gmra.mxu0 %v7250_v24 }
 0x43e   : > { %3926 = vmatmul.bf16.gmra.mxu1 %v7252_v25  ;;  %4161 = vmatpush.bf16.msrb.mxu2 %v6104_v5 }
 0x43f   : > { %v9608_v57 = vsel %vm4996_vm0, %v4562_v46, %v4932_v62  ;;  %v4264_v22 = vpack.c.bf16 %v3827_v56, %v9298_v59  ;;  %v4563_v63 = vadd.f32 %v3827_v56, %v3825_v7  ;;  %v4643_v6 = vmul.f32 %v3827_v56, %v3827_v56  ;;  %3975 = vmatmul.bf16.gmra.mxu2 %v7254_v26  ;;  %v6864_v59 = vld [vmem:[%s10069_s1 + $0x8e4] sm:$0xf]  ;;  %v6421_v7 = vld [vmem:[%s10069_s1 + $0x908] sm:$0xf0] }
 0x440   : > { %4024 = vmatmul.bf16.gmra.mxu3 %v10222_v30  ;;  %v6424_v2 = vor.u32 %v6864_v59, %v6421_v7  ;;  %v6624_v56 = vld [vmem:[%s10069_s1 + $0x164] sm:$0xf] }
 0x441   : > { %4344 = vst [vmem:[%s7826_s25 + $0x40] sm:$0xff] %v4264_v22  ;;  %v4933_v35 = vadd.f32 %v4643_v6, %v4633_v18  ;;  %v5461_v18 = vld [vmem:[%s10069_s1 + $0x188] sm:$0xf0]  ;;  %v6704_v6 = vld [vmem:[%s10069_s1 + $0x3e4] sm:$0xf] }
 0x442   : > { %v3780_v17 = vpop.f32.mrf.mxu2  ;;  %v3684_v29 = vpop.f32.mrf.mxu0  ;;  %4210 = vmatpush.bf16.msrb.mxu3 %v6424_v2  ;;  %v5464_v22 = vor.u32 %v6624_v56, %v5461_v18  ;;  %v6774_v2 = vld [vmem:[%s10069_s1 + $0x614] sm:$0xf] }
 0x443   : > { %v3781_v36 = vadd.f32 %v3780_v17, %v3732_v45  ;;  %v3829_v48 = vpop.f32.mrf.mxu3  ;;  %v3733_v38 = vpop.f32.mrf.mxu1 }
 0x444   : > { %v3734_v62 = vadd.f32 %v3733_v38, %v3684_v29  ;;  %4063 = vmatpush.bf16.msrb.mxu0 %v5464_v22  ;;  %v6061_v38 = vld [vmem:[%s10069_s1 + $0x638] sm:$0xf0] }
 0x445   : > { %v3830_v0 = vadd.f32 %v3829_v48, %v3781_v36 }
 0x447   : > { %v4269_v32 = vpack.c.bf16 %v3830_v0, %v9319_v4  ;;  %v4564_v39 = vadd.f32 %v4563_v63, %v3830_v0  ;;  %v4653_v19 = vmul.f32 %v3830_v0, %v3830_v0  ;;  %v5781_v4 = vld [vmem:[%s10069_s1 + $0x408] sm:$0xf0] }
 0x448   : > { %v5784_v60 = vor.u32 %v6704_v6, %v5781_v4 }
 0x449   : > { %4349 = vst [vmem:[%s7826_s25 + $0x68] sm:$0xff] %v4269_v32  ;;  %v4934_v46 = vadd.f32 %v4933_v35, %v4653_v19  ;;  %v6854_v32 = vld [vmem:[%s10069_s1 + $0x894] sm:$0xf] }
 0x44a   : > { %v3782_v45 = vpop.f32.mrf.mxu2  ;;  %v3687_v27 = vpop.f32.mrf.mxu0  ;;  %4112 = vmatpush.bf16.msrb.mxu1 %v5784_v60  ;;  %v5421_v60 = vld [vmem:[%s10069_s1 + $0x138] sm:$0xf0] }
 0x44b   : > { %v3783_v63 = vadd.f32 %v3782_v45, %v3734_v62  ;;  %v3831_v35 = vpop.f32.mrf.mxu3  ;;  %v3736_v17 = vpop.f32.mrf.mxu1 }
 0x44c   : > { %v3737_v48 = vadd.f32 %v3736_v17, %v3687_v27  ;;  %v6614_v27 = vld [vmem:[%s10069_s1 + $0x114] sm:$0xf] }
 0x44d   : > { %v3832_v5 = vadd.f32 %v3831_v35, %v3783_v63  ;;  %3882 = vmatmul.bf16.gmra.mxu0 %v7294_v49 }
 0x44e   : > { %3931 = vmatmul.bf16.gmra.mxu1 %v7296_v50 }
 0x44f   : > { %v4274_v59 = vpack.c.bf16 %v3832_v5, %v9333_v55  ;;  %v4565_v7 = vadd.f32 %v4564_v39, %v3832_v5  ;;  %v4663_v36 = vmul.f32 %v3832_v5, %v3832_v5  ;;  %3980 = vmatmul.bf16.gmra.mxu2 %v7298_v51  ;;  %v6064_v55 = vor.u32 %v6774_v2, %v6061_v38  ;;  %v6381_v39 = vld [vmem:[%s10069_s1 + $0x8b8] sm:$0xf0] }
 0x450   : > { %4029 = vmatmul.bf16.gmra.mxu3 %v7300_v52  ;;  %v6384_v56 = vor.u32 %v6854_v32, %v6381_v39  ;;  %v5424_v5 = vor.u32 %v6614_v27, %v5421_v60  ;;  %v6764_v32 = vld [vmem:[%s10069_s1 + $0x5c4] sm:$0xf]  ;;  %v6021_v39 = vld [vmem:[%s10069_s1 + $0x5e8] sm:$0xf0] }
 0x451   : > { %4354 = vst [vmem:[%s7826_s25 + $0x90] sm:$0xff] %v4274_v59  ;;  %v4935_v29 = vadd.f32 %v4934_v46, %v4663_v36  ;;  %4162 = vmatpush.bf16.msrb.mxu2 %v6064_v55  ;;  %v5741_v59 = vld [vmem:[%s10069_s1 + $0x3b8] sm:$0xf0] }
 0x452   : > { %v3785_v0 = vpop.f32.mrf.mxu2  ;;  %v3689_v62 = vpop.f32.mrf.mxu0  ;;  %4211 = vmatpush.bf16.msrb.mxu3 %v6384_v56  ;;  %4064 = vmatpush.bf16.msrb.mxu0 %v5424_v5  ;;  %v5381_v5 = vld [vmem:[%s10069_s1 + $0xe8] sm:$0xf0] }
 0x453   : > { %v3786_v19 = vadd.f32 %v3785_v0, %v3737_v48  ;;  %v3834_v46 = vpop.f32.mrf.mxu3  ;;  %v3738_v18 = vpop.f32.mrf.mxu1 }
 0x454   : > { %v3739_v35 = vadd.f32 %v3738_v18, %v3689_v62  ;;  %v6341_v62 = vld [vmem:[%s10069_s1 + $0x868] sm:$0xf0] }
 0x455   : > { %v3835_v45 = vadd.f32 %v3834_v46, %v3786_v19  ;;  %v6024_v46 = vor.u32 %v6764_v32, %v6021_v39 }
 0x457   : > { %v4279_v22 = vpack.c.bf16 %v3835_v45, %v9351_v23  ;;  %v9659_v6 = vadd.f32 %v4565_v7, %v3835_v45  ;;  %v4673_v4 = vmul.f32 %v3835_v45, %v3835_v45  ;;  %v6694_v23 = vld [vmem:[%s10069_s1 + $0x394] sm:$0xf]  ;;  %4163 = vmatpush.bf16.msrb.mxu2 %v6024_v46  ;;  %v5981_v46 = vld [vmem:[%s10069_s1 + $0x598] sm:$0xf0] }
 0x459   : > { %4359 = vst [vmem:[%s7826_s25 + $0xb8] sm:$0xff] %v4279_v22  ;;  %v9662_v63 = vadd.f32 %v4935_v29, %v4673_v4  ;;  %v5744_v29 = vor.u32 %v6694_v23, %v5741_v59 }
 0x45a   : > { %v3787_v17 = vpop.f32.mrf.mxu2  ;;  %v3692_v48 = vpop.f32.mrf.mxu0 }
 0x45b   : > { %v3788_v7 = vadd.f32 %v3787_v17, %v3739_v35  ;;  %v3836_v36 = vpop.f32.mrf.mxu3  ;;  %v3741_v2 = vpop.f32.mrf.mxu1  ;;  %4113 = vmatpush.bf16.msrb.mxu1 %v5744_v29  ;;  %v6604_v17 = vld [vmem:[%s10069_s1 + $0xc4] sm:$0xf] }
 0x45c   : > { %v3742_v55 = vadd.f32 %v3741_v2, %v3692_v48  ;;  %v5384_v59 = vor.u32 %v6604_v17, %v5381_v5 }
 0x45d   : > { %v9676_v38 = vadd.f32 %v3836_v36, %v3788_v7  ;;  %3887 = vmatmul.bf16.gmra.mxu0 %v7338_v12  ;;  %v6684_v7 = vld [vmem:[%s10069_s1 + $0x344] sm:$0xf] }
 0x45e   : > { %3936 = vmatmul.bf16.gmra.mxu1 %v7340_v13  ;;  %4065 = vmatpush.bf16.msrb.mxu0 %v5384_v59  ;;  %v5341_v59 = vld [vmem:[%s10069_s1 + $0x98] sm:$0xf0] }
 0x45f   : > { %v4284_v0 = vpack.c.bf16 %v9676_v38, %v9373_v54  ;;  %3985 = vmatmul.bf16.gmra.mxu2 %v7342_v14  ;;  %v6844_v54 = vld [vmem:[%s10069_s1 + $0x844] sm:$0xf] }
 0x460   : > { %4034 = vmatmul.bf16.gmra.mxu3 %v7344_v15  ;;  %v6344_v22 = vor.u32 %v6844_v54, %v6341_v62 }
 0x461   : > { %4364 = vst [vmem:[%s7826_s25 + $0xe0] sm:$0xff] %v4284_v0 }
 0x462   : > { %v3790_v19 = vpop.f32.mrf.mxu2  ;;  %v3694_v45 = vpop.f32.mrf.mxu0  ;;  %4212 = vmatpush.bf16.msrb.mxu3 %v6344_v22 }
 0x463   : > { %v3791_v56 = vadd.f32 %v3790_v19, %v3742_v55  ;;  %v3839_v18 = vpop.f32.mrf.mxu3  ;;  %v3743_v4 = vpop.f32.mrf.mxu1  ;;  %v6754_v19 = vld [vmem:[%s10069_s1 + $0x574] sm:$0xf] }
 0x464   : > { %v3744_v60 = vadd.f32 %v3743_v4, %v3694_v45  ;;  %v5984_v62 = vor.u32 %v6754_v19, %v5981_v46 }
 0x465   : > { %v9697_v35 = vadd.f32 %v3839_v18, %v3791_v56  ;;  %v6301_v56 = vld [vmem:[%s10069_s1 + $0x818] sm:$0xf0] }
 0x466   : > { %4164 = vmatpush.bf16.msrb.mxu2 %v5984_v62  ;;  %v5941_v62 = vld [vmem:[%s10069_s1 + $0x548] sm:$0xf0] }
 0x467   : > { %v4289_v27 = vpack.c.bf16 %v9697_v35, %v9401_v16  ;;  %v5701_v16 = vld [vmem:[%s10069_s1 + $0x368] sm:$0xf0] }
 0x468   : > { %v5704_v2 = vor.u32 %v6684_v7, %v5701_v16 }
 0x469   : > { %4369 = vst [vmem:[%s7826_s25 + $0x108] sm:$0xff] %v4289_v27 }
 0x46a   : > { %v3792_v23 = vpop.f32.mrf.mxu2  ;;  %v3697_v29 = vpop.f32.mrf.mxu0  ;;  %4114 = vmatpush.bf16.msrb.mxu1 %v5704_v2 }
 0x46b   : > { %v3793_v36 = vadd.f32 %v3792_v23, %v3744_v60  ;;  %v3841_v48 = vpop.f32.mrf.mxu3  ;;  %v3746_v0 = vpop.f32.mrf.mxu1  ;;  %v6594_v23 = vld [vmem:[%s10069_s1 + $0x74] sm:$0xf] }
 0x46c   : > { %v3747_v39 = vadd.f32 %v3746_v0, %v3697_v29  ;;  %v5344_v16 = vor.u32 %v6594_v23, %v5341_v59 }
 0x46d   : > { %v9714_v55 = vadd.f32 %v3841_v48, %v3793_v36  ;;  %3892 = vmatmul.bf16.gmra.mxu0 %v7382_v40  ;;  %v6674_v36 = vld [vmem:[%s10069_s1 + $0x2f4] sm:$0xf] }
 0x46e   : > { %3941 = vmatmul.bf16.gmra.mxu1 %v7384_v41  ;;  %4066 = vmatpush.bf16.msrb.mxu0 %v5344_v16 }
 0x46f   : > { %v4294_v32 = vpack.c.bf16 %v9714_v55, %v9418_v47  ;;  %3990 = vmatmul.bf16.gmra.mxu2 %v7386_v42  ;;  %v6834_v47 = vld [vmem:[%s10069_s1 + $0x7f4] sm:$0xf] }
 0x470   : > { %4039 = vmatmul.bf16.gmra.mxu3 %v7388_v43  ;;  %v6304_v4 = vor.u32 %v6834_v47, %v6301_v56 }
 0x471   : > { %4374 = vst [vmem:[%s7826_s25 + $0x130] sm:$0xff] %v4294_v32 }
 0x472   : > { %v3795_v54 = vpop.f32.mrf.mxu2  ;;  %v3699_v22 = vpop.f32.mrf.mxu0  ;;  %4213 = vmatpush.bf16.msrb.mxu3 %v6304_v4 }
 0x473   : > { %v3796_v18 = vadd.f32 %v3795_v54, %v3747_v39  ;;  %v3844_v45 = vpop.f32.mrf.mxu3  ;;  %v3748_v27 = vpop.f32.mrf.mxu1  ;;  %v6744_v54 = vld [vmem:[%s10069_s1 + $0x524] sm:$0xf] }
 0x474   : > { %v3749_v5 = vadd.f32 %v3748_v27, %v3699_v22  ;;  %v5944_v56 = vor.u32 %v6744_v54, %v5941_v62 }
 0x475   : > { %v9735_v60 = vadd.f32 %v3844_v45, %v3796_v18  ;;  %v6261_v18 = vld [vmem:[%s10069_s1 + $0x7c8] sm:$0xf0] }
 0x476   : > { %4165 = vmatpush.bf16.msrb.mxu2 %v5944_v56  ;;  %v5621_v56 = vld [vmem:[%s10069_s1 + $0x2c8] sm:$0xf0] }
 0x477   : > { %v4299_v17 = vpack.c.bf16 %v9735_v60, %v9439_v58  ;;  %v5661_v58 = vld [vmem:[%s10069_s1 + $0x318] sm:$0xf0] }
 0x478   : > { %v5664_v0 = vor.u32 %v6674_v36, %v5661_v58  ;;  %v4650_v36 = vmul.f32 %v8804_v28, %v8804_v28 }
 0x479   : > { %4379 = vst [vmem:[%s7826_s25 + $0x158] sm:$0xff] %v4299_v17  ;;  %v10226_v17 = vld [vmem:[#allocation12_spill] sm:$0xff] }
 0x47a   : > { %v3797_v7 = vpop.f32.mrf.mxu2  ;;  %v3702_v2 = vpop.f32.mrf.mxu0  ;;  %4115 = vmatpush.bf16.msrb.mxu1 %v5664_v0  ;;  %v6584_v0 = vld [vmem:[%s10069_s1 + $0x24] sm:$0xf] }
 0x47b   : > { %v3798_v48 = vadd.f32 %v3797_v7, %v3749_v5  ;;  %v3846_v29 = vpop.f32.mrf.mxu3  ;;  %v3751_v32 = vpop.f32.mrf.mxu1  ;;  %v4640_v5 = vmul.f32 %v10226_v17, %v10226_v17  ;;  %v10227_v7 = vld [vmem:[#allocation13_spill] sm:$0xff] }
 0x47c   : > { %v3752_v46 = vadd.f32 %v3751_v32, %v3702_v2  ;;  %v4630_v16 = vmul.f32 %v10227_v7, %v10227_v7  ;;  %v5301_v32 = vld [vmem:[%s10069_s1 + $0x48] sm:$0xf0] }
 0x47d   : > { %v9752_v39 = vadd.f32 %v3846_v29, %v3798_v48  ;;  %3897 = vmatmul.bf16.gmra.mxu0 %v7426_v8  ;;  %v4660_v29 = vmul.f32 %v8818_v61, %v8818_v61  ;;  %v5304_v62 = vor.u32 %v6584_v0, %v5301_v32  ;;  %v10231_v0 = vld [vmem:[#allocation8_spill] sm:$0xff] }
 0x47e   : > { %3946 = vmatmul.bf16.gmra.mxu1 %v7428_v9  ;;  %v4870_v48 = vadd.f32 %v4640_v5, %v4630_v16 }
 0x47f   : > { %v4304_v19 = vpack.c.bf16 %v9752_v39, %v9456_v53  ;;  %3995 = vmatmul.bf16.gmra.mxu2 %v7430_v10  ;;  %v6824_v53 = vld [vmem:[%s10069_s1 + $0x7a4] sm:$0xf]  ;;  %4067 = vmatpush.bf16.msrb.mxu0 %v5304_v62  ;;  %v10233_v62 = vld [vmem:[#allocation9_spill] sm:$0xff] }
 0x480   : > { %4044 = vmatmul.bf16.gmra.mxu3 %v7432_v11  ;;  %v6264_v27 = vor.u32 %v6824_v53, %v6261_v18 }
 0x481   : > { %4384 = vst [vmem:[%s7826_s25 + $0x180] sm:$0xff] %v4304_v19  ;;  %v4500_v19 = vadd.f32 %v10226_v17, %v10227_v7  ;;  %v4680_v17 = vmul.f32 %v8850_v1, %v8850_v1 }
 0x482   : > { %v3800_v47 = vpop.f32.mrf.mxu2  ;;  %v3704_v4 = vpop.f32.mrf.mxu0  ;;  %4214 = vmatpush.bf16.msrb.mxu3 %v6264_v27 }
 0x483   : > { %v3801_v45 = vadd.f32 %v3800_v47, %v3752_v46  ;;  %v3849_v22 = vpop.f32.mrf.mxu3  ;;  %v3753_v23 = vpop.f32.mrf.mxu1  ;;  %v4871_v46 = vadd.f32 %v4870_v48, %v4650_v36  ;;  %v6664_v47 = vld [vmem:[%s10069_s1 + $0x2a4] sm:$0xf]  ;;  %v10229_v48 = vld [vmem:[#allocation7_spill] sm:$0xff] }
 0x484   : > { %v3754_v2 = vadd.f32 %v3753_v23, %v3704_v4  ;;  %v4501_v4 = vadd.f32 %v4500_v19, %v8804_v28  ;;  %v10228_v36 = vld [vmem:[#allocation14_spill] sm:$0xff]  ;;  %v10230_v28 = vld [vmem:[#allocation27_spill] sm:$0xff] }
 0x485   : > { %v9775_v59 = vadd.f32 %v3849_v22, %v3801_v45  ;;  %v5624_v22 = vor.u32 %v6664_v47, %v5621_v56  ;;  %v4872_v27 = vadd.f32 %v4871_v46, %v4660_v29  ;;  %v10232_v46 = vld [vmem:[#allocation15_spill] sm:$0xff]  ;;  %v10234_v47 = vld [vmem:[#allocation26_spill] sm:$0xff] }
 0x486   : > { %v4502_v7 = vadd.f32 %v4501_v4, %v8818_v61  ;;  %v4710_v56 = vmul.f32 %v10234_v47, %v10234_v47 }
 0x487   : > { %v4309_v58 = vpack.c.bf16 %v9775_v59, %v9477_v31  ;;  %v4670_v31 = vmul.f32 %v8836_v3, %v8836_v3  ;;  %4116 = vmatpush.bf16.msrb.mxu1 %v5624_v22 }
 0x488   : > { %v4503_v32 = vadd.f32 %v4502_v7, %v8836_v3 }
 0x489   : > { %4389 = vst [vmem:[%s7826_s25 + $0x1a8] sm:$0xff] %v4309_v58  ;;  %v4873_v16 = vadd.f32 %v4872_v27, %v4670_v31  ;;  %v4690_v58 = vmul.f32 %v10228_v36, %v10228_v36  ;;  %v10235_v27 = vld [vmem:[#allocation16_spill] sm:$0xff] }
 0x48a   : > { %v3802_v54 = vpop.f32.mrf.mxu2  ;;  %v3707_v45 = vpop.f32.mrf.mxu0  ;;  %v4504_v61 = vadd.f32 %v4503_v32, %v8850_v1 }
 0x48b   : > { %v3803_v53 = vadd.f32 %v3802_v54, %v3754_v2  ;;  %v3851_v18 = vpop.f32.mrf.mxu3  ;;  %v3756_v5 = vpop.f32.mrf.mxu1  ;;  %v4874_v19 = vadd.f32 %v4873_v16, %v4680_v17  ;;  %v4700_v54 = vmul.f32 %v10232_v46, %v10232_v46  ;;  %v4720_v17 = vmul.f32 %v10235_v27, %v10235_v27 }
 0x48c   : > { %v3757_v2 = vadd.f32 %v3756_v5, %v3707_v45  ;;  %v4505_v3 = vadd.f32 %v4504_v61, %v10228_v36  ;;  %v10237_v36 = vld [vmem:[#allocation18_spill] sm:$0xff] }
 0x48d   : > { %v9805_v23 = vadd.f32 %v3851_v18, %v3803_v53  ;;  %3902 = vmatmul.bf16.gmra.mxu0 %v7470_v44  ;;  %v4875_v31 = vadd.f32 %v4874_v19, %v4690_v58  ;;  %v10236_v58 = vld [vmem:[#allocation17_spill] sm:$0xff]  ;;  %v4740_v19 = vmul.f32 %v10237_v36, %v10237_v36 }
 0x48e   : > { %3951 = vmatmul.bf16.gmra.mxu1 %v10229_v48  ;;  %v4506_v1 = vadd.f32 %v4505_v3, %v10232_v46 }
 0x48f   : > { %v4314_v29 = vpack.c.bf16 %v9805_v23, %v10230_v28  ;;  %4000 = vmatmul.bf16.gmra.mxu2 %v10231_v0  ;;  %v4876_v4 = vadd.f32 %v4875_v31, %v4700_v54  ;;  %v4730_v28 = vmul.f32 %v10236_v58, %v10236_v58  ;;  %v4683_v54 = vmul.f32 %v9676_v38, %v9676_v38 }
 0x490   : > { %4049 = vmatmul.bf16.gmra.mxu3 %v10233_v62 }
 0x491   : > { %4394 = vst [vmem:[%s7826_s25 + $0x1d0] sm:$0xff] %v4314_v29  ;;  %v4877_v16 = vadd.f32 %v4876_v4, %v4710_v56  ;;  %v10238_v56 = vld [vmem:[#allocation19_spill] sm:$0xff] }
 0x492   : > { %v3805_v53 = vpop.f32.mrf.mxu2  ;;  %v3709_v22 = vpop.f32.mrf.mxu0 }
 0x493   : > { %v3806_v18 = vadd.f32 %v3805_v53, %v3757_v2  ;;  %v3854_v45 = vpop.f32.mrf.mxu3  ;;  %v3758_v5 = vpop.f32.mrf.mxu1  ;;  %v4507_v2 = vadd.f32 %v4506_v1, %v10234_v47  ;;  %v4878_v32 = vadd.f32 %v4877_v16, %v4720_v17  ;;  %v4750_v53 = vmul.f32 %v10238_v56, %v10238_v56 }
 0x494   : > { %v3759_v61 = vadd.f32 %v3758_v5, %v3709_v22  ;;  %v4567_v47 = vadd.f32 %v9659_v6, %v9676_v38  ;;  %v10239_v22 = vld [vmem:[#allocation20_spill] sm:$0xff]  ;;  %v4937_v5 = vadd.f32 %v9662_v63, %v4683_v54 }
 0x495   : > { %v9826_v7 = vadd.f32 %v3854_v45, %v3806_v18  ;;  %v4508_v46 = vadd.f32 %v4507_v2, %v10235_v27  ;;  %v4879_v31 = vadd.f32 %v4878_v32, %v4730_v28  ;;  %v4760_v27 = vmul.f32 %v10239_v22, %v10239_v22  ;;  %v10240_v32 = vld [vmem:[#allocation21_spill] sm:$0xff]  ;;  %v10241_v54 = vld [vmem:[#allocation24_spill] sm:$0xff] }
 0x496   : > { %v4568_v28 = vadd.f32 %v4567_v47, %v9697_v35 }
 0x497   : > { %v4319_v29 = vpack.c.bf16 %v9826_v7, %v9503_v37  ;;  %v4693_v37 = vmul.f32 %v9697_v35, %v9697_v35  ;;  %v4509_v17 = vadd.f32 %v4508_v46, %v10236_v58  ;;  %v4880_v1 = vadd.f32 %v4879_v31, %v4740_v19  ;;  %v10242_v31 = vld [vmem:[#allocation10_spill] sm:$0xff] }
 0x498   : > { %v4770_v58 = vmul.f32 %v10240_v32, %v10240_v32  ;;  %v4569_v63 = vadd.f32 %v4568_v28, %v9714_v55  ;;  %v4713_v35 = vmul.f32 %v9735_v60, %v9735_v60 }
 0x499   : > { %4399 = vst [vmem:[%s7826_s25 + $0x1f8] sm:$0xff] %v4319_v29  ;;  %v4703_v29 = vmul.f32 %v9714_v55, %v9714_v55  ;;  %v4510_v6 = vadd.f32 %v4509_v17, %v10237_v36  ;;  %v4881_v38 = vadd.f32 %v4880_v1, %v4750_v53  ;;  %v4938_v19 = vadd.f32 %v4937_v5, %v4693_v37 }
 0x49a   : > { %v3807_v18 = vpop.f32.mrf.mxu2  ;;  %v3712_v4 = vpop.f32.mrf.mxu0  ;;  %v4723_v55 = vmul.f32 %v9752_v39, %v9752_v39 }
 0x49b   : > { %v3808_v45 = vadd.f32 %v3807_v18, %v3759_v61  ;;  %v3856_v3 = vpop.f32.mrf.mxu3  ;;  %v3761_v16 = vpop.f32.mrf.mxu1  ;;  %v4511_v36 = vadd.f32 %v4510_v6, %v10238_v56  ;;  %v4882_v53 = vadd.f32 %v4881_v38, %v4760_v27  ;;  %v10243_v18 = vld [vmem:[#allocation22_spill] sm:$0xff]  ;;  %v4939_v37 = vadd.f32 %v4938_v19, %v4703_v29 }
 0x49c   : > { %v3762_v46 = vadd.f32 %v3761_v16, %v3712_v4  ;;  %v4780_v47 = vmul.f32 %v10243_v18, %v10243_v18  ;;  %v4733_v27 = vmul.f32 %v9775_v59, %v9775_v59 }
 0x49d   : > { %v3857_v2 = vadd.f32 %v3856_v3, %v3808_v45  ;;  %3907 = vmatmul.bf16.gmra.mxu0 %v7514_v20  ;;  %v10244_v45 = vld [vmem:[#allocation11_spill] sm:$0xff]  ;;  %v4570_v3 = vadd.f32 %v4569_v63, %v9735_v60  ;;  %v4512_v17 = vadd.f32 %v4511_v36, %v10239_v22  ;;  %v4883_v4 = vadd.f32 %v4882_v53, %v4770_v58 }
 0x49e   : > { %3956 = vmatmul.bf16.gmra.mxu1 %v7516_v21  ;;  %v4940_v5 = vadd.f32 %v4939_v37, %v4713_v35  ;;  %v4743_v22 = vmul.f32 %v9805_v23, %v9805_v23 }
 0x49f   : > { %v4324_v61 = vpack.c.bf16 %v3857_v2, %v10241_v54  ;;  %4005 = vmatmul.bf16.gmra.mxu2 %v10242_v31  ;;  %v4571_v56 = vadd.f32 %v4570_v3, %v9752_v39  ;;  %v4513_v29 = vadd.f32 %v4512_v17, %v10240_v32  ;;  %v4884_v60 = vadd.f32 %v4883_v4, %v4780_v47 }
 0x4a0   : > { %4054 = vmatmul.bf16.gmra.mxu3 %v10244_v45  ;;  %v4941_v19 = vadd.f32 %v4940_v5, %v4723_v55  ;;  %v4763_v47 = vmul.f32 %v3857_v2, %v3857_v2 }
 0x4a1   : > { %4404 = vst [vmem:[%s7826_s25 + $0x220] sm:$0xff] %v4324_v61  ;;  %v4572_v63 = vadd.f32 %v4571_v56, %v9775_v59  ;;  %v4514_v39 = vadd.f32 %v4513_v29, %v10243_v18  ;;  %v4753_v61 = vmul.f32 %v9826_v7, %v9826_v7  ;;  %v10245_v29 = vld [vmem:[#allocation3_spill] sm:$0xff] }
 0x4a2   : > { %v3810_v1 = vpop.f32.mrf.mxu2  ;;  %v3714_v6 = vpop.f32.mrf.mxu0  ;;  %v4942_v35 = vadd.f32 %v4941_v19, %v4733_v27 }
 0x4a3   : > { %v3811_v16 = vadd.f32 %v3810_v1, %v3762_v46  ;;  %v3859_v28 = vpop.f32.mrf.mxu3  ;;  %v3763_v38 = vpop.f32.mrf.mxu1  ;;  %v4573_v54 = vadd.f32 %v4572_v63, %v9805_v23  ;;  %v4885_v46 = vrot.slane %v4884_v60, 4  ;;  %v4515_v37 = vrot.slane %v4514_v39, 4 }
 0x4a4   : > { %v4943_v36 = vadd.f32 %v4942_v35, %v4743_v22  ;;  %v3764_v59 = vadd.f32 %v3763_v38, %v3714_v6  ;;  %v10246_v38 = vld [vmem:[#allocation2_spill] sm:$0xff]  ;;  %v10247_v22 = vld [vmem:[#allocation4_spill] sm:$0xff] }
 0x4a5   : > { %v3860_v58 = vadd.f32 %v3859_v28, %v3811_v16  ;;  %v4574_v53 = vadd.f32 %v4573_v54, %v9826_v7  ;;  %v4886_v5 = vadd.f32 %v4885_v46, %v4884_v60  ;;  %v4516_v7 = vadd.f32 %v4515_v37, %v4514_v39  ;;  %v10248_v60 = vld [vmem:[#allocation5_spill] sm:$0xff] }
 0x4a6   : > { %v4944_v55 = vadd.f32 %v4943_v36, %v4753_v61 }
 0x4a7   : > { %v4329_v32 = vpack.c.bf16 %v3860_v58, %v9553_v33  ;;  %v4575_v17 = vadd.f32 %v4574_v53, %v3857_v2  ;;  %v4773_v18 = vmul.f32 %v3860_v58, %v3860_v58  ;;  %v4887_v35 = vrot.slane %v4886_v5, 2 }
 0x4a8   : > { %v4945_v27 = vadd.f32 %v4944_v55, %v4763_v47 }
 0x4a9   : > { %4409 = vst [vmem:[%s7826_s25 + $0x248] sm:$0xff] %v4329_v32  ;;  %v4576_v33 = vadd.f32 %v4575_v17, %v3860_v58  ;;  %v4517_v32 = vrot.slane %v4516_v7, 2  ;;  %v4888_v47 = vadd.f32 %v4887_v35, %v4886_v5 }
 0x4aa   : > { %v3812_v3 = vpop.f32.mrf.mxu2  ;;  %v3873_v23 = vpop.f32.mrf.mxu0  ;;  %v4946_v6 = vadd.f32 %v4945_v27, %v4773_v18 }
 0x4ab   : > { %v3813_v4 = vadd.f32 %v3812_v3, %v3764_v59  ;;  %v3861_v1 = vpop.f32.mrf.mxu3  ;;  %v3922_v56 = vpop.f32.mrf.mxu1  ;;  %v4518_v18 = vadd.f32 %v4517_v32, %v4516_v7  ;;  %v10249_v7 = vld [vmem:[#allocation23_spill] sm:$0xff] }
 0x4ac   : > { %v3923_v28 = vadd.f32 %v3922_v56, %v3873_v23  ;;  %v4889_v23 = vrot.slane %v4888_v47, 1 }
 0x4ad   : > { %v3862_v16 = vadd.f32 %v3861_v1, %v3813_v4  ;;  %4068 = vmatmul.bf16.vlgmr.msrb.gmra.mxu0 %v10203_v34 }
 0x4ae   : > { %4117 = vmatmul.bf16.vlgmr.msrb.gmra.mxu1 %v10245_v29 }
 0x4af   : > { %v4334_v19 = vpack.c.bf16 %v3862_v16, %v10246_v38  ;;  %v4577_v2 = vadd.f32 %v4576_v33, %v3862_v16  ;;  %v4783_v63 = vmul.f32 %v3862_v16, %v3862_v16  ;;  %4166 = vmatmul.bf16.vlgmr.msrb.gmra.mxu2 %v10247_v22  ;;  %v4519_v16 = vrot.slane %v4518_v18, 1 }
 0x4b0   : > { %4215 = vmatmul.bf16.vlgmr.msrb.gmra.mxu3 %v10248_v60  ;;  %v5020_v60 = vrot.slane %v10249_v7, 6 }
 0x4b1   : > { %4414 = vst [vmem:[%s7826_s25 + $0x270] sm:$0xff] %v4334_v19  ;;  %v4578_v54 = vrot.slane %v4577_v2, 4  ;;  %v4947_v58 = vadd.f32 %v4946_v6, %v4783_v63  ;;  %v4890_v19 = vadd.f32 %v4889_v23, %v4888_v47 }
 0x4b2   : > { %v3971_v61 = vpop.f32.mrf.mxu2  ;;  %v3875_v53 = vpop.f32.mrf.mxu0 }
 0x4b3   : > { %v4579_v46 = vadd.f32 %v4578_v54, %v4577_v2  ;;  %v4948_v34 = vrot.slane %v4947_v58, 4  ;;  %v3972_v39 = vadd.f32 %v3971_v61, %v3923_v28  ;;  %v4020_v36 = vpop.f32.mrf.mxu3  ;;  %v3924_v59 = vpop.f32.mrf.mxu1  ;;  %v4520_v54 = vadd.f32 %v4519_v16, %v4518_v18 }
 0x4b4   : > { %v3925_v17 = vadd.f32 %v3924_v59, %v3875_v53  ;;  %v5021_v61 = vrot.slane %v9608_v57, 4 }
 0x4b5   : > { %v4580_v37 = vrot.slane %v4579_v46, 2  ;;  %v4949_v3 = vadd.f32 %v4948_v34, %v4947_v58  ;;  %v9892_v55 = vadd.f32 %v4020_v36, %v3972_v39 }
 0x4b7   : > { %v4581_v4 = vadd.f32 %v4580_v37, %v4579_v46  ;;  %v4950_v1 = vrot.slane %v4949_v3, 2  ;;  %v5001_v46 = vsel %vm4996_vm0, %v4520_v54, %v4890_v19 }
 0x4b8   : > { %v5030_v34 = vsel %vm5024_vm1, %v5001_v46, %v5020_v60 }
 0x4b9   : > { %v4582_v56 = vrot.slane %v4581_v4, 1  ;;  %v4951_v27 = vadd.f32 %v4950_v1, %v4949_v3 }
 0x4ba   : > { %v3973_v33 = vpop.f32.mrf.mxu2  ;;  %v3878_v38 = vpop.f32.mrf.mxu0 }
 0x4bb   : > { %v4952_v29 = vrot.slane %v4951_v27, 1  ;;  %v3974_v6 = vadd.f32 %v3973_v33, %v3925_v17  ;;  %v4022_v28 = vpop.f32.mrf.mxu3  ;;  %v3927_v5 = vpop.f32.mrf.mxu1  ;;  %v4583_v2 = vadd.f32 %v4582_v56, %v4581_v4 }
 0x4bc   : > { %v3928_v35 = vadd.f32 %v3927_v5, %v3878_v38 }
 0x4bd   : > { %v4953_v63 = vadd.f32 %v4952_v29, %v4951_v27  ;;  %v9894_v22 = vadd.f32 %v4022_v28, %v3974_v6  ;;  %4073 = vmatmul.bf16.gmra.mxu0 %v7250_v24 }
 0x4be   : > { %4122 = vmatmul.bf16.gmra.mxu1 %v7252_v25 }
 0x4bf   : > { %v5004_v58 = vsel %vm4996_vm0, %v4583_v2, %v4953_v63  ;;  %4171 = vmatmul.bf16.gmra.mxu2 %v7254_v26  ;;  %v4644_v38 = vmul.f32 %v9894_v22, %v9894_v22 }
 0x4c0   : > { %v5022_v32 = vrot.slane %v5004_v58, 2  ;;  %4220 = vmatmul.bf16.gmra.mxu3 %v10222_v30 }
 0x4c2   : > { %v5031_v24 = vsel %vm5026_vm2, %v5021_v61, %v5022_v32  ;;  %v3976_v39 = vpop.f32.mrf.mxu2  ;;  %v3880_v47 = vpop.f32.mrf.mxu0 }
 0x4c3   : > { %v5032_v25 = vsel %vm5028_vm3, %v5030_v34, %v5031_v24  ;;  %v3977_v36 = vadd.f32 %v3976_v39, %v3928_v35  ;;  %v4025_v53 = vpop.f32.mrf.mxu3  ;;  %v3929_v59 = vpop.f32.mrf.mxu1 }
 0x4c4   : > { %5038 = vst [vmem:[%s8795_s17 + $0x8] sm:$0xff] %v5032_v25  ;;  %v3930_v57 = vadd.f32 %v3929_v59, %v3880_v47 }
 0x4c5   : > { %v9908_v26 = vadd.f32 %v4025_v53, %v3977_v36 }
 0x4c7   : > { %v4654_v2 = vmul.f32 %v9908_v26, %v9908_v26 }
 0x4ca   : > { %v3978_v37 = vpop.f32.mrf.mxu2  ;;  %v3883_v17 = vpop.f32.mrf.mxu0 }
 0x4cb   : > { %v3979_v3 = vadd.f32 %v3978_v37, %v3930_v57  ;;  %v4027_v30 = vpop.f32.mrf.mxu3  ;;  %v3932_v18 = vpop.f32.mrf.mxu1 }
 0x4cc   : > { %v3933_v1 = vadd.f32 %v3932_v18, %v3883_v17 }
 0x4cd   : > { %v9910_v4 = vadd.f32 %v4027_v30, %v3979_v3  ;;  %4078 = vmatmul.bf16.gmra.mxu0 %v7294_v49 }
 0x4ce   : > { %4127 = vmatmul.bf16.gmra.mxu1 %v7296_v50  ;;  %v4634_v50 = vmul.f32 %v9892_v55, %v9892_v55 }
 0x4cf   : > { %4176 = vmatmul.bf16.gmra.mxu2 %v7298_v51  ;;  %v4664_v54 = vmul.f32 %v9910_v4, %v9910_v4 }
 0x4d0   : > { %4225 = vmatmul.bf16.gmra.mxu3 %v7300_v52  ;;  %v4584_v52 = vadd.f32 %v9894_v22, %v9892_v55  ;;  %v4954_v7 = vadd.f32 %v4644_v38, %v4634_v50 }
 0x4d2   : > { %v3981_v23 = vpop.f32.mrf.mxu2  ;;  %v3885_v33 = vpop.f32.mrf.mxu0  ;;  %v4585_v60 = vadd.f32 %v4584_v52, %v9908_v26  ;;  %v4955_v58 = vadd.f32 %v4954_v7, %v4654_v2 }
 0x4d3   : > { %v3982_v56 = vadd.f32 %v3981_v23, %v3933_v1  ;;  %v4030_v27 = vpop.f32.mrf.mxu3  ;;  %v3934_v16 = vpop.f32.mrf.mxu1 }
 0x4d4   : > { %v3935_v6 = vadd.f32 %v3934_v16, %v3885_v33  ;;  %v4586_v61 = vadd.f32 %v4585_v60, %v9910_v4 }
 0x4d5   : > { %v9916_v29 = vadd.f32 %v4030_v27, %v3982_v56 }
 0x4d7   : > { %v4674_v32 = vmul.f32 %v9916_v29, %v9916_v29 }
 0x4da   : > { %v3983_v28 = vpop.f32.mrf.mxu2  ;;  %v3888_v5 = vpop.f32.mrf.mxu0 }
 0x4db   : > { %v3984_v19 = vadd.f32 %v3983_v28, %v3935_v6  ;;  %v4032_v49 = vpop.f32.mrf.mxu3  ;;  %v3937_v51 = vpop.f32.mrf.mxu1 }
 0x4dc   : > { %v3938_v35 = vadd.f32 %v3937_v51, %v3888_v5 }
 0x4dd   : > { %v9926_v63 = vadd.f32 %v4032_v49, %v3984_v19  ;;  %4083 = vmatmul.bf16.gmra.mxu0 %v7338_v12  ;;  %v4956_v12 = vadd.f32 %v4955_v58, %v4664_v54 }
 0x4de   : > { %4132 = vmatmul.bf16.gmra.mxu1 %v7340_v13  ;;  %v4587_v13 = vadd.f32 %v4586_v61, %v9916_v29 }
 0x4df   : > { %4181 = vmatmul.bf16.gmra.mxu2 %v7342_v14  ;;  %v4684_v34 = vmul.f32 %v9926_v63, %v9926_v63  ;;  %v4957_v14 = vadd.f32 %v4956_v12, %v4674_v32 }
 0x4e0   : > { %4230 = vmatmul.bf16.gmra.mxu3 %v7344_v15  ;;  %v4588_v15 = vadd.f32 %v4587_v13, %v9926_v63 }
 0x4e1   : > { %v4958_v59 = vadd.f32 %v4957_v14, %v4684_v34 }
 0x4e2   : > { %v3986_v46 = vpop.f32.mrf.mxu2  ;;  %v3890_v25 = vpop.f32.mrf.mxu0 }
 0x4e3   : > { %v3987_v24 = vadd.f32 %v3986_v46, %v3938_v35  ;;  %v4035_v39 = vpop.f32.mrf.mxu3  ;;  %v3939_v36 = vpop.f32.mrf.mxu1 }
 0x4e4   : > { %v3940_v47 = vadd.f32 %v3939_v36, %v3890_v25 }
 0x4e5   : > { %v9942_v53 = vadd.f32 %v4035_v39, %v3987_v24 }
 0x4e7   : > { %v4589_v57 = vadd.f32 %v4588_v15, %v9942_v53  ;;  %v4694_v37 = vmul.f32 %v9942_v53, %v9942_v53 }
 0x4e9   : > { %v4959_v3 = vadd.f32 %v4958_v59, %v4694_v37 }
 0x4ea   : > { %v3988_v30 = vpop.f32.mrf.mxu2  ;;  %v3893_v1 = vpop.f32.mrf.mxu0 }
 0x4eb   : > { %v3989_v17 = vadd.f32 %v3988_v30, %v3940_v47  ;;  %v4037_v18 = vpop.f32.mrf.mxu3  ;;  %v3942_v23 = vpop.f32.mrf.mxu1 }
 0x4ec   : > { %v3943_v27 = vadd.f32 %v3942_v23, %v3893_v1 }
 0x4ed   : > { %v9947_v56 = vadd.f32 %v4037_v18, %v3989_v17  ;;  %4088 = vmatmul.bf16.gmra.mxu0 %v7382_v40 }
 0x4ee   : > { %4137 = vmatmul.bf16.gmra.mxu1 %v7384_v41 }
 0x4ef   : > { %v4590_v33 = vadd.f32 %v4589_v57, %v9947_v56  ;;  %v4704_v16 = vmul.f32 %v9947_v56, %v9947_v56  ;;  %4186 = vmatmul.bf16.gmra.mxu2 %v7386_v42 }
 0x4f0   : > { %4235 = vmatmul.bf16.gmra.mxu3 %v7388_v43 }
 0x4f1   : > { %v4960_v6 = vadd.f32 %v4959_v3, %v4704_v16 }
 0x4f2   : > { %v3991_v28 = vpop.f32.mrf.mxu2  ;;  %v3895_v49 = vpop.f32.mrf.mxu0 }
 0x4f3   : > { %v3992_v38 = vadd.f32 %v3991_v28, %v3943_v27  ;;  %v4040_v19 = vpop.f32.mrf.mxu3  ;;  %v3944_v5 = vpop.f32.mrf.mxu1 }
 0x4f4   : > { %v3945_v40 = vadd.f32 %v3944_v5, %v3895_v49 }
 0x4f5   : > { %v9956_v50 = vadd.f32 %v4040_v19, %v3992_v38 }
 0x4f7   : > { %v4591_v41 = vadd.f32 %v4590_v33, %v9956_v50  ;;  %v4714_v51 = vmul.f32 %v9956_v50, %v9956_v50 }
 0x4f9   : > { %v4961_v52 = vadd.f32 %v4960_v6, %v4714_v51 }
 0x4fa   : > { %v3993_v2 = vpop.f32.mrf.mxu2  ;;  %v3898_v7 = vpop.f32.mrf.mxu0 }
 0x4fb   : > { %v3994_v35 = vadd.f32 %v3993_v2, %v3945_v40  ;;  %v4042_v42 = vpop.f32.mrf.mxu3  ;;  %v3947_v43 = vpop.f32.mrf.mxu1 }
 0x4fc   : > { %v3948_v54 = vadd.f32 %v3947_v43, %v3898_v7 }
 0x4fd   : > { %v9961_v60 = vadd.f32 %v4042_v42, %v3994_v35  ;;  %4093 = vmatmul.bf16.gmra.mxu0 %v7426_v8 }
 0x4fe   : > { %4142 = vmatmul.bf16.gmra.mxu1 %v7428_v9 }
 0x4ff   : > { %v4592_v58 = vadd.f32 %v4591_v41, %v9961_v60  ;;  %v4724_v61 = vmul.f32 %v9961_v60, %v9961_v60  ;;  %4191 = vmatmul.bf16.gmra.mxu2 %v7430_v10 }
 0x500   : > { %4240 = vmatmul.bf16.gmra.mxu3 %v7432_v11 }
 0x501   : > { %v4962_v32 = vadd.f32 %v4961_v52, %v4724_v61 }
 0x502   : > { %v3996_v46 = vpop.f32.mrf.mxu2  ;;  %v3900_v34 = vpop.f32.mrf.mxu0 }
 0x503   : > { %v3997_v12 = vadd.f32 %v3996_v46, %v3948_v54  ;;  %v4045_v13 = vpop.f32.mrf.mxu3  ;;  %v3949_v24 = vpop.f32.mrf.mxu1 }
 0x504   : > { %v3950_v8 = vadd.f32 %v3949_v24, %v3900_v34 }
 0x505   : > { %v9970_v39 = vadd.f32 %v4045_v13, %v3997_v12 }
 0x507   : > { %v4593_v9 = vadd.f32 %v4592_v58, %v9970_v39  ;;  %v4734_v25 = vmul.f32 %v9970_v39, %v9970_v39 }
 0x509   : > { %v4963_v36 = vadd.f32 %v4962_v32, %v4734_v25 }
 0x50a   : > { %v3998_v14 = vpop.f32.mrf.mxu2  ;;  %v3903_v47 = vpop.f32.mrf.mxu0 }
 0x50b   : > { %v3999_v15 = vadd.f32 %v3998_v14, %v3950_v8  ;;  %v4047_v10 = vpop.f32.mrf.mxu3  ;;  %v3952_v11 = vpop.f32.mrf.mxu1 }
 0x50c   : > { %v3953_v57 = vadd.f32 %v3952_v11, %v3903_v47 }
 0x50d   : > { %v9975_v59 = vadd.f32 %v4047_v10, %v3999_v15  ;;  %4098 = vmatmul.bf16.gmra.mxu0 %v7470_v44 }
 0x50e   : > { %4147 = vmatmul.bf16.gmra.mxu1 %v10229_v48 }
 0x50f   : > { %v4594_v37 = vadd.f32 %v4593_v9, %v9975_v59  ;;  %v4744_v3 = vmul.f32 %v9975_v59, %v9975_v59  ;;  %4196 = vmatmul.bf16.gmra.mxu2 %v10231_v0 }
 0x510   : > { %4245 = vmatmul.bf16.gmra.mxu3 %v10233_v62 }
 0x511   : > { %v4964_v30 = vadd.f32 %v4963_v36, %v4744_v3 }
 0x512   : > { %v4001_v17 = vpop.f32.mrf.mxu2  ;;  %v3905_v23 = vpop.f32.mrf.mxu0 }
 0x513   : > { %v4002_v18 = vadd.f32 %v4001_v17, %v3953_v57  ;;  %v4050_v1 = vpop.f32.mrf.mxu3  ;;  %v3954_v27 = vpop.f32.mrf.mxu1 }
 0x514   : > { %v3955_v44 = vadd.f32 %v3954_v27, %v3905_v23 }
 0x515   : > { %v9984_v33 = vadd.f32 %v4050_v1, %v4002_v18 }
 0x517   : > { %v4595_v48 = vadd.f32 %v4594_v37, %v9984_v33  ;;  %v4754_v16 = vmul.f32 %v9984_v33, %v9984_v33 }
 0x519   : > { %v4965_v6 = vadd.f32 %v4964_v30, %v4754_v16 }
 0x51a   : > { %v4003_v28 = vpop.f32.mrf.mxu2  ;;  %v3908_v19 = vpop.f32.mrf.mxu0 }
 0x51b   : > { %v4004_v38 = vadd.f32 %v4003_v28, %v3955_v44  ;;  %v4052_v0 = vpop.f32.mrf.mxu3  ;;  %v3957_v62 = vpop.f32.mrf.mxu1 }
 0x51c   : > { %v3958_v5 = vadd.f32 %v3957_v62, %v3908_v19 }
 0x51d   : > { %v9989_v49 = vadd.f32 %v4052_v0, %v4004_v38  ;;  %4103 = vmatmul.bf16.gmra.mxu0 %v7514_v20 }
 0x51e   : > { %4152 = vmatmul.bf16.gmra.mxu1 %v7516_v21 }
 0x51f   : > { %v4596_v40 = vadd.f32 %v4595_v48, %v9989_v49  ;;  %v4764_v41 = vmul.f32 %v9989_v49, %v9989_v49  ;;  %4201 = vmatmul.bf16.gmra.mxu2 %v10242_v31 }
 0x520   : > { %4250 = vmatmul.bf16.gmra.mxu3 %v10244_v45 }
 0x521   : > { %v4966_v51 = vadd.f32 %v4965_v6, %v4764_v41 }
 0x522   : > { %v4006_v52 = vpop.f32.mrf.mxu2  ;;  %v3910_v42 = vpop.f32.mrf.mxu0 }
 0x523   : > { %v4007_v2 = vadd.f32 %v4006_v52, %v3958_v5  ;;  %v4055_v35 = vpop.f32.mrf.mxu3  ;;  %v3959_v7 = vpop.f32.mrf.mxu1 }
 0x524   : > { %v3960_v20 = vadd.f32 %v3959_v7, %v3910_v42 }
 0x525   : > { %v9998_v43 = vadd.f32 %v4055_v35, %v4007_v2 }
 0x527   : > { %v4597_v21 = vadd.f32 %v4596_v40, %v9998_v43  ;;  %v4774_v54 = vmul.f32 %v9998_v43, %v9998_v43 }
 0x529   : > { %v4967_v58 = vadd.f32 %v4966_v51, %v4774_v54 }
 0x52a   : > { %v4008_v61 = vpop.f32.mrf.mxu2  ;;  %v4069_v46 = vpop.f32.mrf.mxu0 }
 0x52b   : > { %v4009_v32 = vadd.f32 %v4008_v61, %v3960_v20  ;;  %v4057_v31 = vpop.f32.mrf.mxu3  ;;  %v4118_v45 = vpop.f32.mrf.mxu1 }
 0x52c   : > { %v4119_v24 = vadd.f32 %v4118_v45, %v4069_v46 }
 0x52d   : > { %v10003_v12 = vadd.f32 %v4057_v31, %v4009_v32 }
 0x52f   : > { %v4598_v13 = vadd.f32 %v4597_v21, %v10003_v12  ;;  %v4784_v34 = vmul.f32 %v10003_v12, %v10003_v12 }
 0x531   : > { %v4599_v8 = vrot.slane %v4598_v13, 4  ;;  %v4968_v9 = vadd.f32 %v4967_v58, %v4784_v34 }
 0x532   : > { %v4167_v25 = vpop.f32.mrf.mxu2  ;;  %v4071_v47 = vpop.f32.mrf.mxu0 }
 0x533   : > { %v4600_v36 = vadd.f32 %v4599_v8, %v4598_v13  ;;  %v4969_v14 = vrot.slane %v4968_v9, 4  ;;  %v4168_v15 = vadd.f32 %v4167_v25, %v4119_v24  ;;  %v4216_v10 = vpop.f32.mrf.mxu3  ;;  %v4120_v11 = vpop.f32.mrf.mxu1 }
 0x534   : > { %v4121_v27 = vadd.f32 %v4120_v11, %v4071_v47 }
 0x535   : > { %v4601_v57 = vrot.slane %v4600_v36, 2  ;;  %v4970_v37 = vadd.f32 %v4969_v14, %v4968_v9  ;;  %v4217_v3 = vadd.f32 %v4216_v10, %v4168_v15 }
 0x537   : > { %v4602_v30 = vadd.f32 %v4601_v57, %v4600_v36  ;;  %v4971_v17 = vrot.slane %v4970_v37, 2  ;;  %v4260_v18 = vpack.c.bf16 %v4217_v3, %v9892_v55  ;;  %v4635_v5 = vmul.f32 %v4217_v3, %v4217_v3 }
 0x539   : > { %v4603_v1 = vrot.slane %v4602_v30, 1  ;;  %v4972_v23 = vadd.f32 %v4971_v17, %v4970_v37  ;;  %4340 = vst [vmem:[%s7826_s25 + $0x20] sm:$0xff] %v4260_v18 }
 0x53a   : > { %v4169_v44 = vpop.f32.mrf.mxu2  ;;  %v4074_v28 = vpop.f32.mrf.mxu0 }
 0x53b   : > { %v4973_v48 = vrot.slane %v4972_v23, 1  ;;  %v4170_v16 = vadd.f32 %v4169_v44, %v4121_v27  ;;  %v4218_v6 = vpop.f32.mrf.mxu3  ;;  %v4123_v38 = vpop.f32.mrf.mxu1  ;;  %v4604_v0 = vadd.f32 %v4603_v1, %v4602_v30 }
 0x53c   : > { %v4124_v40 = vadd.f32 %v4123_v38, %v4074_v28 }
 0x53d   : > { %v4974_v19 = vadd.f32 %v4973_v48, %v4972_v23  ;;  %v4219_v62 = vadd.f32 %v4218_v6, %v4170_v16 }
 0x53f   : > { %v10011_v41 = vsel %vm4996_vm0, %v4604_v0, %v4974_v19  ;;  %v4265_v55 = vpack.c.bf16 %v4219_v62, %v9894_v22  ;;  %v4605_v51 = vadd.f32 %v4219_v62, %v4217_v3  ;;  %v4645_v52 = vmul.f32 %v4219_v62, %v4219_v62 }
 0x541   : > { %4345 = vst [vmem:[%s7826_s25 + $0x48] sm:$0xff] %v4265_v55  ;;  %v4975_v2 = vadd.f32 %v4645_v52, %v4635_v5 }
 0x542   : > { %v4172_v35 = vpop.f32.mrf.mxu2  ;;  %v4076_v20 = vpop.f32.mrf.mxu0 }
 0x543   : > { %v4173_v42 = vadd.f32 %v4172_v35, %v4124_v40  ;;  %v4221_v7 = vpop.f32.mrf.mxu3  ;;  %v4125_v21 = vpop.f32.mrf.mxu1 }
 0x544   : > { %v4126_v46 = vadd.f32 %v4125_v21, %v4076_v20 }
 0x545   : > { %v4222_v54 = vadd.f32 %v4221_v7, %v4173_v42 }
 0x547   : > { %v4270_v58 = vpack.c.bf16 %v4222_v54, %v9908_v26  ;;  %v4606_v61 = vadd.f32 %v4605_v51, %v4222_v54  ;;  %v4655_v32 = vmul.f32 %v4222_v54, %v4222_v54 }
 0x549   : > { %4350 = vst [vmem:[%s7826_s25 + $0x70] sm:$0xff] %v4270_v58  ;;  %v4976_v31 = vadd.f32 %v4975_v2, %v4655_v32 }
 0x54a   : > { %v4174_v45 = vpop.f32.mrf.mxu2  ;;  %v4079_v34 = vpop.f32.mrf.mxu0 }
 0x54b   : > { %v4175_v22 = vadd.f32 %v4174_v45, %v4126_v46  ;;  %v4223_v13 = vpop.f32.mrf.mxu3  ;;  %v4128_v24 = vpop.f32.mrf.mxu1 }
 0x54c   : > { %v4129_v14 = vadd.f32 %v4128_v24, %v4079_v34 }
 0x54d   : > { %v4224_v8 = vadd.f32 %v4223_v13, %v4175_v22 }
 0x54f   : > { %v4275_v9 = vpack.c.bf16 %v4224_v8, %v9910_v4  ;;  %v4607_v25 = vadd.f32 %v4606_v61, %v4224_v8  ;;  %v4665_v36 = vmul.f32 %v4224_v8, %v4224_v8 }
 0x551   : > { %4355 = vst [vmem:[%s7826_s25 + $0x98] sm:$0xff] %v4275_v9  ;;  %v4977_v26 = vadd.f32 %v4976_v31, %v4665_v36 }
 0x552   : > { %v4177_v15 = vpop.f32.mrf.mxu2  ;;  %v4081_v11 = vpop.f32.mrf.mxu0 }
 0x553   : > { %v4178_v10 = vadd.f32 %v4177_v15, %v4129_v14  ;;  %v4226_v47 = vpop.f32.mrf.mxu3  ;;  %v4130_v57 = vpop.f32.mrf.mxu1 }
 0x554   : > { %v4131_v4 = vadd.f32 %v4130_v57, %v4081_v11 }
 0x555   : > { %v4227_v37 = vadd.f32 %v4226_v47, %v4178_v10 }
 0x557   : > { %v4280_v3 = vpack.c.bf16 %v4227_v37, %v9916_v29  ;;  %v10020_v30 = vadd.f32 %v4607_v25, %v4227_v37  ;;  %v4675_v17 = vmul.f32 %v4227_v37, %v4227_v37 }
 0x559   : > { %4360 = vst [vmem:[%s7826_s25 + $0xc0] sm:$0xff] %v4280_v3  ;;  %v10023_v18 = vadd.f32 %v4977_v26, %v4675_v17 }
 0x55a   : > { %v4179_v1 = vpop.f32.mrf.mxu2  ;;  %v4084_v44 = vpop.f32.mrf.mxu0 }
 0x55b   : > { %v4180_v23 = vadd.f32 %v4179_v1, %v4131_v4  ;;  %v4228_v27 = vpop.f32.mrf.mxu3  ;;  %v4133_v48 = vpop.f32.mrf.mxu1 }
 0x55c   : > { %v4134_v28 = vadd.f32 %v4133_v48, %v4084_v44 }
 0x55d   : > { %v10025_v16 = vadd.f32 %v4228_v27, %v4180_v23 }
 0x55f   : > { %v4285_v6 = vpack.c.bf16 %v10025_v16, %v9926_v63 }
 0x561   : > { %4365 = vst [vmem:[%s7826_s25 + $0xe8] sm:$0xff] %v4285_v6 }
 0x562   : > { %v4182_v29 = vpop.f32.mrf.mxu2  ;;  %v4086_v19 = vpop.f32.mrf.mxu0 }
 0x563   : > { %v4183_v38 = vadd.f32 %v4182_v29, %v4134_v28  ;;  %v4231_v0 = vpop.f32.mrf.mxu3  ;;  %v4135_v62 = vpop.f32.mrf.mxu1  ;;  %v4685_v29 = vmul.f32 %v10025_v16, %v10025_v16 }
 0x564   : > { %v4136_v55 = vadd.f32 %v4135_v62, %v4086_v19 }
 0x565   : > { %v10030_v5 = vadd.f32 %v4231_v0, %v4183_v38 }
 0x567   : > { %v4290_v40 = vpack.c.bf16 %v10030_v5, %v9942_v53  ;;  %v4695_v0 = vmul.f32 %v10030_v5, %v10030_v5 }
 0x569   : > { %4370 = vst [vmem:[%s7826_s25 + $0x110] sm:$0xff] %v4290_v40 }
 0x56a   : > { %v4184_v51 = vpop.f32.mrf.mxu2  ;;  %v4089_v63 = vpop.f32.mrf.mxu0 }
 0x56b   : > { %v4185_v52 = vadd.f32 %v4184_v51, %v4136_v55  ;;  %v4233_v2 = vpop.f32.mrf.mxu3  ;;  %v4138_v35 = vpop.f32.mrf.mxu1  ;;  %v4979_v55 = vadd.f32 %v10023_v18, %v4685_v29 }
 0x56c   : > { %v4139_v20 = vadd.f32 %v4138_v35, %v4089_v63 }
 0x56d   : > { %v4234_v42 = vadd.f32 %v4233_v2, %v4185_v52  ;;  %v4980_v35 = vadd.f32 %v4979_v55, %v4695_v0 }
 0x56f   : > { %v4295_v7 = vpack.c.bf16 %v4234_v42, %v9947_v56  ;;  %v4705_v2 = vmul.f32 %v4234_v42, %v4234_v42 }
 0x571   : > { %4375 = vst [vmem:[%s7826_s25 + $0x138] sm:$0xff] %v4295_v7 }
 0x572   : > { %v4187_v21 = vpop.f32.mrf.mxu2  ;;  %v4091_v61 = vpop.f32.mrf.mxu0 }
 0x573   : > { %v4188_v54 = vadd.f32 %v4187_v21, %v4139_v20  ;;  %v4236_v58 = vpop.f32.mrf.mxu3  ;;  %v4140_v32 = vpop.f32.mrf.mxu1 }
 0x574   : > { %v4141_v46 = vadd.f32 %v4140_v32, %v4091_v61 }
 0x575   : > { %v4237_v53 = vadd.f32 %v4236_v58, %v4188_v54  ;;  %v4981_v58 = vadd.f32 %v4980_v35, %v4705_v2 }
 0x577   : > { %v4300_v31 = vpack.c.bf16 %v4237_v53, %v9956_v50  ;;  %v4715_v20 = vmul.f32 %v4237_v53, %v4237_v53 }
 0x579   : > { %4380 = vst [vmem:[%s7826_s25 + $0x160] sm:$0xff] %v4300_v31  ;;  %v4982_v32 = vadd.f32 %v4981_v58, %v4715_v20 }
 0x57a   : > { %v4189_v45 = vpop.f32.mrf.mxu2  ;;  %v4094_v34 = vpop.f32.mrf.mxu0 }
 0x57b   : > { %v4190_v22 = vadd.f32 %v4189_v45, %v4141_v46  ;;  %v4238_v13 = vpop.f32.mrf.mxu3  ;;  %v4143_v24 = vpop.f32.mrf.mxu1 }
 0x57c   : > { %v4144_v9 = vadd.f32 %v4143_v24, %v4094_v34 }
 0x57d   : > { %v4239_v56 = vadd.f32 %v4238_v13, %v4190_v22 }
 0x57f   : > { %v4305_v8 = vpack.c.bf16 %v4239_v56, %v9961_v60 }
 0x581   : > { %4385 = vst [vmem:[%s7826_s25 + $0x188] sm:$0xff] %v4305_v8 }
 0x582   : > { %v4192_v25 = vpop.f32.mrf.mxu2  ;;  %v4096_v26 = vpop.f32.mrf.mxu0 }
 0x583   : > { %v4193_v36 = vadd.f32 %v4192_v25, %v4144_v9  ;;  %v4241_v14 = vpop.f32.mrf.mxu3  ;;  %v4145_v15 = vpop.f32.mrf.mxu1 }
 0x584   : > { %v4146_v47 = vadd.f32 %v4145_v15, %v4096_v26 }
 0x585   : > { %v4242_v50 = vadd.f32 %v4241_v14, %v4193_v36 }
 0x587   : > { %v4310_v10 = vpack.c.bf16 %v4242_v50, %v9970_v39  ;;  %v4735_v18 = vmul.f32 %v4242_v50, %v4242_v50 }
 0x589   : > { %4390 = vst [vmem:[%s7826_s25 + $0x1b0] sm:$0xff] %v4310_v10 }
 0x58a   : > { %v4194_v11 = vpop.f32.mrf.mxu2  ;;  %v4099_v3 = vpop.f32.mrf.mxu0 }
 0x58b   : > { %v4195_v57 = vadd.f32 %v4194_v11, %v4146_v47  ;;  %v4243_v37 = vpop.f32.mrf.mxu3  ;;  %v4148_v17 = vpop.f32.mrf.mxu1 }
 0x58c   : > { %v4149_v1 = vadd.f32 %v4148_v17, %v4099_v3 }
 0x58d   : > { %v4244_v60 = vadd.f32 %v4243_v37, %v4195_v57 }
 0x58f   : > { %v4315_v4 = vpack.c.bf16 %v4244_v60, %v9975_v59  ;;  %v4609_v59 = vadd.f32 %v10020_v30, %v10025_v16  ;;  %v4725_v30 = vmul.f32 %v4239_v56, %v4239_v56  ;;  %v4745_v13 = vmul.f32 %v4244_v60, %v4244_v60 }
 0x591   : > { %4395 = vst [vmem:[%s7826_s25 + $0x1d8] sm:$0xff] %v4315_v4 }
 0x592   : > { %v4197_v23 = vpop.f32.mrf.mxu2  ;;  %v4101_v48 = vpop.f32.mrf.mxu0 }
 0x593   : > { %v4198_v27 = vadd.f32 %v4197_v23, %v4149_v1  ;;  %v4246_v44 = vpop.f32.mrf.mxu3  ;;  %v4150_v6 = vpop.f32.mrf.mxu1 }
 0x594   : > { %v4151_v38 = vadd.f32 %v4150_v6, %v4101_v48 }
 0x595   : > { %v4247_v28 = vadd.f32 %v4246_v44, %v4198_v27 }
 0x597   : > { %v4320_v39 = vpack.c.bf16 %v4247_v28, %v9984_v33  ;;  %v4610_v33 = vadd.f32 %v4609_v59, %v10030_v5  ;;  %v4983_v5 = vadd.f32 %v4982_v32, %v4725_v30  ;;  %v4755_v9 = vmul.f32 %v4247_v28, %v4247_v28 }
 0x599   : > { %4400 = vst [vmem:[%s7826_s25 + $0x200] sm:$0xff] %v4320_v39  ;;  %v4611_v7 = vadd.f32 %v4610_v33, %v4234_v42  ;;  %v4984_v8 = vadd.f32 %v4983_v5, %v4735_v18 }
 0x59a   : > { %v4199_v19 = vpop.f32.mrf.mxu2  ;;  %v4104_v51 = vpop.f32.mrf.mxu0 }
 0x59b   : > { %v4200_v62 = vadd.f32 %v4199_v19, %v4151_v38  ;;  %v4248_v40 = vpop.f32.mrf.mxu3  ;;  %v4153_v52 = vpop.f32.mrf.mxu1  ;;  %v4612_v61 = vadd.f32 %v4611_v7, %v4237_v53  ;;  %v4985_v25 = vadd.f32 %v4984_v8, %v4745_v13 }
 0x59c   : > { %v4154_v54 = vadd.f32 %v4153_v52, %v4104_v51 }
 0x59d   : > { %v4249_v63 = vadd.f32 %v4248_v40, %v4200_v62  ;;  %v4613_v31 = vadd.f32 %v4612_v61, %v4239_v56  ;;  %v4986_v15 = vadd.f32 %v4985_v25, %v4755_v9 }
 0x59f   : > { %v4325_v21 = vpack.c.bf16 %v4249_v63, %v9989_v49  ;;  %v4614_v22 = vadd.f32 %v4613_v31, %v4242_v50  ;;  %v4765_v14 = vmul.f32 %v4249_v63, %v4249_v63 }
 0x5a1   : > { %4405 = vst [vmem:[%s7826_s25 + $0x228] sm:$0xff] %v4325_v21  ;;  %v4615_v49 = vadd.f32 %v4614_v22, %v4244_v60  ;;  %v4987_v57 = vadd.f32 %v4986_v15, %v4765_v14 }
 0x5a2   : > { %v4202_v16 = vpop.f32.mrf.mxu2  ;;  %v4106_v42 = vpop.f32.mrf.mxu0 }
 0x5a3   : > { %v4203_v46 = vadd.f32 %v4202_v16, %v4154_v54  ;;  %v4251_v45 = vpop.f32.mrf.mxu3  ;;  %v4155_v24 = vpop.f32.mrf.mxu1  ;;  %v4616_v36 = vadd.f32 %v4615_v49, %v4247_v28 }
 0x5a4   : > { %v4156_v56 = vadd.f32 %v4155_v24, %v4106_v42 }
 0x5a5   : > { %v4252_v34 = vadd.f32 %v4251_v45, %v4203_v46  ;;  %v4617_v10 = vadd.f32 %v4616_v36, %v4249_v63 }
 0x5a7   : > { %v4330_v53 = vpack.c.bf16 %v4252_v34, %v9998_v43  ;;  %v4775_v47 = vmul.f32 %v4252_v34, %v4252_v34  ;;  %v4618_v37 = vadd.f32 %v4617_v10, %v4252_v34 }
 0x5a9   : > { %4410 = vst [vmem:[%s7826_s25 + $0x250] sm:$0xff] %v4330_v53  ;;  %v4988_v17 = vadd.f32 %v4987_v57, %v4775_v47 }
 0x5aa   : > { %v4204_v26 = vpop.f32.mrf.mxu2 }
 0x5ab   : > { %v4205_v50 = vadd.f32 %v4204_v26, %v4156_v56  ;;  %v4253_v11 = vpop.f32.mrf.mxu3 }
 0x5ad   : > { %v4254_v3 = vadd.f32 %v4253_v11, %v4205_v50 }
 0x5af   : > { %v4335_v60 = vpack.c.bf16 %v4254_v3, %v10003_v12  ;;  %v4619_v4 = vadd.f32 %v4618_v37, %v4254_v3  ;;  %v4785_v43 = vmul.f32 %v4254_v3, %v4254_v3 }
 0x5b1   : > { %4415 = vst [vmem:[%s7826_s25 + $0x278] sm:$0xff] %v4335_v60  ;;  %v4620_v1 = vrot.slane %v4619_v4, 4  ;;  %v4989_v23 = vadd.f32 %v4988_v17, %v4785_v43 }
 0x5b3   : > { %v4621_v27 = vadd.f32 %v4620_v1, %v4619_v4  ;;  %v4990_v44 = vrot.slane %v4989_v23, 4 }
 0x5b5   : > { %v4622_v48 = vrot.slane %v4621_v27, 2  ;;  %v4991_v6 = vadd.f32 %v4990_v44, %v4989_v23 }
 0x5b7   : > { %v4623_v28 = vadd.f32 %v4622_v48, %v4621_v27  ;;  %v4992_v39 = vrot.slane %v4991_v6, 2 }
 0x5b9   : > { %v4624_v29 = vrot.slane %v4623_v28, 1  ;;  %v4993_v38 = vadd.f32 %v4992_v39, %v4991_v6 }
 0x5bb   : > { %v4994_v0 = vrot.slane %v4993_v38, 1  ;;  %v4625_v19 = vadd.f32 %v4624_v29, %v4623_v28 }
 0x5bd   : > { %v4995_v59 = vadd.f32 %v4994_v0, %v4993_v38 }
 0x5bf   : > { %v5006_v62 = vsel %vm4996_vm0, %v4625_v19, %v4995_v59 }
 0x5c0   : > { %v5023_v12 = vrot.slane %v5006_v62, 6 }
 0x5c2   : > { %v5033_v40 = vsel %vm5024_vm1, %v10011_v41, %v5023_v12 }
 0x5c3   : > { %5039 = vst [vmem:[%s8795_s17 + $0x10] sm:$0xf] %v5033_v40 }
 0x5c4 PF: > { %s14_s12 = sadd.s32 1, %s6916_s12  }
 0x5c5   : > { %p11_p4 = scmp.ge.s32.totalorder %s14_s12, 4  }
 0x5c7   :  { %13 = sbr.rel (!%p11_p4) target bundleno = 1 (0x1), region = 70 }

</bundles_post_ra>
